<compile_context>
chip_gen: v6e
topology: v6e:2x2x1
jax: 0.10.0
libtpu: 0.0.40
codegen_flags: <defaults>
</compile_context>

<pallas_src>
import jax
import jax.numpy as jnp
from jax.experimental import pallas as pl
from jax.experimental.pallas import tpu as pltpu


_SQRT_2_OVER_PI = 0.7978845608028654
_GELU_C = 0.044715


def _gelu_tanh(x):
    # Matches torch.nn.functional.gelu(x, approximate='tanh').
    # Factored so x*x is computed once; tanh goes to the EUP slot.
    x2 = x * x
    inner = _SQRT_2_OVER_PI * x * (1.0 + _GELU_C * x2)
    return 0.5 * x * (1.0 + jnp.tanh(inner))


# ----------------------------------------------------------------------------
# Kernels
# ----------------------------------------------------------------------------
def _mlp_kernel_f32_out(x_ref, w1_ref, b1_ref, w2_ref, b2_ref, o_ref):
    """f32 output: accumulate directly into the VMEM-resident output block."""
    h_idx = pl.program_id(1)

    @pl.when(h_idx == 0)
    def _init():
        o_ref[...] = jnp.zeros_like(o_ref)

    # fc1 partial: (tile_b, D_in) @ (D_in, tile_h); bias + gelu are elementwise
    # over H, so applying them per hidden slab is exact.
    h = jnp.dot(x_ref[...], w1_ref[...], preferred_element_type=jnp.float32)
    h = _gelu_tanh(h + b1_ref[...].astype(jnp.float32))

    # dropout: identity in eval mode.
    # TODO(synk): training-mode dropout not implemented in-kernel.

    # fc2 partial: (tile_b, tile_h) @ (tile_h, D_out), accumulated in f32
    # across the hidden (reduction) grid axis, directly into the output.
    o_ref[...] += jnp.dot(h.astype(w2_ref.dtype), w2_ref[...],
                          preferred_element_type=jnp.float32)

    @pl.when(h_idx == pl.num_programs(1) - 1)
    def _finalize():
        # b2 added exactly once.
        o_ref[...] += b2_ref[...].astype(jnp.float32)


def _mlp_kernel_acc(x_ref, w1_ref, b1_ref, w2_ref, b2_ref, o_ref, acc_ref):
    """Narrow output dtypes (e.g. bf16): accumulate in a f32 scratch."""
    h_idx = pl.program_id(1)

    @pl.when(h_idx == 0)
    def _init():
        acc_ref[...] = jnp.zeros_like(acc_ref)

    h = jnp.dot(x_ref[...], w1_ref[...], preferred_element_type=jnp.float32)
    h = _gelu_tanh(h + b1_ref[...].astype(jnp.float32))

    # dropout: identity in eval mode.

    acc_ref[...] += jnp.dot(h.astype(w2_ref.dtype), w2_ref[...],
                            preferred_element_type=jnp.float32)

    @pl.when(h_idx == pl.num_programs(1) - 1)
    def _finalize():
        o_ref[...] = (acc_ref[...] + b2_ref[...].astype(jnp.float32)).astype(o_ref.dtype)


# ----------------------------------------------------------------------------
# Tiling / VMEM helpers
# ----------------------------------------------------------------------------
def _choose_tile(dim, cap):
    """Largest 128-multiple <= min(cap, dim) that divides dim, else full dim."""
    cap = min(cap, dim)
    t = (cap // 128) * 128
    while t >= 128:
        if dim % t == 0:
            return t
        t -= 128
    return dim  # small / unaligned dim: single full block (legal per BlockSpec rule)


def _vmem_capacity_bytes():
    """Physical per-core VMEM, generation-aware with conservative fallbacks."""
    try:
        info = pltpu.get_tpu_info()
        cap = getattr(info, "vmem_capacity_bytes", None)
        if cap:
            return int(cap)
    except Exception:
        pass
    kind = ""
    try:
        kind = jax.devices()[0].device_kind.lower()
    except Exception:
        pass
    if "7" in kind:
        return 64 * 1024 * 1024   # v7x
    return 128 * 1024 * 1024      # v5e / v6e


def _is_v7x():
    try:
        return "7" in jax.devices()[0].device_kind.lower()
    except Exception:
        return False


def _footprint_bytes(tb, th, d_in, d_out, in_itemsize, out_itemsize, use_scratch):
    """Estimated VMEM working set (double-buffered streams + temps + acc)."""
    # double-buffered streamed input blocks + biases
    dbl = 2 * in_itemsize * (tb * d_in + d_in * th + th + th * d_out + d_out)
    # double-buffered output block
    dbl += 2 * out_itemsize * tb * d_out
    # f32 GELU intermediate + elementwise temporaries (~2x)
    gelu = 2 * tb * th * 4
    # f32 accumulator scratch (only for non-f32 outputs)
    acc = tb * d_out * 4 if use_scratch else 0
    return dbl + gelu + acc


# ----------------------------------------------------------------------------
# Wrapper
# ----------------------------------------------------------------------------
def mlp_forward(x, w1, b1, w2, b2, *, tile_b=None, tile_h=None,
                vmem_budget_bytes=None):
    """x: (B, D_in); w1: (D_in, H); b1: (H,); w2: (H, D_out); b2: (D_out,).

    For production on v6e/v7x pass bf16 x/w1/w2 (f32 accumulation is kept
    inside the kernel) to halve HBM traffic and double arithmetic intensity.
    """
    B, D_in = x.shape
    H = w1.shape[1]
    D_out = w2.shape[1]
    assert w1.shape == (D_in, H) and w2.shape == (H, D_out)
    assert b1.shape == (H,) and b2.shape == (D_out,)

    out_dtype = x.dtype
    use_scratch = jnp.dtype(out_dtype) != jnp.dtype(jnp.float32)
    in_itemsize = jnp.dtype(x.dtype).itemsize
    out_itemsize = jnp.dtype(out_dtype).itemsize

    # --- generation-aware VMEM budget ---------------------------------------
    vmem_cap = _vmem_capacity_bytes()
    if vmem_budget_bytes is None:
        # ~70% of physical VMEM: ≈90 MiB on 128 MiB chips, ≈45 MiB on v7x.
        vmem_budget_bytes = int(vmem_cap * 0.70)
    vmem_limit = min(int(vmem_cap * 0.85), vmem_cap - 4 * 1024 * 1024)

    # --- tile selection ------------------------------------------------------
    # Hidden (reduction) tile: big slabs -> fewer accumulator RMWs, deeper K.
    if tile_h is None:
        tile_h = _choose_tile(H, 2048)
    # Batch tile: as large as the budget allows (weight HBM traffic ~ B/tile_b).
    if tile_b is None:
        b_cap = B
        if _is_v7x() and B >= 1024 and B % 2 == 0:
            # Keep >= 2 batch blocks so the "parallel" axis shards across both
            # TensorCores; v7x's 3.2 TB/s HBM absorbs the extra weight stream.
            b_cap = B // 2
        tile_b = _choose_tile(B, b_cap)

    def fits(tb, th):
        return _footprint_bytes(tb, th, D_in, D_out,
                                in_itemsize, out_itemsize,
                                use_scratch) <= vmem_budget_bytes

    # Shrink the hidden tile first (keeps arithmetic intensity ~ tile_b high),
    # then the batch tile, until the working set fits the budget.
    while (not fits(tile_b, tile_h) and tile_h > 128
           and (tile_h // 2) % 128 == 0 and H % (tile_h // 2) == 0):
        tile_h //= 2
    while (not fits(tile_b, tile_h) and tile_b > 128
           and (tile_b // 2) % 8 == 0 and B % (tile_b // 2) == 0):
        tile_b //= 2

    assert B % tile_b == 0 and H % tile_h == 0

    b1_2d = b1.reshape(1, H)
    b2_2d = b2.reshape(1, D_out)

    grid = (B // tile_b, H // tile_h)

    in_specs = [
        # activations: one batch tile, reused across the hidden axis
        pl.BlockSpec((tile_b, D_in), lambda i, h: (i, 0)),
        # w1 streamed as (D_in, tile_h) column slabs
        pl.BlockSpec((D_in, tile_h), lambda i, h: (0, h)),
        pl.BlockSpec((1, tile_h), lambda i, h: (0, h)),
        # w2 streamed as (tile_h, D_out) row slabs
        pl.BlockSpec((tile_h, D_out), lambda i, h: (h, 0)),
        pl.BlockSpec((1, D_out), lambda i, h: (0, 0)),
    ]
    # Lane-dense full-D_out output; same block index across the h axis keeps
    # it VMEM-resident until the reduction finishes (P3 accumulator pattern).
    out_specs = pl.BlockSpec((tile_b, D_out), lambda i, h: (i, 0))

    if use_scratch:
        kernel = _mlp_kernel_acc
        scratch_shapes = [pltpu.VMEM((tile_b, D_out), jnp.float32)]
    else:
        kernel = _mlp_kernel_f32_out
        scratch_shapes = []

    # Advisory cost estimate for the XLA scheduler.
    flops = 2 * B * H * (D_in + D_out)
    transcendentals = B * H
    bytes_accessed = (
        in_itemsize * (B * D_in
                       + (B // tile_b) * (D_in * H + H + H * D_out + D_out))
        + out_itemsize * B * D_out
    )
    cost = pl.CostEstimate(flops=flops, transcendentals=transcendentals,
                           bytes_accessed=bytes_accessed)

    return pl.pallas_call(
        kernel,
        out_shape=jax.ShapeDtypeStruct((B, D_out), out_dtype),
        grid_spec=pltpu.PrefetchScalarGridSpec(
            num_scalar_prefetch=0,
            grid=grid,
            in_specs=in_specs,
            out_specs=out_specs,
            scratch_shapes=scratch_shapes,
        ),
        compiler_params=pltpu.CompilerParams(
            dimension_semantics=("parallel", "arbitrary"),
            vmem_limit_bytes=vmem_limit,
        ),
        cost_estimate=cost,
    )(x, w1, b1_2d, w2, b2_2d)


def reference_mlp(x, w1, b1, w2, b2):
    h = jnp.dot(x, w1, precision=jax.lax.Precision.HIGHEST) + b1
    h = _gelu_tanh(h)
    return jnp.dot(h, w2, precision=jax.lax.Precision.HIGHEST) + b2


if __name__ == "__main__":
    key = jax.random.PRNGKey(0)
    # Small but tiling-friendly shapes (MLP: input -> hidden -> output).
    B, D_in, H, D_out = 256, 128, 1024, 128

    k_x, k_w1, k_b1, k_w2, k_b2 = jax.random.split(key, 5)
    x = jax.random.normal(k_x, (B, D_in), dtype=jnp.float32)
    # Deterministic synthetic parameters (Linear-scale init)
    w1 = jax.random.normal(k_w1, (D_in, H), dtype=jnp.float32) * (1.0 / D_in ** 0.5)
    b1 = jax.random.normal(k_b1, (H,), dtype=jnp.float32) * 0.01
    w2 = jax.random.normal(k_w2, (H, D_out), dtype=jnp.float32) * (1.0 / H ** 0.5)
    b2 = jax.random.normal(k_b2, (D_out,), dtype=jnp.float32) * 0.01

    out = mlp_forward(x, w1, b1, w2, b2)
    out = jax.block_until_ready(out)

    ref = reference_mlp(x, w1, b1, w2, b2)
    assert out.shape == (B, D_out)
    max_err = float(jnp.max(jnp.abs(out - ref)))
    assert jnp.allclose(out, ref, atol=2e-2, rtol=2e-2), (
        f"mismatch vs reference (max abs err {max_err})")

    print("KERNEL_OK")
</pallas_src>

<mosaic_0001>
module attributes {stable_mosaic.version = 11 : i64} {
  func.func @_mlp_kernel_f32_out(%arg0: i32, %arg1: i32, %arg2: memref<256x128xf32, #tpu.memory_space<vmem>>, %arg3: memref<128x1024xf32, #tpu.memory_space<vmem>>, %arg4: memref<1x1024xf32, #tpu.memory_space<vmem>>, %arg5: memref<1024x128xf32, #tpu.memory_space<vmem>>, %arg6: memref<1x128xf32, #tpu.memory_space<vmem>>, %arg7: memref<256x128xf32, #tpu.memory_space<vmem>>) attributes {dimension_semantics = [#tpu.dimension_semantics<parallel>, #tpu.dimension_semantics<arbitrary>], iteration_bounds = array<i64: 1, 1>, scalar_prefetch = 0 : i64, scratch_operands = 0 : i64, tpu.core_type = #tpu.core_type<tc>, window_params = [{transform_indices = @transform_0, window_bounds = array<i64: 256, 128>}, {transform_indices = @transform_1, window_bounds = array<i64: 128, 1024>}, {transform_indices = @transform_2, window_bounds = array<i64: 1, 1024>}, {transform_indices = @transform_3, window_bounds = array<i64: 1024, 128>}, {pipeline_mode = #tpu.pipeline_mode<synchronous>, transform_indices = @transform_4, window_bounds = array<i64: 1, 128>}, {transform_indices = @transform_5, window_bounds = array<i64: 256, 128>}]} {
    %c0_i32 = arith.constant 0 : i32
    %0 = arith.cmpi eq, %arg1, %c0_i32 : i32
    %1 = arith.extui %0 : i1 to i32
    %c0_i32_0 = arith.constant 0 : i32
    %2 = arith.cmpi ne, %1, %c0_i32_0 : i32
    scf.if %2 {
      %cst_20 = arith.constant 0.000000e+00 : f32
      %31 = vector.broadcast %cst_20 : f32 to vector<256x128xf32>
      %c0_21 = arith.constant 0 : index
      %c0_22 = arith.constant 0 : index
      %32 = vector.load %arg7[%c0_21, %c0_22] : memref<256x128xf32, #tpu.memory_space<vmem>>, vector<256x128xf32>
      tpu.vector_store %arg7[%c0_21, %c0_22], %31 {strides = array<i32>} : memref<256x128xf32, #tpu.memory_space<vmem>>, vector<256x128xf32>,
    } else {
    }
    %c0 = arith.constant 0 : index
    %c0_1 = arith.constant 0 : index
    %3 = vector.load %arg2[%c0, %c0_1] : memref<256x128xf32, #tpu.memory_space<vmem>>, vector<256x128xf32>
    %c0_2 = arith.constant 0 : index
    %c0_3 = arith.constant 0 : index
    %4 = vector.load %arg3[%c0_2, %c0_3] : memref<128x1024xf32, #tpu.memory_space<vmem>>, vector<128x1024xf32>
    %cst = arith.constant dense<0.000000e+00> : vector<256x1024xf32>
    %5 = tpu.matmul %3, %4, %cst {dimension_numbers = #tpu.dot_dimension_numbers<[1], [0], [0], [1], [0, 0, 1, 1], [], []>} : vector<256x128xf32>, vector<128x1024xf32>, vector<256x1024xf32> -> vector<256x1024xf32>
    %c0_4 = arith.constant 0 : index
    %c0_5 = arith.constant 0 : index
    %6 = vector.load %arg4[%c0_4, %c0_5] : memref<1x1024xf32, #tpu.memory_space<vmem>>, vector<1x1024xf32>
    %7 = vector.broadcast %6 : vector<1x1024xf32> to vector<256x1024xf32>
    %8 = arith.addf %5, %7 : vector<256x1024xf32>
    %9 = arith.mulf %8, %8 : vector<256x1024xf32>
    %cst_6 = arith.constant 0.797884583 : f32
    %10 = vector.broadcast %cst_6 : f32 to vector<256x1024xf32>
    %11 = arith.mulf %10, %8 : vector<256x1024xf32>
    %cst_7 = arith.constant 4.471500e-02 : f32
    %12 = vector.broadcast %cst_7 : f32 to vector<256x1024xf32>
    %13 = arith.mulf %12, %9 : vector<256x1024xf32>
    %cst_8 = arith.constant 1.000000e+00 : f32
    %14 = vector.broadcast %cst_8 : f32 to vector<256x1024xf32>
    %15 = arith.addf %14, %13 : vector<256x1024xf32>
    %16 = arith.mulf %11, %15 : vector<256x1024xf32>
    %cst_9 = arith.constant 5.000000e-01 : f32
    %17 = vector.broadcast %cst_9 : f32 to vector<256x1024xf32>
    %18 = arith.mulf %17, %8 : vector<256x1024xf32>
    %19 = math.tanh %16 : vector<256x1024xf32>
    %cst_10 = arith.constant 1.000000e+00 : f32
    %20 = vector.broadcast %cst_10 : f32 to vector<256x1024xf32>
    %21 = arith.addf %20, %19 : vector<256x1024xf32>
    %22 = arith.mulf %18, %21 : vector<256x1024xf32>
    %c0_11 = arith.constant 0 : index
    %c0_12 = arith.constant 0 : index
    %23 = vector.load %arg7[%c0_11, %c0_12] : memref<256x128xf32, #tpu.memory_space<vmem>>, vector<256x128xf32>
    %c0_13 = arith.constant 0 : index
    %c0_14 = arith.constant 0 : index
    %24 = vector.load %arg5[%c0_13, %c0_14] : memref<1024x128xf32, #tpu.memory_space<vmem>>, vector<1024x128xf32>
    %cst_15 = arith.constant dense<0.000000e+00> : vector<256x128xf32>
    %25 = tpu.matmul %22, %24, %cst_15 {dimension_numbers = #tpu.dot_dimension_numbers<[1], [0], [0], [1], [0, 0, 1, 1], [], []>} : vector<256x1024xf32>, vector<1024x128xf32>, vector<256x128xf32> -> vector<256x128xf32>
    %26 = arith.addf %23, %25 : vector<256x128xf32>
    %c0_16 = arith.constant 0 : index
    %c0_17 = arith.constant 0 : index
    %27 = vector.load %arg7[%c0_16, %c0_17] : memref<256x128xf32, #tpu.memory_space<vmem>>, vector<256x128xf32>
    tpu.vector_store %arg7[%c0_16, %c0_17], %26 {strides = array<i32>} : memref<256x128xf32, #tpu.memory_space<vmem>>, vector<256x128xf32>,
    %c0_i32_18 = arith.constant 0 : i32
    %28 = arith.cmpi eq, %arg1, %c0_i32_18 : i32
    %29 = arith.extui %28 : i1 to i32
    %c0_i32_19 = arith.constant 0 : i32
    %30 = arith.cmpi ne, %29, %c0_i32_19 : i32
    scf.if %30 {
      %c0_20 = arith.constant 0 : index
      %c0_21 = arith.constant 0 : index
      %31 = vector.load %arg7[%c0_20, %c0_21] : memref<256x128xf32, #tpu.memory_space<vmem>>, vector<256x128xf32>
      %c0_22 = arith.constant 0 : index
      %c0_23 = arith.constant 0 : index
      %32 = vector.load %arg6[%c0_22, %c0_23] : memref<1x128xf32, #tpu.memory_space<vmem>>, vector<1x128xf32>
      %33 = vector.broadcast %32 : vector<1x128xf32> to vector<256x128xf32>
      %34 = arith.addf %31, %33 : vector<256x128xf32>
      %c0_24 = arith.constant 0 : index
      %c0_25 = arith.constant 0 : index
      %35 = vector.load %arg7[%c0_24, %c0_25] : memref<256x128xf32, #tpu.memory_space<vmem>>, vector<256x128xf32>
      tpu.vector_store %arg7[%c0_24, %c0_25], %34 {strides = array<i32>} : memref<256x128xf32, #tpu.memory_space<vmem>>, vector<256x128xf32>,
    } else {
    }
    return
  }
  func.func @transform_0(%arg0: i32, %arg1: i32) -> (i32, i32) {
    %c0_i32 = arith.constant 0 : i32
    %c0_i32_0 = arith.constant 0 : i32
    return %arg0, %c0_i32 : i32, i32
  }
  func.func @transform_1(%arg0: i32, %arg1: i32) -> (i32, i32) {
    %c0_i32 = arith.constant 0 : i32
    %c0_i32_0 = arith.constant 0 : i32
    return %c0_i32, %arg1 : i32, i32
  }
  func.func @transform_2(%arg0: i32, %arg1: i32) -> (i32, i32) {
    %c0_i32 = arith.constant 0 : i32
    %c0_i32_0 = arith.constant 0 : i32
    return %c0_i32, %arg1 : i32, i32
  }
  func.func @transform_3(%arg0: i32, %arg1: i32) -> (i32, i32) {
    %c0_i32 = arith.constant 0 : i32
    %c0_i32_0 = arith.constant 0 : i32
    return %arg1, %c0_i32 : i32, i32
  }
  func.func @transform_4(%arg0: i32, %arg1: i32) -> (i32, i32) {
    %c0_i32 = arith.constant 0 : i32
    %c0_i32_0 = arith.constant 0 : i32
    %c0_i32_1 = arith.constant 0 : i32
    return %c0_i32, %c0_i32_0 : i32, i32
  }
  func.func @transform_5(%arg0: i32, %arg1: i32) -> (i32, i32) {
    %c0_i32 = arith.constant 0 : i32
    %c0_i32_0 = arith.constant 0 : i32
    return %arg0, %c0_i32 : i32, i32
  }
}

</mosaic_0001>

<bundles_post_ra>
// kernel: tpu_custom_call.1
= control target key start
LH: loop header
LB: loop body
LE: loop exit
PB: predicated region body
PF: predicated region fallthrough
CT: control target
= control target key end

     0   :  { %10 = vsyncpa [#allocation3], 0  ;;  %s9983_s0 = inlined_call_operand.hbm [shape: f32[256,128], index: 0, kind: input, shape index: {}]   ;;  %s9984_s1 = inlined_call_operand.hbm [shape: f32[128,1024], index: 1, kind: input, shape index: {}]   ;;  %s9985_s2 = inlined_call_operand.hbm [shape: f32[1,1024], index: 2, kind: input, shape index: {}]   ;;  %s9986_s3 = inlined_call_operand.hbm [shape: f32[1024,128], index: 3, kind: input, shape index: {}]   ;;  %s9987_s4 = inlined_call_operand.vmem [shape: f32[1,128], index: 4, kind: input, shape index: {}]   ;;  %s9988_s5 = inlined_call_operand.hbm [shape: f32[256,128], index: 5, kind: output, shape index: {}]  }
   0x1   :  { %11 = vsyncpa [#allocation6], 0 }
   0x2   :  { %12 = vsyncpa [#allocation9], 0 }
   0x3   :  { %13 = vsyncpa [#allocation4], 0  ;;  %s5526_s18 = smov [#allocation5]  }
   0x4   :  { %s31_s19 = sshll.u32 %s5526_s18, 4  ;;  %s32_s19 = int_to_ptr.vmem [resolvable:$true] %s31_s19 }
   0x5   :  { %s5426_s20 = scalar_lea.vmem %s32_s19, 16384  ;;  %p5431_p1 = scmp.lt.s32.totalorder %s32_s19, %s32_s19 }
   0x6   :  { %p5427_p0 = scmp.ne.s32.totalorder %s32_s19, %s5426_s20  ;;  %p5432_p2 = scmp.lt.s32.totalorder %s5426_s20, %s5426_s20 }
   0x8   :  { %p5433_p3 = por %p5432_p2, %p5431_p1 }
   0xa   :  { %p5434_p4 = pnand %p5433_p3, %p5427_p0 }
   0xc   :  { %5437 = shalt.err (!%p5434_p4)
}
   0xd   :  { %s5527_s21 = smov 1024   ;;  %s5528_s22 = smov 64  }
   0xe   :  { %37 = dma.hbm_to_vmem [thread:$0]  %s9984_s1, 16384, %s32_s19, [#allocation6], %s5527_s21, %s5527_s21, %s5528_s22  }
   0xf   :  { %s5529_s25 = smov [#allocation2]  }
  0x10   :  { %s19_s26 = sshll.u32 %s5529_s25, 4  ;;  %s20_s26 = int_to_ptr.vmem [resolvable:$true] %s19_s26 }
  0x11   :  { %s5446_s27 = scalar_lea.vmem %s20_s26, 4096  ;;  %p5451_p6 = scmp.lt.s32.totalorder %s20_s26, %s20_s26 }
  0x12   :  { %p5447_p5 = scmp.ne.s32.totalorder %s20_s26, %s5446_s27  ;;  %p5452_p7 = scmp.lt.s32.totalorder %s5446_s27, %s5446_s27 }
  0x14   :  { %p5453_p8 = por %p5452_p7, %p5451_p6 }
  0x16   :  { %p5454_p9 = pnand %p5453_p8, %p5447_p5 }
  0x18   :  { %5457 = shalt.err (!%p5454_p9)
}
  0x19   :  { %s5530_s28 = smov 128   ;;  %s5531_s29 = smov 8  }
  0x1a   :  { %25 = dma.hbm_to_vmem [thread:$0]  %s9983_s0, 4096, %s20_s26, [#allocation3], %s5530_s28, %s5530_s28, %s5531_s29  }
  0x1b   :  { %s5532_s1 = smov [#allocation7]   ;;  %s5533_s8 = smov [#allocation8]  }
  0x1c   :  { %s44_s7 = sshll.u32 %s5532_s1, 4  ;;  %s53_s9 = sshll.u32 %s5533_s8, 4  ;;  %s45_s7 = int_to_ptr.vmem [resolvable:$true] %s44_s7  ;;  %s54_s9 = int_to_ptr.vmem [resolvable:$true] %s53_s9 }
  0x1d   :  { %s5466_s10 = scalar_lea.vmem %s45_s7, 128  ;;  %p5471_p11 = scmp.lt.s32.totalorder %s45_s7, %s45_s7 }
  0x1e   :  { %p5467_p10 = scmp.ne.s32.totalorder %s45_s7, %s5466_s10  ;;  %p5472_p12 = scmp.lt.s32.totalorder %s5466_s10, %s5466_s10 }
  0x20   :  { %p5473_p13 = por %p5472_p12, %p5471_p11 }
  0x22   :  { %p5474_p0 = pnand %p5473_p13, %p5467_p10 }
  0x24   :  { %5477 = shalt.err (!%p5474_p0)
}
  0x25   :  { %47 = dma.hbm_to_vmem [thread:$0]  %s9985_s2, 128, %s45_s7, [#allocation6]  }
  0x26   :  { %s5486_s13 = scalar_lea.vmem %s54_s9, 16384  ;;  %p5491_p2 = scmp.lt.s32.totalorder %s54_s9, %s54_s9 }
  0x27   :  { %p5487_p1 = scmp.ne.s32.totalorder %s54_s9, %s5486_s13  ;;  %p5492_p3 = scmp.lt.s32.totalorder %s5486_s13, %s5486_s13 }
  0x29   :  { %p5493_p4 = por %p5492_p3, %p5491_p2 }
  0x2b   :  { %p5494_p5 = pnand %p5493_p4, %p5487_p1 }
  0x2d   :  { %5497 = shalt.err (!%p5494_p5)
}
  0x2e   :  { %59 = dma.hbm_to_vmem [thread:$0]  %s9986_s3, 16384, %s54_s9, [#allocation9], %s5530_s28, %s5530_s28, %s5531_s29  }
  0x2f   :  { %5518 = dma.done.wait [#allocation3], 4096  }
  0x30   :  { %5519 = vsyncadd [#allocation3], 4294963200 }
  0x31   :  { %5520 = dma.done.wait [#allocation6], 16512  }
  0x32   :  { %5521 = vsyncadd [#allocation6], 4294950784 }
  0x33   :  { %5522 = dma.done.wait [#allocation9], 16384  }
  0x34   :  { %5523 = vsyncadd [#allocation9], 4294950912  ;;  %v9989_v0 = vmov 0.0   ;;  %v263_v1 = vld [vmem:[#allocation5 + $0x3c8] sm:$0xff]  ;;  %v265_v2 = vld [vmem:[#allocation5 + $0x3d8] sm:$0xff] }
  0x35   :  { %376 = vmatprep.mubr.f32.mxu0 %v9989_v0  ;;  %633 = vmatprep.mubr.f32.mxu1 %v9989_v0  ;;  %v262_v3 = vld [vmem:[#allocation5 + $0x3c0] sm:$0xff]  ;;  %v264_v4 = vld [vmem:[#allocation5 + $0x3d0] sm:$0xff]  ;;  %v255_v5 = vld [vmem:[#allocation5 + $0x388] sm:$0xff] }
  0x36   :  { %312 = vmatprep.subr.mxu0 %v263_v1  ;;  %569 = vmatprep.subr.mxu1 %v265_v2  ;;  %v257_v6 = vld [vmem:[#allocation5 + $0x398] sm:$0xff]  ;;  %v254_v7 = vld [vmem:[#allocation5 + $0x380] sm:$0xff]  ;;  %v256_v8 = vld [vmem:[#allocation5 + $0x390] sm:$0xff] }
  0x37   :  { %313 = vmatpush1.msra.mxu0 %v262_v3  ;;  %570 = vmatpush1.msra.mxu1 %v264_v4  ;;  %v247_v9 = vld [vmem:[#allocation5 + $0x348] sm:$0xff]  ;;  %v249_v10 = vld [vmem:[#allocation5 + $0x358] sm:$0xff]  ;;  %v246_v11 = vld [vmem:[#allocation5 + $0x340] sm:$0xff] }
  0x38   :  { %314 = vmatprep.subr.mxu0 %v255_v5  ;;  %571 = vmatprep.subr.mxu1 %v257_v6  ;;  %v248_v12 = vld [vmem:[#allocation5 + $0x350] sm:$0xff]  ;;  %v239_v13 = vld [vmem:[#allocation5 + $0x308] sm:$0xff]  ;;  %v241_v14 = vld [vmem:[#allocation5 + $0x318] sm:$0xff] }
  0x39   :  { %315 = vmatpush1.msra.mxu0 %v254_v7  ;;  %572 = vmatpush1.msra.mxu1 %v256_v8  ;;  %v238_v15 = vld [vmem:[#allocation5 + $0x300] sm:$0xff]  ;;  %v240_v16 = vld [vmem:[#allocation5 + $0x310] sm:$0xff]  ;;  %v231_v17 = vld [vmem:[#allocation5 + $0x2c8] sm:$0xff] }
  0x3a   :  { %316 = vmatprep.subr.mxu0 %v247_v9  ;;  %573 = vmatprep.subr.mxu1 %v249_v10  ;;  %v233_v18 = vld [vmem:[#allocation5 + $0x2d8] sm:$0xff]  ;;  %v230_v19 = vld [vmem:[#allocation5 + $0x2c0] sm:$0xff]  ;;  %v232_v20 = vld [vmem:[#allocation5 + $0x2d0] sm:$0xff] }
  0x3b   :  { %317 = vmatpush1.msra.mxu0 %v246_v11  ;;  %574 = vmatpush1.msra.mxu1 %v248_v12  ;;  %v223_v21 = vld [vmem:[#allocation5 + $0x288] sm:$0xff]  ;;  %v225_v22 = vld [vmem:[#allocation5 + $0x298] sm:$0xff]  ;;  %v222_v23 = vld [vmem:[#allocation5 + $0x280] sm:$0xff] }
  0x3c   :  { %318 = vmatprep.subr.mxu0 %v239_v13  ;;  %575 = vmatprep.subr.mxu1 %v241_v14  ;;  %v224_v24 = vld [vmem:[#allocation5 + $0x290] sm:$0xff]  ;;  %v215_v25 = vld [vmem:[#allocation5 + $0x248] sm:$0xff]  ;;  %v217_v26 = vld [vmem:[#allocation5 + $0x258] sm:$0xff] }
  0x3d   :  { %319 = vmatpush1.msra.mxu0 %v238_v15  ;;  %576 = vmatpush1.msra.mxu1 %v240_v16  ;;  %v214_v27 = vld [vmem:[#allocation5 + $0x240] sm:$0xff]  ;;  %v216_v28 = vld [vmem:[#allocation5 + $0x250] sm:$0xff]  ;;  %v207_v29 = vld [vmem:[#allocation5 + $0x208] sm:$0xff] }
  0x3e   :  { %320 = vmatprep.subr.mxu0 %v231_v17  ;;  %577 = vmatprep.subr.mxu1 %v233_v18  ;;  %v209_v30 = vld [vmem:[#allocation5 + $0x218] sm:$0xff]  ;;  %v206_v31 = vld [vmem:[#allocation5 + $0x200] sm:$0xff]  ;;  %v208_v32 = vld [vmem:[#allocation5 + $0x210] sm:$0xff] }
  0x3f   :  { %321 = vmatpush1.msra.mxu0 %v230_v19  ;;  %578 = vmatpush1.msra.mxu1 %v232_v20  ;;  %v199_v33 = vld [vmem:[#allocation5 + $0x1c8] sm:$0xff]  ;;  %v201_v34 = vld [vmem:[#allocation5 + $0x1d8] sm:$0xff]  ;;  %v198_v35 = vld [vmem:[#allocation5 + $0x1c0] sm:$0xff] }
  0x40   :  { %322 = vmatprep.subr.mxu0 %v223_v21  ;;  %579 = vmatprep.subr.mxu1 %v225_v22  ;;  %v200_v36 = vld [vmem:[#allocation5 + $0x1d0] sm:$0xff]  ;;  %v191_v37 = vld [vmem:[#allocation5 + $0x188] sm:$0xff]  ;;  %v193_v38 = vld [vmem:[#allocation5 + $0x198] sm:$0xff] }
  0x41   :  { %323 = vmatpush1.msra.mxu0 %v222_v23  ;;  %580 = vmatpush1.msra.mxu1 %v224_v24  ;;  %v190_v39 = vld [vmem:[#allocation5 + $0x180] sm:$0xff]  ;;  %v192_v40 = vld [vmem:[#allocation5 + $0x190] sm:$0xff]  ;;  %v183_v41 = vld [vmem:[#allocation5 + $0x148] sm:$0xff] }
  0x42   :  { %324 = vmatprep.subr.mxu0 %v215_v25  ;;  %581 = vmatprep.subr.mxu1 %v217_v26  ;;  %v185_v42 = vld [vmem:[#allocation5 + $0x158] sm:$0xff]  ;;  %v182_v43 = vld [vmem:[#allocation5 + $0x140] sm:$0xff]  ;;  %v184_v44 = vld [vmem:[#allocation5 + $0x150] sm:$0xff] }
  0x43   :  { %325 = vmatpush1.msra.mxu0 %v214_v27  ;;  %582 = vmatpush1.msra.mxu1 %v216_v28  ;;  %v175_v45 = vld [vmem:[#allocation5 + $0x108] sm:$0xff]  ;;  %v177_v46 = vld [vmem:[#allocation5 + $0x118] sm:$0xff]  ;;  %v174_v47 = vld [vmem:[#allocation5 + $0x100] sm:$0xff] }
  0x44   :  { %326 = vmatprep.subr.mxu0 %v207_v29  ;;  %583 = vmatprep.subr.mxu1 %v209_v30  ;;  %v176_v48 = vld [vmem:[#allocation5 + $0x110] sm:$0xff]  ;;  %v167_v49 = vld [vmem:[#allocation5 + $0xc8] sm:$0xff]  ;;  %v169_v50 = vld [vmem:[#allocation5 + $0xd8] sm:$0xff] }
  0x45   :  { %327 = vmatpush1.msra.mxu0 %v206_v31  ;;  %584 = vmatpush1.msra.mxu1 %v208_v32  ;;  %v166_v51 = vld [vmem:[#allocation5 + $0xc0] sm:$0xff]  ;;  %v168_v52 = vld [vmem:[#allocation5 + $0xd0] sm:$0xff]  ;;  %v159_v53 = vld [vmem:[#allocation5 + $0x88] sm:$0xff] }
  0x46   :  { %328 = vmatprep.subr.mxu0 %v199_v33  ;;  %585 = vmatprep.subr.mxu1 %v201_v34  ;;  %v161_v54 = vld [vmem:[#allocation5 + $0x98] sm:$0xff]  ;;  %v158_v55 = vld [vmem:[#allocation5 + $0x80] sm:$0xff]  ;;  %v160_v56 = vld [vmem:[#allocation5 + $0x90] sm:$0xff] }
  0x47   :  { %329 = vmatpush1.msra.mxu0 %v198_v35  ;;  %586 = vmatpush1.msra.mxu1 %v200_v36  ;;  %v151_v57 = vld [vmem:[#allocation5 + $0x48] sm:$0xff]  ;;  %v153_v58 = vld [vmem:[#allocation5 + $0x58] sm:$0xff]  ;;  %v150_v59 = vld [vmem:[#allocation5 + $0x40] sm:$0xff] }
  0x48   :  { %330 = vmatprep.subr.mxu0 %v191_v37  ;;  %587 = vmatprep.subr.mxu1 %v193_v38  ;;  %v152_v60 = vld [vmem:[#allocation5 + $0x50] sm:$0xff]  ;;  %v143_v61 = vld [vmem:[#allocation5 + $0x8] sm:$0xff]  ;;  %v145_v62 = vld [vmem:[#allocation5 + $0x18] sm:$0xff] }
  0x49   :  { %331 = vmatpush1.msra.mxu0 %v190_v39  ;;  %588 = vmatpush1.msra.mxu1 %v192_v40  ;;  %v142_v63 = vld [vmem:[#allocation5] sm:$0xff]  ;;  %v144_v1 = vld [vmem:[#allocation5 + $0x10] sm:$0xff]  ;;  %v267_v3 = vld [vmem:[#allocation5 + $0x3e8] sm:$0xff] }
  0x4a   :  { %332 = vmatprep.subr.mxu0 %v183_v41  ;;  %589 = vmatprep.subr.mxu1 %v185_v42  ;;  %v5586_v2 = vld [vmem:[#allocation2] sm:$0xff]  ;;  %v269_v4 = vld [vmem:[#allocation5 + $0x3f8] sm:$0xff]  ;;  %v268_v6 = vld [vmem:[#allocation5 + $0x3f0] sm:$0xff] }
  0x4b   :  { %333 = vmatpush1.msra.mxu0 %v182_v43  ;;  %590 = vmatpush1.msra.mxu1 %v184_v44  ;;  %v266_v5 = vld [vmem:[#allocation5 + $0x3e0] sm:$0xff]  ;;  %v5590_v7 = vld [vmem:[#allocation2 + $0x8] sm:$0xff]  ;;  %v261_v9 = vld [vmem:[#allocation5 + $0x3b8] sm:$0xff] }
  0x4c   :  { %334 = vmatprep.subr.mxu0 %v175_v45  ;;  %591 = vmatprep.subr.mxu1 %v177_v46  ;;  %v259_v8 = vld [vmem:[#allocation5 + $0x3a8] sm:$0xff]  ;;  %v258_v10 = vld [vmem:[#allocation5 + $0x3a0] sm:$0xff]  ;;  %v260_v11 = vld [vmem:[#allocation5 + $0x3b0] sm:$0xff] }
  0x4d   :  { %335 = vmatpush1.msra.mxu0 %v174_v47  ;;  %592 = vmatpush1.msra.mxu1 %v176_v48  ;;  %v5598_v12 = vld [vmem:[#allocation2 + $0x10] sm:$0xff]  ;;  %v251_v13 = vld [vmem:[#allocation5 + $0x368] sm:$0xff]  ;;  %v253_v14 = vld [vmem:[#allocation5 + $0x378] sm:$0xff] }
  0x4e   :  { %336 = vmatprep.subr.mxu0 %v167_v49  ;;  %593 = vmatprep.subr.mxu1 %v169_v50  ;;  %v250_v15 = vld [vmem:[#allocation5 + $0x360] sm:$0xff]  ;;  %v252_v16 = vld [vmem:[#allocation5 + $0x370] sm:$0xff]  ;;  %v5604_v17 = vld [vmem:[#allocation2 + $0x18] sm:$0xff] }
  0x4f   :  { %337 = vmatpush1.msra.mxu0 %v166_v51  ;;  %594 = vmatpush1.msra.mxu1 %v168_v52  ;;  %v243_v18 = vld [vmem:[#allocation5 + $0x328] sm:$0xff]  ;;  %v245_v19 = vld [vmem:[#allocation5 + $0x338] sm:$0xff]  ;;  %v242_v20 = vld [vmem:[#allocation5 + $0x320] sm:$0xff] }
  0x50   :  { %338 = vmatprep.subr.mxu0 %v159_v53  ;;  %595 = vmatprep.subr.mxu1 %v161_v54  ;;  %v244_v21 = vld [vmem:[#allocation5 + $0x330] sm:$0xff]  ;;  %v5610_v22 = vld [vmem:[#allocation2 + $0x20] sm:$0xff]  ;;  %v235_v23 = vld [vmem:[#allocation5 + $0x2e8] sm:$0xff] }
  0x51   :  { %339 = vmatpush1.msra.mxu0 %v158_v55  ;;  %596 = vmatpush1.msra.mxu1 %v160_v56  ;;  %v237_v24 = vld [vmem:[#allocation5 + $0x2f8] sm:$0xff]  ;;  %v234_v25 = vld [vmem:[#allocation5 + $0x2e0] sm:$0xff]  ;;  %v236_v26 = vld [vmem:[#allocation5 + $0x2f0] sm:$0xff] }
  0x52   :  { %340 = vmatprep.subr.mxu0 %v151_v57  ;;  %597 = vmatprep.subr.mxu1 %v153_v58  ;;  %v5616_v27 = vld [vmem:[#allocation2 + $0x28] sm:$0xff]  ;;  %v229_v29 = vld [vmem:[#allocation5 + $0x2b8] sm:$0xff]  ;;  %v226_v30 = vld [vmem:[#allocation5 + $0x2a0] sm:$0xff] }
  0x53   :  { %341 = vmatpush1.msra.mxu0 %v150_v59  ;;  %598 = vmatpush1.msra.mxu1 %v152_v60  ;;  %v227_v28 = vld [vmem:[#allocation5 + $0x2a8] sm:$0xff]  ;;  %v228_v31 = vld [vmem:[#allocation5 + $0x2b0] sm:$0xff]  ;;  %v221_v34 = vld [vmem:[#allocation5 + $0x278] sm:$0xff] }
  0x54   :  { %342 = vmatprep.subr.mxu0 %v143_v61  ;;  %599 = vmatprep.subr.mxu1 %v145_v62  ;;  %v5622_v32 = vld [vmem:[#allocation2 + $0x30] sm:$0xff]  ;;  %v219_v33 = vld [vmem:[#allocation5 + $0x268] sm:$0xff]  ;;  %v218_v35 = vld [vmem:[#allocation5 + $0x260] sm:$0xff] }
  0x55   :  { %343 = vmatpush1.msra.mxu0 %v142_v63  ;;  %600 = vmatpush1.msra.mxu1 %v144_v1  ;;  %v220_v36 = vld [vmem:[#allocation5 + $0x270] sm:$0xff]  ;;  %v5628_v37 = vld [vmem:[#allocation2 + $0x38] sm:$0xff]  ;;  %v211_v38 = vld [vmem:[#allocation5 + $0x228] sm:$0xff] }
  0x56   :  { %377 = vmatmul.mubr.f32.vlgmr.msra.gmra.mxu0 %v5586_v2  ;;  %634 = vmatmul.mubr.f32.vlgmr.msra.gmra.mxu1 %v5586_v2  ;;  %v213_v39 = vld [vmem:[#allocation5 + $0x238] sm:$0xff]  ;;  %v210_v40 = vld [vmem:[#allocation5 + $0x220] sm:$0xff]  ;;  %v212_v41 = vld [vmem:[#allocation5 + $0x230] sm:$0xff] }
  0x57   :  { %826 = vmatprep.subr.mxu0 %v267_v3  ;;  %1083 = vmatprep.subr.mxu1 %v269_v4  ;;  %v5634_v42 = vld [vmem:[#allocation2 + $0x40] sm:$0xff]  ;;  %v203_v43 = vld [vmem:[#allocation5 + $0x1e8] sm:$0xff]  ;;  %v205_v44 = vld [vmem:[#allocation5 + $0x1f8] sm:$0xff] }
  0x58   :  { %827 = vmatpush1.msra.mxu0 %v266_v5  ;;  %382 = vmatprep.mubr.f32.mxu0 %v9989_v0  ;;  %v202_v45 = vld [vmem:[#allocation5 + $0x1e0] sm:$0xff]  ;;  %v204_v46 = vld [vmem:[#allocation5 + $0x1f0] sm:$0xff]  ;;  %v5640_v47 = vld [vmem:[#allocation2 + $0x48] sm:$0xff] }
  0x59   :  { %639 = vmatprep.mubr.f32.mxu1 %v9989_v0  ;;  %1084 = vmatpush1.msra.mxu1 %v268_v6  ;;  %v195_v48 = vld [vmem:[#allocation5 + $0x1a8] sm:$0xff]  ;;  %v197_v49 = vld [vmem:[#allocation5 + $0x1b8] sm:$0xff]  ;;  %v194_v50 = vld [vmem:[#allocation5 + $0x1a0] sm:$0xff] }
  0x5a   :  { %383 = vmatmul.mubr.f32.gmra.mxu0 %v5590_v7  ;;  %640 = vmatmul.mubr.f32.gmra.mxu1 %v5590_v7  ;;  %v196_v51 = vld [vmem:[#allocation5 + $0x1b0] sm:$0xff]  ;;  %v187_v53 = vld [vmem:[#allocation5 + $0x168] sm:$0xff]  ;;  %v189_v54 = vld [vmem:[#allocation5 + $0x178] sm:$0xff] }
  0x5b   :  { %388 = vmatprep.mubr.f32.mxu0 %v9989_v0  ;;  %645 = vmatprep.mubr.f32.mxu1 %v9989_v0  ;;  %v5646_v52 = vld [vmem:[#allocation2 + $0x50] sm:$0xff]  ;;  %v186_v55 = vld [vmem:[#allocation5 + $0x160] sm:$0xff]  ;;  %v5652_v57 = vld [vmem:[#allocation2 + $0x58] sm:$0xff] }
  0x5c   :  { %828 = vmatprep.subr.mxu0 %v259_v8  ;;  %1085 = vmatprep.subr.mxu1 %v261_v9  ;;  %v188_v56 = vld [vmem:[#allocation5 + $0x170] sm:$0xff]  ;;  %v179_v58 = vld [vmem:[#allocation5 + $0x128] sm:$0xff]  ;;  %v181_v59 = vld [vmem:[#allocation5 + $0x138] sm:$0xff] }
  0x5d   :  { %829 = vmatpush1.msra.mxu0 %v258_v10  ;;  %1086 = vmatpush1.msra.mxu1 %v260_v11  ;;  %v178_v60 = vld [vmem:[#allocation5 + $0x120] sm:$0xff]  ;;  %v180_v61 = vld [vmem:[#allocation5 + $0x130] sm:$0xff]  ;;  %v171_v63 = vld [vmem:[#allocation5 + $0xe8] sm:$0xff] }
  0x5e   :  { %389 = vmatmul.mubr.f32.gmra.mxu0 %v5598_v12  ;;  %646 = vmatmul.mubr.f32.gmra.mxu1 %v5598_v12  ;;  %v5658_v62 = vld [vmem:[#allocation2 + $0x60] sm:$0xff]  ;;  %v173_v1 = vld [vmem:[#allocation5 + $0xf8] sm:$0xff]  ;;  %v172_v4 = vld [vmem:[#allocation5 + $0xf0] sm:$0xff] }
  0x5f   :  { %394 = vmatprep.mubr.f32.mxu0 %v9989_v0  ;;  %651 = vmatprep.mubr.f32.mxu1 %v9989_v0  ;;  %v170_v3 = vld [vmem:[#allocation5 + $0xe0] sm:$0xff]  ;;  %v5664_v5 = vld [vmem:[#allocation2 + $0x68] sm:$0xff]  ;;  %v165_v8 = vld [vmem:[#allocation5 + $0xb8] sm:$0xff] }
  0x60   :  { %830 = vmatprep.subr.mxu0 %v251_v13  ;;  %1087 = vmatprep.subr.mxu1 %v253_v14  ;;  %v163_v6 = vld [vmem:[#allocation5 + $0xa8] sm:$0xff]  ;;  %v162_v9 = vld [vmem:[#allocation5 + $0xa0] sm:$0xff]  ;;  %v164_v10 = vld [vmem:[#allocation5 + $0xb0] sm:$0xff] }
  0x61   :  { %831 = vmatpush1.msra.mxu0 %v250_v15  ;;  %1088 = vmatpush1.msra.mxu1 %v252_v16  ;;  %v5670_v11 = vld [vmem:[#allocation2 + $0x70] sm:$0xff]  ;;  %v155_v13 = vld [vmem:[#allocation5 + $0x68] sm:$0xff]  ;;  %v157_v14 = vld [vmem:[#allocation5 + $0x78] sm:$0xff] }
  0x62   :  { %395 = vmatmul.mubr.f32.gmra.mxu0 %v5604_v17  ;;  %652 = vmatmul.mubr.f32.gmra.mxu1 %v5604_v17  ;;  %v154_v15 = vld [vmem:[#allocation5 + $0x60] sm:$0xff]  ;;  %v156_v16 = vld [vmem:[#allocation5 + $0x70] sm:$0xff] }
  0x63   :  { %400 = vmatprep.mubr.f32.mxu0 %v9989_v0  ;;  %657 = vmatprep.mubr.f32.mxu1 %v9989_v0 }
  0x64   :  { %832 = vmatprep.subr.mxu0 %v243_v18  ;;  %1089 = vmatprep.subr.mxu1 %v245_v19  ;;  %v5676_v18 = vld [vmem:[#allocation2 + $0x78] sm:$0xff]  ;;  %v147_v19 = vld [vmem:[#allocation5 + $0x28] sm:$0xff] }
  0x65   :  { %833 = vmatpush1.msra.mxu0 %v242_v20  ;;  %1090 = vmatpush1.msra.mxu1 %v244_v21  ;;  %v149_v20 = vld [vmem:[#allocation5 + $0x38] sm:$0xff]  ;;  %v146_v21 = vld [vmem:[#allocation5 + $0x20] sm:$0xff] }
  0x66   :  { %401 = vmatmul.mubr.f32.gmra.mxu0 %v5610_v22  ;;  %658 = vmatmul.mubr.f32.gmra.mxu1 %v5610_v22 }
  0x67   :  { %406 = vmatprep.mubr.f32.mxu0 %v9989_v0  ;;  %663 = vmatprep.mubr.f32.mxu1 %v9989_v0 }
  0x68   :  { %834 = vmatprep.subr.mxu0 %v235_v23  ;;  %1091 = vmatprep.subr.mxu1 %v237_v24  ;;  %v148_v23 = vld [vmem:[#allocation5 + $0x30] sm:$0xff]  ;;  %v5682_v24 = vld [vmem:[#allocation2 + $0x80] sm:$0xff] }
  0x69   :  { %835 = vmatpush1.msra.mxu0 %v234_v25  ;;  %1092 = vmatpush1.msra.mxu1 %v236_v26  ;;  %v5688_v25 = vld [vmem:[#allocation2 + $0x88] sm:$0xff]  ;;  %v5696_v26 = vld [vmem:[#allocation2 + $0x90] sm:$0xff] }
  0x6a   :  { %407 = vmatmul.mubr.f32.gmra.mxu0 %v5616_v27  ;;  %664 = vmatmul.mubr.f32.gmra.mxu1 %v5616_v27 }
  0x6b   :  { %412 = vmatprep.mubr.f32.mxu0 %v9989_v0  ;;  %669 = vmatprep.mubr.f32.mxu1 %v9989_v0 }
  0x6c   :  { %836 = vmatprep.subr.mxu0 %v227_v28  ;;  %1093 = vmatprep.subr.mxu1 %v229_v29  ;;  %v5702_v28 = vld [vmem:[#allocation2 + $0x98] sm:$0xff]  ;;  %v5708_v29 = vld [vmem:[#allocation2 + $0xa0] sm:$0xff] }
  0x6d   :  { %837 = vmatpush1.msra.mxu0 %v226_v30  ;;  %1094 = vmatpush1.msra.mxu1 %v228_v31  ;;  %v5714_v30 = vld [vmem:[#allocation2 + $0xa8] sm:$0xff]  ;;  %v5720_v31 = vld [vmem:[#allocation2 + $0xb0] sm:$0xff] }
  0x6e   :  { %413 = vmatmul.mubr.f32.gmra.mxu0 %v5622_v32  ;;  %670 = vmatmul.mubr.f32.gmra.mxu1 %v5622_v32 }
  0x6f   :  { %418 = vmatprep.mubr.f32.mxu0 %v9989_v0  ;;  %675 = vmatprep.mubr.f32.mxu1 %v9989_v0 }
  0x70   :  { %838 = vmatprep.subr.mxu0 %v219_v33  ;;  %1095 = vmatprep.subr.mxu1 %v221_v34  ;;  %v5726_v33 = vld [vmem:[#allocation2 + $0xb8] sm:$0xff]  ;;  %v5732_v34 = vld [vmem:[#allocation2 + $0xc0] sm:$0xff] }
  0x71   :  { %839 = vmatpush1.msra.mxu0 %v218_v35  ;;  %1096 = vmatpush1.msra.mxu1 %v220_v36  ;;  %v5738_v35 = vld [vmem:[#allocation2 + $0xc8] sm:$0xff]  ;;  %v5744_v36 = vld [vmem:[#allocation2 + $0xd0] sm:$0xff] }
  0x72   :  { %419 = vmatmul.mubr.f32.gmra.mxu0 %v5628_v37  ;;  %676 = vmatmul.mubr.f32.gmra.mxu1 %v5628_v37 }
  0x73   :  { %424 = vmatprep.mubr.f32.mxu0 %v9989_v0  ;;  %681 = vmatprep.mubr.f32.mxu1 %v9989_v0 }
  0x74   :  { %840 = vmatprep.subr.mxu0 %v211_v38  ;;  %1097 = vmatprep.subr.mxu1 %v213_v39  ;;  %v5750_v38 = vld [vmem:[#allocation2 + $0xd8] sm:$0xff]  ;;  %v5756_v39 = vld [vmem:[#allocation2 + $0xe0] sm:$0xff] }
  0x75   :  { %841 = vmatpush1.msra.mxu0 %v210_v40  ;;  %1098 = vmatpush1.msra.mxu1 %v212_v41  ;;  %v5762_v40 = vld [vmem:[#allocation2 + $0xe8] sm:$0xff]  ;;  %v5768_v41 = vld [vmem:[#allocation2 + $0xf0] sm:$0xff] }
  0x76   :  { %425 = vmatmul.mubr.f32.gmra.mxu0 %v5634_v42  ;;  %682 = vmatmul.mubr.f32.gmra.mxu1 %v5634_v42 }
  0x77   :  { %430 = vmatprep.mubr.f32.mxu0 %v9989_v0  ;;  %687 = vmatprep.mubr.f32.mxu1 %v9989_v0 }
  0x78   :  { %842 = vmatprep.subr.mxu0 %v203_v43  ;;  %1099 = vmatprep.subr.mxu1 %v205_v44  ;;  %v5774_v43 = vld [vmem:[#allocation2 + $0xf8] sm:$0xff]  ;;  %v3691_v44 = vld [vmem:[#allocation8 + $0x78] sm:$0xff] }
  0x79   :  { %843 = vmatpush1.msra.mxu0 %v202_v45  ;;  %1100 = vmatpush1.msra.mxu1 %v204_v46  ;;  %v3723_v45 = vld [vmem:[#allocation8 + $0x178] sm:$0xff]  ;;  %v3690_v46 = vld [vmem:[#allocation8 + $0x70] sm:$0xff] }
  0x7a   :  { %431 = vmatmul.mubr.f32.gmra.mxu0 %v5640_v47  ;;  %688 = vmatmul.mubr.f32.gmra.mxu1 %v5640_v47 }
  0x7b   :  { %436 = vmatprep.mubr.f32.mxu0 %v9989_v0  ;;  %693 = vmatprep.mubr.f32.mxu1 %v9989_v0 }
  0x7c   :  { %844 = vmatprep.subr.mxu0 %v195_v48  ;;  %1101 = vmatprep.subr.mxu1 %v197_v49  ;;  %v3722_v48 = vld [vmem:[#allocation8 + $0x170] sm:$0xff]  ;;  %v3721_v49 = vld [vmem:[#allocation8 + $0x168] sm:$0xff] }
  0x7d   :  { %845 = vmatpush1.msra.mxu0 %v194_v50  ;;  %1102 = vmatpush1.msra.mxu1 %v196_v51  ;;  %v3720_v50 = vld [vmem:[#allocation8 + $0x160] sm:$0xff]  ;;  %v3719_v51 = vld [vmem:[#allocation8 + $0x158] sm:$0xff] }
  0x7e   :  { %437 = vmatmul.mubr.f32.gmra.mxu0 %v5646_v52  ;;  %694 = vmatmul.mubr.f32.gmra.mxu1 %v5646_v52 }
  0x7f   :  { %442 = vmatprep.mubr.f32.mxu0 %v9989_v0  ;;  %699 = vmatprep.mubr.f32.mxu1 %v9989_v0 }
  0x80   :  { %846 = vmatprep.subr.mxu0 %v187_v53  ;;  %1103 = vmatprep.subr.mxu1 %v189_v54  ;;  %v3718_v53 = vld [vmem:[#allocation8 + $0x150] sm:$0xff]  ;;  %v3717_v54 = vld [vmem:[#allocation8 + $0x148] sm:$0xff] }
  0x81   :  { %847 = vmatpush1.msra.mxu0 %v186_v55  ;;  %1104 = vmatpush1.msra.mxu1 %v188_v56  ;;  %v3716_v55 = vld [vmem:[#allocation8 + $0x140] sm:$0xff]  ;;  %v3715_v56 = vld [vmem:[#allocation8 + $0x138] sm:$0xff] }
  0x82   :  { %443 = vmatmul.mubr.f32.gmra.mxu0 %v5652_v57  ;;  %700 = vmatmul.mubr.f32.gmra.mxu1 %v5652_v57 }
  0x83   :  { %448 = vmatprep.mubr.f32.mxu0 %v9989_v0  ;;  %705 = vmatprep.mubr.f32.mxu1 %v9989_v0 }
  0x84   :  { %848 = vmatprep.subr.mxu0 %v179_v58  ;;  %1105 = vmatprep.subr.mxu1 %v181_v59  ;;  %v3714_v58 = vld [vmem:[#allocation8 + $0x130] sm:$0xff]  ;;  %v3713_v59 = vld [vmem:[#allocation8 + $0x128] sm:$0xff] }
  0x85   :  { %849 = vmatpush1.msra.mxu0 %v178_v60  ;;  %1106 = vmatpush1.msra.mxu1 %v180_v61  ;;  %v3712_v60 = vld [vmem:[#allocation8 + $0x120] sm:$0xff]  ;;  %v3711_v61 = vld [vmem:[#allocation8 + $0x118] sm:$0xff] }
  0x86   :  { %449 = vmatmul.mubr.f32.gmra.mxu0 %v5658_v62  ;;  %706 = vmatmul.mubr.f32.gmra.mxu1 %v5658_v62 }
  0x87   :  { %454 = vmatprep.mubr.f32.mxu0 %v9989_v0  ;;  %711 = vmatprep.mubr.f32.mxu1 %v9989_v0 }
  0x88   :  { %850 = vmatprep.subr.mxu0 %v171_v63  ;;  %1107 = vmatprep.subr.mxu1 %v173_v1  ;;  %v3710_v63 = vld [vmem:[#allocation8 + $0x110] sm:$0xff]  ;;  %v3709_v1 = vld [vmem:[#allocation8 + $0x108] sm:$0xff] }
  0x89   :  { %851 = vmatpush1.msra.mxu0 %v170_v3  ;;  %1108 = vmatpush1.msra.mxu1 %v172_v4  ;;  %v3676_v3 = vld [vmem:[#allocation8] sm:$0xff] }
  0x8a   :  { %455 = vmatmul.mubr.f32.gmra.mxu0 %v5664_v5  ;;  %712 = vmatmul.mubr.f32.gmra.mxu1 %v5664_v5  ;;  %v3708_v4 = vld [vmem:[#allocation8 + $0x100] sm:$0xff] }
  0x8b   :  { %460 = vmatprep.mubr.f32.mxu0 %v9989_v0  ;;  %717 = vmatprep.mubr.f32.mxu1 %v9989_v0 }
  0x8c   :  { %852 = vmatprep.subr.mxu0 %v163_v6  ;;  %1109 = vmatprep.subr.mxu1 %v165_v8  ;;  %v3707_v6 = vld [vmem:[#allocation8 + $0xf8] sm:$0xff] }
  0x8d   :  { %853 = vmatpush1.msra.mxu0 %v162_v9  ;;  %1110 = vmatpush1.msra.mxu1 %v164_v10  ;;  %v3739_v8 = vld [vmem:[#allocation8 + $0x1f8] sm:$0xff] }
  0x8e   :  { %461 = vmatmul.mubr.f32.gmra.mxu0 %v5670_v11  ;;  %718 = vmatmul.mubr.f32.gmra.mxu1 %v5670_v11 }
  0x8f   :  { %466 = vmatprep.mubr.f32.mxu0 %v9989_v0  ;;  %723 = vmatprep.mubr.f32.mxu1 %v9989_v0 }
  0x90   :  { %854 = vmatprep.subr.mxu0 %v155_v13  ;;  %1111 = vmatprep.subr.mxu1 %v157_v14  ;;  %v3706_v14 = vld [vmem:[#allocation8 + $0xf0] sm:$0xff] }
  0x91   :  { %855 = vmatpush1.msra.mxu0 %v154_v15  ;;  %1112 = vmatpush1.msra.mxu1 %v156_v16  ;;  %v3738_v15 = vld [vmem:[#allocation8 + $0x1f0] sm:$0xff] }
  0x92   :  { %467 = vmatmul.mubr.f32.gmra.mxu0 %v5676_v18  ;;  %724 = vmatmul.mubr.f32.gmra.mxu1 %v5676_v18 }
  0x93   :  { %472 = vmatprep.mubr.f32.mxu0 %v9989_v0  ;;  %729 = vmatprep.mubr.f32.mxu1 %v9989_v0 }
  0x94   :  { %856 = vmatprep.subr.mxu0 %v147_v19  ;;  %1113 = vmatprep.subr.mxu1 %v149_v20  ;;  %v270_v19 = vld [vmem:[#allocation7] sm:$0xff] }
  0x95   :  { %857 = vmatpush1.msra.mxu0 %v146_v21  ;;  %1114 = vmatpush1.msra.mxu1 %v148_v23  ;;  %v3705_v21 = vld [vmem:[#allocation8 + $0xe8] sm:$0xff] }
  0x96   :  { %473 = vmatmul.mubr.f32.gmra.mxu0 %v5682_v24  ;;  %730 = vmatmul.mubr.f32.gmra.mxu1 %v5682_v24 }
  0x97   :  { %478 = vmatprep.mubr.f32.mxu0 %v9989_v0  ;;  %735 = vmatprep.mubr.f32.mxu1 %v9989_v0 }
  0x98   :  { %3804 = vmatprep.subr.mxu0 %v9989_v0  ;;  %4029 = vmatprep.subr.mxu1 %v9989_v0 }
  0x9a   :  { %479 = vmatmul.mubr.f32.gmra.mxu0 %v5688_v25  ;;  %736 = vmatmul.mubr.f32.gmra.mxu1 %v5688_v25 }
  0x9b   :  { %484 = vmatprep.mubr.f32.mxu0 %v9989_v0  ;;  %741 = vmatprep.mubr.f32.mxu1 %v9989_v0 }
  0x9e   :  { %485 = vmatmul.mubr.f32.gmra.mxu0 %v5696_v26  ;;  %742 = vmatmul.mubr.f32.gmra.mxu1 %v5696_v26 }
  0x9f   :  { %490 = vmatprep.mubr.f32.mxu0 %v9989_v0  ;;  %747 = vmatprep.mubr.f32.mxu1 %v9989_v0 }
  0xa2   :  { %491 = vmatmul.mubr.f32.gmra.mxu0 %v5702_v28  ;;  %748 = vmatmul.mubr.f32.gmra.mxu1 %v5702_v28 }
  0xa3   :  { %496 = vmatprep.mubr.f32.mxu0 %v9989_v0  ;;  %753 = vmatprep.mubr.f32.mxu1 %v9989_v0 }
  0xa6   :  { %497 = vmatmul.mubr.f32.gmra.mxu0 %v5708_v29  ;;  %754 = vmatmul.mubr.f32.gmra.mxu1 %v5708_v29 }
  0xa7   :  { %502 = vmatprep.mubr.f32.mxu0 %v9989_v0  ;;  %759 = vmatprep.mubr.f32.mxu1 %v9989_v0 }
  0xaa   :  { %503 = vmatmul.mubr.f32.gmra.mxu0 %v5714_v30  ;;  %760 = vmatmul.mubr.f32.gmra.mxu1 %v5714_v30 }
  0xab   :  { %508 = vmatprep.mubr.f32.mxu0 %v9989_v0  ;;  %765 = vmatprep.mubr.f32.mxu1 %v9989_v0 }
  0xae   :  { %509 = vmatmul.mubr.f32.gmra.mxu0 %v5720_v31  ;;  %766 = vmatmul.mubr.f32.gmra.mxu1 %v5720_v31 }
  0xaf   :  { %514 = vmatprep.mubr.f32.mxu0 %v9989_v0  ;;  %771 = vmatprep.mubr.f32.mxu1 %v9989_v0 }
  0xb2   :  { %515 = vmatmul.mubr.f32.gmra.mxu0 %v5726_v33  ;;  %772 = vmatmul.mubr.f32.gmra.mxu1 %v5726_v33 }
  0xb3   :  { %520 = vmatprep.mubr.f32.mxu0 %v9989_v0  ;;  %777 = vmatprep.mubr.f32.mxu1 %v9989_v0 }
  0xb6   :  { %521 = vmatmul.mubr.f32.gmra.mxu0 %v5732_v34  ;;  %778 = vmatmul.mubr.f32.gmra.mxu1 %v5732_v34 }
  0xb7   :  { %526 = vmatprep.mubr.f32.mxu0 %v9989_v0  ;;  %783 = vmatprep.mubr.f32.mxu1 %v9989_v0 }
  0xba   :  { %527 = vmatmul.mubr.f32.gmra.mxu0 %v5738_v35  ;;  %784 = vmatmul.mubr.f32.gmra.mxu1 %v5738_v35 }
  0xbb   :  { %532 = vmatprep.mubr.f32.mxu0 %v9989_v0  ;;  %789 = vmatprep.mubr.f32.mxu1 %v9989_v0 }
  0xbe   :  { %533 = vmatmul.mubr.f32.gmra.mxu0 %v5744_v36  ;;  %790 = vmatmul.mubr.f32.gmra.mxu1 %v5744_v36 }
  0xbf   :  { %538 = vmatprep.mubr.f32.mxu0 %v9989_v0  ;;  %795 = vmatprep.mubr.f32.mxu1 %v9989_v0 }
  0xc2   :  { %539 = vmatmul.mubr.f32.gmra.mxu0 %v5750_v38  ;;  %796 = vmatmul.mubr.f32.gmra.mxu1 %v5750_v38 }
  0xc3   :  { %544 = vmatprep.mubr.f32.mxu0 %v9989_v0  ;;  %801 = vmatprep.mubr.f32.mxu1 %v9989_v0 }
  0xc6   :  { %545 = vmatmul.mubr.f32.gmra.mxu0 %v5756_v39  ;;  %802 = vmatmul.mubr.f32.gmra.mxu1 %v5756_v39 }
  0xc7   :  { %550 = vmatprep.mubr.f32.mxu0 %v9989_v0  ;;  %807 = vmatprep.mubr.f32.mxu1 %v9989_v0 }
  0xca   :  { %551 = vmatmul.mubr.f32.gmra.mxu0 %v5762_v40  ;;  %808 = vmatmul.mubr.f32.gmra.mxu1 %v5762_v40 }
  0xcb   :  { %556 = vmatprep.mubr.f32.mxu0 %v9989_v0  ;;  %813 = vmatprep.mubr.f32.mxu1 %v9989_v0 }
  0xce   :  { %557 = vmatmul.mubr.f32.gmra.mxu0 %v5768_v41  ;;  %814 = vmatmul.mubr.f32.gmra.mxu1 %v5768_v41 }
  0xcf   :  { %562 = vmatprep.mubr.f32.mxu0 %v9989_v0  ;;  %819 = vmatprep.mubr.f32.mxu1 %v9989_v0 }
  0xd2   :  { %563 = vmatmul.mubr.f32.gmra.mxu0 %v5774_v43  ;;  %820 = vmatmul.mubr.f32.gmra.mxu1 %v5774_v43 }
  0xd3   :  { %890 = vmatprep.mubr.f32.mxu0 %v9989_v0  ;;  %1147 = vmatprep.mubr.f32.mxu1 %v9989_v0 }
  0xd6   :  { %891 = vmatmul.mubr.f32.vlgmr.msra.gmra.mxu0 %v5586_v2  ;;  %1148 = vmatmul.mubr.f32.vlgmr.msra.gmra.mxu1 %v5586_v2  ;;  %v3689_v2 = vld [vmem:[#allocation8 + $0x68] sm:$0xff] }
  0xd7   :  { %3805 = vmatpush1.msra.mxu0 %v3691_v44  ;;  %896 = vmatprep.mubr.f32.mxu0 %v9989_v0 }
  0xd8   :  { %1153 = vmatprep.mubr.f32.mxu1 %v9989_v0  ;;  %4030 = vmatpush1.msra.mxu1 %v3723_v45 }
  0xd9   :  { %3806 = vmatprep.subr.mxu0 %v9989_v0  ;;  %4031 = vmatprep.subr.mxu1 %v9989_v0 }
  0xda   :  { %897 = vmatmul.mubr.f32.gmra.mxu0 %v5590_v7  ;;  %1154 = vmatmul.mubr.f32.gmra.mxu1 %v5590_v7  ;;  %v3688_v7 = vld [vmem:[#allocation8 + $0x60] sm:$0xff] }
  0xdb   :  { %3807 = vmatpush1.msra.mxu0 %v3690_v46  ;;  %902 = vmatprep.mubr.f32.mxu0 %v9989_v0  ;;  %v3704_v46 = vld [vmem:[#allocation8 + $0xe0] sm:$0xff] }
  0xdc   :  { %1159 = vmatprep.mubr.f32.mxu1 %v9989_v0  ;;  %4032 = vmatpush1.msra.mxu1 %v3722_v48 }
  0xdd   :  { %3808 = vmatprep.subr.mxu0 %v9989_v0  ;;  %4033 = vmatprep.subr.mxu1 %v9989_v0 }
  0xde   :  { %903 = vmatmul.mubr.f32.gmra.mxu0 %v5598_v12  ;;  %1160 = vmatmul.mubr.f32.gmra.mxu1 %v5598_v12  ;;  %v3687_v12 = vld [vmem:[#allocation8 + $0x58] sm:$0xff] }
  0xdf   :  { %3809 = vmatpush1.msra.mxu0 %v3689_v2  ;;  %908 = vmatprep.mubr.f32.mxu0 %v9989_v0  ;;  %v3736_v2 = vld [vmem:[#allocation8 + $0x1e0] sm:$0xff] }
  0xe0   :  { %1165 = vmatprep.mubr.f32.mxu1 %v9989_v0  ;;  %4034 = vmatpush1.msra.mxu1 %v3721_v49 }
  0xe1   :  { %3810 = vmatprep.subr.mxu0 %v9989_v0  ;;  %4035 = vmatprep.subr.mxu1 %v9989_v0 }
  0xe2   :  { %909 = vmatmul.mubr.f32.gmra.mxu0 %v5604_v17  ;;  %1166 = vmatmul.mubr.f32.gmra.mxu1 %v5604_v17  ;;  %v3686_v17 = vld [vmem:[#allocation8 + $0x50] sm:$0xff] }
  0xe3   :  { %3811 = vmatpush1.msra.mxu0 %v3688_v7  ;;  %914 = vmatprep.mubr.f32.mxu0 %v9989_v0 }
  0xe4   :  { %1171 = vmatprep.mubr.f32.mxu1 %v9989_v0  ;;  %4036 = vmatpush1.msra.mxu1 %v3720_v50 }
  0xe5   :  { %3812 = vmatprep.subr.mxu0 %v9989_v0  ;;  %4037 = vmatprep.subr.mxu1 %v9989_v0 }
  0xe6   :  { %915 = vmatmul.mubr.f32.gmra.mxu0 %v5610_v22  ;;  %1172 = vmatmul.mubr.f32.gmra.mxu1 %v5610_v22  ;;  %v3685_v22 = vld [vmem:[#allocation8 + $0x48] sm:$0xff] }
  0xe7   :  { %3813 = vmatpush1.msra.mxu0 %v3687_v12  ;;  %920 = vmatprep.mubr.f32.mxu0 %v9989_v0  ;;  %v3703_v12 = vld [vmem:[#allocation8 + $0xd8] sm:$0xff] }
  0xe8   :  { %1177 = vmatprep.mubr.f32.mxu1 %v9989_v0  ;;  %4038 = vmatpush1.msra.mxu1 %v3719_v51 }
  0xe9   :  { %3814 = vmatprep.subr.mxu0 %v9989_v0  ;;  %4039 = vmatprep.subr.mxu1 %v9989_v0 }
  0xea   :  { %921 = vmatmul.mubr.f32.gmra.mxu0 %v5616_v27  ;;  %1178 = vmatmul.mubr.f32.gmra.mxu1 %v5616_v27  ;;  %v3684_v27 = vld [vmem:[#allocation8 + $0x40] sm:$0xff] }
  0xeb   :  { %3815 = vmatpush1.msra.mxu0 %v3686_v17  ;;  %926 = vmatprep.mubr.f32.mxu0 %v9989_v0 }
  0xec   :  { %1183 = vmatprep.mubr.f32.mxu1 %v9989_v0  ;;  %4040 = vmatpush1.msra.mxu1 %v3718_v53 }
  0xed   :  { %3816 = vmatprep.subr.mxu0 %v9989_v0  ;;  %4041 = vmatprep.subr.mxu1 %v9989_v0 }
  0xee   :  { %927 = vmatmul.mubr.f32.gmra.mxu0 %v5622_v32  ;;  %1184 = vmatmul.mubr.f32.gmra.mxu1 %v5622_v32  ;;  %v3683_v32 = vld [vmem:[#allocation8 + $0x38] sm:$0xff] }
  0xef   :  { %3817 = vmatpush1.msra.mxu0 %v3685_v22  ;;  %932 = vmatprep.mubr.f32.mxu0 %v9989_v0 }
  0xf0   :  { %1189 = vmatprep.mubr.f32.mxu1 %v9989_v0  ;;  %4042 = vmatpush1.msra.mxu1 %v3717_v54 }
  0xf1   :  { %3818 = vmatprep.subr.mxu0 %v9989_v0  ;;  %4043 = vmatprep.subr.mxu1 %v9989_v0 }
  0xf2   :  { %933 = vmatmul.mubr.f32.gmra.mxu0 %v5628_v37  ;;  %1190 = vmatmul.mubr.f32.gmra.mxu1 %v5628_v37  ;;  %v3682_v37 = vld [vmem:[#allocation8 + $0x30] sm:$0xff] }
  0xf3   :  { %3819 = vmatpush1.msra.mxu0 %v3684_v27  ;;  %938 = vmatprep.mubr.f32.mxu0 %v9989_v0 }
  0xf4   :  { %1195 = vmatprep.mubr.f32.mxu1 %v9989_v0  ;;  %4044 = vmatpush1.msra.mxu1 %v3716_v55  ;;  %v3702_v55 = vld [vmem:[#allocation8 + $0xd0] sm:$0xff] }
  0xf5   :  { %3820 = vmatprep.subr.mxu0 %v9989_v0  ;;  %4045 = vmatprep.subr.mxu1 %v9989_v0 }
  0xf6   :  { %939 = vmatmul.mubr.f32.gmra.mxu0 %v5634_v42  ;;  %1196 = vmatmul.mubr.f32.gmra.mxu1 %v5634_v42  ;;  %v3681_v42 = vld [vmem:[#allocation8 + $0x28] sm:$0xff] }
  0xf7   :  { %3821 = vmatpush1.msra.mxu0 %v3683_v32  ;;  %944 = vmatprep.mubr.f32.mxu0 %v9989_v0 }
  0xf8   :  { %1201 = vmatprep.mubr.f32.mxu1 %v9989_v0  ;;  %4046 = vmatpush1.msra.mxu1 %v3715_v56 }
  0xf9   :  { %3822 = vmatprep.subr.mxu0 %v9989_v0  ;;  %4047 = vmatprep.subr.mxu1 %v9989_v0 }
  0xfa   :  { %945 = vmatmul.mubr.f32.gmra.mxu0 %v5640_v47  ;;  %1202 = vmatmul.mubr.f32.gmra.mxu1 %v5640_v47  ;;  %v3680_v47 = vld [vmem:[#allocation8 + $0x20] sm:$0xff] }
  0xfb   :  { %3823 = vmatpush1.msra.mxu0 %v3682_v37  ;;  %950 = vmatprep.mubr.f32.mxu0 %v9989_v0 }
  0xfc   :  { %1207 = vmatprep.mubr.f32.mxu1 %v9989_v0  ;;  %4048 = vmatpush1.msra.mxu1 %v3714_v58 }
  0xfd   :  { %3824 = vmatprep.subr.mxu0 %v9989_v0  ;;  %4049 = vmatprep.subr.mxu1 %v9989_v0 }
  0xfe   :  { %951 = vmatmul.mubr.f32.gmra.mxu0 %v5646_v52  ;;  %1208 = vmatmul.mubr.f32.gmra.mxu1 %v5646_v52  ;;  %v3679_v52 = vld [vmem:[#allocation8 + $0x18] sm:$0xff] }
  0xff   :  { %3825 = vmatpush1.msra.mxu0 %v3681_v42  ;;  %956 = vmatprep.mubr.f32.mxu0 %v9989_v0 }
 0x100   :  { %1213 = vmatprep.mubr.f32.mxu1 %v9989_v0  ;;  %4050 = vmatpush1.msra.mxu1 %v3713_v59 }
 0x101   :  { %3826 = vmatprep.subr.mxu0 %v9989_v0  ;;  %4051 = vmatprep.subr.mxu1 %v9989_v0 }
 0x102   :  { %957 = vmatmul.mubr.f32.gmra.mxu0 %v5652_v57  ;;  %1214 = vmatmul.mubr.f32.gmra.mxu1 %v5652_v57  ;;  %v3678_v57 = vld [vmem:[#allocation8 + $0x10] sm:$0xff] }
 0x103   :  { %3827 = vmatpush1.msra.mxu0 %v3680_v47  ;;  %962 = vmatprep.mubr.f32.mxu0 %v9989_v0 }
 0x104   :  { %1219 = vmatprep.mubr.f32.mxu1 %v9989_v0  ;;  %4052 = vmatpush1.msra.mxu1 %v3712_v60 }
 0x105   :  { %3828 = vmatprep.subr.mxu0 %v9989_v0  ;;  %4053 = vmatprep.subr.mxu1 %v9989_v0 }
 0x106   :  { %963 = vmatmul.mubr.f32.gmra.mxu0 %v5658_v62  ;;  %1220 = vmatmul.mubr.f32.gmra.mxu1 %v5658_v62  ;;  %v3677_v62 = vld [vmem:[#allocation8 + $0x8] sm:$0xff] }
 0x107   :  { %3829 = vmatpush1.msra.mxu0 %v3679_v52  ;;  %968 = vmatprep.mubr.f32.mxu0 %v9989_v0  ;;  %v3701_v52 = vld [vmem:[#allocation8 + $0xc8] sm:$0xff] }
 0x108   :  { %1225 = vmatprep.mubr.f32.mxu1 %v9989_v0  ;;  %4054 = vmatpush1.msra.mxu1 %v3711_v61  ;;  %v3733_v61 = vld [vmem:[#allocation8 + $0x1c8] sm:$0xff] }
 0x109   :  { %3830 = vmatprep.subr.mxu0 %v9989_v0  ;;  %4055 = vmatprep.subr.mxu1 %v9989_v0 }
 0x10a   :  { %969 = vmatmul.mubr.f32.gmra.mxu0 %v5664_v5  ;;  %1226 = vmatmul.mubr.f32.gmra.mxu1 %v5664_v5  ;;  %v272_v5 = vlaneseq }
 0x10b   :  { %3831 = vmatpush1.msra.mxu0 %v3678_v57  ;;  %974 = vmatprep.mubr.f32.mxu0 %v9989_v0 }
 0x10c   :  { %1231 = vmatprep.mubr.f32.mxu1 %v9989_v0  ;;  %4056 = vmatpush1.msra.mxu1 %v3710_v63  ;;  %v5878_v10 = vshrl.u32 %v272_v5, 7 }
 0x10d   :  { %3832 = vmatprep.subr.mxu0 %v9989_v0  ;;  %4057 = vmatprep.subr.mxu1 %v9989_v0 }
 0x10e   :  { %975 = vmatmul.mubr.f32.gmra.mxu0 %v5670_v11  ;;  %1232 = vmatmul.mubr.f32.gmra.mxu1 %v5670_v11  ;;  %10121 = vst [vmem:[#allocation15_spill] sm:$0xff] %v5878_v10  ;;  %v274_v16 = vsub.s32 0, %v5878_v10  ;;  %v282_v23 = vsub.s32 2, %v5878_v10  ;;  %v278_v7 = vsub.s32 1, %v5878_v10  ;;  %v286_v17 = vsub.s32 3, %v5878_v10 }
 0x10f   :  { %3833 = vmatpush1.msra.mxu0 %v3677_v62  ;;  %980 = vmatprep.mubr.f32.mxu0 %v9989_v0 }
 0x110   :  { %1237 = vmatprep.mubr.f32.mxu1 %v9989_v0  ;;  %4058 = vmatpush1.msra.mxu1 %v3709_v1  ;;  %v5904_v48 = vrot.slane %v270_v19, %v282_v23  ;;  %v5931_v54 = vrot.slane %v270_v19, %v278_v7  ;;  %v5940_v56 = vrot.slane %v270_v19, %v286_v17 }
 0x111   :  { %3834 = vmatprep.subr.mxu0 %v9989_v0  ;;  %4059 = vmatprep.subr.mxu1 %v9989_v0 }
 0x112   :  { %981 = vmatmul.mubr.f32.gmra.mxu0 %v5676_v18  ;;  %1238 = vmatmul.mubr.f32.gmra.mxu1 %v5676_v18 }
 0x113   :  { %3835 = vmatpush1.msra.mxu0 %v3676_v3  ;;  %986 = vmatprep.mubr.f32.mxu0 %v9989_v0 }
 0x114   :  { %1243 = vmatprep.mubr.f32.mxu1 %v9989_v0  ;;  %4060 = vmatpush1.msra.mxu1 %v3708_v4 }
 0x115   :  { %3836 = vmatprep.subr.mxu0 %v9989_v0  ;;  %4061 = vmatprep.subr.mxu1 %v9989_v0 }
 0x116   :  { %v378_v9 = vpop.f32.mrf.mxu0  ;;  %987 = vmatmul.mubr.f32.gmra.mxu0 %v5682_v24  ;;  %1244 = vmatmul.mubr.f32.gmra.mxu1 %v5682_v24  ;;  %v635_v11 = vpop.f32.mrf.mxu1  ;;  %v3737_v24 = vld [vmem:[#allocation8 + $0x1e8] sm:$0xff] }
 0x117   :  { %3837 = vmatpush2.msra.mxu0 %v3707_v6  ;;  %992 = vmatprep.mubr.f32.mxu0 %v9989_v0  ;;  %v5921_v51 = vadd.f32 %v635_v11, %v5904_v48  ;;  %v3700_v6 = vld [vmem:[#allocation8 + $0xc0] sm:$0xff] }
 0x118   :  { %v5881_v13 = vpop.f32.mrf.mxu0  ;;  %1249 = vmatprep.mubr.f32.mxu1 %v9989_v0  ;;  %4062 = vmatpush2.msra.mxu1 %v3739_v8  ;;  %v5889_v18 = vpop.f32.mrf.mxu1  ;;  %v3732_v11 = vld [vmem:[#allocation8 + $0x1c0] sm:$0xff] }
 0x119   :  { %3838 = vmatprep.subr.mxu0 %v9989_v0  ;;  %4063 = vmatprep.subr.mxu1 %v9989_v0  ;;  %v1342_v32 = vmul.f32 %v5921_v51, %v5921_v51  ;;  %v5955_v47 = vadd.f32 %v5881_v13, %v5931_v54  ;;  %v5964_v57 = vadd.f32 %v5889_v18, %v5940_v56  ;;  %v1598_v18 = vmul.f32 0.7978846, %v5921_v51 }
 0x11a   :  { %993 = vmatmul.mubr.f32.gmra.mxu0 %v5688_v25  ;;  %1250 = vmatmul.mubr.f32.gmra.mxu1 %v5688_v25  ;;  %v384_v20 = vpop.f32.mrf.mxu0  ;;  %v5898_v25 = vrot.slane %v270_v19, %v274_v16  ;;  %v641_v44 = vpop.f32.mrf.mxu1 }
 0x11b   :  { %3839 = vmatpush2.msra.mxu0 %v3706_v14  ;;  %998 = vmatprep.mubr.f32.mxu0 %v9989_v0  ;;  %v5948_v42 = vadd.f32 %v641_v44, %v5904_v48  ;;  %v1341_v4 = vmul.f32 %v5955_v47, %v5955_v47  ;;  %v1343_v13 = vmul.f32 %v5964_v57, %v5964_v57  ;;  %v3699_v44 = vld [vmem:[#allocation8 + $0xb8] sm:$0xff] }
 0x11c   :  { %1255 = vmatprep.mubr.f32.mxu1 %v9989_v0  ;;  %4064 = vmatpush2.msra.mxu1 %v3738_v15  ;;  %v5901_v45 = vpop.f32.mrf.mxu0  ;;  %v5913_v49 = vpop.f32.mrf.mxu1  ;;  %v5943_v37 = vadd.f32 %v384_v20, %v5898_v25 }
 0x11d   :  { %3840 = vmatprep.subr.mxu0 %v9989_v0  ;;  %4065 = vmatprep.subr.mxu1 %v9989_v0  ;;  %v1350_v1 = vmul.f32 %v5948_v42, %v5948_v42  ;;  %v1853_v23 = vmul.f32 0.044715, %v1341_v4  ;;  %v1855_v7 = vmul.f32 0.044715, %v1343_v13  ;;  %v6046_v4 = vmul.f32 0.5, %v5921_v51 }
 0x11e   :  { %999 = vmatmul.mubr.f32.gmra.mxu0 %v5696_v26  ;;  %1256 = vmatmul.mubr.f32.gmra.mxu1 %v5696_v26  ;;  %v5911_v26 = vadd.f32 %v378_v9, %v5898_v25  ;;  %v5917_v50 = vpop.f32.mrf.mxu0  ;;  %v647_v22 = vpop.f32.mrf.mxu1  ;;  %v1348_v63 = vmul.f32 %v5943_v37, %v5943_v37  ;;  %v5983_v9 = vadd.f32 %v5901_v45, %v5931_v54  ;;  %v1599_v13 = vmul.f32 0.7978846, %v5964_v57 }
 0x11f   :  { %3841 = vmatpush2.msra.mxu0 %v3705_v21  ;;  %1004 = vmatprep.mubr.f32.mxu0 %v9989_v0  ;;  %v5991_v15 = vadd.f32 %v5917_v50, %v5898_v25  ;;  %v1862_v19 = vmul.f32 0.044715, %v1350_v1  ;;  %v5997_v20 = vadd.f32 %v647_v22, %v5904_v48  ;;  %v1597_v22 = vmul.f32 0.7978846, %v5955_v47 }
 0x120   :  { %1261 = vmatprep.mubr.f32.mxu1 %v9989_v0  ;;  %4066 = vmatpush2.msra.mxu1 %v3737_v24  ;;  %v1340_v53 = vmul.f32 %v5911_v26, %v5911_v26  ;;  %v5933_v27 = vpop.f32.mrf.mxu0  ;;  %v5950_v59 = vpop.f32.mrf.mxu1  ;;  %v1860_v14 = vmul.f32 0.044715, %v1348_v63  ;;  %v1349_v45 = vmul.f32 %v5983_v9, %v5983_v9 }
 0x121   :  { %3842 = vmatprep.subr.mxu0 %v9989_v0  ;;  %4067 = vmatprep.subr.mxu1 %v9989_v0  ;;  %v1358_v17 = vmul.f32 %v5997_v20, %v5997_v20 }
 0x122   :  { %1005 = vmatmul.mubr.f32.gmra.mxu0 %v5702_v28  ;;  %1262 = vmatmul.mubr.f32.gmra.mxu1 %v5702_v28  ;;  %v3735_v28 = vld [vmem:[#allocation8 + $0x1d8] sm:$0xff]  ;;  %v1852_v58 = vmul.f32 0.044715, %v1340_v53  ;;  %v5957_v60 = vpop.f32.mrf.mxu0  ;;  %v5972_v3 = vpop.f32.mrf.mxu1  ;;  %v2116_v50 = vadd.f32 1.0, %v1860_v14 }
 0x123   :  { %3843 = vmatpush2.msra.mxu0 %v3704_v46  ;;  %1010 = vmatprep.mubr.f32.mxu0 %v9989_v0  ;;  %v6009_v46 = vadd.f32 %v5913_v49, %v5940_v56  ;;  %v2118_v49 = vadd.f32 1.0, %v1862_v19  ;;  %v6041_v1 = vadd.f32 %v5972_v3, %v5904_v48 }
 0x124   :  { %1267 = vmatprep.mubr.f32.mxu1 %v9989_v0  ;;  %4068 = vmatpush2.msra.mxu1 %v3736_v2  ;;  %v2108_v62 = vadd.f32 1.0, %v1852_v58  ;;  %v5977_v5 = vpop.f32.mrf.mxu0  ;;  %v5999_v21 = vpop.f32.mrf.mxu1  ;;  %v3731_v2 = vld [vmem:[#allocation8 + $0x1b8] sm:$0xff]  ;;  %v1606_v58 = vmul.f32 0.7978846, %v5948_v42 }
 0x125   :  { %3844 = vmatprep.subr.mxu0 %v9989_v0  ;;  %4069 = vmatprep.subr.mxu1 %v9989_v0 }
 0x126   :  { %1011 = vmatmul.mubr.f32.gmra.mxu0 %v5708_v29  ;;  %1268 = vmatmul.mubr.f32.gmra.mxu1 %v5708_v29  ;;  %v3734_v29 = vld [vmem:[#allocation8 + $0x1d0] sm:$0xff]  ;;  %v6002_v24 = vpop.f32.mrf.mxu0  ;;  %v6022_v53 = vpop.f32.mrf.mxu1 }
 0x127   :  { %3845 = vmatpush2.msra.mxu0 %v3703_v12  ;;  %1016 = vmatprep.mubr.f32.mxu0 %v9989_v0  ;;  %v1356_v12 = vmul.f32 %v5991_v15, %v5991_v15 }
 0x128   :  { %1273 = vmatprep.mubr.f32.mxu1 %v9989_v0  ;;  %4070 = vmatpush2.msra.mxu1 %v3735_v28  ;;  %v6018_v28 = vmul.f32 0.5, %v5911_v26 }
 0x129   :  { %3846 = vmatprep.subr.mxu0 %v9989_v0  ;;  %4071 = vmatprep.subr.mxu1 %v9989_v0 }
 0x12a   :  { %1017 = vmatmul.mubr.f32.gmra.mxu0 %v5714_v30  ;;  %1274 = vmatmul.mubr.f32.gmra.mxu1 %v5714_v30  ;;  %v1854_v30 = vmul.f32 0.044715, %v1342_v32  ;;  %v1604_v32 = vmul.f32 0.7978846, %v5943_v37 }
 0x12b   :  { %3847 = vmatpush2.msra.mxu0 %v3702_v55  ;;  %1022 = vmatprep.mubr.f32.mxu0 %v9989_v0  ;;  %v2109_v55 = vadd.f32 1.0, %v1853_v23 }
 0x12c   :  { %1279 = vmatprep.mubr.f32.mxu1 %v9989_v0  ;;  %4072 = vmatpush2.msra.mxu1 %v3734_v29  ;;  %v2110_v8 = vadd.f32 1.0, %v1854_v30  ;;  %v3698_v29 = vld [vmem:[#allocation8 + $0xb0] sm:$0xff]  ;;  %v1351_v30 = vmul.f32 %v6009_v46, %v6009_v46  ;;  %v2372_v63 = vmul.f32 %v2116_v50, %v1604_v32  ;;  %v1612_v50 = vmul.f32 0.7978846, %v5991_v15 }
 0x12d   :  { %3848 = vmatprep.subr.mxu0 %v9989_v0  ;;  %4073 = vmatprep.subr.mxu1 %v9989_v0  ;;  %v2365_v3 = vmul.f32 %v2109_v55, %v1597_v22  ;;  %v1614_v32 = vmul.f32 0.7978846, %v5997_v20 }
 0x12e   :  { %1023 = vmatmul.mubr.f32.gmra.mxu0 %v5720_v31  ;;  %1280 = vmatmul.mubr.f32.gmra.mxu1 %v5720_v31  ;;  %v1596_v31 = vmul.f32 0.7978846, %v5911_v26  ;;  %v6031_v26 = vpop.f32.mrf.mxu0  ;;  %v1863_v23 = vmul.f32 0.044715, %v1351_v30 }
 0x12f   :  { %3849 = vmatpush2.msra.mxu0 %v3701_v52  ;;  %1028 = vmatprep.mubr.f32.mxu0 %v9989_v0  ;;  %v1861_v52 = vmul.f32 0.044715, %v1349_v45  ;;  %v1366_v45 = vmul.f32 %v6041_v1, %v6041_v1 }
 0x130   :  { %1285 = vmatprep.mubr.f32.mxu1 %v9989_v0  ;;  %4074 = vmatpush2.msra.mxu1 %v3733_v61  ;;  %v2364_v16 = vmul.f32 %v2108_v62, %v1596_v31  ;;  %v3730_v61 = vld [vmem:[#allocation8 + $0x1b0] sm:$0xff]  ;;  %v1868_v62 = vmul.f32 0.044715, %v1356_v12  ;;  %v1870_v31 = vmul.f32 0.044715, %v1358_v17  ;;  %v6062_v14 = vpop.f32.mrf.mxu0  ;;  %v3696_v17 = vld [vmem:[#allocation8 + $0xa0] sm:$0xff] }
 0x131   :  { %3850 = vmatprep.subr.mxu0 %v9989_v0  ;;  %4075 = vmatprep.subr.mxu1 %v9989_v0  ;;  %v2117_v19 = vadd.f32 1.0, %v1861_v52  ;;  %v2119_v55 = vadd.f32 1.0, %v1863_v23  ;;  %v1607_v52 = vmul.f32 0.7978846, %v6009_v46  ;;  %v3727_v23 = vld [vmem:[#allocation8 + $0x198] sm:$0xff] }
 0x132   :  { %1029 = vmatmul.mubr.f32.gmra.mxu0 %v5726_v33  ;;  %1286 = vmatmul.mubr.f32.gmra.mxu1 %v5726_v33  ;;  %v2366_v33 = vmul.f32 %v2110_v8, %v1598_v18  ;;  %4904 = vtanh.f32 %v2364_v16  ;;  %v6050_v8 = vadd.f32 %v5933_v27, %v5931_v54  ;;  %v3697_v27 = vld [vmem:[#allocation8 + $0xa8] sm:$0xff]  ;;  %v6066_v16 = vmul.f32 0.5, %v5943_v37 }
 0x133   :  { %3851 = vmatpush2.msra.mxu0 %v3700_v6  ;;  %1034 = vmatprep.mubr.f32.mxu0 %v9989_v0  ;;  %v2374_v6 = vmul.f32 %v2118_v49, %v1606_v58  ;;  %v6069_v18 = vmul.f32 0.5, %v5948_v42  ;;  %v1605_v37 = vmul.f32 0.7978846, %v5983_v9  ;;  %v2126_v42 = vadd.f32 1.0, %v1870_v31  ;;  %v3728_v58 = vld [vmem:[#allocation8 + $0x1a0] sm:$0xff] }
 0x134   :  { %1291 = vmatprep.mubr.f32.mxu1 %v9989_v0  ;;  %4076 = vmatpush2.msra.mxu1 %v3732_v11  ;;  %4906 = vtanh.f32 %v2366_v33  ;;  %v6052_v11 = vpop.f32.mrf.mxu1  ;;  %v2124_v33 = vadd.f32 1.0, %v1868_v62 }
 0x135   :  { %3852 = vmatprep.subr.mxu0 %v9989_v0  ;;  %4077 = vmatprep.subr.mxu1 %v9989_v0  ;;  %4908 = vtanh.f32 %v2372_v63  ;;  %v2373_v22 = vmul.f32 %v2117_v19, %v1605_v37  ;;  %v2382_v63 = vmul.f32 %v2126_v42, %v1614_v32  ;;  %v1613_v37 = vmul.f32 0.7978846, %v6050_v8 }
 0x136   :  { %1035 = vmatmul.mubr.f32.gmra.mxu0 %v5732_v34  ;;  %1292 = vmatmul.mubr.f32.gmra.mxu1 %v5732_v34  ;;  %v6029_v34 = vadd.f32 %v5957_v60, %v5898_v25  ;;  %v2111_v60 = vadd.f32 1.0, %v1855_v7  ;;  %4910 = vtanh.f32 %v2374_v6  ;;  %v6080_v7 = vpop.f32.mrf.mxu1  ;;  %v2380_v30 = vmul.f32 %v2124_v33, %v1612_v50 }
 0x137   :  { %3853 = vmatpush2.msra.mxu0 %v3699_v44  ;;  %1040 = vmatprep.mubr.f32.mxu0 %v9989_v0  ;;  %4912 = vtanh.f32 %v2365_v3  ;;  %v6110_v3 = vmul.f32 0.5, %v5997_v20  ;;  %v6128_v33 = vadd.f32 %v5999_v21, %v5940_v56 }
 0x138   :  { %1297 = vmatprep.mubr.f32.mxu1 %v9989_v0  ;;  %4078 = vmatpush2.msra.mxu1 %v3731_v2  ;;  %v1364_v51 = vmul.f32 %v6029_v34, %v6029_v34  ;;  %v2367_v44 = vmul.f32 %v2111_v60, %v1599_v13  ;;  %v1357_v2 = vmul.f32 %v6050_v8, %v6050_v8  ;;  %v6106_v6 = vpop.f32.mrf.mxu1  ;;  %v1620_v19 = vmul.f32 0.7978846, %v6029_v34 }
 0x139   :  { %3854 = vmatprep.subr.mxu0 %v9989_v0  ;;  %4079 = vmatprep.subr.mxu1 %v9989_v0  ;;  %v6099_v60 = vadd.f32 %v5977_v5, %v5931_v54  ;;  %10124 = vst [vmem:[#allocation18_spill] sm:$0xff] %v6128_v33 }
 0x13a   :  { %1041 = vmatmul.mubr.f32.gmra.mxu0 %v5738_v35  ;;  %1298 = vmatmul.mubr.f32.gmra.mxu1 %v5738_v35  ;;  %v6058_v35 = vadd.f32 %v5950_v59, %v5940_v56  ;;  %v3729_v59 = vld [vmem:[#allocation8 + $0x1a8] sm:$0xff]  ;;  %v1876_v49 = vmul.f32 0.044715, %v1364_v51  ;;  %4914 = vtanh.f32 %v2367_v44  ;;  %v1869_v62 = vmul.f32 0.044715, %v1357_v2  ;;  %v6133_v2 = vpop.f32.mrf.mxu1 }
 0x13b   :  { %3855 = vmatpush2.msra.mxu0 %v3698_v29  ;;  %1046 = vmatprep.mubr.f32.mxu0 %v9989_v0  ;;  %v6092_v29 = vadd.f32 %v6002_v24, %v5898_v25  ;;  %10123 = vst [vmem:[#allocation17_spill] sm:$0xff] %v6099_v60  ;;  %v6104_v24 = vmul.f32 0.5, %v5991_v15  ;;  %v3695_v15 = vld [vmem:[#allocation8 + $0x98] sm:$0xff]  ;;  %4916 = vtanh.f32 %v2373_v22  ;;  %v1365_v44 = vmul.f32 %v6099_v60, %v6099_v60 }
 0x13c   :  { %10122 = vst [vmem:[#allocation16_spill] sm:$0xff] %v6058_v35  ;;  %1303 = vmatprep.mubr.f32.mxu1 %v9989_v0  ;;  %4080 = vmatpush2.msra.mxu1 %v3730_v61  ;;  %v1359_v12 = vmul.f32 %v6058_v35, %v6058_v35  ;;  %v1878_v61 = vmul.f32 0.044715, %v1366_v45  ;;  %v2132_v13 = vadd.f32 1.0, %v1876_v49  ;;  %4918 = vtanh.f32 %v2380_v30 }
 0x13d   :  { %3856 = vmatprep.subr.mxu0 %v9989_v0  ;;  %4081 = vmatprep.subr.mxu1 %v9989_v0  ;;  %v1372_v20 = vmul.f32 %v6092_v29, %v6092_v29  ;;  %4920 = vtanh.f32 %v2382_v63  ;;  %v2125_v42 = vadd.f32 1.0, %v1869_v62  ;;  %v1622_v49 = vmul.f32 0.7978846, %v6041_v1 }
 0x13e   :  { %1047 = vmatmul.mubr.f32.gmra.mxu0 %v5744_v36  ;;  %1304 = vmatmul.mubr.f32.gmra.mxu1 %v5744_v36  ;;  %v6086_v36 = vpop.f32.mrf.mxu0  ;;  %v1871_v5 = vmul.f32 0.044715, %v1359_v12  ;;  %v2388_v12 = vmul.f32 %v2132_v13, %v1620_v19  ;;  %v1877_v30 = vmul.f32 0.044715, %v1365_v44  ;;  %v6149_v63 = vadd.f32 %v6031_v26, %v5931_v54 }
 0x13f   :  { %3857 = vmatpush2.msra.mxu0 %v3697_v27  ;;  %1052 = vmatprep.mubr.f32.mxu0 %v9989_v0  ;;  %v4905_v31 = vpop.eup %4904  ;;  %v2375_v27 = vmul.f32 %v2119_v55, %v1607_v52  ;;  %v1615_v55 = vmul.f32 0.7978846, %v6058_v35  ;;  %v1884_v32 = vmul.f32 0.044715, %v1372_v20  ;;  %v6157_v13 = vmul.f32 0.5, %v6029_v34  ;;  %v3693_v34 = vld [vmem:[#allocation8 + $0x88] sm:$0xff] }
 0x140   :  { %1309 = vmatprep.mubr.f32.mxu1 %v9989_v0  ;;  %4082 = vmatpush2.msra.mxu1 %v3729_v59  ;;  %v6116_v51 = vpop.f32.mrf.mxu0  ;;  %v2134_v59 = vadd.f32 1.0, %v1878_v61  ;;  %v3132_v45 = vadd.f32 1.0, %v4905_v31  ;;  %v2127_v50 = vadd.f32 1.0, %v1871_v5  ;;  %v1367_v61 = vmul.f32 %v6128_v33, %v6128_v33  ;;  %10125 = vst [vmem:[#allocation19_spill] sm:$0xff] %v6149_v63 }
 0x141   :  { %3858 = vmatprep.subr.mxu0 %v9989_v0  ;;  %4083 = vmatprep.subr.mxu1 %v9989_v0  ;;  %4922 = vtanh.f32 %v2375_v27  ;;  %v2381_v5 = vmul.f32 %v2125_v42, %v1613_v37  ;;  %v6163_v27 = vpop.f32.mrf.mxu1  ;;  %v6183_v44 = vadd.f32 %v6080_v7, %v5904_v48  ;;  %v1373_v37 = vmul.f32 %v6149_v63, %v6149_v63 }
 0x142   :  { %1053 = vmatmul.mubr.f32.gmra.mxu0 %v5750_v38  ;;  %1310 = vmatmul.mubr.f32.gmra.mxu1 %v5750_v38  ;;  %v6114_v38 = vadd.f32 %v6022_v53, %v5904_v48  ;;  %v4907_v53 = vpop.eup %4906  ;;  %v2390_v52 = vmul.f32 %v2134_v59, %v1622_v49  ;;  %v6154_v31 = vmul.f32 %v3132_v45, %v6018_v28  ;;  %4924 = vtanh.f32 %v2388_v12 }
 0x143   :  { %3859 = vmatpush2.msra.mxu0 %v3696_v17  ;;  %1058 = vmatprep.mubr.f32.mxu0 %v9989_v0  ;;  %v6139_v17 = vpop.f32.mrf.mxu0  ;;  %v3134_v22 = vadd.f32 1.0, %v4907_v53  ;;  %v4909_v62 = vpop.eup %4908  ;;  %v2383_v19 = vmul.f32 %v2127_v50, %v1615_v55  ;;  %v6168_v28 = vadd.f32 %v6052_v11, %v5940_v56  ;;  %v6179_v53 = vmul.f32 0.5, %v6041_v1 }
 0x144   :  { %1315 = vmatprep.mubr.f32.mxu1 %v9989_v0  ;;  %4084 = vmatpush2.msra.mxu1 %v3728_v58  ;;  %v1374_v21 = vmul.f32 %v6114_v38, %v6114_v38  ;;  %v3726_v58 = vld [vmem:[#allocation8 + $0x190] sm:$0xff]  ;;  %v4911_v26 = vpop.eup %4910  ;;  %v2140_v59 = vadd.f32 1.0, %v1884_v32  ;;  %4926 = vtanh.f32 %v2390_v52  ;;  %v2133_v11 = vadd.f32 1.0, %v1877_v30  ;;  %v6193_v12 = vpop.f32.mrf.mxu1  ;;  %v3692_v32 = vld [vmem:[#allocation8 + $0x80] sm:$0xff] }
 0x145   :  { %3860 = vmatprep.subr.mxu0 %v9989_v0  ;;  %4085 = vmatprep.subr.mxu1 %v9989_v0  ;;  %10126 = vst [vmem:[#allocation20_spill] sm:$0xff] %v6168_v28  ;;  %v6170_v20 = vpop.f32.mrf.mxu0  ;;  %v1879_v45 = vmul.f32 0.044715, %v1367_v61  ;;  %v3140_v1 = vadd.f32 1.0, %v4909_v62  ;;  %v3142_v42 = vadd.f32 1.0, %v4911_v26  ;;  %4928 = vtanh.f32 %v2381_v5  ;;  %v3724_v30 = vld [vmem:[#allocation8 + $0x180] sm:$0xff] }
 0x146   :  { %1059 = vmatmul.mubr.f32.gmra.mxu0 %v5756_v39  ;;  %1316 = vmatmul.mubr.f32.gmra.mxu1 %v5756_v39  ;;  %v3694_v39 = vld [vmem:[#allocation8 + $0x90] sm:$0xff]  ;;  %v1628_v50 = vmul.f32 0.7978846, %v6092_v29  ;;  %4930 = vtanh.f32 %v2383_v19  ;;  %v1382_v52 = vmul.f32 %v6183_v44, %v6183_v44  ;;  %v1630_v26 = vmul.f32 0.7978846, %v6114_v38 }
 0x147   :  { %3861 = vmatpush2.msra.mxu0 %v3695_v15  ;;  %1064 = vmatprep.mubr.f32.mxu0 %v9989_v0  ;;  %v6161_v15 = vadd.f32 %v6062_v14, %v5898_v25  ;;  %v6173_v14 = vpop.eup %4912  ;;  %v6201_v55 = vpop.f32.mrf.mxu0  ;;  %v2135_v5 = vadd.f32 1.0, %v1879_v45  ;;  %v5416_v45 = vld [vmem:[#allocation2 + $0xf8] sm:$0xff] }
 0x148   :  { %1321 = vmatprep.mubr.f32.mxu1 %v9989_v0  ;;  %4086 = vmatpush2.msra.mxu1 %v3727_v23  ;;  %v6176_v23 = vmul.f32 %v3134_v22, %v6046_v4  ;;  %v3725_v4 = vld [vmem:[#allocation8 + $0x188] sm:$0xff]  ;;  %v6196_v49 = vpop.eup %4914  ;;  %v1375_v22 = vmul.f32 %v6168_v28, %v6168_v28 }
 0x149   :  { %3862 = vmatprep.subr.mxu0 %v9989_v0  ;;  %4087 = vmatprep.subr.mxu1 %v9989_v0  ;;  %v1380_v7 = vmul.f32 %v6161_v15, %v6161_v15  ;;  %v6209_v61 = vpop.eup %4916  ;;  %v6283_v35 = vmul.f32 0.5, %v6161_v15 }
 0x14a   :  { %1065 = vmatmul.mubr.f32.gmra.mxu0 %v5762_v40  ;;  %1322 = vmatmul.mubr.f32.gmra.mxu1 %v5762_v40  ;;  %v1886_v40 = vmul.f32 0.044715, %v1374_v21  ;;  %v1621_v21 = vmul.f32 0.7978846, %v6099_v60  ;;  %v4919_v19 = vpop.eup %4918 }
 0x14b   :  { %3863 = vmatpush2.msra.mxu0 %v3694_v39  ;;  %1070 = vmatprep.mubr.f32.mxu0 %v9989_v0 }
 0x14c   :  { %1327 = vmatprep.mubr.f32.mxu1 %v9989_v0  ;;  %4088 = vmatpush2.msra.mxu1 %v3726_v58  ;;  %v2142_v39 = vadd.f32 1.0, %v1886_v40  ;;  %v2396_v58 = vmul.f32 %v2140_v59, %v1628_v50  ;;  %v2389_v62 = vmul.f32 %v2133_v11, %v1621_v21  ;;  %v1885_v40 = vmul.f32 0.044715, %v1373_v37  ;;  %v6224_v11 = vpop.f32.mrf.mxu1 }
 0x14d   :  { %3864 = vmatprep.subr.mxu0 %v9989_v0  ;;  %4089 = vmatprep.subr.mxu1 %v9989_v0  ;;  %v6218_v59 = vmul.f32 %v3142_v42, %v6069_v18  ;;  %v6222_v50 = vadd.f32 %v6086_v36, %v5931_v54  ;;  %v6227_v37 = vmul.f32 0.5, %v6092_v29  ;;  %v6231_v18 = vadd.f32 %v6106_v6, %v5940_v56 }
 0x14e   :  { %1071 = vmatmul.mubr.f32.gmra.mxu0 %v5768_v41  ;;  %1328 = vmatmul.mubr.f32.gmra.mxu1 %v5768_v41  ;;  %v1623_v41 = vmul.f32 0.7978846, %v6128_v33  ;;  %v2398_v21 = vmul.f32 %v2142_v39, %v1630_v26  ;;  %4932 = vtanh.f32 %v2396_v58  ;;  %v6237_v36 = vmul.f32 0.5, %v6114_v38 }
 0x14f   :  { %3865 = vmatpush2.msra.mxu0 %v3693_v34  ;;  %1076 = vmatprep.mubr.f32.mxu0 %v9989_v0  ;;  %v6215_v34 = vmul.f32 %v3140_v1, %v6066_v16  ;;  %10127 = vst [vmem:[#allocation21_spill] sm:$0xff] %v6222_v50  ;;  %v1887_v16 = vmul.f32 0.044715, %v1375_v22  ;;  %10128 = vst [vmem:[#allocation22_spill] sm:$0xff] %v6231_v18  ;;  %v6233_v1 = vpop.f32.mrf.mxu0  ;;  %v1894_v42 = vmul.f32 0.044715, %v1382_v52  ;;  %4934 = vtanh.f32 %v2389_v62 }
 0x150   :  { %1333 = vmatprep.mubr.f32.mxu1 %v9989_v0  ;;  %4090 = vmatpush2.msra.mxu1 %v3725_v4  ;;  %v1892_v4 = vmul.f32 0.044715, %v1380_v7  ;;  %v6241_v29 = vadd.f32 %v6116_v51, %v5898_v25  ;;  %v2391_v6 = vmul.f32 %v2135_v5, %v1623_v41  ;;  %v2141_v39 = vadd.f32 1.0, %v1885_v40  ;;  %v6253_v51 = vpop.f32.mrf.mxu1 }
 0x151   :  { %3866 = vmatprep.subr.mxu0 %v9989_v0  ;;  %4091 = vmatprep.subr.mxu1 %v9989_v0  ;;  %v6248_v22 = vadd.f32 %v6133_v2, %v5904_v48  ;;  %v1629_v38 = vmul.f32 0.7978846, %v6149_v63  ;;  %v1381_v52 = vmul.f32 %v6222_v50, %v6222_v50  ;;  %4936 = vtanh.f32 %v2398_v21  ;;  %v6257_v62 = vpop.f32.mrf.mxu0 }
 0x152   :  { %1077 = vmatmul.mubr.f32.gmra.mxu0 %v5774_v43  ;;  %1334 = vmatmul.mubr.f32.gmra.mxu1 %v5416_v45  ;;  %v4921_v43 = vpop.eup %4920  ;;  %v2148_v58 = vadd.f32 1.0, %v1892_v4  ;;  %v2143_v26 = vadd.f32 1.0, %v1887_v16  ;;  %v1383_v41 = vmul.f32 %v6231_v18, %v6231_v18  ;;  %v1636_v2 = vmul.f32 0.7978846, %v6161_v15  ;;  %v6273_v33 = vpop.f32.mrf.mxu1 }
 0x153   :  { %3867 = vmatpush2.msra.mxu0 %v3692_v32  ;;  %4092 = vmatpush2.msra.mxu1 %v3724_v30  ;;  %v6244_v7 = vpop.eup %4922  ;;  %v3148_v32 = vadd.f32 1.0, %v4919_v19  ;;  %v3150_v30 = vadd.f32 1.0, %v4921_v43  ;;  %v2150_v40 = vadd.f32 1.0, %v1894_v42  ;;  %v1388_v19 = vmul.f32 %v6241_v29, %v6241_v29 }
 0x154   :  { %4254 = vmatprep.subr.mxu0 %v9989_v0  ;;  %4479 = vmatprep.subr.mxu1 %v9989_v0  ;;  %v4925_v5 = vpop.eup %4924  ;;  %v6264_v4 = vadd.f32 %v6139_v17, %v5931_v54  ;;  %4938 = vtanh.f32 %v2391_v6  ;;  %v2397_v45 = vmul.f32 %v2141_v39, %v1629_v38  ;;  %v1631_v43 = vmul.f32 0.7978846, %v6168_v28  ;;  %v6278_v28 = vpop.f32.mrf.mxu0 }
 0x155   :  { %v1390_v21 = vmul.f32 %v6248_v22, %v6248_v22  ;;  %v4927_v16 = vpop.eup %4926  ;;  %v6270_v0 = vmul.f32 %v3148_v32, %v6104_v24  ;;  %v2404_v10 = vmul.f32 %v2148_v58, %v1636_v2  ;;  %v1638_v42 = vmul.f32 0.7978846, %v6183_v44 }
 0x156   :  { %10129 = vst [vmem:[#allocation23_spill] sm:$0xff] %v6264_v4  ;;  %v1893_v63 = vmul.f32 0.044715, %v1381_v52  ;;  %v6276_v17 = vmul.f32 %v3150_v30, %v6110_v3  ;;  %v3156_v6 = vadd.f32 1.0, %v4925_v5  ;;  %v2399_v39 = vmul.f32 %v2143_v26, %v1631_v43  ;;  %v6280_v60 = vpop.eup %4928  ;;  %v6298_v5 = vpop.f32.mrf.mxu1 }
 0x157   :  { %10130 = vst [vmem:[#allocation24_spill] sm:$0xff] %v6270_v0  ;;  %v1895_v38 = vmul.f32 0.044715, %v1383_v41  ;;  %v2406_v24 = vmul.f32 %v2150_v40, %v1638_v42  ;;  %v1900_v32 = vmul.f32 0.044715, %v1388_v19  ;;  %v1389_v58 = vmul.f32 %v6264_v4, %v6264_v4  ;;  %v6287_v52 = vpop.eup %4930 }
 0x158   :  { %10131 = vst [vmem:[#allocation25_spill] sm:$0xff] %v6276_v17  ;;  %10132 = vst [vmem:[#allocation26_spill] sm:$0xff] %v6287_v52  ;;  %v3158_v2 = vadd.f32 1.0, %v4927_v16  ;;  %4940 = vtanh.f32 %v2397_v45  ;;  %v1902_v3 = vmul.f32 0.044715, %v1390_v21  ;;  %v421_v30 = vadd.f32 %v6170_v20, %v5898_v25 }
 0x159   :  { %4942 = vtanh.f32 %v2404_v10  ;;  %v6292_v26 = vmul.f32 0.5, %v6183_v44  ;;  %v2149_v41 = vadd.f32 1.0, %v1893_v63  ;;  %v6296_v15 = vadd.f32 %v6193_v12, %v5904_v48  ;;  %v6307_v10 = vpop.f32.mrf.mxu0 }
 0x15a   :  { %v6301_v40 = vmul.f32 %v3156_v6, %v6157_v13  ;;  %4944 = vtanh.f32 %v2399_v39  ;;  %v2151_v19 = vadd.f32 1.0, %v1895_v38  ;;  %v6305_v45 = vadd.f32 %v6163_v27, %v5940_v56 }
 0x15b   :  { %4946 = vtanh.f32 %v2406_v24  ;;  %v1637_v63 = vmul.f32 0.7978846, %v6222_v50  ;;  %v2156_v20 = vadd.f32 1.0, %v1900_v32  ;;  %v1901_v44 = vmul.f32 0.044715, %v1389_v58  ;;  %v4933_v12 = vpop.eup %4932  ;;  %v6322_v24 = vpop.f32.mrf.mxu1 }
 0x15c   :  { %10133 = vst [vmem:[#allocation27_spill] sm:$0xff] %v6301_v40  ;;  %10134 = vst [vmem:[#allocation28_spill] sm:$0xff] %v6305_v45  ;;  %v6311_v43 = vmul.f32 %v3158_v2, %v6179_v53  ;;  %v1639_v13 = vmul.f32 0.7978846, %v6231_v18  ;;  %v2158_v21 = vadd.f32 1.0, %v1902_v3  ;;  %v1396_v16 = vmul.f32 %v421_v30, %v421_v30  ;;  %v6314_v42 = vpop.eup %4934  ;;  %v6331_v3 = vpop.f32.mrf.mxu0 }
 0x15d   :  { %10136 = vst [vmem:[#allocation30_spill] sm:$0xff] %v6314_v42  ;;  %v2405_v6 = vmul.f32 %v2149_v41, %v1637_v63  ;;  %v1644_v27 = vmul.f32 0.7978846, %v6241_v29  ;;  %v6318_v39 = vmul.f32 0.5, %v6241_v29  ;;  %v1398_v38 = vmul.f32 %v6296_v15, %v6296_v15 }
 0x15e   :  { %10135 = vst [vmem:[#allocation29_spill] sm:$0xff] %v6311_v43  ;;  %v2407_v32 = vmul.f32 %v2151_v19, %v1639_v13  ;;  %v1646_v53 = vmul.f32 0.7978846, %v6248_v22  ;;  %v1391_v58 = vmul.f32 %v6305_v45, %v6305_v45  ;;  %v6329_v2 = vadd.f32 %v6233_v1, %v5898_v25  ;;  %v4937_v41 = vpop.eup %4936 }
 0x15f   :  { %v3164_v29 = vadd.f32 1.0, %v4933_v12  ;;  %v2412_v63 = vmul.f32 %v2156_v20, %v1644_v27  ;;  %v2157_v18 = vadd.f32 1.0, %v1901_v44  ;;  %v6335_v50 = vadd.f32 %v6201_v55, %v5931_v54  ;;  %v6351_v55 = vpop.f32.mrf.mxu1 }
 0x160   :  { %v2414_v19 = vmul.f32 %v2158_v21, %v1646_v53  ;;  %v6338_v13 = vmul.f32 0.5, %v6248_v22  ;;  %v1908_v43 = vmul.f32 0.044715, %v1396_v16  ;;  %v6342_v40 = vadd.f32 %v6224_v11, %v5940_v56  ;;  %v6355_v11 = vpop.f32.mrf.mxu0 }
 0x161   :  { %10137 = vst [vmem:[#allocation31_spill] sm:$0xff] %v6335_v50  ;;  %v6344_v1 = vpop.eup %4938  ;;  %4948 = vtanh.f32 %v2405_v6  ;;  %v1645_v12 = vmul.f32 0.7978846, %v6264_v4  ;;  %v1910_v20 = vmul.f32 0.044715, %v1398_v38  ;;  %v6349_v44 = vadd.f32 %v6253_v51, %v5904_v48 }
 0x162   :  { %10138 = vst [vmem:[#allocation32_spill] sm:$0xff] %v6342_v40  ;;  %10139 = vst [vmem:[#allocation33_spill] sm:$0xff] %v6344_v1  ;;  %v3166_v21 = vadd.f32 1.0, %v4937_v41  ;;  %4950 = vtanh.f32 %v2407_v32  ;;  %v1903_v22 = vmul.f32 0.044715, %v1391_v58  ;;  %v1404_v16 = vmul.f32 %v6329_v2, %v6329_v2 }
 0x163   :  { %v6358_v27 = vmul.f32 %v3164_v29, %v6227_v37  ;;  %4952 = vtanh.f32 %v2412_v63  ;;  %v2413_v6 = vmul.f32 %v2157_v18, %v1645_v12  ;;  %v1397_v38 = vmul.f32 %v6335_v50, %v6335_v50  ;;  %v6371_v18 = vpop.f32.mrf.mxu1 }
 0x164   :  { %4954 = vtanh.f32 %v2414_v19  ;;  %v1647_v51 = vmul.f32 0.7978846, %v6305_v45  ;;  %v2164_v53 = vadd.f32 1.0, %v1908_v43  ;;  %v1399_v32 = vmul.f32 %v6342_v40, %v6342_v40  ;;  %v6380_v45 = vpop.f32.mrf.mxu0 }
 0x165   :  { %10140 = vst [vmem:[#allocation34_spill] sm:$0xff] %v6358_v27  ;;  %v6365_v58 = vpop.eup %4940  ;;  %v1652_v41 = vmul.f32 0.7978846, %v421_v30  ;;  %v6367_v4 = vmul.f32 0.5, %v421_v30  ;;  %v2166_v1 = vadd.f32 1.0, %v1910_v20  ;;  %v1406_v37 = vmul.f32 %v6349_v44, %v6349_v44  ;;  %v6400_v42 = vpop.f32.mrf.mxu1 }
 0x166   :  { %10141 = vst [vmem:[#allocation35_spill] sm:$0xff] %v6365_v58  ;;  %v4943_v29 = vpop.eup %4942  ;;  %v6374_v63 = vmul.f32 %v3166_v21, %v6237_v36  ;;  %v2159_v19 = vadd.f32 1.0, %v1903_v22  ;;  %v1916_v43 = vmul.f32 0.044715, %v1404_v16  ;;  %v6378_v12 = vadd.f32 %v6278_v28, %v5898_v25 }
 0x167   :  { %v6382_v30 = vpop.eup %4944  ;;  %4956 = vtanh.f32 %v2413_v6  ;;  %v1654_v20 = vmul.f32 0.7978846, %v6296_v15  ;;  %v1909_v27 = vmul.f32 0.044715, %v1397_v38  ;;  %v6387_v58 = vadd.f32 %v6298_v5, %v5904_v48 }
 0x168   :  { %10142 = vst [vmem:[#allocation36_spill] sm:$0xff] %v6374_v63  ;;  %10143 = vst [vmem:[#allocation37_spill] sm:$0xff] %v6382_v30  ;;  %v4947_v36 = vpop.eup %4946  ;;  %v2420_v21 = vmul.f32 %v2164_v53, %v1652_v41  ;;  %v6390_v22 = vmul.f32 0.5, %v6296_v15  ;;  %v1911_v16 = vmul.f32 0.044715, %v1399_v32  ;;  %v6394_v28 = vadd.f32 %v6257_v62, %v5931_v54  ;;  %v6405_v32 = vpop.f32.mrf.mxu0 }
 0x169   :  { %v3172_v63 = vadd.f32 1.0, %v4943_v29  ;;  %v2422_v30 = vmul.f32 %v2166_v1, %v1654_v20  ;;  %v1918_v6 = vmul.f32 0.044715, %v1406_v37  ;;  %v6398_v38 = vadd.f32 %v6273_v33, %v5940_v56  ;;  %v6418_v20 = vpop.f32.mrf.mxu1 }
 0x16a   :  { %10144 = vst [vmem:[#allocation38_spill] sm:$0xff] %v6394_v28  ;;  %v2415_v5 = vmul.f32 %v2159_v19, %v1647_v51  ;;  %v1653_v53 = vmul.f32 0.7978846, %v6335_v50  ;;  %v2172_v41 = vadd.f32 1.0, %v1916_v43  ;;  %v1412_v15 = vmul.f32 %v6378_v12, %v6378_v12 }
 0x16b   :  { %10145 = vst [vmem:[#allocation39_spill] sm:$0xff] %v6398_v38  ;;  %v3174_v62 = vadd.f32 1.0, %v4947_v36  ;;  %v2165_v17 = vadd.f32 1.0, %v1909_v27  ;;  %v1655_v1 = vmul.f32 0.7978846, %v6342_v40  ;;  %v1414_v37 = vmul.f32 %v6387_v58, %v6387_v58 }
 0x16c   :  { %4958 = vtanh.f32 %v2420_v21  ;;  %v2167_v33 = vadd.f32 1.0, %v1911_v16  ;;  %v1660_v29 = vmul.f32 0.7978846, %v6329_v2  ;;  %v1405_v51 = vmul.f32 %v6394_v28, %v6394_v28 }
 0x16d   :  { %v6414_v19 = vmul.f32 %v3172_v63, %v6283_v35  ;;  %4960 = vtanh.f32 %v2422_v30  ;;  %v2174_v43 = vadd.f32 1.0, %v1918_v6  ;;  %v1407_v27 = vmul.f32 %v6398_v38, %v6398_v38  ;;  %v6430_v35 = vpop.f32.mrf.mxu0 }
 0x16e   :  { %v6420_v36 = vpop.eup %4948  ;;  %v2428_v40 = vmul.f32 %v2172_v41, %v1660_v29  ;;  %v1924_v21 = vmul.f32 0.044715, %v1412_v15  ;;  %v6424_v16 = vadd.f32 %v6307_v10, %v5931_v54  ;;  %v6428_v50 = vadd.f32 %v6331_v3, %v5898_v25 }
 0x16f   :  { %10146 = vst [vmem:[#allocation40_spill] sm:$0xff] %v6414_v19  ;;  %10147 = vst [vmem:[#allocation41_spill] sm:$0xff] %v6420_v36  ;;  %v6432_v63 = vpop.eup %4950  ;;  %4962 = vtanh.f32 %v2415_v5  ;;  %v2421_v30 = vmul.f32 %v2165_v17, %v1653_v53  ;;  %v1662_v6 = vmul.f32 0.7978846, %v6349_v44  ;;  %v1926_v19 = vmul.f32 0.044715, %v1414_v37  ;;  %v6448_v5 = vpop.f32.mrf.mxu1 }
 0x170   :  { %10148 = vst [vmem:[#allocation42_spill] sm:$0xff] %v6424_v16  ;;  %10149 = vst [vmem:[#allocation43_spill] sm:$0xff] %v6432_v63  ;;  %v4953_v36 = vpop.eup %4952  ;;  %v6436_v41 = vmul.f32 %v3174_v62, %v6292_v26  ;;  %v2423_v15 = vmul.f32 %v2167_v33, %v1655_v1  ;;  %v6439_v10 = vmul.f32 0.5, %v6329_v2  ;;  %v1917_v29 = vmul.f32 0.044715, %v1405_v51  ;;  %v6454_v62 = vpop.f32.mrf.mxu0 }
 0x171   :  { %v4955_v3 = vpop.eup %4954  ;;  %v2430_v0 = vmul.f32 %v2174_v43, %v1662_v6  ;;  %v6442_v52 = vmul.f32 0.5, %v6349_v44  ;;  %v1919_v63 = vmul.f32 0.044715, %v1407_v27  ;;  %v6446_v17 = vadd.f32 %v6351_v55, %v5904_v48  ;;  %v6467_v6 = vpop.f32.mrf.mxu1 }
 0x172   :  { %10150 = vst [vmem:[#allocation44_spill] sm:$0xff] %v6436_v41  ;;  %4964 = vtanh.f32 %v2428_v40  ;;  %v2180_v26 = vadd.f32 1.0, %v1924_v21  ;;  %v1413_v53 = vmul.f32 %v6424_v16, %v6424_v16  ;;  %v1420_v2 = vmul.f32 %v6428_v50, %v6428_v50  ;;  %v6469_v41 = vpop.f32.mrf.mxu0 }
 0x173   :  { %4966 = vtanh.f32 %v2421_v30  ;;  %v1661_v44 = vmul.f32 0.7978846, %v6394_v28  ;;  %v2182_v1 = vadd.f32 1.0, %v1926_v19  ;;  %v6459_v55 = vadd.f32 %v6322_v24, %v5940_v56 }
 0x174   :  { %v6461_v37 = vpop.eup %4956  ;;  %v3180_v40 = vadd.f32 1.0, %v4953_v36  ;;  %v3182_v33 = vadd.f32 1.0, %v4955_v3  ;;  %v2173_v51 = vadd.f32 1.0, %v1917_v29  ;;  %v1668_v43 = vmul.f32 0.7978846, %v6378_v12 }
 0x175   :  { %10151 = vst [vmem:[#allocation45_spill] sm:$0xff] %v6459_v55  ;;  %10152 = vst [vmem:[#allocation46_spill] sm:$0xff] %v6461_v37  ;;  %4968 = vtanh.f32 %v2430_v0  ;;  %v2175_v27 = vadd.f32 1.0, %v1919_v63  ;;  %v1670_v21 = vmul.f32 0.7978846, %v6387_v58  ;;  %v1422_v30 = vmul.f32 %v6446_v17, %v6446_v17 }
 0x176   :  { %4970 = vtanh.f32 %v2423_v15  ;;  %v2436_v19 = vmul.f32 %v2180_v26, %v1668_v43  ;;  %v1925_v24 = vmul.f32 0.044715, %v1413_v53  ;;  %v1932_v28 = vmul.f32 0.044715, %v1420_v2 }
 0x177   :  { %v1663_v36 = vmul.f32 0.7978846, %v6398_v38  ;;  %v2438_v29 = vmul.f32 %v2182_v1, %v1670_v21  ;;  %v1415_v0 = vmul.f32 %v6459_v55, %v6459_v55  ;;  %v6476_v63 = vadd.f32 %v6355_v11, %v5931_v54 }
 0x178   :  { %v6479_v3 = vmul.f32 %v3180_v40, %v6318_v39  ;;  %v6482_v15 = vmul.f32 %v3182_v33, %v6338_v13  ;;  %v2429_v26 = vmul.f32 %v2173_v51, %v1661_v44  ;;  %v6486_v53 = vadd.f32 %v6371_v18, %v5940_v56  ;;  %v6495_v39 = vpop.f32.mrf.mxu1  ;;  %v6500_v33 = vpop.f32.mrf.mxu0 }
 0x179   :  { %10153 = vst [vmem:[#allocation47_spill] sm:$0xff] %v6476_v63  ;;  %v4959_v2 = vpop.eup %4958  ;;  %v2431_v1 = vmul.f32 %v2175_v27, %v1663_v36  ;;  %v6489_v43 = vmul.f32 0.5, %v6378_v12  ;;  %v1934_v21 = vmul.f32 0.044715, %v1422_v30  ;;  %v6493_v11 = vadd.f32 %v6380_v45, %v5898_v25 }
 0x17a   :  { %10154 = vst [vmem:[#allocation48_spill] sm:$0xff] %v6479_v3  ;;  %10155 = vst [vmem:[#allocation49_spill] sm:$0xff] %v6482_v15  ;;  %v4961_v40 = vpop.eup %4960  ;;  %4972 = vtanh.f32 %v2436_v19  ;;  %v6498_v13 = vmul.f32 0.5, %v6387_v58  ;;  %v2181_v44 = vadd.f32 1.0, %v1925_v24  ;;  %v2188_v18 = vadd.f32 1.0, %v1932_v28 }
 0x17b   :  { %10156 = vst [vmem:[#allocation50_spill] sm:$0xff] %v6486_v53  ;;  %4974 = vtanh.f32 %v2438_v29  ;;  %v1927_v51 = vmul.f32 0.044715, %v1415_v0  ;;  %v1421_v12 = vmul.f32 %v6476_v63, %v6476_v63  ;;  %v6506_v45 = vadd.f32 %v6400_v42, %v5904_v48  ;;  %v6516_v0 = vpop.f32.mrf.mxu1 }
 0x17c   :  { %v6508_v27 = vpop.eup %4962  ;;  %v3188_v30 = vadd.f32 1.0, %v4959_v2  ;;  %v1669_v19 = vmul.f32 0.7978846, %v6424_v16  ;;  %v1676_v58 = vmul.f32 0.7978846, %v6428_v50  ;;  %v1423_v28 = vmul.f32 %v6486_v53, %v6486_v53  ;;  %v6522_v16 = vpop.f32.mrf.mxu0 }
 0x17d   :  { %10157 = vst [vmem:[#allocation51_spill] sm:$0xff] %v6508_v27  ;;  %v3190_v24 = vadd.f32 1.0, %v4961_v40  ;;  %4976 = vtanh.f32 %v2429_v26  ;;  %v2190_v36 = vadd.f32 1.0, %v1934_v21  ;;  %v1428_v29 = vmul.f32 %v6493_v11, %v6493_v11  ;;  %v6543_v37 = vpop.f32.mrf.mxu1 }
 0x17e   :  { %4978 = vtanh.f32 %v2431_v1  ;;  %v2437_v42 = vmul.f32 %v2181_v44, %v1669_v19  ;;  %v2444_v38 = vmul.f32 %v2188_v18, %v1676_v58  ;;  %v6520_v2 = vadd.f32 %v6405_v32, %v5931_v54 }
 0x17f   :  { %v4965_v15 = vpop.eup %4964  ;;  %v2183_v3 = vadd.f32 1.0, %v1927_v51  ;;  %v1678_v40 = vmul.f32 0.7978846, %v6446_v17  ;;  %v1933_v26 = vmul.f32 0.044715, %v1421_v12  ;;  %v1430_v21 = vmul.f32 %v6506_v45, %v6506_v45 }
 0x180   :  { %10158 = vst [vmem:[#allocation52_spill] sm:$0xff] %v6520_v2  ;;  %v6527_v27 = vpop.eup %4966  ;;  %v6530_v1 = vmul.f32 %v3188_v30, %v6367_v4  ;;  %v1671_v44 = vmul.f32 0.7978846, %v6459_v55  ;;  %v1935_v18 = vmul.f32 0.044715, %v1423_v28  ;;  %v6535_v32 = vadd.f32 %v6418_v20, %v5940_v56  ;;  %v6550_v28 = vpop.f32.mrf.mxu0 }
 0x181   :  { %10159 = vst [vmem:[#allocation53_spill] sm:$0xff] %v6527_v27  ;;  %v6538_v51 = vmul.f32 %v3190_v24, %v6390_v22  ;;  %v6541_v12 = vmul.f32 0.5, %v6428_v50  ;;  %v2446_v19 = vmul.f32 %v2190_v36, %v1678_v40  ;;  %v1940_v58 = vmul.f32 0.044715, %v1428_v29 }
 0x182   :  { %10160 = vst [vmem:[#allocation54_spill] sm:$0xff] %v6530_v1  ;;  %10161 = vst [vmem:[#allocation55_spill] sm:$0xff] %v6535_v32  ;;  %v4969_v27 = vpop.eup %4968  ;;  %v3196_v4 = vadd.f32 1.0, %v4965_v15  ;;  %4980 = vtanh.f32 %v2444_v38  ;;  %v6546_v30 = vmul.f32 0.5, %v6446_v17  ;;  %v1429_v20 = vmul.f32 %v6520_v2, %v6520_v2 }
 0x183   :  { %10162 = vst [vmem:[#allocation56_spill] sm:$0xff] %v6538_v51  ;;  %v6552_v22 = vpop.eup %4970  ;;  %4982 = vtanh.f32 %v2437_v42  ;;  %v2439_v50 = vmul.f32 %v2183_v3, %v1671_v44  ;;  %v2189_v24 = vadd.f32 1.0, %v1933_v26  ;;  %v1942_v36 = vmul.f32 0.044715, %v1430_v21  ;;  %v6563_v42 = vpop.f32.mrf.mxu1 }
 0x184   :  { %v1677_v29 = vmul.f32 0.7978846, %v6476_v63  ;;  %v2191_v40 = vadd.f32 1.0, %v1935_v18  ;;  %v1431_v38 = vmul.f32 %v6535_v32, %v6535_v32  ;;  %v451_v17 = vadd.f32 %v6430_v35, %v5898_v25  ;;  %v6573_v35 = vpop.f32.mrf.mxu0 }
 0x185   :  { %v3198_v15 = vadd.f32 1.0, %v4969_v27  ;;  %4984 = vtanh.f32 %v2446_v19  ;;  %v2196_v55 = vadd.f32 1.0, %v1940_v58  ;;  %v6561_v51 = vadd.f32 %v6448_v5, %v5904_v48 }
 0x186   :  { %v6566_v3 = vmul.f32 %v3196_v4, %v6439_v10  ;;  %v1679_v26 = vmul.f32 0.7978846, %v6486_v53  ;;  %v1941_v21 = vmul.f32 0.044715, %v1429_v20  ;;  %v6571_v44 = vadd.f32 %v6454_v62, %v5931_v54 }
 0x187   :  { %v4973_v27 = vpop.eup %4972  ;;  %4986 = vtanh.f32 %v2439_v50  ;;  %v2445_v18 = vmul.f32 %v2189_v24, %v1677_v29  ;;  %v1684_v5 = vmul.f32 0.7978846, %v6493_v11  ;;  %v2198_v19 = vadd.f32 1.0, %v1942_v36  ;;  %v6585_v24 = vpop.f32.mrf.mxu1 }
 0x188   :  { %10163 = vst [vmem:[#allocation57_spill] sm:$0xff] %v6566_v3  ;;  %10164 = vst [vmem:[#allocation58_spill] sm:$0xff] %v6571_v44  ;;  %v4975_v58 = vpop.eup %4974  ;;  %v2447_v63 = vmul.f32 %v2191_v40, %v1679_v26  ;;  %v6577_v10 = vmul.f32 0.5, %v6493_v11  ;;  %v1943_v4 = vmul.f32 0.044715, %v1431_v38  ;;  %v1436_v53 = vmul.f32 %v451_v17, %v451_v17 }
 0x189   :  { %v6580_v20 = vmul.f32 %v3198_v15, %v6442_v52  ;;  %v2452_v62 = vmul.f32 %v2196_v55, %v1684_v5  ;;  %v1686_v3 = vmul.f32 0.7978846, %v6506_v45  ;;  %v1438_v50 = vmul.f32 %v6561_v51, %v6561_v51  ;;  %v6595_v52 = vpop.f32.mrf.mxu0 }
 0x18a   :  { %v6587_v29 = vpop.eup %4976  ;;  %v3204_v36 = vadd.f32 1.0, %v4973_v27  ;;  %v2197_v40 = vadd.f32 1.0, %v1941_v21  ;;  %v1437_v11 = vmul.f32 %v6571_v44, %v6571_v44  ;;  %v6593_v38 = vadd.f32 %v6467_v6, %v5940_v56 }
 0x18b   :  { %10165 = vst [vmem:[#allocation59_spill] sm:$0xff] %v6580_v20  ;;  %10166 = vst [vmem:[#allocation60_spill] sm:$0xff] %v6587_v29  ;;  %v6597_v55 = vpop.eup %4978  ;;  %v3206_v15 = vadd.f32 1.0, %v4975_v58  ;;  %4988 = vtanh.f32 %v2445_v18  ;;  %v2454_v26 = vmul.f32 %v2198_v19, %v1686_v3  ;;  %v6600_v5 = vmul.f32 0.5, %v6506_v45  ;;  %v6615_v19 = vpop.f32.mrf.mxu0 }
 0x18c   :  { %10167 = vst [vmem:[#allocation61_spill] sm:$0xff] %v6593_v38  ;;  %10168 = vst [vmem:[#allocation62_spill] sm:$0xff] %v6597_v55  ;;  %4990 = vtanh.f32 %v2447_v63  ;;  %v1685_v21 = vmul.f32 0.7978846, %v6520_v2  ;;  %v2199_v27 = vadd.f32 1.0, %v1943_v4  ;;  %v6606_v1 = vadd.f32 %v6469_v41, %v5898_v25  ;;  %v6608_v55 = vpop.f32.mrf.mxu1 }
 0x18d   :  { %v1948_v20 = vmul.f32 0.044715, %v1436_v53  ;;  %4992 = vtanh.f32 %v2452_v62  ;;  %v1687_v29 = vmul.f32 0.7978846, %v6535_v32  ;;  %v1950_v6 = vmul.f32 0.044715, %v1438_v50 }
 0x18e   :  { %v6611_v3 = vmul.f32 %v3204_v36, %v6489_v43  ;;  %v2453_v45 = vmul.f32 %v2197_v40, %v1685_v21  ;;  %v1949_v18 = vmul.f32 0.044715, %v1437_v11  ;;  %v1439_v63 = vmul.f32 %v6593_v38, %v6593_v38 }
 0x18f   :  { %v4981_v53 = vpop.eup %4980  ;;  %v6618_v58 = vmul.f32 %v3206_v15, %v6498_v13  ;;  %4994 = vtanh.f32 %v2454_v26  ;;  %v1692_v4 = vmul.f32 0.7978846, %v451_v17  ;;  %v6622_v41 = vadd.f32 %v6495_v39, %v5904_v48  ;;  %v6633_v26 = vpop.f32.mrf.mxu1 }
 0x190   :  { %10169 = vst [vmem:[#allocation63_spill] sm:$0xff] %v6611_v3  ;;  %v6624_v62 = vpop.eup %4982  ;;  %v2455_v43 = vmul.f32 %v2199_v27, %v1687_v29  ;;  %v2204_v50 = vadd.f32 1.0, %v1948_v20  ;;  %v6626_v36 = vmul.f32 0.5, %v451_v17  ;;  %v1694_v40 = vmul.f32 0.7978846, %v6561_v51  ;;  %v6635_v20 = vpop.f32.mrf.mxu0 }
 0x191   :  { %10170 = vst [vmem:[#allocation64_spill] sm:$0xff] %v6618_v58  ;;  %v2206_v11 = vadd.f32 1.0, %v1950_v6  ;;  %v1444_v21 = vmul.f32 %v6606_v1, %v6606_v1  ;;  %v2621_v13 = vmul.f32 0.5, %v5955_v47  ;;  %v3133_v15 = vadd.f32 1.0, %v6173_v14 }
 0x192   :  { %v4985_v39 = vpop.eup %4984  ;;  %v3212_v32 = vadd.f32 1.0, %v4981_v53  ;;  %4996 = vtanh.f32 %v2453_v45  ;;  %v2205_v2 = vadd.f32 1.0, %v1949_v18  ;;  %v1951_v29 = vmul.f32 0.044715, %v1439_v63  ;;  %v3755_v63 = vld [vmem:[#allocation8 + $0x278] sm:$0xff] }
 0x193   :  { %v1446_v17 = vmul.f32 %v6622_v41, %v6622_v41  ;;  %v3389_v27 = vmul.f32 %v3133_v15, %v2621_v13  ;;  %v2623_v6 = vmul.f32 0.5, %v5964_v57  ;;  %v3135_v58 = vadd.f32 1.0, %v6196_v49  ;;  %v6652_v49 = vpop.f32.mrf.mxu1 }
 0x194   :  { %v6641_v47 = vpop.eup %4986  ;;  %v2460_v14 = vmul.f32 %v2204_v50, %v1692_v4  ;;  %v1693_v3 = vmul.f32 0.7978846, %v6571_v44  ;;  %v6646_v45 = vadd.f32 %v6500_v33, %v5931_v54  ;;  %v6650_v18 = vadd.f32 %v6522_v16, %v5898_v25  ;;  %v3787_v16 = vld [vmem:[#allocation8 + $0x378] sm:$0xff]  ;;  %v6662_v44 = vpop.f32.mrf.mxu0 }
 0x195   :  { %v3214_v53 = vadd.f32 1.0, %v4985_v39  ;;  %v2462_v13 = vmul.f32 %v2206_v11, %v1694_v40  ;;  %v1956_v15 = vmul.f32 0.044715, %v1444_v21  ;;  %3868 = vmatprep.mubr.f32.mxu0 %v3389_v27  ;;  %v3391_v57 = vmul.f32 %v3135_v58, %v2623_v6  ;;  %v3754_v40 = vld [vmem:[#allocation8 + $0x270] sm:$0xff]  ;;  %v6686_v27 = vpop.f32.mrf.mxu1 }
 0x196   :  { %10171 = vst [vmem:[#allocation65_spill] sm:$0xff] %v6646_v45  ;;  %4998 = vtanh.f32 %v2455_v43  ;;  %v6655_v4 = vmul.f32 0.5, %v6561_v51  ;;  %v2461_v50 = vmul.f32 %v2205_v2, %v1693_v3  ;;  %v6659_v33 = vadd.f32 %v6543_v37, %v5904_v48  ;;  %3869 = vmatmul.mubr.f32.vlgmr.msra.gmra.mxu0 %v6154_v31  ;;  %v3753_v3 = vld [vmem:[#allocation8 + $0x268] sm:$0xff] }
 0x197   :  { %v6665_v11 = vmul.f32 %v3212_v32, %v6541_v12  ;;  %v1695_v58 = vmul.f32 0.7978846, %v6593_v38  ;;  %v2207_v43 = vadd.f32 1.0, %v1951_v29  ;;  %v1958_v21 = vmul.f32 0.044715, %v1446_v17  ;;  %4093 = vmatprep.mubr.f32.mxu1 %v3391_v57  ;;  %4255 = vmatpush1.msra.mxu0 %v3755_v63  ;;  %v3786_v12 = vld [vmem:[#allocation8 + $0x370] sm:$0xff]  ;;  %v6697_v63 = vpop.f32.mrf.mxu0 }
 0x198   :  { %v6668_v2 = vpop.eup %4988  ;;  %5000 = vtanh.f32 %v2460_v14  ;;  %v1700_v37 = vmul.f32 0.7978846, %v6606_v1  ;;  %v6673_v31 = vadd.f32 %v6516_v0, %v5940_v56  ;;  %v1452_v51 = vmul.f32 %v6650_v18, %v6650_v18  ;;  %4094 = vmatmul.mubr.f32.vlgmr.msra.gmra.mxu1 %v6176_v23 }
 0x199   :  { %10172 = vst [vmem:[#allocation66_spill] sm:$0xff] %v6665_v11  ;;  %10173 = vst [vmem:[#allocation67_spill] sm:$0xff] %v6668_v2  ;;  %v10175_v32 = vmov 0.0   ;;  %v6679_v39 = vpop.eup %4990  ;;  %v6682_v29 = vmul.f32 %v3214_v53, %v6546_v30  ;;  %5002 = vtanh.f32 %v2462_v13  ;;  %v2212_v17 = vadd.f32 1.0, %v1956_v15  ;;  %4480 = vmatpush1.msra.mxu1 %v3787_v16  ;;  %v3785_v53 = vld [vmem:[#allocation8 + $0x368] sm:$0xff]  ;;  %v3752_v13 = vld [vmem:[#allocation8 + $0x260] sm:$0xff]  ;;  %v6713_v11 = vpop.f32.mrf.mxu1 }
 0x19a   :  { %10174 = vst [vmem:[#allocation68_spill] sm:$0xff] %v6673_v31  ;;  %4256 = vmatprep.subr.mxu0 %v10175_v32  ;;  %10176 = vst [vmem:[#allocation69_spill] sm:$0xff] %v6679_v39  ;;  %v1445_v0 = vmul.f32 %v6646_v45, %v6646_v45  ;;  %v4993_v6 = vpop.eup %4992  ;;  %5004 = vtanh.f32 %v2461_v50  ;;  %v6689_v23 = vmul.f32 0.5, %v6606_v1  ;;  %v1454_v14 = vmul.f32 %v6659_v33, %v6659_v33  ;;  %v6721_v2 = vpop.f32.mrf.mxu0 }
 0x19b   :  { %10177 = vst [vmem:[#allocation70_spill] sm:$0xff] %v6682_v29  ;;  %4257 = vmatpush1.msra.mxu0 %v3754_v40  ;;  %v6695_v30 = vadd.f32 %v6573_v35, %v5898_v25  ;;  %4481 = vmatprep.subr.mxu1 %v10175_v32  ;;  %v2463_v15 = vmul.f32 %v2207_v43, %v1695_v58  ;;  %v1702_v57 = vmul.f32 0.7978846, %v6622_v41  ;;  %v2214_v1 = vadd.f32 1.0, %v1958_v21  ;;  %v3784_v58 = vld [vmem:[#allocation8 + $0x360] sm:$0xff]  ;;  %v3751_v43 = vld [vmem:[#allocation8 + $0x258] sm:$0xff] }
 0x19c   :  { %4258 = vmatprep.subr.mxu0 %v10175_v32  ;;  %v6703_v50 = vmul.f32 0.5, %v6622_v41  ;;  %4482 = vmatpush1.msra.mxu1 %v3786_v12  ;;  %v4995_v16 = vpop.eup %4994  ;;  %v1447_v35 = vmul.f32 %v6673_v31, %v6673_v31  ;;  %v1964_v40 = vmul.f32 0.044715, %v1452_v51  ;;  %v2629_v38 = vmul.f32 0.5, %v5983_v9 }
 0x19d   :  { %4259 = vmatpush1.msra.mxu0 %v3753_v3  ;;  %v3141_v29 = vadd.f32 1.0, %v6209_v61  ;;  %4483 = vmatprep.subr.mxu1 %v10175_v32  ;;  %v2468_v21 = vmul.f32 %v2212_v17, %v1700_v37  ;;  %v1957_v41 = vmul.f32 0.044715, %v1445_v0  ;;  %v2631_v12 = vmul.f32 0.5, %v6009_v46 }
 0x19e   :  { %4260 = vmatprep.subr.mxu0 %v10175_v32  ;;  %v3143_v3 = vadd.f32 1.0, %v6244_v7  ;;  %4484 = vmatpush1.msra.mxu1 %v3785_v53  ;;  %v1966_v51 = vmul.f32 0.044715, %v1454_v14  ;;  %v6717_v9 = vadd.f32 %v6550_v28, %v5931_v54  ;;  %v1460_v61 = vmul.f32 %v6695_v30, %v6695_v30  ;;  %v3750_v53 = vld [vmem:[#allocation8 + $0x250] sm:$0xff] }
 0x19f   :  { %4261 = vmatpush1.msra.mxu0 %v3752_v13  ;;  %v3397_v39 = vmul.f32 %v3141_v29, %v2629_v38  ;;  %4485 = vmatprep.subr.mxu1 %v10175_v32  ;;  %v6725_v46 = vpop.eup %4996  ;;  %v3220_v7 = vadd.f32 1.0, %v4993_v6  ;;  %v3222_v37 = vadd.f32 1.0, %v4995_v16  ;;  %v2470_v17 = vmul.f32 %v2214_v1, %v1702_v57  ;;  %v3783_v29 = vld [vmem:[#allocation8 + $0x358] sm:$0xff] }
 0x1a0   :  { %10178 = vst [vmem:[#allocation71_spill] sm:$0xff] %v6717_v9  ;;  %4262 = vmatprep.subr.mxu0 %v10175_v32  ;;  %v3399_v0 = vmul.f32 %v3143_v3, %v2631_v12  ;;  %4486 = vmatpush1.msra.mxu1 %v3784_v58  ;;  %5006 = vtanh.f32 %v2463_v15  ;;  %v1959_v28 = vmul.f32 0.044715, %v1447_v35  ;;  %v2220_v14 = vadd.f32 1.0, %v1964_v40  ;;  %v6738_v15 = vpop.f32.mrf.mxu1  ;;  %v6744_v40 = vpop.f32.mrf.mxu0 }
 0x1a1   :  { %4263 = vmatpush1.msra.mxu0 %v3751_v43  ;;  %v6729_v38 = vadd.f32 %v6563_v42, %v5940_v56  ;;  %3873 = vmatprep.mubr.f32.mxu0 %v3397_v39  ;;  %5008 = vtanh.f32 %v2468_v21  ;;  %v1701_v6 = vmul.f32 0.7978846, %v6646_v45  ;;  %v2213_v13 = vadd.f32 1.0, %v1957_v41  ;;  %v3782_v42 = vld [vmem:[#allocation8 + $0x350] sm:$0xff]  ;;  %v3747_v45 = vld [vmem:[#allocation8 + $0x238] sm:$0xff] }
 0x1a2   :  { %4487 = vmatprep.subr.mxu1 %v10175_v32  ;;  %v6735_v57 = vadd.f32 %v6585_v24, %v5904_v48  ;;  %4098 = vmatprep.mubr.f32.mxu1 %v3399_v0  ;;  %v1708_v39 = vmul.f32 0.7978846, %v6650_v18  ;;  %v2222_v1 = vadd.f32 1.0, %v1966_v51  ;;  %v1453_v16 = vmul.f32 %v6717_v9, %v6717_v9  ;;  %v3749_v24 = vld [vmem:[#allocation8 + $0x248] sm:$0xff]  ;;  %v3748_v51 = vld [vmem:[#allocation8 + $0x240] sm:$0xff]  ;;  %v6765_v0 = vpop.f32.mrf.mxu1 }
 0x1a3   :  { %10179 = vst [vmem:[#allocation72_spill] sm:$0xff] %v6729_v38  ;;  %3874 = vmatmul.mubr.f32.gmra.mxu0 %v6215_v34  ;;  %v1972_v35 = vmul.f32 0.044715, %v1460_v61  ;;  %4099 = vmatmul.mubr.f32.gmra.mxu1 %v6218_v59  ;;  %v6747_v58 = vpop.eup %4998  ;;  %v6750_v34 = vmul.f32 %v3220_v7, %v6577_v10  ;;  %v6753_v43 = vmul.f32 %v3222_v37, %v6600_v5  ;;  %5010 = vtanh.f32 %v2470_v17  ;;  %v3781_v10 = vld [vmem:[#allocation8 + $0x348] sm:$0xff] }
 0x1a4   :  { %4264 = vmatprep.subr.mxu0 %v10175_v32  ;;  %10180 = vst [vmem:[#allocation73_spill] sm:$0xff] %v6747_v58  ;;  %v1703_v21 = vmul.f32 0.7978846, %v6673_v31  ;;  %4488 = vmatpush1.msra.mxu1 %v3783_v29  ;;  %v2215_v41 = vadd.f32 1.0, %v1959_v28  ;;  %v2476_v59 = vmul.f32 %v2220_v14, %v1708_v39  ;;  %v1710_v12 = vmul.f32 0.7978846, %v6659_v33  ;;  %v6770_v31 = vpop.f32.mrf.mxu0 }
 0x1a5   :  { %10181 = vst [vmem:[#allocation74_spill] sm:$0xff] %v6750_v34  ;;  %10182 = vst [vmem:[#allocation75_spill] sm:$0xff] %v6753_v43  ;;  %4265 = vmatpush1.msra.mxu0 %v3750_v53  ;;  %v1455_v3 = vmul.f32 %v6729_v38, %v6729_v38  ;;  %4489 = vmatprep.subr.mxu1 %v10175_v32  ;;  %v5001_v5 = vpop.eup %5000  ;;  %v2469_v61 = vmul.f32 %v2213_v13, %v1701_v6  ;;  %v2637_v37 = vmul.f32 0.5, %v6050_v8  ;;  %v3780_v8 = vld [vmem:[#allocation8 + $0x340] sm:$0xff] }
 0x1a6   :  { %4266 = vmatprep.subr.mxu0 %v10175_v32  ;;  %v1462_v7 = vmul.f32 %v6735_v57, %v6735_v57  ;;  %v3149_v17 = vadd.f32 1.0, %v6280_v60  ;;  %4490 = vmatpush1.msra.mxu1 %v3782_v42  ;;  %v5003_v28 = vpop.eup %5002  ;;  %v6768_v14 = vmul.f32 0.5, %v6650_v18  ;;  %v2478_v29 = vmul.f32 %v2222_v1, %v1710_v12  ;;  %v10185_v42 = vld [vmem:[#allocation16_spill] sm:$0xff]  ;;  %v10232_v58 = vld [vmem:[#allocation51_spill] sm:$0xff] }
 0x1a7   :  { %4267 = vmatpush1.msra.mxu0 %v3749_v24  ;;  %v1965_v53 = vmul.f32 0.044715, %v1453_v16  ;;  %v2228_v39 = vadd.f32 1.0, %v1972_v35  ;;  %4491 = vmatprep.subr.mxu1 %v10175_v32  ;;  %v6774_v6 = vpop.eup %5004  ;;  %v6778_v60 = vadd.f32 %v6595_v52, %v5931_v54  ;;  %v2639_v18 = vmul.f32 0.5, %v10185_v42  ;;  %v10186_v24 = vld [vmem:[#allocation26_spill] sm:$0xff]  ;;  %v10189_v42 = vld [vmem:[#allocation25_spill] sm:$0xff] }
 0x1a8   :  { %4268 = vmatprep.subr.mxu0 %v10175_v32  ;;  %10183 = vst [vmem:[#allocation76_spill] sm:$0xff] %v6774_v6  ;;  %v3405_v13 = vmul.f32 %v3149_v17, %v2637_v37  ;;  %v3151_v1 = vadd.f32 1.0, %v10186_v24  ;;  %4492 = vmatpush1.msra.mxu1 %v3781_v10  ;;  %v2471_v16 = vmul.f32 %v2215_v41, %v1703_v21  ;;  %5012 = vtanh.f32 %v2476_v59  ;;  %v6793_v41 = vpop.f32.mrf.mxu1 }
 0x1a9   :  { %10184 = vst [vmem:[#allocation77_spill] sm:$0xff] %v6778_v60  ;;  %4269 = vmatpush1.msra.mxu0 %v3748_v51  ;;  %v1967_v35 = vmul.f32 0.044715, %v1455_v3  ;;  %v1716_v12 = vmul.f32 0.7978846, %v6695_v30  ;;  %4493 = vmatprep.subr.mxu1 %v10175_v32  ;;  %v6787_v52 = vadd.f32 %v6608_v55, %v5940_v56  ;;  %v6791_v37 = vadd.f32 %v6615_v19, %v5898_v25  ;;  %v10188_v51 = vld [vmem:[#allocation24_spill] sm:$0xff]  ;;  %v6800_v55 = vpop.f32.mrf.mxu0 }
 0x1aa   :  { %4270 = vmatprep.subr.mxu0 %v10175_v32  ;;  %v1974_v6 = vmul.f32 0.044715, %v1462_v7  ;;  %3878 = vmatprep.mubr.f32.mxu0 %v3405_v13  ;;  %v3407_v21 = vmul.f32 %v3151_v1, %v2639_v18  ;;  %v3228_v59 = vadd.f32 1.0, %v5001_v5  ;;  %5014 = vtanh.f32 %v2478_v29  ;;  %v3779_v19 = vld [vmem:[#allocation8 + $0x338] sm:$0xff]  ;;  %v3746_v7 = vld [vmem:[#allocation8 + $0x230] sm:$0xff] }
 0x1ab   :  { %10187 = vst [vmem:[#allocation16_spill] sm:$0xff] %v6787_v52  ;;  %4494 = vmatpush1.msra.mxu1 %v3780_v8  ;;  %v2221_v3 = vadd.f32 1.0, %v1965_v53  ;;  %v6797_v10 = vadd.f32 %v6633_v26, %v5904_v48  ;;  %3879 = vmatmul.mubr.f32.gmra.mxu0 %v10188_v51  ;;  %v6804_v17 = vmul.f32 0.5, %v6659_v33  ;;  %v1709_v8 = vmul.f32 0.7978846, %v6717_v9  ;;  %v3778_v18 = vld [vmem:[#allocation8 + $0x330] sm:$0xff] }
 0x1ac   :  { %4495 = vmatprep.subr.mxu1 %v10175_v32  ;;  %v2484_v5 = vmul.f32 %v2228_v39, %v1716_v12  ;;  %v1461_v29 = vmul.f32 %v6778_v60, %v6778_v60  ;;  %4103 = vmatprep.mubr.f32.mxu1 %v3407_v21  ;;  %v3230_v26 = vadd.f32 1.0, %v5003_v28  ;;  %5016 = vtanh.f32 %v2469_v61  ;;  %v3745_v33 = vld [vmem:[#allocation8 + $0x228] sm:$0xff]  ;;  %v6818_v61 = vpop.f32.mrf.mxu1 }
 0x1ad   :  { %4271 = vmatpush1.msra.mxu0 %v3747_v45  ;;  %v1711_v53 = vmul.f32 0.7978846, %v6729_v38  ;;  %v2223_v13 = vadd.f32 1.0, %v1967_v35  ;;  %4104 = vmatmul.mubr.f32.gmra.mxu1 %v10189_v42  ;;  %v6812_v24 = vpop.eup %5006  ;;  %5018 = vtanh.f32 %v2471_v16  ;;  %v2230_v39 = vadd.f32 1.0, %v1974_v6  ;;  %v6826_v16 = vpop.f32.mrf.mxu0  ;;  %v3777_v51 = vld [vmem:[#allocation8 + $0x328] sm:$0xff]  ;;  %v3744_v42 = vld [vmem:[#allocation8 + $0x220] sm:$0xff] }
 0x1ae   :  { %4272 = vmatprep.subr.mxu0 %v10175_v32  ;;  %10190 = vst [vmem:[#allocation26_spill] sm:$0xff] %v6812_v24  ;;  %v1463_v1 = vmul.f32 %v6787_v52, %v6787_v52  ;;  %v1468_v45 = vmul.f32 %v6791_v37, %v6791_v37  ;;  %4496 = vmatpush1.msra.mxu1 %v3779_v19  ;;  %v5009_v28 = vpop.eup %5008  ;;  %v1718_v21 = vmul.f32 0.7978846, %v6735_v57  ;;  %5020 = vtanh.f32 %v2484_v5 }
 0x1af   :  { %4273 = vmatpush1.msra.mxu0 %v3746_v7  ;;  %v6821_v35 = vmul.f32 %v3228_v59, %v6626_v36  ;;  %v2477_v12 = vmul.f32 %v2221_v3, %v1709_v8  ;;  %v1470_v6 = vmul.f32 %v6797_v10, %v6797_v10  ;;  %4497 = vmatprep.subr.mxu1 %v10175_v32  ;;  %v1973_v19 = vmul.f32 0.044715, %v1461_v29  ;;  %v10192_v7 = vld [vmem:[#allocation17_spill] sm:$0xff]  ;;  %v10193_v36 = vld [vmem:[#allocation30_spill] sm:$0xff] }
 0x1b0   :  { %4274 = vmatprep.subr.mxu0 %v10175_v32  ;;  %v2645_v38 = vmul.f32 0.5, %v10192_v7  ;;  %v3157_v59 = vadd.f32 1.0, %v10193_v36  ;;  %4498 = vmatpush1.msra.mxu1 %v3778_v18  ;;  %v5011_v3 = vpop.eup %5010  ;;  %v6833_v8 = vmul.f32 %v3230_v26, %v6655_v4  ;;  %v2479_v9 = vmul.f32 %v2223_v13, %v1711_v53  ;;  %v3776_v4 = vld [vmem:[#allocation8 + $0x320] sm:$0xff]  ;;  %v10196_v36 = vld [vmem:[#allocation33_spill] sm:$0xff] }
 0x1b1   :  { %10191 = vst [vmem:[#allocation24_spill] sm:$0xff] %v6821_v35  ;;  %4275 = vmatpush1.msra.mxu0 %v3745_v33  ;;  %v6836_v35 = vmul.f32 0.5, %v6695_v30  ;;  %v6839_v24 = vmul.f32 0.5, %v6735_v57  ;;  %4499 = vmatprep.subr.mxu1 %v10175_v32  ;;  %v2486_v5 = vmul.f32 %v2230_v39, %v1718_v21  ;;  %v1975_v29 = vmul.f32 0.044715, %v1463_v1  ;;  %v6843_v33 = vpop.f32.mrf.mxu1  ;;  %v10195_v30 = vld [vmem:[#allocation18_spill] sm:$0xff] }
 0x1b2   :  { %10194 = vst [vmem:[#allocation25_spill] sm:$0xff] %v6833_v8  ;;  %4276 = vmatprep.subr.mxu0 %v10175_v32  ;;  %v1980_v7 = vmul.f32 0.044715, %v1468_v45  ;;  %v3413_v18 = vmul.f32 %v3157_v59, %v2645_v38  ;;  %4500 = vmatpush1.msra.mxu1 %v3777_v51  ;;  %v3236_v26 = vadd.f32 1.0, %v5009_v28  ;;  %v1982_v53 = vmul.f32 0.044715, %v1470_v6  ;;  %v6847_v8 = vpop.f32.mrf.mxu0 }
 0x1b3   :  { %4277 = vmatpush1.msra.mxu0 %v3744_v42  ;;  %v2647_v13 = vmul.f32 0.5, %v10195_v30  ;;  %v3159_v57 = vadd.f32 1.0, %v10196_v36  ;;  %4501 = vmatprep.subr.mxu1 %v10175_v32  ;;  %v3743_v39 = vld [vmem:[#allocation8 + $0x218] sm:$0xff]  ;;  %5022 = vtanh.f32 %v2477_v12  ;;  %v2229_v38 = vadd.f32 1.0, %v1973_v19  ;;  %v10198_v12 = vld [vmem:[#allocation27_spill] sm:$0xff] }
 0x1b4   :  { %4278 = vmatprep.subr.mxu0 %v10175_v32  ;;  %v6853_v1 = vadd.f32 %v6635_v20, %v5931_v54  ;;  %v6857_v45 = vadd.f32 %v6662_v44, %v5898_v25  ;;  %3883 = vmatprep.mubr.f32.mxu0 %v3413_v18  ;;  %v3775_v28 = vld [vmem:[#allocation8 + $0x318] sm:$0xff]  ;;  %v3238_v21 = vadd.f32 1.0, %v5011_v3  ;;  %v1717_v6 = vmul.f32 0.7978846, %v6778_v60  ;;  %v6869_v18 = vpop.f32.mrf.mxu1  ;;  %v3742_v3 = vld [vmem:[#allocation8 + $0x210] sm:$0xff]  ;;  %v10206_v60 = vld [vmem:[#allocation35_spill] sm:$0xff] }
 0x1b5   :  { %v6862_v51 = vadd.f32 %v6686_v27, %v5904_v48  ;;  %v3415_v42 = vmul.f32 %v3159_v57, %v2647_v13  ;;  %3884 = vmatmul.mubr.f32.gmra.mxu0 %v10198_v12  ;;  %4502 = vmatpush1.msra.mxu1 %v3776_v4  ;;  %v5013_v19 = vpop.eup %5012  ;;  %5024 = vtanh.f32 %v2486_v5  ;;  %v2231_v20 = vadd.f32 1.0, %v1975_v29  ;;  %v6876_v5 = vpop.f32.mrf.mxu0  ;;  %v3774_v29 = vld [vmem:[#allocation8 + $0x310] sm:$0xff] }
 0x1b6   :  { %10197 = vst [vmem:[#allocation17_spill] sm:$0xff] %v6853_v1  ;;  %v2236_v59 = vadd.f32 1.0, %v1980_v7  ;;  %v6867_v44 = vadd.f32 %v6652_v49, %v5940_v56  ;;  %4279 = vmatpush1.msra.mxu0 %v3743_v39  ;;  %4503 = vmatprep.subr.mxu1 %v10175_v32  ;;  %v6873_v27 = vmul.f32 %v3236_v26, %v6689_v23  ;;  %5026 = vtanh.f32 %v2479_v9  ;;  %v10201_v26 = vld [vmem:[#allocation29_spill] sm:$0xff] }
 0x1b7   :  { %v1719_v4 = vmul.f32 0.7978846, %v6787_v52  ;;  %v2238_v30 = vadd.f32 1.0, %v1982_v53  ;;  %4108 = vmatprep.mubr.f32.mxu1 %v3415_v42  ;;  %4504 = vmatpush1.msra.mxu1 %v3775_v28  ;;  %v5015_v49 = vpop.eup %5014  ;;  %v2485_v7 = vmul.f32 %v2229_v38, %v1717_v6  ;;  %v1724_v13 = vmul.f32 0.7978846, %v6791_v37 }
 0x1b8   :  { %10199 = vst [vmem:[#allocation30_spill] sm:$0xff] %v6867_v44  ;;  %10200 = vst [vmem:[#allocation18_spill] sm:$0xff] %v6873_v27  ;;  %v1469_v36 = vmul.f32 %v6853_v1, %v6853_v1  ;;  %v1476_v23 = vmul.f32 %v6857_v45, %v6857_v45  ;;  %4109 = vmatmul.mubr.f32.gmra.mxu1 %v10201_v26  ;;  %4280 = vmatprep.subr.mxu0 %v10175_v32  ;;  %v6889_v53 = vmul.f32 0.5, %v6791_v37  ;;  %v6906_v27 = vpop.f32.mrf.mxu0 }
 0x1b9   :  { %v6886_v9 = vmul.f32 %v3238_v21, %v6703_v50  ;;  %v1726_v57 = vmul.f32 0.7978846, %v6797_v10  ;;  %v1478_v39 = vmul.f32 %v6862_v51, %v6862_v51  ;;  %4281 = vmatpush1.msra.mxu0 %v3742_v3  ;;  %4505 = vmatprep.subr.mxu1 %v10175_v32  ;;  %v6895_v38 = vpop.eup %5016  ;;  %v3244_v28 = vadd.f32 1.0, %v5013_v19  ;;  %v6899_v21 = vpop.f32.mrf.mxu1  ;;  %v10205_v3 = vld [vmem:[#allocation19_spill] sm:$0xff] }
 0x1ba   :  { %10203 = vst [vmem:[#allocation27_spill] sm:$0xff] %v6895_v38  ;;  %v2487_v6 = vmul.f32 %v2231_v20, %v1719_v4  ;;  %v2492_v42 = vmul.f32 %v2236_v59, %v1724_v13  ;;  %v1471_v50 = vmul.f32 %v6867_v44, %v6867_v44  ;;  %4506 = vmatpush1.msra.mxu1 %v3774_v29  ;;  %v6902_v37 = vpop.eup %5018  ;;  %v3246_v12 = vadd.f32 1.0, %v5015_v49  ;;  %v10207_v49 = vld [vmem:[#allocation20_spill] sm:$0xff] }
 0x1bb   :  { %10202 = vst [vmem:[#allocation33_spill] sm:$0xff] %v6886_v9  ;;  %4282 = vmatprep.subr.mxu0 %v10175_v32  ;;  %10204 = vst [vmem:[#allocation29_spill] sm:$0xff] %v6902_v37  ;;  %v2494_v26 = vmul.f32 %v2238_v30, %v1726_v57  ;;  %v2653_v52 = vmul.f32 0.5, %v10205_v3  ;;  %v3165_v9 = vadd.f32 1.0, %v10206_v60  ;;  %4507 = vmatprep.subr.mxu1 %v10175_v32  ;;  %5028 = vtanh.f32 %v2485_v7  ;;  %v5021_v4 = vpop.eup %5020  ;;  %v10208_v57 = vld [vmem:[#allocation37_spill] sm:$0xff] }
 0x1bc   :  { %v1981_v19 = vmul.f32 0.044715, %v1469_v36  ;;  %v1988_v20 = vmul.f32 0.044715, %v1476_v23  ;;  %v6911_v59 = vadd.f32 %v6721_v2, %v5898_v25  ;;  %v1990_v29 = vmul.f32 0.044715, %v1478_v39  ;;  %v6922_v36 = vpop.f32.mrf.mxu1 }
 0x1bd   :  { %v3421_v13 = vmul.f32 %v3165_v9, %v2653_v52  ;;  %v2655_v30 = vmul.f32 0.5, %v10207_v49  ;;  %v3167_v3 = vadd.f32 1.0, %v10208_v57  ;;  %5030 = vtanh.f32 %v2492_v42  ;;  %v6931_v9 = vpop.f32.mrf.mxu0  ;;  %v3773_v39 = vld [vmem:[#allocation8 + $0x308] sm:$0xff] }
 0x1be   :  { %v6916_v60 = vmul.f32 0.5, %v6797_v10  ;;  %v1983_v37 = vmul.f32 0.044715, %v1471_v50  ;;  %v6920_v7 = vadd.f32 %v6697_v63, %v5931_v54  ;;  %v6925_v2 = vmul.f32 %v3244_v28, %v6768_v14  ;;  %v3741_v10 = vld [vmem:[#allocation8 + $0x208] sm:$0xff]  ;;  %v10212_v28 = vld [vmem:[#allocation34_spill] sm:$0xff]  ;;  %4508 = vmatpush1.msra.mxu1 %v3773_v39 }
 0x1bf   :  { %5032 = vtanh.f32 %v2494_v26  ;;  %v6929_v52 = vadd.f32 %v6738_v15, %v5904_v48  ;;  %3888 = vmatprep.mubr.f32.mxu0 %v3421_v13  ;;  %v3423_v23 = vmul.f32 %v3167_v3, %v2655_v30  ;;  %v3252_v42 = vadd.f32 1.0, %v5021_v4  ;;  %4283 = vmatpush1.msra.mxu0 %v3741_v10  ;;  %v10215_v57 = vld [vmem:[#allocation36_spill] sm:$0xff]  ;;  %v6950_v3 = vpop.f32.mrf.mxu1 }
 0x1c0   :  { %10209 = vst [vmem:[#allocation19_spill] sm:$0xff] %v6920_v7  ;;  %10210 = vst [vmem:[#allocation35_spill] sm:$0xff] %v6925_v2  ;;  %v2244_v50 = vadd.f32 1.0, %v1988_v20  ;;  %v6935_v63 = vadd.f32 %v6713_v11, %v5940_v56  ;;  %v1484_v14 = vmul.f32 %v6911_v59, %v6911_v59  ;;  %3889 = vmatmul.mubr.f32.gmra.mxu0 %v10212_v28  ;;  %v6940_v15 = vpop.eup %5022  ;;  %5034 = vtanh.f32 %v2487_v6  ;;  %v10219_v2 = vld [vmem:[#allocation41_spill] sm:$0xff] }
 0x1c1   :  { %10213 = vst [vmem:[#allocation37_spill] sm:$0xff] %v6940_v15  ;;  %v6943_v26 = vmul.f32 %v3246_v12, %v6804_v17  ;;  %v2237_v13 = vadd.f32 1.0, %v1981_v19  ;;  %v2246_v49 = vadd.f32 1.0, %v1990_v29  ;;  %4113 = vmatprep.mubr.f32.mxu1 %v3423_v23  ;;  %v1725_v20 = vmul.f32 0.7978846, %v6853_v1  ;;  %4284 = vmatprep.subr.mxu0 %v10175_v32  ;;  %v6960_v29 = vpop.f32.mrf.mxu0  ;;  %v10218_v1 = vld [vmem:[#allocation21_spill] sm:$0xff] }
 0x1c2   :  { %10211 = vst [vmem:[#allocation20_spill] sm:$0xff] %v6935_v63  ;;  %v2239_v11 = vadd.f32 1.0, %v1983_v37  ;;  %v1732_v4 = vmul.f32 0.7978846, %v6857_v45  ;;  %v1477_v30 = vmul.f32 %v6920_v7, %v6920_v7  ;;  %4114 = vmatmul.mubr.f32.gmra.mxu1 %v10215_v57  ;;  %v5025_v17 = vpop.eup %5024  ;;  %v1727_v6 = vmul.f32 0.7978846, %v6867_v44  ;;  %4509 = vmatprep.subr.mxu1 %v10175_v32 }
 0x1c3   :  { %10214 = vst [vmem:[#allocation34_spill] sm:$0xff] %v6943_v26  ;;  %v6955_v12 = vmul.f32 0.5, %v6857_v45  ;;  %v1734_v19 = vmul.f32 0.7978846, %v6862_v51  ;;  %v1486_v37 = vmul.f32 %v6929_v52, %v6929_v52  ;;  %v6963_v23 = vpop.eup %5026  ;;  %v6966_v10 = vmul.f32 %v3252_v42, %v6836_v35  ;;  %v6976_v35 = vpop.f32.mrf.mxu1 }
 0x1c4   :  { %10216 = vst [vmem:[#allocation36_spill] sm:$0xff] %v6963_v23  ;;  %v2500_v39 = vmul.f32 %v2244_v50, %v1732_v4  ;;  %v1479_v28 = vmul.f32 %v6935_v63, %v6935_v63  ;;  %v1996_v45 = vmul.f32 0.044715, %v1484_v14  ;;  %v2493_v57 = vmul.f32 %v2237_v13, %v1725_v20  ;;  %v10220_v4 = vld [vmem:[#allocation22_spill] sm:$0xff]  ;;  %v10221_v14 = vld [vmem:[#allocation43_spill] sm:$0xff] }
 0x1c5   :  { %10217 = vst [vmem:[#allocation78_spill] sm:$0xff] %v6966_v10  ;;  %v2502_v44 = vmul.f32 %v2246_v49, %v1734_v19  ;;  %v2661_v26 = vmul.f32 0.5, %v10218_v1  ;;  %v3173_v15 = vadd.f32 1.0, %v10219_v2  ;;  %v3254_v38 = vadd.f32 1.0, %v5025_v17  ;;  %v6980_v49 = vpop.f32.mrf.mxu0  ;;  %v3772_v17 = vld [vmem:[#allocation8 + $0x300] sm:$0xff] }
 0x1c6   :  { %v2495_v43 = vmul.f32 %v2239_v11, %v1727_v6  ;;  %v1989_v34 = vmul.f32 0.044715, %v1477_v30  ;;  %v6974_v23 = vadd.f32 %v6770_v31, %v5898_v25  ;;  %v1998_v42 = vmul.f32 0.044715, %v1486_v37  ;;  %v3740_v30 = vld [vmem:[#allocation8 + $0x200] sm:$0xff]  ;;  %v10225_v37 = vld [vmem:[#allocation40_spill] sm:$0xff]  ;;  %4510 = vmatpush1.msra.mxu1 %v3772_v17 }
 0x1c7   :  { %v3429_v50 = vmul.f32 %v3173_v15, %v2661_v26  ;;  %v2663_v10 = vmul.f32 0.5, %v10220_v4  ;;  %v3175_v13 = vadd.f32 1.0, %v10221_v14  ;;  %5036 = vtanh.f32 %v2500_v39  ;;  %4285 = vmatpush1.msra.mxu0 %v3740_v30  ;;  %v10227_v14 = vld [vmem:[#allocation44_spill] sm:$0xff]  ;;  %4511 = vmatprep.subr.mxu1 %v10175_v32 }
 0x1c8   :  { %v1991_v1 = vmul.f32 0.044715, %v1479_v28  ;;  %v2252_v2 = vadd.f32 1.0, %v1996_v45  ;;  %v6984_v20 = vadd.f32 %v6793_v41, %v5904_v48  ;;  %v6986_v11 = vpop.eup %5028  ;;  %v6989_v31 = vmul.f32 0.5, %v6862_v51  ;;  %v7009_v28 = vpop.f32.mrf.mxu0  ;;  %4286 = vmatprep.subr.mxu0 %v10175_v32 }
 0x1c9   :  { %10222 = vst [vmem:[#allocation21_spill] sm:$0xff] %v6986_v11  ;;  %5038 = vtanh.f32 %v2502_v44  ;;  %v6993_v15 = vadd.f32 %v6744_v40, %v5931_v54  ;;  %3893 = vmatprep.mubr.f32.mxu0 %v3429_v50  ;;  %v3431_v26 = vmul.f32 %v3175_v13, %v2663_v10  ;;  %v2245_v6 = vadd.f32 1.0, %v1989_v34  ;;  %v7003_v44 = vpop.f32.mrf.mxu1 }
 0x1ca   :  { %v1740_v19 = vmul.f32 0.7978846, %v6911_v59  ;;  %v6998_v41 = vadd.f32 %v6765_v0, %v5940_v56  ;;  %v1492_v51 = vmul.f32 %v6974_v23, %v6974_v23  ;;  %3894 = vmatmul.mubr.f32.gmra.mxu0 %v10225_v37  ;;  %v5031_v40 = vpop.eup %5030  ;;  %v7006_v10 = vmul.f32 %v3254_v38, %v6839_v24 }
 0x1cb   :  { %10223 = vst [vmem:[#allocation41_spill] sm:$0xff] %v6993_v15  ;;  %5040 = vtanh.f32 %v2493_v57  ;;  %v1733_v34 = vmul.f32 0.7978846, %v6920_v7  ;;  %v2254_v39 = vadd.f32 1.0, %v1998_v42  ;;  %4118 = vmatprep.mubr.f32.mxu1 %v3431_v26  ;;  %v2247_v45 = vadd.f32 1.0, %v1991_v1  ;;  %v7027_v30 = vpop.f32.mrf.mxu1  ;;  %v7031_v7 = vpop.f32.mrf.mxu0 }
 0x1cc   :  { %10224 = vst [vmem:[#allocation22_spill] sm:$0xff] %v6998_v41  ;;  %10226 = vst [vmem:[#allocation43_spill] sm:$0xff] %v7006_v10  ;;  %v5033_v0 = vpop.eup %5032  ;;  %5042 = vtanh.f32 %v2495_v43  ;;  %v2508_v50 = vmul.f32 %v2252_v2, %v1740_v19  ;;  %v1494_v4 = vmul.f32 %v6984_v20, %v6984_v20  ;;  %4119 = vmatmul.mubr.f32.gmra.mxu1 %v10227_v14  ;;  %v1735_v24 = vmul.f32 0.7978846, %v6935_v63  ;;  %v10229_v19 = vld [vmem:[#allocation23_spill] sm:$0xff]  ;;  %v10230_v14 = vld [vmem:[#allocation46_spill] sm:$0xff] }
 0x1cd   :  { %v7017_v38 = vmul.f32 0.5, %v6911_v59  ;;  %v1742_v57 = vmul.f32 0.7978846, %v6929_v52  ;;  %v1485_v42 = vmul.f32 %v6993_v15, %v6993_v15  ;;  %v7023_v43 = vpop.eup %5034  ;;  %v3260_v13 = vadd.f32 1.0, %v5031_v40 }
 0x1ce   :  { %10228 = vst [vmem:[#allocation40_spill] sm:$0xff] %v7023_v43  ;;  %v2501_v1 = vmul.f32 %v2245_v6, %v1733_v34  ;;  %v1487_v2 = vmul.f32 %v6998_v41, %v6998_v41  ;;  %v2004_v26 = vmul.f32 0.044715, %v1492_v51  ;;  %v3262_v17 = vadd.f32 1.0, %v5033_v0  ;;  %v10231_v51 = vld [vmem:[#allocation28_spill] sm:$0xff] }
 0x1cf   :  { %v2510_v59 = vmul.f32 %v2254_v39, %v1742_v57  ;;  %v2669_v37 = vmul.f32 0.5, %v10229_v19  ;;  %v3181_v63 = vadd.f32 1.0, %v10230_v14  ;;  %v2503_v10 = vmul.f32 %v2247_v45, %v1735_v24 }
 0x1d0   :  { %5044 = vtanh.f32 %v2508_v50  ;;  %v2006_v11 = vmul.f32 0.044715, %v1494_v4  ;;  %v7035_v6 = vadd.f32 %v6826_v16, %v5898_v25  ;;  %v1997_v40 = vmul.f32 0.044715, %v1485_v42  ;;  %v7046_v50 = vpop.f32.mrf.mxu1  ;;  %v10235_v42 = vld [vmem:[#allocation48_spill] sm:$0xff] }
 0x1d1   :  { %v3437_v34 = vmul.f32 %v3181_v63, %v2669_v37  ;;  %v2671_v43 = vmul.f32 0.5, %v10231_v51  ;;  %v3183_v0 = vadd.f32 1.0, %v10232_v58  ;;  %v7040_v39 = vmul.f32 0.5, %v6929_v52  ;;  %v7055_v52 = vpop.f32.mrf.mxu0  ;;  %v10238_v37 = vld [vmem:[#allocation49_spill] sm:$0xff] }
 0x1d2   :  { %v1999_v57 = vmul.f32 0.044715, %v1487_v2  ;;  %v2260_v19 = vadd.f32 1.0, %v2004_v26  ;;  %v7044_v45 = vadd.f32 %v6843_v33, %v5904_v48  ;;  %v7049_v16 = vmul.f32 %v3260_v13, %v6889_v53  ;;  %v7072_v14 = vpop.f32.mrf.mxu1 }
 0x1d3   :  { %5046 = vtanh.f32 %v2510_v59  ;;  %v7053_v63 = vadd.f32 %v6800_v55, %v5931_v54  ;;  %3898 = vmatprep.mubr.f32.mxu0 %v3437_v34  ;;  %v3439_v58 = vmul.f32 %v3183_v0, %v2671_v43  ;;  %v1748_v4 = vmul.f32 0.7978846, %v6974_v23 }
 0x1d4   :  { %10233 = vst [vmem:[#allocation44_spill] sm:$0xff] %v7049_v16  ;;  %5048 = vtanh.f32 %v2501_v1  ;;  %v2262_v24 = vadd.f32 1.0, %v2006_v11  ;;  %v1500_v33 = vmul.f32 %v7035_v6, %v7035_v6  ;;  %3899 = vmatmul.mubr.f32.gmra.mxu0 %v10235_v42  ;;  %v5037_v53 = vpop.eup %5036  ;;  %v7062_v13 = vmul.f32 %v3262_v17, %v6916_v60  ;;  %v3771_v60 = vld [vmem:[#allocation8 + $0x2f8] sm:$0xff] }
 0x1d5   :  { %10234 = vst [vmem:[#allocation23_spill] sm:$0xff] %v7053_v63  ;;  %5050 = vtanh.f32 %v2503_v10  ;;  %v2253_v55 = vadd.f32 1.0, %v1997_v40  ;;  %v1750_v2 = vmul.f32 0.7978846, %v6984_v20  ;;  %4123 = vmatprep.mubr.f32.mxu1 %v3439_v58  ;;  %v2255_v26 = vadd.f32 1.0, %v1999_v57  ;;  %4287 = vmatpush2.msra.mxu0 %v3771_v60 }
 0x1d6   :  { %10236 = vst [vmem:[#allocation46_spill] sm:$0xff] %v7062_v13  ;;  %v5039_v43 = vpop.eup %5038  ;;  %v2516_v1 = vmul.f32 %v2260_v19, %v1748_v4  ;;  %v7067_v11 = vadd.f32 %v6818_v61, %v5940_v56  ;;  %v1502_v59 = vmul.f32 %v7044_v45, %v7044_v45  ;;  %4124 = vmatmul.mubr.f32.gmra.mxu1 %v10238_v37  ;;  %v1741_v10 = vmul.f32 0.7978846, %v6993_v15  ;;  %v7081_v61 = vpop.f32.mrf.mxu0  ;;  %v3803_v4 = vld [vmem:[#allocation8 + $0x3f8] sm:$0xff]  ;;  %v10242_v13 = vld [vmem:[#allocation53_spill] sm:$0xff] }
 0x1d7   :  { %v1743_v17 = vmul.f32 0.7978846, %v6998_v41  ;;  %v7077_v40 = vmul.f32 0.5, %v6974_v23  ;;  %v1493_v34 = vmul.f32 %v7053_v63, %v7053_v63  ;;  %v3268_v0 = vadd.f32 1.0, %v5037_v53  ;;  %4288 = vmatprep.subr.mxu0 %v10175_v32  ;;  %v10241_v41 = vld [vmem:[#allocation31_spill] sm:$0xff]  ;;  %4512 = vmatpush2.msra.mxu1 %v3803_v4 }
 0x1d8   :  { %10237 = vst [vmem:[#allocation28_spill] sm:$0xff] %v7067_v11  ;;  %v7083_v51 = vpop.eup %5040  ;;  %v2518_v57 = vmul.f32 %v2262_v24, %v1750_v2  ;;  %v2012_v19 = vmul.f32 0.044715, %v1500_v33  ;;  %v7087_v58 = vadd.f32 %v6876_v5, %v5898_v25  ;;  %v3270_v42 = vadd.f32 1.0, %v5039_v43  ;;  %v7096_v5 = vpop.f32.mrf.mxu1  ;;  %4513 = vmatprep.subr.mxu1 %v10175_v32 }
 0x1d9   :  { %10239 = vst [vmem:[#allocation51_spill] sm:$0xff] %v7083_v51  ;;  %v7090_v23 = vpop.eup %5042  ;;  %v2509_v37 = vmul.f32 %v2253_v55, %v1741_v10  ;;  %v2677_v15 = vmul.f32 0.5, %v10241_v41  ;;  %v3189_v60 = vadd.f32 1.0, %v10242_v13  ;;  %v2511_v16 = vmul.f32 %v2255_v26, %v1743_v17  ;;  %v7101_v41 = vpop.f32.mrf.mxu0 }
 0x1da   :  { %10240 = vst [vmem:[#allocation48_spill] sm:$0xff] %v7090_v23  ;;  %5052 = vtanh.f32 %v2516_v1  ;;  %v1495_v24 = vmul.f32 %v7067_v11, %v7067_v11  ;;  %v2014_v33 = vmul.f32 0.044715, %v1502_v59  ;;  %v2005_v53 = vmul.f32 0.044715, %v1493_v34  ;;  %v10243_v23 = vld [vmem:[#allocation32_spill] sm:$0xff]  ;;  %v7122_v4 = vpop.f32.mrf.mxu1 }
 0x1db   :  { %v3445_v2 = vmul.f32 %v3189_v60, %v2677_v15  ;;  %v2679_v43 = vmul.f32 0.5, %v10243_v23  ;;  %v3191_v55 = vadd.f32 1.0, %v6552_v22  ;;  %5054 = vtanh.f32 %v2518_v57  ;;  %v7130_v60 = vpop.f32.mrf.mxu0 }
 0x1dc   :  { %v2268_v13 = vadd.f32 1.0, %v2012_v19  ;;  %v1508_v26 = vmul.f32 %v7087_v58, %v7087_v58  ;;  %v7107_v1 = vadd.f32 %v6899_v21, %v5904_v48  ;;  %5056 = vtanh.f32 %v2509_v37  ;;  %v10246_v21 = vld [vmem:[#allocation54_spill] sm:$0xff] }
 0x1dd   :  { %v5045_v59 = vpop.eup %5044  ;;  %v7110_v10 = vmul.f32 0.5, %v6984_v20  ;;  %v1756_v15 = vmul.f32 0.7978846, %v7035_v6  ;;  %3903 = vmatprep.mubr.f32.mxu0 %v3445_v2  ;;  %v3447_v22 = vmul.f32 %v3191_v55, %v2679_v43  ;;  %v2007_v17 = vmul.f32 0.044715, %v1495_v24  ;;  %v10249_v43 = vld [vmem:[#allocation56_spill] sm:$0xff] }
 0x1de   :  { %v2270_v34 = vadd.f32 1.0, %v2014_v33  ;;  %v7115_v57 = vadd.f32 %v6847_v8, %v5931_v54  ;;  %v7119_v19 = vadd.f32 %v6869_v18, %v5940_v56  ;;  %3904 = vmatmul.mubr.f32.gmra.mxu0 %v10246_v21  ;;  %v7125_v20 = vmul.f32 %v3268_v0, %v6955_v12  ;;  %v3770_v12 = vld [vmem:[#allocation8 + $0x2f0] sm:$0xff]  ;;  %v7149_v21 = vpop.f32.mrf.mxu1 }
 0x1df   :  { %v7128_v23 = vmul.f32 %v3270_v42, %v6989_v31  ;;  %5058 = vtanh.f32 %v2511_v16  ;;  %v2261_v37 = vadd.f32 1.0, %v2005_v53  ;;  %4128 = vmatprep.mubr.f32.mxu1 %v3447_v22  ;;  %v2524_v24 = vmul.f32 %v2268_v13, %v1756_v15  ;;  %4289 = vmatpush2.msra.mxu0 %v3770_v12  ;;  %v10253_v12 = vld [vmem:[#allocation60_spill] sm:$0xff] }
 0x1e0   :  { %10244 = vst [vmem:[#allocation49_spill] sm:$0xff] %v7115_v57  ;;  %10245 = vst [vmem:[#allocation31_spill] sm:$0xff] %v7119_v19  ;;  %v5047_v8 = vpop.eup %5046  ;;  %v1758_v18 = vmul.f32 0.7978846, %v7044_v45  ;;  %v2020_v33 = vmul.f32 0.044715, %v1508_v26  ;;  %v1510_v2 = vmul.f32 %v7107_v1, %v7107_v1  ;;  %4129 = vmatmul.mubr.f32.gmra.mxu1 %v10249_v43  ;;  %v1501_v15 = vmul.f32 %v7115_v57, %v7115_v57 }
 0x1e1   :  { %10247 = vst [vmem:[#allocation53_spill] sm:$0xff] %v7125_v20  ;;  %10248 = vst [vmem:[#allocation32_spill] sm:$0xff] %v7128_v23  ;;  %v7136_v0 = vpop.eup %5048  ;;  %v3276_v31 = vadd.f32 1.0, %v5045_v59  ;;  %v1749_v16 = vmul.f32 0.7978846, %v7053_v63  ;;  %v7141_v53 = vmul.f32 0.5, %v7035_v6  ;;  %v1503_v22 = vmul.f32 %v7119_v19, %v7119_v19  ;;  %4290 = vmatprep.subr.mxu0 %v10175_v32  ;;  %v7154_v20 = vpop.f32.mrf.mxu0 }
 0x1e2   :  { %10250 = vst [vmem:[#allocation54_spill] sm:$0xff] %v7136_v0  ;;  %v1751_v42 = vmul.f32 0.7978846, %v7067_v11  ;;  %v7143_v55 = vpop.eup %5050  ;;  %v2263_v13 = vadd.f32 1.0, %v2007_v17  ;;  %v2526_v26 = vmul.f32 %v2270_v34, %v1758_v18  ;;  %v3802_v59 = vld [vmem:[#allocation8 + $0x3f0] sm:$0xff]  ;;  %v3278_v43 = vadd.f32 1.0, %v5047_v8 }
 0x1e3   :  { %10251 = vst [vmem:[#allocation56_spill] sm:$0xff] %v7143_v55  ;;  %v2517_v11 = vmul.f32 %v2261_v37, %v1749_v16  ;;  %v10252_v6 = vld [vmem:[#allocation38_spill] sm:$0xff]  ;;  %v3197_v23 = vadd.f32 1.0, %v10253_v12  ;;  %4514 = vmatpush2.msra.mxu1 %v3802_v59  ;;  %5060 = vtanh.f32 %v2524_v24  ;;  %v2276_v17 = vadd.f32 1.0, %v2020_v33  ;;  %v10255_v16 = vld [vmem:[#allocation39_spill] sm:$0xff] }
 0x1e4   :  { %v2685_v63 = vmul.f32 0.5, %v10252_v6  ;;  %v2022_v34 = vmul.f32 0.044715, %v1510_v2  ;;  %v7158_v18 = vadd.f32 %v6906_v27, %v5931_v54  ;;  %4515 = vmatprep.subr.mxu1 %v10175_v32  ;;  %v7163_v8 = vadd.f32 %v6931_v9, %v5898_v25  ;;  %v10256_v12 = vld [vmem:[#allocation62_spill] sm:$0xff]  ;;  %v7167_v2 = vpop.f32.mrf.mxu1 }
 0x1e5   :  { %v2687_v6 = vmul.f32 0.5, %v10255_v16  ;;  %v3199_v55 = vadd.f32 1.0, %v10256_v12  ;;  %v2519_v0 = vmul.f32 %v2263_v13, %v1751_v42  ;;  %5062 = vtanh.f32 %v2526_v26  ;;  %v10262_v12 = vld [vmem:[#allocation59_spill] sm:$0xff] }
 0x1e6   :  { %10254 = vst [vmem:[#allocation38_spill] sm:$0xff] %v7158_v18  ;;  %v3453_v37 = vmul.f32 %v3197_v23, %v2685_v63  ;;  %v2013_v24 = vmul.f32 0.044715, %v1501_v15  ;;  %v2015_v33 = vmul.f32 0.044715, %v1503_v22  ;;  %v7170_v27 = vmul.f32 0.5, %v7044_v45  ;;  %v7177_v23 = vpop.f32.mrf.mxu0 }
 0x1e7   :  { %v5053_v59 = vpop.eup %5052  ;;  %v1764_v51 = vmul.f32 0.7978846, %v7087_v58  ;;  %v7175_v9 = vadd.f32 %v6950_v3, %v5904_v48  ;;  %v3455_v63 = vmul.f32 %v3199_v55, %v2687_v6  ;;  %v7180_v42 = vmul.f32 %v3276_v31, %v7017_v38  ;;  %v10259_v15 = vld [vmem:[#allocation57_spill] sm:$0xff]  ;;  %v3769_v22 = vld [vmem:[#allocation8 + $0x2e8] sm:$0xff] }
 0x1e8   :  { %3908 = vmatprep.mubr.f32.mxu0 %v3453_v37  ;;  %v2278_v13 = vadd.f32 1.0, %v2022_v34  ;;  %v1509_v26 = vmul.f32 %v7158_v18, %v7158_v18  ;;  %v7186_v45 = vadd.f32 %v6922_v36, %v5940_v56  ;;  %v3801_v3 = vld [vmem:[#allocation8 + $0x3e8] sm:$0xff]  ;;  %v5055_v16 = vpop.eup %5054  ;;  %v7190_v55 = vmul.f32 %v3278_v43, %v7040_v39  ;;  %4291 = vmatpush2.msra.mxu0 %v3769_v22 }
 0x1e9   :  { %10257 = vst [vmem:[#allocation60_spill] sm:$0xff] %v7180_v42  ;;  %3909 = vmatmul.mubr.f32.gmra.mxu0 %v10259_v15  ;;  %5064 = vtanh.f32 %v2517_v11  ;;  %v2532_v37 = vmul.f32 %v2276_v17, %v1764_v51  ;;  %v1516_v38 = vmul.f32 %v7163_v8, %v7163_v8  ;;  %4133 = vmatprep.mubr.f32.mxu1 %v3455_v63  ;;  %v7194_v31 = vpop.eup %5056  ;;  %v2269_v36 = vadd.f32 1.0, %v2013_v24  ;;  %v7198_v15 = vpop.f32.mrf.mxu1 }
 0x1ea   :  { %10258 = vst [vmem:[#allocation39_spill] sm:$0xff] %v7186_v45  ;;  %10260 = vst [vmem:[#allocation62_spill] sm:$0xff] %v7190_v55  ;;  %5066 = vtanh.f32 %v2519_v0  ;;  %v2271_v34 = vadd.f32 1.0, %v2015_v33  ;;  %v1766_v6 = vmul.f32 0.7978846, %v7107_v1  ;;  %4134 = vmatmul.mubr.f32.gmra.mxu1 %v10262_v12  ;;  %4292 = vmatprep.subr.mxu0 %v10175_v32  ;;  %v3284_v39 = vadd.f32 1.0, %v5053_v59  ;;  %v7205_v17 = vpop.f32.mrf.mxu0 }
 0x1eb   :  { %10261 = vst [vmem:[#allocation57_spill] sm:$0xff] %v7194_v31  ;;  %v1757_v11 = vmul.f32 0.7978846, %v7115_v57  ;;  %v1759_v51 = vmul.f32 0.7978846, %v7119_v19  ;;  %v1518_v43 = vmul.f32 %v7175_v9, %v7175_v9  ;;  %4516 = vmatpush2.msra.mxu1 %v3801_v3  ;;  %v3286_v24 = vadd.f32 1.0, %v5055_v16 }
 0x1ec   :  { %v7207_v0 = vpop.eup %5058  ;;  %v2534_v33 = vmul.f32 %v2278_v13, %v1766_v6  ;;  %v2021_v63 = vmul.f32 0.044715, %v1509_v26  ;;  %v1511_v22 = vmul.f32 %v7186_v45, %v7186_v45  ;;  %4517 = vmatprep.subr.mxu1 %v10175_v32  ;;  %5068 = vtanh.f32 %v2532_v37  ;;  %v10264_v12 = vld [vmem:[#allocation42_spill] sm:$0xff]  ;;  %v7220_v13 = vpop.f32.mrf.mxu1 }
 0x1ed   :  { %10263 = vst [vmem:[#allocation59_spill] sm:$0xff] %v7207_v0  ;;  %v2028_v59 = vmul.f32 0.044715, %v1516_v38  ;;  %v2693_v19 = vmul.f32 0.5, %v10264_v12  ;;  %v3205_v57 = vadd.f32 1.0, %v6624_v62  ;;  %v2525_v55 = vmul.f32 %v2269_v36, %v1757_v11  ;;  %v10265_v0 = vld [vmem:[#allocation45_spill] sm:$0xff]  ;;  %v7224_v38 = vpop.f32.mrf.mxu0 }
 0x1ee   :  { %v2527_v42 = vmul.f32 %v2271_v34, %v1759_v51  ;;  %v7215_v3 = vmul.f32 0.5, %v7087_v58  ;;  %v7218_v16 = vmul.f32 0.5, %v7107_v1  ;;  %v2030_v26 = vmul.f32 0.044715, %v1518_v43  ;;  %v10269_v43 = vld [vmem:[#allocation63_spill] sm:$0xff] }
 0x1ef   :  { %v3461_v6 = vmul.f32 %v3205_v57, %v2693_v19  ;;  %v2695_v31 = vmul.f32 0.5, %v10265_v0  ;;  %v3207_v37 = vadd.f32 1.0, %v6641_v47  ;;  %5070 = vtanh.f32 %v2534_v33  ;;  %v3768_v0 = vld [vmem:[#allocation8 + $0x2e0] sm:$0xff] }
 0x1f0   :  { %v2277_v62 = vadd.f32 1.0, %v2021_v63  ;;  %v2023_v36 = vmul.f32 0.044715, %v1511_v22  ;;  %v7228_v58 = vadd.f32 %v6980_v49, %v5898_v25  ;;  %v5061_v34 = vpop.eup %5060  ;;  %v7231_v1 = vmul.f32 %v3284_v39, %v7077_v40  ;;  %v7246_v40 = vpop.f32.mrf.mxu1  ;;  %4293 = vmatpush2.msra.mxu0 %v3768_v0 }
 0x1f1   :  { %v7234_v11 = vmul.f32 %v3286_v24, %v7110_v10  ;;  %v2284_v57 = vadd.f32 1.0, %v2028_v59  ;;  %3913 = vmatprep.mubr.f32.mxu0 %v3461_v6  ;;  %v3463_v19 = vmul.f32 %v3207_v37, %v2695_v31  ;;  %5072 = vtanh.f32 %v2525_v55  ;;  %v3800_v24 = vld [vmem:[#allocation8 + $0x3e0] sm:$0xff]  ;;  %v10271_v59 = vld [vmem:[#allocation64_spill] sm:$0xff]  ;;  %4294 = vmatprep.subr.mxu0 %v10175_v32 }
 0x1f2   :  { %10266 = vst [vmem:[#allocation42_spill] sm:$0xff] %v7231_v1  ;;  %v1765_v47 = vmul.f32 0.7978846, %v7158_v18  ;;  %v7239_v51 = vadd.f32 %v6960_v29, %v5931_v54  ;;  %v7243_v49 = vadd.f32 %v7003_v44, %v5904_v48  ;;  %3914 = vmatmul.mubr.f32.gmra.mxu0 %v10269_v43  ;;  %v5063_v10 = vpop.eup %5062  ;;  %5074 = vtanh.f32 %v2527_v42  ;;  %v7253_v29 = vpop.f32.mrf.mxu0  ;;  %4518 = vmatpush2.msra.mxu1 %v3800_v24  ;;  %v10275_v43 = vld [vmem:[#allocation47_spill] sm:$0xff] }
 0x1f3   :  { %10267 = vst [vmem:[#allocation45_spill] sm:$0xff] %v7234_v11  ;;  %v1772_v39 = vmul.f32 0.7978846, %v7163_v8  ;;  %v2286_v31 = vadd.f32 1.0, %v2030_v26  ;;  %v7251_v55 = vadd.f32 %v6976_v35, %v5940_v56  ;;  %4138 = vmatprep.mubr.f32.mxu1 %v3463_v19  ;;  %v3292_v44 = vadd.f32 1.0, %v5061_v34  ;;  %4519 = vmatprep.subr.mxu1 %v10175_v32  ;;  %v10278_v11 = vld [vmem:[#allocation50_spill] sm:$0xff] }
 0x1f4   :  { %10268 = vst [vmem:[#allocation79_spill] sm:$0xff] %v7239_v51  ;;  %v2533_v33 = vmul.f32 %v2277_v62, %v1765_v47  ;;  %v2279_v63 = vadd.f32 1.0, %v2023_v36  ;;  %v1524_v22 = vmul.f32 %v7228_v58, %v7228_v58  ;;  %4139 = vmatmul.mubr.f32.gmra.mxu1 %v10271_v59  ;;  %v1767_v42 = vmul.f32 0.7978846, %v7186_v45  ;;  %v7282_v0 = vpop.f32.mrf.mxu0 }
 0x1f5   :  { %10270 = vst [vmem:[#allocation63_spill] sm:$0xff] %v7251_v55  ;;  %v2540_v12 = vmul.f32 %v2284_v57, %v1772_v39  ;;  %v7260_v35 = vmul.f32 0.5, %v7163_v8  ;;  %v1774_v26 = vmul.f32 0.7978846, %v7175_v9  ;;  %v3294_v37 = vadd.f32 1.0, %v5063_v10  ;;  %v7273_v57 = vpop.f32.mrf.mxu1 }
 0x1f6   :  { %v7264_v6 = vpop.eup %5064  ;;  %v7267_v62 = vmul.f32 0.5, %v7175_v9  ;;  %v1517_v36 = vmul.f32 %v7239_v51, %v7239_v51  ;;  %v1526_v34 = vmul.f32 %v7243_v49, %v7243_v49  ;;  %10273 = vst [vmem:[#allocation80_spill] sm:$0xff] %v7273_v57  ;;  %v1519_v47 = vmul.f32 %v7251_v55, %v7251_v55  ;;  %v10276_v9 = vld [vmem:[#allocation67_spill] sm:$0xff] }
 0x1f7   :  { %10272 = vst [vmem:[#allocation64_spill] sm:$0xff] %v7264_v6  ;;  %v7276_v8 = vpop.eup %5066  ;;  %v2542_v19 = vmul.f32 %v2286_v31, %v1774_v26  ;;  %v2701_v10 = vmul.f32 0.5, %v10275_v43  ;;  %v3213_v39 = vadd.f32 1.0, %v10276_v9  ;;  %v7285_v24 = vmul.f32 %v3292_v44, %v7141_v53  ;;  %v10279_v31 = vld [vmem:[#allocation69_spill] sm:$0xff]  ;;  %v7294_v53 = vpop.f32.mrf.mxu1 }
 0x1f8   :  { %10274 = vst [vmem:[#allocation81_spill] sm:$0xff] %v7276_v8  ;;  %5076 = vtanh.f32 %v2533_v33  ;;  %v2535_v59 = vmul.f32 %v2279_v63, %v1767_v42  ;;  %v2036_v45 = vmul.f32 0.044715, %v1524_v22  ;;  %v2703_v1 = vmul.f32 0.5, %v10278_v11  ;;  %v7300_v63 = vpop.f32.mrf.mxu0 }
 0x1f9   :  { %10277 = vst [vmem:[#allocation47_spill] sm:$0xff] %v7285_v24  ;;  %5078 = vtanh.f32 %v2540_v12  ;;  %v3469_v18 = vmul.f32 %v3213_v39, %v2701_v10  ;;  %v3215_v26 = vadd.f32 1.0, %v10279_v31  ;;  %v5069_v8 = vpop.eup %5068  ;;  %v1773_v6 = vmul.f32 0.7978846, %v7239_v51  ;;  %v10284_v39 = vld [vmem:[#allocation70_spill] sm:$0xff]  ;;  %v7322_v31 = vpop.f32.mrf.mxu1 }
 0x1fa   :  { %v2029_v43 = vmul.f32 0.044715, %v1517_v36  ;;  %v2038_v57 = vmul.f32 0.044715, %v1526_v34  ;;  %v7292_v9 = vadd.f32 %v7031_v7, %v5898_v25  ;;  %5080 = vtanh.f32 %v2542_v19  ;;  %v10282_v36 = vld [vmem:[#allocation66_spill] sm:$0xff] }
 0x1fb   :  { %v2031_v44 = vmul.f32 0.044715, %v1519_v47  ;;  %v7298_v33 = vadd.f32 %v7046_v50, %v5904_v48  ;;  %3918 = vmatprep.mubr.f32.mxu0 %v3469_v18  ;;  %v3471_v11 = vmul.f32 %v3215_v26, %v2703_v1  ;;  %v1775_v22 = vmul.f32 0.7978846, %v7251_v55  ;;  %v3799_v19 = vld [vmem:[#allocation8 + $0x3d8] sm:$0xff]  ;;  %10285 = vst [vmem:[#allocation66_spill] sm:$0xff] %v7322_v31 }
 0x1fc   :  { %v2292_v42 = vadd.f32 1.0, %v2036_v45  ;;  %v7305_v12 = vadd.f32 %v7009_v28, %v5931_v54  ;;  %v7309_v7 = vadd.f32 %v7027_v30, %v5940_v56  ;;  %3919 = vmatmul.mubr.f32.gmra.mxu0 %v10282_v36  ;;  %v5071_v34 = vpop.eup %5070  ;;  %v7313_v50 = vmul.f32 %v3294_v37, %v7170_v27  ;;  %v3767_v45 = vld [vmem:[#allocation8 + $0x2d8] sm:$0xff]  ;;  %4520 = vmatpush2.msra.mxu1 %v3799_v19  ;;  %v10289_v19 = vld [vmem:[#allocation52_spill] sm:$0xff] }
 0x1fd   :  { %v3300_v18 = vadd.f32 1.0, %v5069_v8  ;;  %5082 = vtanh.f32 %v2535_v59  ;;  %v1780_v1 = vmul.f32 0.7978846, %v7228_v58  ;;  %4143 = vmatprep.mubr.f32.mxu1 %v3471_v11  ;;  %v2285_v47 = vadd.f32 1.0, %v2029_v43  ;;  %4295 = vmatpush2.msra.mxu0 %v3767_v45 }
 0x1fe   :  { %10280 = vst [vmem:[#allocation67_spill] sm:$0xff] %v7305_v12  ;;  %10281 = vst [vmem:[#allocation50_spill] sm:$0xff] %v7309_v7  ;;  %v7317_v28 = vmul.f32 0.5, %v7228_v58  ;;  %v2294_v10 = vadd.f32 1.0, %v2038_v57  ;;  %v1532_v30 = vmul.f32 %v7292_v9, %v7292_v9  ;;  %4144 = vmatmul.mubr.f32.gmra.mxu1 %v10284_v39  ;;  %v7324_v27 = vpop.eup %5072  ;;  %v2287_v37 = vadd.f32 1.0, %v2031_v44  ;;  %v7332_v57 = vpop.f32.mrf.mxu0  ;;  %4296 = vmatprep.subr.mxu0 %v10175_v32 }
 0x1ff   :  { %10283 = vst [vmem:[#allocation69_spill] sm:$0xff] %v7313_v50  ;;  %10286 = vst [vmem:[#allocation70_spill] sm:$0xff] %v7324_v27  ;;  %v1782_v8 = vmul.f32 0.7978846, %v7243_v49  ;;  %v7328_v59 = vmul.f32 0.5, %v7243_v49  ;;  %v1534_v58 = vmul.f32 %v7298_v33, %v7298_v33  ;;  %v7335_v26 = vpop.eup %5074  ;;  %v3302_v43 = vadd.f32 1.0, %v5071_v34  ;;  %4521 = vmatprep.subr.mxu1 %v10175_v32  ;;  %v7355_v50 = vpop.f32.mrf.mxu1 }
 0x200   :  { %10287 = vst [vmem:[#allocation82_spill] sm:$0xff] %v7335_v26  ;;  %v2548_v11 = vmul.f32 %v2292_v42, %v1780_v1  ;;  %v1525_v44 = vmul.f32 %v7305_v12, %v7305_v12  ;;  %v1527_v36 = vmul.f32 %v7309_v7, %v7309_v7  ;;  %v7343_v49 = vmul.f32 %v3300_v18, %v7215_v3  ;;  %v10290_v18 = vld [vmem:[#allocation55_spill] sm:$0xff]  ;;  %v10291_v26 = vld [vmem:[#allocation73_spill] sm:$0xff]  ;;  %v7359_v27 = vpop.f32.mrf.mxu0 }
 0x201   :  { %v7347_v45 = vadd.f32 %v7081_v61, %v5898_v25  ;;  %v2709_v39 = vmul.f32 0.5, %v10289_v19  ;;  %v3221_v34 = vadd.f32 1.0, %v6725_v46  ;;  %v2541_v42 = vmul.f32 %v2285_v47, %v1773_v6  ;;  %10292 = vst [vmem:[#allocation52_spill] sm:$0xff] %v7359_v27  ;;  %v10305_v27 = vld [vmem:[#allocation61_spill] sm:$0xff] }
 0x202   :  { %10288 = vst [vmem:[#allocation83_spill] sm:$0xff] %v7343_v49  ;;  %v2550_v1 = vmul.f32 %v2294_v10, %v1782_v8  ;;  %v2044_v55 = vmul.f32 0.044715, %v1532_v30  ;;  %v7353_v51 = vadd.f32 %v7096_v5, %v5904_v48  ;;  %v2046_v24 = vmul.f32 0.044715, %v1534_v58 }
 0x203   :  { %v3477_v3 = vmul.f32 %v3221_v34, %v2709_v39  ;;  %v2711_v49 = vmul.f32 0.5, %v10290_v18  ;;  %v3223_v61 = vadd.f32 1.0, %v10291_v26  ;;  %5084 = vtanh.f32 %v2548_v11  ;;  %v3766_v39 = vld [vmem:[#allocation8 + $0x2d0] sm:$0xff] }
 0x204   :  { %v2037_v19 = vmul.f32 0.044715, %v1525_v44  ;;  %v2039_v46 = vmul.f32 0.044715, %v1527_v36  ;;  %v7363_v6 = vadd.f32 %v7055_v52, %v5931_v54  ;;  %v2543_v5 = vmul.f32 %v2287_v37, %v1775_v22  ;;  %v10296_v44 = vld [vmem:[#allocation74_spill] sm:$0xff]  ;;  %v7377_v22 = vpop.f32.mrf.mxu1  ;;  %4297 = vmatpush2.msra.mxu0 %v3766_v39 }
 0x205   :  { %v7365_v47 = vpop.eup %5076  ;;  %v1781_v10 = vmul.f32 0.7978846, %v7305_v12  ;;  %v1540_v30 = vmul.f32 %v7347_v45, %v7347_v45  ;;  %3923 = vmatprep.mubr.f32.mxu0 %v3477_v3  ;;  %v3479_v8 = vmul.f32 %v3223_v61, %v2711_v49  ;;  %5086 = vtanh.f32 %v2550_v1  ;;  %10297 = vst [vmem:[#allocation74_spill] sm:$0xff] %v7377_v22  ;;  %4298 = vmatprep.subr.mxu0 %v10175_v32 }
 0x206   :  { %10293 = vst [vmem:[#allocation55_spill] sm:$0xff] %v7363_v6  ;;  %10294 = vst [vmem:[#allocation73_spill] sm:$0xff] %v7365_v47  ;;  %v5079_v58 = vpop.eup %5078  ;;  %v2300_v26 = vadd.f32 1.0, %v2044_v55  ;;  %v7372_v11 = vadd.f32 %v7072_v14, %v5940_v56  ;;  %v1542_v52 = vmul.f32 %v7353_v51, %v7353_v51  ;;  %3924 = vmatmul.mubr.f32.gmra.mxu0 %v10296_v44  ;;  %5088 = vtanh.f32 %v2541_v42  ;;  %v7383_v55 = vpop.f32.mrf.mxu0  ;;  %v3798_v14 = vld [vmem:[#allocation8 + $0x3d0] sm:$0xff]  ;;  %v10300_v44 = vld [vmem:[#allocation75_spill] sm:$0xff] }
 0x207   :  { %v7380_v37 = vmul.f32 %v3302_v43, %v7218_v16  ;;  %v1783_v36 = vmul.f32 0.7978846, %v7309_v7  ;;  %v2302_v49 = vadd.f32 1.0, %v2046_v24  ;;  %4148 = vmatprep.mubr.f32.mxu1 %v3479_v8  ;;  %10299 = vst [vmem:[#allocation86_spill] sm:$0xff] %v7383_v55  ;;  %v5081_v34 = vpop.eup %5080  ;;  %v2293_v1 = vadd.f32 1.0, %v2037_v19  ;;  %4522 = vmatpush2.msra.mxu1 %v3798_v14  ;;  %v10304_v7 = vld [vmem:[#allocation76_spill] sm:$0xff] }
 0x208   :  { %10295 = vst [vmem:[#allocation84_spill] sm:$0xff] %v7372_v11  ;;  %v2295_v3 = vadd.f32 1.0, %v2039_v46  ;;  %v1788_v18 = vmul.f32 0.7978846, %v7292_v9  ;;  %v1533_v61 = vmul.f32 %v7363_v6, %v7363_v6  ;;  %4149 = vmatmul.mubr.f32.gmra.mxu1 %v10300_v44  ;;  %5090 = vtanh.f32 %v2543_v5  ;;  %v7401_v5 = vpop.f32.mrf.mxu1  ;;  %4523 = vmatprep.subr.mxu1 %v10175_v32  ;;  %v10306_v55 = vld [vmem:[#allocation26_spill] sm:$0xff] }
 0x209   :  { %10298 = vst [vmem:[#allocation85_spill] sm:$0xff] %v7380_v37  ;;  %v7390_v16 = vmul.f32 0.5, %v7292_v9  ;;  %v1790_v24 = vmul.f32 0.7978846, %v7298_v33  ;;  %v2052_v43 = vmul.f32 0.044715, %v1540_v30  ;;  %v1535_v8 = vmul.f32 %v7372_v11, %v7372_v11  ;;  %v7406_v37 = vpop.f32.mrf.mxu0 }
 0x20a   :  { %v7394_v42 = vpop.eup %5082  ;;  %v2556_v19 = vmul.f32 %v2300_v26, %v1788_v18  ;;  %v7397_v46 = vmul.f32 0.5, %v7298_v33  ;;  %v2054_v39 = vmul.f32 0.044715, %v1542_v52  ;;  %10302 = vst [vmem:[#allocation87_spill] sm:$0xff] %v7401_v5  ;;  %v3308_v9 = vadd.f32 1.0, %v5079_v58  ;;  %v10303_v30 = vld [vmem:[#allocation58_spill] sm:$0xff] }
 0x20b   :  { %10301 = vst [vmem:[#allocation75_spill] sm:$0xff] %v7394_v42  ;;  %v2558_v44 = vmul.f32 %v2302_v49, %v1790_v24  ;;  %v2717_v14 = vmul.f32 0.5, %v10303_v30  ;;  %v3229_v12 = vadd.f32 1.0, %v10304_v7  ;;  %v3310_v26 = vadd.f32 1.0, %v5081_v34  ;;  %v7414_v7 = vpop.f32.mrf.mxu1  ;;  %v3765_v24 = vld [vmem:[#allocation8 + $0x2c8] sm:$0xff] }
 0x20c   :  { %v2549_v18 = vmul.f32 %v2293_v1, %v1781_v10  ;;  %v2551_v33 = vmul.f32 %v2295_v3, %v1783_v36  ;;  %v2045_v42 = vmul.f32 0.044715, %v1533_v61  ;;  %v2308_v47 = vadd.f32 1.0, %v2052_v43  ;;  %v10310_v3 = vld [vmem:[#allocation24_spill] sm:$0xff]  ;;  %4299 = vmatpush2.msra.mxu0 %v3765_v24 }
 0x20d   :  { %v3485_v22 = vmul.f32 %v3229_v12, %v2717_v14  ;;  %v2719_v52 = vmul.f32 0.5, %v10305_v27  ;;  %v3231_v5 = vadd.f32 1.0, %v10306_v55  ;;  %5092 = vtanh.f32 %v2556_v19  ;;  %v7421_v27 = vpop.f32.mrf.mxu0  ;;  %v3797_v43 = vld [vmem:[#allocation8 + $0x3c8] sm:$0xff]  ;;  %4300 = vmatprep.subr.mxu0 %v10175_v32 }
 0x20e   :  { %v2047_v31 = vmul.f32 0.044715, %v1535_v8  ;;  %v2310_v58 = vadd.f32 1.0, %v2054_v39  ;;  %v7412_v49 = vadd.f32 %v7130_v60, %v5898_v25  ;;  %5094 = vtanh.f32 %v2558_v44  ;;  %v7442_v39 = vpop.f32.mrf.mxu1  ;;  %4524 = vmatpush2.msra.mxu1 %v3797_v43 }
 0x20f   :  { %v1796_v10 = vmul.f32 0.7978846, %v7347_v45  ;;  %v7419_v36 = vadd.f32 %v7101_v41, %v5931_v54  ;;  %3928 = vmatprep.mubr.f32.mxu0 %v3485_v22  ;;  %v3487_v12 = vmul.f32 %v3231_v5, %v2719_v52  ;;  %v7424_v55 = vmul.f32 %v3308_v9, %v7260_v35  ;;  %v7451_v9 = vpop.f32.mrf.mxu0  ;;  %4525 = vmatprep.subr.mxu1 %v10175_v32 }
 0x210   :  { %v1798_v34 = vmul.f32 0.7978846, %v7353_v51  ;;  %v7429_v60 = vadd.f32 %v7122_v4, %v5940_v56  ;;  %v7433_v1 = vadd.f32 %v7149_v21, %v5904_v48  ;;  %3929 = vmatmul.mubr.f32.gmra.mxu0 %v10310_v3  ;;  %v5085_v41 = vpop.eup %5084  ;;  %v7437_v22 = vmul.f32 %v3310_v26, %v7267_v62  ;;  %v10312_v21 = vld [vmem:[#allocation25_spill] sm:$0xff] }
 0x211   :  { %10307 = vst [vmem:[#allocation58_spill] sm:$0xff] %v7419_v36  ;;  %10308 = vst [vmem:[#allocation76_spill] sm:$0xff] %v7424_v55  ;;  %5096 = vtanh.f32 %v2549_v18  ;;  %v2301_v61 = vadd.f32 1.0, %v2045_v42  ;;  %v2564_v35 = vmul.f32 %v2308_v47, %v1796_v10  ;;  %4153 = vmatprep.mubr.f32.mxu1 %v3487_v12  ;;  %v2303_v19 = vadd.f32 1.0, %v2047_v31 }
 0x212   :  { %10309 = vst [vmem:[#allocation61_spill] sm:$0xff] %v7429_v60  ;;  %10311 = vst [vmem:[#allocation26_spill] sm:$0xff] %v7437_v22  ;;  %5098 = vtanh.f32 %v2551_v33  ;;  %v2566_v4 = vmul.f32 %v2310_v58, %v1798_v34  ;;  %v1548_v8 = vmul.f32 %v7412_v49, %v7412_v49  ;;  %4154 = vmatmul.mubr.f32.gmra.mxu1 %v10312_v21  ;;  %v5087_v5 = vpop.eup %5086  ;;  %v1789_v62 = vmul.f32 0.7978846, %v7363_v6  ;;  %v10314_v33 = vld [vmem:[#allocation65_spill] sm:$0xff]  ;;  %v10315_v58 = vld [vmem:[#allocation27_spill] sm:$0xff] }
 0x213   :  { %v1791_v42 = vmul.f32 0.7978846, %v7372_v11  ;;  %v7447_v47 = vmul.f32 0.5, %v7347_v45  ;;  %v1541_v31 = vmul.f32 %v7419_v36, %v7419_v36  ;;  %v7454_v44 = vpop.eup %5088  ;;  %v3316_v30 = vadd.f32 1.0, %v5085_v41  ;;  %v7468_v41 = vpop.f32.mrf.mxu1  ;;  %v10318_v21 = vld [vmem:[#allocation68_spill] sm:$0xff]  ;;  %v10319_v6 = vld [vmem:[#allocation29_spill] sm:$0xff] }
 0x214   :  { %10313 = vst [vmem:[#allocation24_spill] sm:$0xff] %v7454_v44  ;;  %v7457_v14 = vmul.f32 0.5, %v7353_v51  ;;  %v1543_v26 = vmul.f32 %v7429_v60, %v7429_v60  ;;  %v1550_v45 = vmul.f32 %v7433_v1, %v7433_v1  ;;  %v2557_v18 = vmul.f32 %v2301_v61, %v1789_v62  ;;  %10317 = vst [vmem:[#allocation65_spill] sm:$0xff] %v7468_v41  ;;  %v7472_v61 = vpop.f32.mrf.mxu0 }
 0x215   :  { %5100 = vtanh.f32 %v2564_v35  ;;  %v2725_v52 = vmul.f32 0.5, %v10314_v33  ;;  %v3237_v10 = vadd.f32 1.0, %v10315_v58  ;;  %v7466_v12 = vpop.eup %5090  ;;  %v3318_v34 = vadd.f32 1.0, %v5087_v5 }
 0x216   :  { %10316 = vst [vmem:[#allocation25_spill] sm:$0xff] %v7466_v12  ;;  %v2559_v3 = vmul.f32 %v2303_v19, %v1791_v42  ;;  %5102 = vtanh.f32 %v2566_v4  ;;  %v2060_v51 = vmul.f32 0.044715, %v1548_v8  ;;  %v2053_v24 = vmul.f32 0.044715, %v1541_v31  ;;  %v10331_v12 = vld [vmem:[#allocation72_spill] sm:$0xff] }
 0x217   :  { %v3493_v43 = vmul.f32 %v3237_v10, %v2725_v52  ;;  %v2727_v11 = vmul.f32 0.5, %v10318_v21  ;;  %v3239_v22 = vadd.f32 1.0, %v10319_v6  ;;  %v2055_v35 = vmul.f32 0.044715, %v1543_v26 }
 0x218   :  { %v2062_v62 = vmul.f32 0.044715, %v1550_v45  ;;  %v7476_v33 = vadd.f32 %v7154_v20, %v5931_v54  ;;  %v7480_v19 = vadd.f32 %v7177_v23, %v5898_v25  ;;  %v7483_v4 = vmul.f32 %v3316_v30, %v7317_v28  ;;  %v10323_v23 = vld [vmem:[#allocation18_spill] sm:$0xff]  ;;  %v7496_v28 = vpop.f32.mrf.mxu1  ;;  %v3764_v45 = vld [vmem:[#allocation8 + $0x2c0] sm:$0xff] }
 0x219   :  { %5104 = vtanh.f32 %v2557_v18  ;;  %v7487_v8 = vadd.f32 %v7198_v15, %v5904_v48  ;;  %3933 = vmatprep.mubr.f32.mxu0 %v3493_v43  ;;  %v3495_v6 = vmul.f32 %v3239_v22, %v2727_v11  ;;  %v1797_v5 = vmul.f32 0.7978846, %v7419_v36  ;;  %v7502_v22 = vpop.f32.mrf.mxu0  ;;  %v3796_v18 = vld [vmem:[#allocation8 + $0x3c0] sm:$0xff]  ;;  %4301 = vmatpush2.msra.mxu0 %v3764_v45  ;;  %v10330_v36 = vld [vmem:[#allocation37_spill] sm:$0xff] }
 0x21a   :  { %10320 = vst [vmem:[#allocation27_spill] sm:$0xff] %v7476_v33  ;;  %10321 = vst [vmem:[#allocation68_spill] sm:$0xff] %v7483_v4  ;;  %v1799_v42 = vmul.f32 0.7978846, %v7429_v60  ;;  %v2316_v20 = vadd.f32 1.0, %v2060_v51  ;;  %v7493_v31 = vadd.f32 %v7167_v2, %v5940_v56  ;;  %3934 = vmatmul.mubr.f32.gmra.mxu0 %v10323_v23  ;;  %v5093_v30 = vpop.eup %5092  ;;  %v7499_v26 = vmul.f32 %v3318_v34, %v7328_v59  ;;  %v10326_v59 = vld [vmem:[#allocation33_spill] sm:$0xff]  ;;  %v7527_v23 = vpop.f32.mrf.mxu1 }
 0x21b   :  { %5106 = vtanh.f32 %v2559_v3  ;;  %v2309_v15 = vadd.f32 1.0, %v2053_v24  ;;  %v1804_v11 = vmul.f32 0.7978846, %v7412_v49  ;;  %4158 = vmatprep.mubr.f32.mxu1 %v3495_v6  ;;  %10325 = vst [vmem:[#allocation88_spill] sm:$0xff] %v7502_v22  ;;  %v5095_v52 = vpop.eup %5094  ;;  %v2311_v2 = vadd.f32 1.0, %v2055_v35  ;;  %4526 = vmatpush2.msra.mxu1 %v3796_v18  ;;  %10328 = vst [vmem:[#allocation89_spill] sm:$0xff] %v7527_v23 }
 0x21c   :  { %10322 = vst [vmem:[#allocation29_spill] sm:$0xff] %v7493_v31  ;;  %10324 = vst [vmem:[#allocation18_spill] sm:$0xff] %v7499_v26  ;;  %v2318_v58 = vadd.f32 1.0, %v2062_v62  ;;  %v1549_v10 = vmul.f32 %v7476_v33, %v7476_v33  ;;  %v1556_v51 = vmul.f32 %v7480_v19, %v7480_v19  ;;  %4159 = vmatmul.mubr.f32.gmra.mxu1 %v10326_v59  ;;  %v7510_v34 = vmul.f32 0.5, %v7412_v49  ;;  %v10329_v59 = vld [vmem:[#allocation71_spill] sm:$0xff]  ;;  %v10332_v23 = vld [vmem:[#allocation36_spill] sm:$0xff] }
 0x21d   :  { %v1806_v3 = vmul.f32 0.7978846, %v7433_v1  ;;  %v7514_v24 = vmul.f32 0.5, %v7433_v1  ;;  %v1558_v43 = vmul.f32 %v7487_v8, %v7487_v8  ;;  %4302 = vmatprep.subr.mxu0 %v10175_v32  ;;  %v3324_v35 = vadd.f32 1.0, %v5093_v30  ;;  %4527 = vmatprep.subr.mxu1 %v10175_v32 }
 0x21e   :  { %v7519_v21 = vpop.eup %5096  ;;  %v2572_v62 = vmul.f32 %v2316_v20, %v1804_v11  ;;  %v1551_v6 = vmul.f32 %v7493_v31, %v7493_v31  ;;  %v7525_v49 = vadd.f32 %v7224_v38, %v5898_v25  ;;  %v3326_v45 = vadd.f32 1.0, %v5095_v52  ;;  %v7534_v20 = vpop.f32.mrf.mxu0 }
 0x21f   :  { %10327 = vst [vmem:[#allocation33_spill] sm:$0xff] %v7519_v21  ;;  %v7530_v1 = vpop.eup %5098  ;;  %v2565_v18 = vmul.f32 %v2309_v15, %v1797_v5  ;;  %v2733_v60 = vmul.f32 0.5, %v10329_v59  ;;  %v3245_v30 = vadd.f32 1.0, %v10330_v36  ;;  %v2567_v11 = vmul.f32 %v2311_v2, %v1799_v42  ;;  %v7544_v42 = vpop.f32.mrf.mxu1 }
 0x220   :  { %v2574_v26 = vmul.f32 %v2318_v58, %v1806_v3  ;;  %v2061_v4 = vmul.f32 0.044715, %v1549_v10  ;;  %v2068_v21 = vmul.f32 0.044715, %v1556_v51  ;;  %v2070_v38 = vmul.f32 0.044715, %v1558_v43  ;;  %v7552_v58 = vpop.f32.mrf.mxu0 }
 0x221   :  { %v3501_v55 = vmul.f32 %v3245_v30, %v2733_v60  ;;  %v2735_v44 = vmul.f32 0.5, %v10331_v12  ;;  %v3247_v22 = vadd.f32 1.0, %v10332_v23  ;;  %5108 = vtanh.f32 %v2572_v62  ;;  %v7570_v62 = vpop.f32.mrf.mxu1 }
 0x222   :  { %v5101_v41 = vpop.eup %5100  ;;  %v2063_v52 = vmul.f32 0.044715, %v1551_v6  ;;  %v1564_v5 = vmul.f32 %v7525_v49, %v7525_v49  ;;  %v7542_v36 = vadd.f32 %v7246_v40, %v5904_v48  ;;  %v7547_v2 = vmul.f32 %v3324_v35, %v7390_v16  ;;  %v10337_v16 = vld [vmem:[#allocation35_spill] sm:$0xff]  ;;  %v10338_v35 = vld [vmem:[#allocation34_spill] sm:$0xff] }
 0x223   :  { %v5103_v15 = vpop.eup %5102  ;;  %v7550_v60 = vmul.f32 %v3326_v45, %v7397_v46  ;;  %5110 = vtanh.f32 %v2565_v18  ;;  %3938 = vmatprep.mubr.f32.mxu0 %v3501_v55  ;;  %v3503_v12 = vmul.f32 %v3247_v22, %v2735_v44  ;;  %v2324_v10 = vadd.f32 1.0, %v2068_v21  ;;  %v3763_v44 = vld [vmem:[#allocation8 + $0x2b8] sm:$0xff]  ;;  %v7577_v18 = vpop.f32.mrf.mxu0 }
 0x224   :  { %10333 = vst [vmem:[#allocation71_spill] sm:$0xff] %v7547_v2  ;;  %5112 = vtanh.f32 %v2574_v26  ;;  %v7556_v40 = vadd.f32 %v7205_v17, %v5931_v54  ;;  %v7560_v51 = vadd.f32 %v7220_v13, %v5940_v56  ;;  %3939 = vmatmul.mubr.f32.gmra.mxu0 %v10337_v16  ;;  %v1805_v46 = vmul.f32 0.7978846, %v7476_v33  ;;  %v3795_v22 = vld [vmem:[#allocation8 + $0x3b8] sm:$0xff]  ;;  %v10341_v16 = vld [vmem:[#allocation21_spill] sm:$0xff] }
 0x225   :  { %10334 = vst [vmem:[#allocation37_spill] sm:$0xff] %v7550_v60  ;;  %5114 = vtanh.f32 %v2567_v11  ;;  %v2317_v3 = vadd.f32 1.0, %v2061_v4  ;;  %v2326_v55 = vadd.f32 1.0, %v2070_v38  ;;  %4163 = vmatprep.mubr.f32.mxu1 %v3503_v12  ;;  %v2319_v43 = vadd.f32 1.0, %v2063_v52  ;;  %4303 = vmatpush2.msra.mxu0 %v3763_v44 }
 0x226   :  { %10335 = vst [vmem:[#allocation72_spill] sm:$0xff] %v7556_v40  ;;  %10336 = vst [vmem:[#allocation36_spill] sm:$0xff] %v7560_v51  ;;  %v7564_v26 = vpop.eup %5104  ;;  %v1812_v17 = vmul.f32 0.7978846, %v7480_v19  ;;  %v2076_v21 = vmul.f32 0.044715, %v1564_v5  ;;  %v1566_v13 = vmul.f32 %v7542_v36, %v7542_v36  ;;  %4164 = vmatmul.mubr.f32.gmra.mxu1 %v10338_v35  ;;  %4304 = vmatprep.subr.mxu0 %v10175_v32 }
 0x227   :  { %v3332_v6 = vadd.f32 1.0, %v5101_v41  ;;  %v1807_v4 = vmul.f32 0.7978846, %v7493_v31  ;;  %v7574_v23 = vmul.f32 0.5, %v7480_v19  ;;  %v1814_v45 = vmul.f32 0.7978846, %v7487_v8  ;;  %4528 = vmatpush2.msra.mxu1 %v3795_v22 }
 0x228   :  { %v7580_v59 = vpop.eup %5106  ;;  %v3334_v30 = vadd.f32 1.0, %v5103_v15  ;;  %v2580_v11 = vmul.f32 %v2324_v10, %v1812_v17  ;;  %v1557_v38 = vmul.f32 %v7556_v40, %v7556_v40  ;;  %v1559_v41 = vmul.f32 %v7560_v51, %v7560_v51  ;;  %4529 = vmatprep.subr.mxu1 %v10175_v32  ;;  %v10340_v5 = vld [vmem:[#allocation77_spill] sm:$0xff]  ;;  %v7593_v10 = vpop.f32.mrf.mxu1  ;;  %v10343_v17 = vld [vmem:[#allocation80_spill] sm:$0xff] }
 0x229   :  { %10339 = vst [vmem:[#allocation35_spill] sm:$0xff] %v7580_v59  ;;  %v2573_v19 = vmul.f32 %v2317_v3, %v1805_v46  ;;  %v2582_v52 = vmul.f32 %v2326_v55, %v1814_v45  ;;  %v2741_v12 = vmul.f32 0.5, %v10340_v5  ;;  %v3253_v44 = vadd.f32 1.0, %v10341_v16  ;;  %v10345_v46 = vld [vmem:[#allocation16_spill] sm:$0xff]  ;;  %v7601_v5 = vpop.f32.mrf.mxu0 }
 0x22a   :  { %v2575_v22 = vmul.f32 %v2319_v43, %v1807_v4  ;;  %v2332_v35 = vadd.f32 1.0, %v2076_v21  ;;  %v2078_v31 = vmul.f32 0.044715, %v1566_v13  ;;  %v7591_v15 = vadd.f32 %v7253_v29, %v5931_v54  ;;  %v10346_v55 = vld [vmem:[#allocation40_spill] sm:$0xff] }
 0x22b   :  { %v7597_v33 = vadd.f32 %v10343_v17, %v5940_v56  ;;  %v3509_v60 = vmul.f32 %v3253_v44, %v2741_v12  ;;  %v2743_v3 = vmul.f32 0.5, %v10345_v46  ;;  %v3255_v45 = vadd.f32 1.0, %v10346_v55 }
 0x22c   :  { %10342 = vst [vmem:[#allocation34_spill] sm:$0xff] %v7591_v15  ;;  %5116 = vtanh.f32 %v2580_v11  ;;  %v2069_v43 = vmul.f32 0.044715, %v1557_v38  ;;  %v2071_v21 = vmul.f32 0.044715, %v1559_v41  ;;  %v7605_v29 = vmul.f32 0.5, %v7487_v8  ;;  %v7617_v41 = vpop.f32.mrf.mxu1 }
 0x22d   :  { %10344 = vst [vmem:[#allocation77_spill] sm:$0xff] %v7597_v33  ;;  %v1820_v13 = vmul.f32 0.7978846, %v7525_v49  ;;  %5118 = vtanh.f32 %v2582_v52  ;;  %v7609_v4 = vadd.f32 %v7282_v0, %v5898_v25  ;;  %3943 = vmatprep.mubr.f32.mxu0 %v3509_v60  ;;  %v3511_v12 = vmul.f32 %v3255_v45, %v2743_v3  ;;  %v10348_v38 = vld [vmem:[#allocation78_spill] sm:$0xff]  ;;  %v3762_v60 = vld [vmem:[#allocation8 + $0x2b0] sm:$0xff] }
 0x22e   :  { %v7612_v16 = vmul.f32 %v3332_v6, %v7447_v47  ;;  %v2334_v17 = vadd.f32 1.0, %v2078_v31  ;;  %v1565_v11 = vmul.f32 %v7591_v15, %v7591_v15  ;;  %3944 = vmatmul.mubr.f32.gmra.mxu0 %v10348_v38  ;;  %v5109_v8 = vpop.eup %5108  ;;  %v7620_v52 = vmul.f32 %v3334_v30, %v7457_v14  ;;  %v7628_v31 = vpop.f32.mrf.mxu0  ;;  %v3794_v6 = vld [vmem:[#allocation8 + $0x3b0] sm:$0xff]  ;;  %v10351_v30 = vld [vmem:[#allocation43_spill] sm:$0xff] }
 0x22f   :  { %v2588_v44 = vmul.f32 %v2332_v35, %v1820_v13  ;;  %5120 = vtanh.f32 %v2573_v19  ;;  %v1567_v0 = vmul.f32 %v7597_v33, %v7597_v33  ;;  %v7626_v47 = vadd.f32 %v7294_v53, %v5904_v48  ;;  %4168 = vmatprep.mubr.f32.mxu1 %v3511_v12  ;;  %4305 = vmatpush2.msra.mxu0 %v3762_v60  ;;  %v7644_v38 = vpop.f32.mrf.mxu1 }
 0x230   :  { %10347 = vst [vmem:[#allocation21_spill] sm:$0xff] %v7612_v16  ;;  %10349 = vst [vmem:[#allocation80_spill] sm:$0xff] %v7620_v52  ;;  %v7630_v35 = vpop.eup %5110  ;;  %5122 = vtanh.f32 %v2575_v22  ;;  %v2325_v46 = vadd.f32 1.0, %v2069_v43  ;;  %v2327_v3 = vadd.f32 1.0, %v2071_v21  ;;  %v1822_v14 = vmul.f32 0.7978846, %v7542_v36  ;;  %4169 = vmatmul.mubr.f32.gmra.mxu1 %v10351_v30  ;;  %4306 = vmatprep.subr.mxu0 %v10175_v32  ;;  %v7651_v52 = vpop.f32.mrf.mxu0 }
 0x231   :  { %10350 = vst [vmem:[#allocation16_spill] sm:$0xff] %v7630_v35  ;;  %v5113_v19 = vpop.eup %5112  ;;  %v1813_v55 = vmul.f32 0.7978846, %v7556_v40  ;;  %v1815_v53 = vmul.f32 0.7978846, %v7560_v51  ;;  %v7637_v45 = vmul.f32 0.5, %v7525_v49  ;;  %v1572_v13 = vmul.f32 %v7609_v4, %v7609_v4  ;;  %4530 = vmatpush2.msra.mxu1 %v3794_v6 }
 0x232   :  { %v7642_v22 = vpop.eup %5114  ;;  %v3340_v43 = vadd.f32 1.0, %v5109_v8  ;;  %5124 = vtanh.f32 %v2588_v44  ;;  %v2590_v21 = vmul.f32 %v2334_v17, %v1822_v14  ;;  %v2077_v12 = vmul.f32 0.044715, %v1565_v11  ;;  %4531 = vmatprep.subr.mxu1 %v10175_v32  ;;  %v10353_v30 = vld [vmem:[#allocation17_spill] sm:$0xff]  ;;  %v10354_v40 = vld [vmem:[#allocation51_spill] sm:$0xff]  ;;  %v10355_v14 = vld [vmem:[#allocation30_spill] sm:$0xff] }
 0x233   :  { %10352 = vst [vmem:[#allocation40_spill] sm:$0xff] %v7642_v22  ;;  %v2079_v60 = vmul.f32 0.044715, %v1567_v0  ;;  %v1574_v49 = vmul.f32 %v7626_v47, %v7626_v47  ;;  %v2749_v51 = vmul.f32 0.5, %v10353_v30  ;;  %v3261_v6 = vadd.f32 1.0, %v10354_v40  ;;  %v10356_v35 = vld [vmem:[#allocation48_spill] sm:$0xff] }
 0x234   :  { %v3342_v16 = vadd.f32 1.0, %v5113_v19  ;;  %v2581_v22 = vmul.f32 %v2325_v46, %v1813_v55  ;;  %v2583_v8 = vmul.f32 %v2327_v3, %v1815_v53  ;;  %v7655_v44 = vadd.f32 %v7332_v57, %v5898_v25  ;;  %v7665_v46 = vpop.f32.mrf.mxu1  ;;  %v7671_v53 = vpop.f32.mrf.mxu0  ;;  %v10361_v30 = vld [vmem:[#allocation66_spill] sm:$0xff] }
 0x235   :  { %v2084_v17 = vmul.f32 0.044715, %v1572_v13  ;;  %v3517_v11 = vmul.f32 %v3261_v6, %v2749_v51  ;;  %v2751_v0 = vmul.f32 0.5, %v10355_v14  ;;  %v3263_v2 = vadd.f32 1.0, %v10356_v35  ;;  %v10359_v13 = vld [vmem:[#allocation44_spill] sm:$0xff] }
 0x236   :  { %v7660_v59 = vmul.f32 %v3340_v43, %v7510_v34  ;;  %v7663_v40 = vmul.f32 0.5, %v7542_v36  ;;  %5126 = vtanh.f32 %v2590_v21  ;;  %v2333_v19 = vadd.f32 1.0, %v2077_v12  ;;  %v3793_v12 = vld [vmem:[#allocation8 + $0x3a8] sm:$0xff] }
 0x237   :  { %v2335_v3 = vadd.f32 1.0, %v2079_v60  ;;  %v2086_v55 = vmul.f32 0.044715, %v1574_v49  ;;  %v7669_v57 = vadd.f32 %v7300_v63, %v5931_v54  ;;  %3948 = vmatprep.mubr.f32.mxu0 %v3517_v11  ;;  %v3519_v51 = vmul.f32 %v3263_v2, %v2751_v0  ;;  %v10364_v11 = vld [vmem:[#allocation19_spill] sm:$0xff]  ;;  %v10365_v0 = vld [vmem:[#allocation54_spill] sm:$0xff]  ;;  %4532 = vmatpush2.msra.mxu1 %v3793_v12 }
 0x238   :  { %10357 = vst [vmem:[#allocation78_spill] sm:$0xff] %v7660_v59  ;;  %5128 = vtanh.f32 %v2581_v22  ;;  %v1821_v34 = vmul.f32 0.7978846, %v7591_v15  ;;  %v1580_v36 = vmul.f32 %v7655_v44, %v7655_v44  ;;  %v7678_v35 = vadd.f32 %v7355_v50, %v5904_v48  ;;  %3949 = vmatmul.mubr.f32.gmra.mxu0 %v10359_v13  ;;  %v3761_v22 = vld [vmem:[#allocation8 + $0x2a8] sm:$0xff]  ;;  %v10363_v50 = vld [vmem:[#allocation46_spill] sm:$0xff]  ;;  %4533 = vmatprep.subr.mxu1 %v10175_v32 }
 0x239   :  { %10358 = vst [vmem:[#allocation43_spill] sm:$0xff] %v7669_v57  ;;  %v5117_v43 = vpop.eup %5116  ;;  %v7682_v63 = vmul.f32 %v3342_v16, %v7514_v24  ;;  %5130 = vtanh.f32 %v2583_v8  ;;  %v1823_v2 = vmul.f32 0.7978846, %v7597_v33  ;;  %v2340_v21 = vadd.f32 1.0, %v2084_v17  ;;  %4173 = vmatprep.mubr.f32.mxu1 %v3519_v51  ;;  %v7692_v16 = vpop.f32.mrf.mxu1  ;;  %4307 = vmatpush2.msra.mxu0 %v3761_v22  ;;  %v10367_v22 = vld [vmem:[#allocation56_spill] sm:$0xff] }
 0x23a   :  { %v5119_v60 = vpop.eup %5118  ;;  %v2589_v49 = vmul.f32 %v2333_v19, %v1821_v34  ;;  %v7687_v6 = vadd.f32 %v10361_v30, %v5940_v56  ;;  %4174 = vmatmul.mubr.f32.gmra.mxu1 %v10363_v50  ;;  %v2757_v14 = vmul.f32 0.5, %v10364_v11  ;;  %v3269_v24 = vadd.f32 1.0, %v10365_v0  ;;  %v7697_v34 = vpop.f32.mrf.mxu0  ;;  %4308 = vmatprep.subr.mxu0 %v10175_v32 }
 0x23b   :  { %10360 = vst [vmem:[#allocation17_spill] sm:$0xff] %v7682_v63  ;;  %v2591_v8 = vmul.f32 %v2335_v3, %v1823_v2  ;;  %v1828_v17 = vmul.f32 0.7978846, %v7609_v4  ;;  %v2342_v51 = vadd.f32 1.0, %v2086_v55  ;;  %v1573_v19 = vmul.f32 %v7669_v57, %v7669_v57 }
 0x23c   :  { %10362 = vst [vmem:[#allocation51_spill] sm:$0xff] %v7687_v6  ;;  %v7700_v13 = vpop.eup %5120  ;;  %v2092_v30 = vmul.f32 0.044715, %v1580_v36  ;;  %v1582_v50 = vmul.f32 %v7678_v35, %v7678_v35  ;;  %v3525_v11 = vmul.f32 %v3269_v24, %v2757_v14  ;;  %v3271_v3 = vadd.f32 1.0, %v10367_v22  ;;  %v10369_v36 = vld [vmem:[#allocation86_spill] sm:$0xff]  ;;  %v10370_v14 = vld [vmem:[#allocation20_spill] sm:$0xff]  ;;  %v7716_v22 = vpop.f32.mrf.mxu1 }
 0x23d   :  { %10366 = vst [vmem:[#allocation30_spill] sm:$0xff] %v7700_v13  ;;  %v7706_v55 = vpop.eup %5122  ;;  %v3348_v2 = vadd.f32 1.0, %v5117_v43  ;;  %v3350_v0 = vadd.f32 1.0, %v5119_v60  ;;  %v2596_v33 = vmul.f32 %v2340_v21, %v1828_v17  ;;  %v1830_v12 = vmul.f32 0.7978846, %v7626_v47  ;;  %10371 = vst [vmem:[#allocation44_spill] sm:$0xff] %v7716_v22  ;;  %v7722_v17 = vpop.f32.mrf.mxu0 }
 0x23e   :  { %10368 = vst [vmem:[#allocation48_spill] sm:$0xff] %v7706_v55  ;;  %5132 = vtanh.f32 %v2589_v49  ;;  %v1575_v15 = vmul.f32 %v7687_v6, %v7687_v6  ;;  %v7713_v63 = vadd.f32 %v10369_v36, %v5898_v25  ;;  %3953 = vmatprep.mubr.f32.mxu0 %v3525_v11  ;;  %v2759_v24 = vmul.f32 0.5, %v10370_v14  ;;  %v10372_v49 = vld [vmem:[#allocation53_spill] sm:$0xff]  ;;  %10373 = vst [vmem:[#allocation66_spill] sm:$0xff] %v7722_v17  ;;  %v10374_v25 = vld [vmem:[#allocation87_spill] sm:$0xff] }
 0x23f   :  { %v5125_v59 = vpop.eup %5124  ;;  %5134 = vtanh.f32 %v2591_v8  ;;  %v7719_v43 = vmul.f32 0.5, %v7609_v4  ;;  %v2598_v21 = vmul.f32 %v2342_v51, %v1830_v12  ;;  %v2085_v60 = vmul.f32 0.044715, %v1573_v19  ;;  %3954 = vmatmul.mubr.f32.gmra.mxu0 %v10372_v49  ;;  %v3760_v12 = vld [vmem:[#allocation8 + $0x2a0] sm:$0xff] }
 0x240   :  { %v2348_v55 = vadd.f32 1.0, %v2092_v30  ;;  %v2094_v13 = vmul.f32 0.044715, %v1582_v50  ;;  %v7726_v11 = vadd.f32 %v10374_v25, %v5904_v48  ;;  %v3527_v36 = vmul.f32 %v3271_v3, %v2759_v24  ;;  %v7741_v50 = vpop.f32.mrf.mxu1  ;;  %v3792_v24 = vld [vmem:[#allocation8 + $0x3a0] sm:$0xff]  ;;  %4309 = vmatpush2.msra.mxu0 %v3760_v12 }
 0x241   :  { %v7729_v14 = vmul.f32 %v3348_v2, %v7574_v23  ;;  %v7732_v8 = vmul.f32 %v3350_v0, %v7605_v29  ;;  %5136 = vtanh.f32 %v2596_v33  ;;  %v7735_v4 = vmul.f32 0.5, %v7626_v47  ;;  %10377 = vst [vmem:[#allocation54_spill] sm:$0xff] %v7741_v50  ;;  %v10378_v29 = vld [vmem:[#allocation52_spill] sm:$0xff]  ;;  %v10380_v47 = vld [vmem:[#allocation15_spill] sm:$0xff]  ;;  %4534 = vmatpush2.msra.mxu1 %v3792_v24  ;;  %4310 = vmatprep.subr.mxu0 %v10175_v32 }
 0x242   :  { %v1829_v51 = vmul.f32 0.7978846, %v7669_v57  ;;  %v2087_v19 = vmul.f32 0.044715, %v1575_v15  ;;  %v1836_v30 = vmul.f32 0.7978846, %v7655_v44  ;;  %v1588_v48 = vmul.f32 %v7713_v63, %v7713_v63  ;;  %4178 = vmatprep.mubr.f32.mxu1 %v3527_v36  ;;  %v7749_v15 = vpop.f32.mrf.mxu0  ;;  %4535 = vmatprep.subr.mxu1 %v10175_v32  ;;  %v7772_v24 = vpop.f32.mrf.mxu1 }
 0x243   :  { %10375 = vst [vmem:[#allocation46_spill] sm:$0xff] %v7729_v14  ;;  %10376 = vst [vmem:[#allocation19_spill] sm:$0xff] %v7732_v8  ;;  %v5127_v23 = vpop.eup %5126  ;;  %v3356_v3 = vadd.f32 1.0, %v5125_v59  ;;  %5138 = vtanh.f32 %v2598_v21  ;;  %v7745_v33 = vadd.f32 %v10378_v29, %v5931_v54  ;;  %v290_v2 = vsub.s32 4, %v10380_v47  ;;  %v10381_v0 = vld [vmem:[#allocation32_spill] sm:$0xff] }
 0x244   :  { %4179 = vmatmul.mubr.f32.gmra.mxu1 %v10381_v0  ;;  %10382 = vst [vmem:[#allocation86_spill] sm:$0xff] %v7749_v15  ;;  %v2341_v49 = vadd.f32 1.0, %v2085_v60  ;;  %v2604_v25 = vmul.f32 %v2348_v55, %v1836_v30  ;;  %v2350_v36 = vadd.f32 1.0, %v2094_v13  ;;  %v1590_v57 = vmul.f32 %v7726_v11, %v7726_v11  ;;  %v10384_v0 = vld [vmem:[#allocation74_spill] sm:$0xff]  ;;  %10387 = vst [vmem:[#allocation52_spill] sm:$0xff] %v7772_v24 }
 0x245   :  { %10379 = vst [vmem:[#allocation56_spill] sm:$0xff] %v7745_v33  ;;  %v7753_v59 = vpop.eup %5128  ;;  %v1831_v21 = vmul.f32 0.7978846, %v7687_v6  ;;  %v7757_v29 = vmul.f32 0.5, %v7655_v44  ;;  %v7761_v8 = vadd.f32 %v10384_v0, %v5940_v56  ;;  %v298_v60 = vsub.s32 6, %v10380_v47 }
 0x246   :  { %10383 = vst [vmem:[#allocation20_spill] sm:$0xff] %v7753_v59  ;;  %v7766_v13 = vpop.eup %5130  ;;  %v2343_v55 = vadd.f32 1.0, %v2087_v19  ;;  %v1838_v30 = vmul.f32 0.7978846, %v7678_v35  ;;  %v7770_v12 = vmul.f32 0.5, %v7678_v35  ;;  %v7775_v0 = vmul.f32 %v3356_v3, %v7637_v45  ;;  %v7779_v59 = vld [vmem:[#allocation7] sm:$0xff]  ;;  %v7784_v19 = vpop.f32.mrf.mxu0 }
 0x247   :  { %10385 = vst [vmem:[#allocation53_spill] sm:$0xff] %v7761_v8  ;;  %10386 = vst [vmem:[#allocation87_spill] sm:$0xff] %v7766_v13  ;;  %v2100_v44 = vmul.f32 0.044715, %v1588_v48  ;;  %v3358_v6 = vadd.f32 1.0, %v5127_v23  ;;  %v1581_v14 = vmul.f32 %v7745_v33, %v7745_v33  ;;  %v7782_v13 = vrot.slane %v7779_v59, %v290_v2  ;;  %v10390_v23 = vld [vmem:[#allocation41_spill] sm:$0xff] }
 0x248   :  { %10388 = vst [vmem:[#allocation15_spill] sm:$0xff] %v7775_v0  ;;  %10389 = vst [vmem:[#allocation32_spill] sm:$0xff] %v7784_v19  ;;  %v2597_v15 = vmul.f32 %v2341_v49, %v1829_v51  ;;  %5140 = vtanh.f32 %v2604_v25  ;;  %v2606_v35 = vmul.f32 %v2350_v36, %v1838_v30  ;;  %v2102_v48 = vmul.f32 0.044715, %v1590_v57  ;;  %v10391_v0 = vld [vmem:[#allocation57_spill] sm:$0xff]  ;;  %v10393_v19 = vld [vmem:[#allocation22_spill] sm:$0xff]  ;;  %v7799_v57 = vpop.f32.mrf.mxu1 }
 0x249   :  { %v1583_v24 = vmul.f32 %v7761_v8, %v7761_v8  ;;  %v7789_v45 = vrot.slane %v7779_v59, %v298_v60  ;;  %v2765_v3 = vmul.f32 0.5, %v10390_v23  ;;  %v3277_v22 = vadd.f32 1.0, %v10391_v0  ;;  %v10394_v49 = vld [vmem:[#allocation59_spill] sm:$0xff] }
 0x24a   :  { %v2356_v50 = vadd.f32 1.0, %v2100_v44  ;;  %v7795_v2 = vadd.f32 %v7406_v37, %v5931_v54  ;;  %v2767_v51 = vmul.f32 0.5, %v10393_v19  ;;  %v3279_v25 = vadd.f32 1.0, %v10394_v49  ;;  %v7807_v44 = vpop.f32.mrf.mxu0 }
 0x24b   :  { %v7801_v36 = vpop.eup %5132  ;;  %v2599_v30 = vmul.f32 %v2343_v55, %v1831_v21  ;;  %v2093_v60 = vmul.f32 0.044715, %v1581_v14  ;;  %v7805_v23 = vadd.f32 %v7421_v27, %v7782_v13  ;;  %v3533_v0 = vmul.f32 %v3277_v22, %v2765_v3  ;;  %v3759_v22 = vld [vmem:[#allocation8 + $0x298] sm:$0xff] }
 0x24c   :  { %10392 = vst [vmem:[#allocation74_spill] sm:$0xff] %v7795_v2  ;;  %10395 = vst [vmem:[#allocation41_spill] sm:$0xff] %v7801_v36  ;;  %v7809_v17 = vpop.eup %5134  ;;  %5142 = vtanh.f32 %v2606_v35  ;;  %v1844_v54 = vmul.f32 0.7978846, %v7713_v63  ;;  %v2358_v37 = vadd.f32 1.0, %v2102_v48  ;;  %v3535_v19 = vmul.f32 %v3279_v25, %v2767_v51  ;;  %v3791_v21 = vld [vmem:[#allocation8 + $0x398] sm:$0xff]  ;;  %4311 = vmatpush2.msra.mxu0 %v3759_v22 }
 0x24d   :  { %10396 = vst [vmem:[#allocation57_spill] sm:$0xff] %v7809_v17  ;;  %v7813_v49 = vmul.f32 %v3358_v6, %v7663_v40  ;;  %v2095_v36 = vmul.f32 0.044715, %v1583_v24  ;;  %v7817_v14 = vadd.f32 %v7414_v7, %v5940_v56  ;;  %v7821_v27 = vadd.f32 %v7442_v39, %v7789_v45  ;;  %3958 = vmatprep.mubr.f32.mxu0 %v3533_v0  ;;  %v10399_v6 = vld [vmem:[#allocation60_spill] sm:$0xff]  ;;  %v7827_v56 = vpop.f32.mrf.mxu1  ;;  %v10401_v3 = vld [vmem:[#allocation62_spill] sm:$0xff] }
 0x24e   :  { %v5137_v55 = vpop.eup %5136  ;;  %5144 = vtanh.f32 %v2597_v15  ;;  %v2612_v35 = vmul.f32 %v2356_v50, %v1844_v54  ;;  %v1846_v48 = vmul.f32 0.7978846, %v7726_v11  ;;  %v1589_v40 = vmul.f32 %v7795_v2, %v7795_v2  ;;  %4183 = vmatprep.mubr.f32.mxu1 %v3535_v19  ;;  %3959 = vmatmul.mubr.f32.gmra.mxu0 %v10399_v6  ;;  %10400 = vst [vmem:[#allocation60_spill] sm:$0xff] %v7827_v56  ;;  %v7833_v50 = vpop.f32.mrf.mxu0 }
 0x24f   :  { %10397 = vst [vmem:[#allocation22_spill] sm:$0xff] %v7813_v49  ;;  %10398 = vst [vmem:[#allocation59_spill] sm:$0xff] %v7817_v14  ;;  %5146 = vtanh.f32 %v2599_v30  ;;  %v1837_v7 = vmul.f32 0.7978846, %v7745_v33  ;;  %v2349_v39 = vadd.f32 1.0, %v2093_v60  ;;  %v1344_v24 = vmul.f32 %v7805_v23, %v7805_v23  ;;  %4184 = vmatmul.mubr.f32.gmra.mxu1 %v10401_v3  ;;  %4312 = vmatprep.subr.mxu0 %v10175_v32 }
 0x250   :  { %v5139_v15 = vpop.eup %5138  ;;  %v1839_v51 = vmul.f32 0.7978846, %v7761_v8  ;;  %v7837_v25 = vmul.f32 0.5, %v7713_v63  ;;  %v2614_v0 = vmul.f32 %v2358_v37, %v1846_v48  ;;  %v294_v30 = vsub.s32 5, %v10380_v47  ;;  %4536 = vmatpush2.msra.mxu1 %v3791_v21  ;;  %v10402_v63 = vld [vmem:[#allocation23_spill] sm:$0xff]  ;;  %v10403_v37 = vld [vmem:[#allocation64_spill] sm:$0xff]  ;;  %v7848_v8 = vpop.f32.mrf.mxu1 }
 0x251   :  { %v3364_v60 = vadd.f32 1.0, %v5137_v55  ;;  %v2351_v54 = vadd.f32 1.0, %v2095_v36  ;;  %v1591_v19 = vmul.f32 %v7817_v14, %v7817_v14  ;;  %v1346_v22 = vmul.f32 %v7821_v27, %v7821_v27  ;;  %4537 = vmatprep.subr.mxu1 %v10175_v32  ;;  %10404 = vst [vmem:[#allocation62_spill] sm:$0xff] %v7848_v8  ;;  %v7851_v49 = vpop.f32.mrf.mxu0  ;;  %v10406_v8 = vld [vmem:[#allocation28_spill] sm:$0xff] }
 0x252   :  { %5148 = vtanh.f32 %v2612_v35  ;;  %v2101_v6 = vmul.f32 0.044715, %v1589_v40  ;;  %v2773_v3 = vmul.f32 0.5, %v10402_v63  ;;  %v3285_v48 = vadd.f32 1.0, %v10403_v37  ;;  %10405 = vst [vmem:[#allocation23_spill] sm:$0xff] %v7851_v49  ;;  %v7868_v49 = vpop.f32.mrf.mxu1 }
 0x253   :  { %v3366_v21 = vadd.f32 1.0, %v5139_v15  ;;  %v2605_v33 = vmul.f32 %v2349_v39, %v1837_v7  ;;  %v1856_v55 = vmul.f32 0.044715, %v1344_v24  ;;  %v302_v36 = vsub.s32 7, %v10380_v47  ;;  %v10407_v7 = vld [vmem:[#allocation81_spill] sm:$0xff] }
 0x254   :  { %5150 = vtanh.f32 %v2614_v0  ;;  %v7854_v17 = vrot.slane %v7779_v59, %v294_v30  ;;  %v7858_v35 = vadd.f32 %v7472_v61, %v7782_v13  ;;  %v3541_v40 = vmul.f32 %v3285_v48, %v2773_v3 }
 0x255   :  { %v5141_v63 = vpop.eup %5140  ;;  %v2103_v37 = vmul.f32 0.044715, %v1591_v19  ;;  %v1858_v56 = vmul.f32 0.044715, %v1346_v22  ;;  %v2775_v15 = vmul.f32 0.5, %v10406_v8  ;;  %v3287_v39 = vadd.f32 1.0, %v10407_v7 }
 0x256   :  { %v7863_v47 = vmul.f32 %v3364_v60, %v7719_v43  ;;  %v2607_v24 = vmul.f32 %v2351_v54, %v1839_v51  ;;  %v7866_v0 = vmul.f32 0.5, %v7726_v11  ;;  %v2357_v30 = vadd.f32 1.0, %v2101_v6  ;;  %3963 = vmatprep.mubr.f32.mxu0 %v3541_v40  ;;  %v10409_v22 = vld [vmem:[#allocation42_spill] sm:$0xff]  ;;  %v7878_v43 = vpop.f32.mrf.mxu0  ;;  %v3758_v51 = vld [vmem:[#allocation8 + $0x290] sm:$0xff] }
 0x257   :  { %v2112_v61 = vadd.f32 1.0, %v1856_v55  ;;  %v7871_v3 = vrot.slane %v7779_v59, %v302_v36  ;;  %v7875_v8 = vadd.f32 %v7496_v28, %v7789_v45  ;;  %v3543_v19 = vmul.f32 %v3287_v39, %v2775_v15  ;;  %3964 = vmatmul.mubr.f32.gmra.mxu0 %v10409_v22  ;;  %v3790_v11 = vld [vmem:[#allocation8 + $0x390] sm:$0xff]  ;;  %v7894_v15 = vpop.f32.mrf.mxu1 }
 0x258   :  { %10408 = vst [vmem:[#allocation64_spill] sm:$0xff] %v7863_v47  ;;  %v7881_v60 = vmul.f32 %v3366_v21, %v7735_v4  ;;  %v1845_v54 = vmul.f32 0.7978846, %v7795_v2  ;;  %v7886_v59 = vadd.f32 %v7451_v9, %v7854_v17  ;;  %v1352_v28 = vmul.f32 %v7858_v35, %v7858_v35  ;;  %4313 = vmatpush2.msra.mxu0 %v3758_v51  ;;  %v10412_v40 = vld [vmem:[#allocation45_spill] sm:$0xff]  ;;  %v10420_v2 = vld [vmem:[#allocation88_spill] sm:$0xff]  ;;  %v10422_v47 = vld [vmem:[#allocation31_spill] sm:$0xff] }
 0x259   :  { %4538 = vmatpush2.msra.mxu1 %v3790_v11  ;;  %v5143_v6 = vpop.eup %5142  ;;  %5152 = vtanh.f32 %v2605_v33  ;;  %v2359_v48 = vadd.f32 1.0, %v2103_v37  ;;  %v1600_v55 = vmul.f32 0.7978846, %v7805_v23  ;;  %v2114_v36 = vadd.f32 1.0, %v1858_v56  ;;  %4188 = vmatprep.mubr.f32.mxu1 %v3543_v19  ;;  %v10414_v56 = vld [vmem:[#allocation65_spill] sm:$0xff] }
 0x25a   :  { %10410 = vst [vmem:[#allocation28_spill] sm:$0xff] %v7881_v60  ;;  %10411 = vst [vmem:[#allocation81_spill] sm:$0xff] %v7886_v59  ;;  %4314 = vmatprep.subr.mxu0 %v10175_v32  ;;  %v3372_v4 = vadd.f32 1.0, %v5141_v63  ;;  %5154 = vtanh.f32 %v2607_v24  ;;  %v2613_v21 = vmul.f32 %v2357_v30, %v1845_v54  ;;  %v1847_v9 = vmul.f32 0.7978846, %v7817_v14  ;;  %4189 = vmatmul.mubr.f32.gmra.mxu1 %v10412_v40  ;;  %v7906_v24 = vpop.f32.mrf.mxu0 }
 0x25b   :  { %4539 = vmatprep.subr.mxu1 %v10175_v32  ;;  %v7897_v7 = vpop.eup %5144  ;;  %v2368_v33 = vmul.f32 %v2112_v61, %v1600_v55  ;;  %v1602_v37 = vmul.f32 0.7978846, %v7821_v27  ;;  %v7902_v39 = vadd.f32 %v10414_v56, %v7871_v3  ;;  %v1354_v63 = vmul.f32 %v7875_v8, %v7875_v8  ;;  %10416 = vst [vmem:[#allocation65_spill] sm:$0xff] %v7906_v24  ;;  %v10418_v55 = vld [vmem:[#allocation49_spill] sm:$0xff]  ;;  %v10419_v56 = vld [vmem:[#allocation70_spill] sm:$0xff] }
 0x25c   :  { %10413 = vst [vmem:[#allocation42_spill] sm:$0xff] %v7897_v7  ;;  %v7908_v30 = vpop.eup %5146  ;;  %v3374_v19 = vadd.f32 1.0, %v5143_v6  ;;  %v7911_v22 = vmul.f32 0.5, %v7805_v23  ;;  %v1345_v61 = vmul.f32 %v7886_v59, %v7886_v59  ;;  %v1864_v51 = vmul.f32 0.044715, %v1352_v28  ;;  %v7923_v7 = vpop.f32.mrf.mxu1 }
 0x25d   :  { %10415 = vst [vmem:[#allocation45_spill] sm:$0xff] %v7902_v39  ;;  %10417 = vst [vmem:[#allocation90_spill] sm:$0xff] %v7908_v30  ;;  %v2615_v11 = vmul.f32 %v2359_v48, %v1847_v9  ;;  %v2370_v54 = vmul.f32 %v2114_v36, %v1602_v37  ;;  %v2781_v40 = vmul.f32 0.5, %v10418_v55  ;;  %v3293_v14 = vadd.f32 1.0, %v10419_v56  ;;  %v10423_v30 = vld [vmem:[#allocation82_spill] sm:$0xff]  ;;  %v7927_v9 = vpop.f32.mrf.mxu0  ;;  %v10429_v56 = vld [vmem:[#allocation69_spill] sm:$0xff] }
 0x25e   :  { %5156 = vtanh.f32 %v2613_v21  ;;  %v7919_v60 = vadd.f32 %v10420_v2, %v7854_v17  ;;  %v2783_v6 = vmul.f32 0.5, %v10422_v47  ;;  %v3295_v23 = vadd.f32 1.0, %v10423_v30 }
 0x25f   :  { %v5149_v24 = vpop.eup %5148  ;;  %5158 = vtanh.f32 %v2368_v33  ;;  %v1347_v28 = vmul.f32 %v7902_v39, %v7902_v39  ;;  %v1866_v48 = vmul.f32 0.044715, %v1354_v63  ;;  %v3549_v36 = vmul.f32 %v3293_v14, %v2781_v40  ;;  %v3757_v63 = vld [vmem:[#allocation8 + $0x288] sm:$0xff] }
 0x260   :  { %10421 = vst [vmem:[#allocation49_spill] sm:$0xff] %v7919_v60  ;;  %v1857_v21 = vmul.f32 0.044715, %v1345_v61  ;;  %v2120_v37 = vadd.f32 1.0, %v1864_v51  ;;  %v7931_v2 = vadd.f32 %v7534_v20, %v7782_v13  ;;  %v3551_v47 = vmul.f32 %v3295_v23, %v2783_v6  ;;  %v3789_v61 = vld [vmem:[#allocation8 + $0x388] sm:$0xff]  ;;  %v7957_v6 = vpop.f32.mrf.mxu0  ;;  %4315 = vmatpush2.msra.mxu0 %v3757_v63 }
 0x261   :  { %v5151_v55 = vpop.eup %5150  ;;  %v7934_v30 = vmul.f32 %v3372_v4, %v7757_v29  ;;  %v7937_v33 = vmul.f32 %v3374_v19, %v7770_v12  ;;  %5160 = vtanh.f32 %v2370_v54  ;;  %v7941_v14 = vadd.f32 %v7544_v42, %v7789_v45  ;;  %3968 = vmatprep.mubr.f32.mxu0 %v3549_v36  ;;  %v10426_v29 = vld [vmem:[#allocation89_spill] sm:$0xff]  ;;  %v10428_v12 = vld [vmem:[#allocation47_spill] sm:$0xff]  ;;  %v7951_v19 = vpop.f32.mrf.mxu1  ;;  %10430 = vst [vmem:[#allocation82_spill] sm:$0xff] %v7957_v6 }
 0x262   :  { %v3380_v51 = vadd.f32 1.0, %v5149_v24  ;;  %v1608_v20 = vmul.f32 0.7978846, %v7858_v35  ;;  %v1353_v40 = vmul.f32 %v7919_v60, %v7919_v60  ;;  %v7948_v4 = vadd.f32 %v10426_v29, %v7871_v3  ;;  %4193 = vmatprep.mubr.f32.mxu1 %v3551_v47  ;;  %3969 = vmatmul.mubr.f32.gmra.mxu0 %v10428_v12 }
 0x263   :  { %10424 = vst [vmem:[#allocation70_spill] sm:$0xff] %v7934_v30  ;;  %10425 = vst [vmem:[#allocation88_spill] sm:$0xff] %v7937_v33  ;;  %5162 = vtanh.f32 %v2615_v11  ;;  %v7954_v42 = vmul.f32 0.5, %v7821_v27  ;;  %v1859_v54 = vmul.f32 0.044715, %v1347_v28  ;;  %v2122_v24 = vadd.f32 1.0, %v1866_v48  ;;  %4194 = vmatmul.mubr.f32.gmra.mxu1 %v10429_v56  ;;  %4316 = vmatprep.subr.mxu0 %v10175_v32 }
 0x264   :  { %10427 = vst [vmem:[#allocation31_spill] sm:$0xff] %v7948_v4  ;;  %v2113_v23 = vadd.f32 1.0, %v1857_v21  ;;  %v2376_v36 = vmul.f32 %v2120_v37, %v1608_v20  ;;  %v7960_v29 = vmul.f32 0.5, %v7858_v35  ;;  %v1360_v47 = vmul.f32 %v7931_v2, %v7931_v2  ;;  %4540 = vmatpush2.msra.mxu1 %v3789_v61  ;;  %v7978_v61 = vpop.f32.mrf.mxu1 }
 0x265   :  { %v3382_v27 = vadd.f32 1.0, %v5151_v55  ;;  %v1601_v11 = vmul.f32 0.7978846, %v7886_v59  ;;  %v1610_v28 = vmul.f32 0.7978846, %v7875_v8  ;;  %v1362_v48 = vmul.f32 %v7941_v14, %v7941_v14  ;;  %4541 = vmatprep.subr.mxu1 %v10175_v32  ;;  %10433 = vst [vmem:[#allocation69_spill] sm:$0xff] %v7978_v61 }
 0x266   :  { %v7970_v21 = vpop.eup %5152  ;;  %v7973_v35 = vmul.f32 %v3380_v51, %v7837_v25  ;;  %v1603_v37 = vmul.f32 0.7978846, %v7902_v39  ;;  %v1865_v63 = vmul.f32 0.044715, %v1353_v40  ;;  %v1355_v55 = vmul.f32 %v7948_v4, %v7948_v4  ;;  %v10435_v59 = vld [vmem:[#allocation38_spill] sm:$0xff]  ;;  %v10436_v32 = vld [vmem:[#allocation73_spill] sm:$0xff] }
 0x267   :  { %10431 = vst [vmem:[#allocation89_spill] sm:$0xff] %v7970_v21  ;;  %v7980_v20 = vpop.eup %5154  ;;  %v2115_v12 = vadd.f32 1.0, %v1859_v54  ;;  %v2378_v56 = vmul.f32 %v2122_v24, %v1610_v28  ;;  %v2789_v33 = vmul.f32 0.5, %v10435_v59  ;;  %v3301_v30 = vadd.f32 1.0, %v10436_v32  ;;  %v7984_v21 = vpop.f32.mrf.mxu0  ;;  %v10438_v61 = vld [vmem:[#allocation39_spill] sm:$0xff] }
 0x268   :  { %10432 = vst [vmem:[#allocation47_spill] sm:$0xff] %v7973_v35  ;;  %10434 = vst [vmem:[#allocation91_spill] sm:$0xff] %v7980_v20  ;;  %v2369_v25 = vmul.f32 %v2113_v23, %v1601_v11  ;;  %5164 = vtanh.f32 %v2376_v36  ;;  %v1872_v51 = vmul.f32 0.044715, %v1360_v47  ;;  %v7988_v40 = vadd.f32 %v7552_v58, %v7854_v17  ;;  %v10439_v20 = vld [vmem:[#allocation75_spill] sm:$0xff]  ;;  %v7999_v36 = vpop.f32.mrf.mxu1 }
 0x269   :  { %v1874_v39 = vmul.f32 0.044715, %v1362_v48  ;;  %v3557_v35 = vmul.f32 %v3301_v30, %v2789_v33  ;;  %v2791_v6 = vmul.f32 0.5, %v10438_v61  ;;  %v3303_v54 = vadd.f32 1.0, %v10439_v20  ;;  %v3756_v11 = vld [vmem:[#allocation8 + $0x280] sm:$0xff] }
 0x26a   :  { %10437 = vst [vmem:[#allocation38_spill] sm:$0xff] %v7988_v40  ;;  %v7993_v24 = vmul.f32 0.5, %v7875_v8  ;;  %v2121_v59 = vadd.f32 1.0, %v1865_v63  ;;  %v1867_v28 = vmul.f32 0.044715, %v1355_v55  ;;  %v7997_v23 = vadd.f32 %v7577_v18, %v7782_v13  ;;  %v8007_v8 = vpop.f32.mrf.mxu0  ;;  %v3788_v48 = vld [vmem:[#allocation8 + $0x380] sm:$0xff]  ;;  %4317 = vmatpush2.msra.mxu0 %v3756_v11 }
 0x26b   :  { %v8001_v47 = vpop.eup %5156  ;;  %v2371_v58 = vmul.f32 %v2115_v12, %v1603_v37  ;;  %5166 = vtanh.f32 %v2378_v56  ;;  %v8005_v30 = vadd.f32 %v7593_v10, %v7789_v45  ;;  %3973 = vmatprep.mubr.f32.mxu0 %v3557_v35  ;;  %v3559_v33 = vmul.f32 %v3303_v54, %v2791_v6  ;;  %v10442_v20 = vld [vmem:[#allocation83_spill] sm:$0xff]  ;;  %4542 = vmatpush2.msra.mxu1 %v3788_v48  ;;  %v10444_v54 = vld [vmem:[#allocation85_spill] sm:$0xff]  ;;  %v8025_v48 = vpop.f32.mrf.mxu1 }
 0x26c   :  { %10440 = vst [vmem:[#allocation73_spill] sm:$0xff] %v8001_v47  ;;  %v5159_v63 = vpop.eup %5158  ;;  %v1609_v18 = vmul.f32 0.7978846, %v7919_v60  ;;  %v2128_v55 = vadd.f32 1.0, %v1872_v51  ;;  %v1361_v61 = vmul.f32 %v7988_v40, %v7988_v40  ;;  %v8014_v37 = vadd.f32 %v7570_v62, %v7871_v3  ;;  %3974 = vmatmul.mubr.f32.gmra.mxu0 %v10442_v20  ;;  %10445 = vst [vmem:[#allocation83_spill] sm:$0xff] %v8025_v48 }
 0x26d   :  { %v8018_v10 = vmul.f32 %v3382_v27, %v7866_v0  ;;  %5168 = vtanh.f32 %v2369_v25  ;;  %v1611_v6 = vmul.f32 0.7978846, %v7948_v4  ;;  %v2130_v35 = vadd.f32 1.0, %v1874_v39  ;;  %4198 = vmatprep.mubr.f32.mxu1 %v3559_v33  ;;  %v8033_v25 = vpop.f32.mrf.mxu0  ;;  %v10449_v4 = vld [vmem:[#allocation24_spill] sm:$0xff] }
 0x26e   :  { %10441 = vst [vmem:[#allocation39_spill] sm:$0xff] %v8014_v37  ;;  %v5161_v12 = vpop.eup %5160  ;;  %v2377_v56 = vmul.f32 %v2121_v59, %v1609_v18  ;;  %v2123_v32 = vadd.f32 1.0, %v1867_v28  ;;  %v1616_v51 = vmul.f32 0.7978846, %v7931_v2  ;;  %v1368_v62 = vmul.f32 %v7997_v23, %v7997_v23  ;;  %4199 = vmatmul.mubr.f32.gmra.mxu1 %v10444_v54  ;;  %10446 = vst [vmem:[#allocation85_spill] sm:$0xff] %v8033_v25  ;;  %v10448_v54 = vld [vmem:[#allocation79_spill] sm:$0xff] }
 0x26f   :  { %10443 = vst [vmem:[#allocation75_spill] sm:$0xff] %v8018_v10  ;;  %5170 = vtanh.f32 %v2371_v58  ;;  %v8028_v0 = vmul.f32 0.5, %v7931_v2  ;;  %v1618_v39 = vmul.f32 0.7978846, %v7941_v14  ;;  %v1370_v27 = vmul.f32 %v8005_v30, %v8005_v30  ;;  %v10452_v25 = vld [vmem:[#allocation25_spill] sm:$0xff] }
 0x270   :  { %v8035_v59 = vpop.eup %5162  ;;  %v3136_v28 = vadd.f32 1.0, %v5159_v63  ;;  %v2384_v33 = vmul.f32 %v2128_v55, %v1616_v51  ;;  %v1873_v11 = vmul.f32 0.044715, %v1361_v61  ;;  %v1363_v18 = vmul.f32 %v8014_v37, %v8014_v37  ;;  %v10451_v61 = vld [vmem:[#allocation63_spill] sm:$0xff] }
 0x271   :  { %10447 = vst [vmem:[#allocation92_spill] sm:$0xff] %v8035_v59  ;;  %v3138_v20 = vadd.f32 1.0, %v5161_v12  ;;  %v2386_v58 = vmul.f32 %v2130_v35, %v1618_v39  ;;  %v2797_v2 = vmul.f32 0.5, %v10448_v54  ;;  %v3309_v60 = vadd.f32 1.0, %v10449_v4  ;;  %v8045_v59 = vpop.f32.mrf.mxu1  ;;  %v8049_v35 = vpop.f32.mrf.mxu0 }
 0x272   :  { %5172 = vtanh.f32 %v2377_v56  ;;  %v2379_v10 = vmul.f32 %v2123_v32, %v1611_v6  ;;  %v1880_v47 = vmul.f32 0.044715, %v1368_v62  ;;  %v8043_v48 = vadd.f32 %v7601_v5, %v7854_v17 }
 0x273   :  { %v1882_v63 = vmul.f32 0.044715, %v1370_v27  ;;  %v3565_v55 = vmul.f32 %v3309_v60, %v2797_v2  ;;  %v2799_v51 = vmul.f32 0.5, %v10451_v61  ;;  %v3311_v12 = vadd.f32 1.0, %v10452_v25  ;;  %v10457_v61 = vld [vmem:[#allocation26_spill] sm:$0xff] }
 0x274   :  { %10450 = vst [vmem:[#allocation79_spill] sm:$0xff] %v8043_v48  ;;  %5174 = vtanh.f32 %v2384_v33  ;;  %v2129_v39 = vadd.f32 1.0, %v1873_v11  ;;  %v1875_v4 = vmul.f32 0.044715, %v1363_v18  ;;  %v8053_v6 = vadd.f32 %v7628_v31, %v7782_v13  ;;  %v10454_v33 = vld [vmem:[#allocation76_spill] sm:$0xff] }
 0x275   :  { %v5165_v56 = vpop.eup %5164  ;;  %v8056_v5 = vmul.f32 0.5, %v7941_v14  ;;  %5176 = vtanh.f32 %v2386_v58  ;;  %v8060_v60 = vadd.f32 %v7644_v38, %v7789_v45  ;;  %3978 = vmatprep.mubr.f32.mxu0 %v3565_v55  ;;  %v3567_v32 = vmul.f32 %v3311_v12, %v2799_v51  ;;  %v8070_v14 = vpop.f32.mrf.mxu1 }
 0x276   :  { %v1617_v62 = vmul.f32 0.7978846, %v7988_v40  ;;  %v2136_v27 = vadd.f32 1.0, %v1880_v47  ;;  %v1369_v25 = vmul.f32 %v8043_v48, %v8043_v48  ;;  %v8067_v31 = vadd.f32 %v7617_v41, %v7871_v3  ;;  %3979 = vmatmul.mubr.f32.gmra.mxu0 %v10454_v33  ;;  %v8078_v47 = vpop.f32.mrf.mxu0 }
 0x277   :  { %v8073_v11 = vmul.f32 %v3136_v28, %v7911_v22  ;;  %v8076_v38 = vmul.f32 %v3138_v20, %v7954_v42  ;;  %5178 = vtanh.f32 %v2379_v10  ;;  %v2138_v18 = vadd.f32 1.0, %v1882_v63  ;;  %4203 = vmatprep.mubr.f32.mxu1 %v3567_v32 }
 0x278   :  { %10453 = vst [vmem:[#allocation24_spill] sm:$0xff] %v8067_v31  ;;  %v5167_v58 = vpop.eup %5166  ;;  %v2385_v54 = vmul.f32 %v2129_v39, %v1617_v62  ;;  %v2131_v2 = vadd.f32 1.0, %v1875_v4  ;;  %v1624_v41 = vmul.f32 0.7978846, %v7997_v23  ;;  %v1376_v55 = vmul.f32 %v8053_v6, %v8053_v6  ;;  %4204 = vmatmul.mubr.f32.gmra.mxu1 %v10457_v61  ;;  %v8095_v4 = vpop.f32.mrf.mxu1  ;;  %v10459_v62 = vld [vmem:[#allocation67_spill] sm:$0xff]  ;;  %v10460_v61 = vld [vmem:[#allocation33_spill] sm:$0xff] }
 0x279   :  { %10455 = vst [vmem:[#allocation63_spill] sm:$0xff] %v8073_v11  ;;  %10456 = vst [vmem:[#allocation25_spill] sm:$0xff] %v8076_v38  ;;  %v3144_v22 = vadd.f32 1.0, %v5165_v56  ;;  %v1619_v28 = vmul.f32 0.7978846, %v8014_v37  ;;  %v1378_v10 = vmul.f32 %v8060_v60, %v8060_v60  ;;  %v8091_v51 = vmul.f32 0.5, %v7997_v23  ;;  %v8099_v40 = vpop.f32.mrf.mxu0 }
 0x27a   :  { %v1626_v42 = vmul.f32 0.7978846, %v8005_v30  ;;  %v8088_v20 = vpop.eup %5168  ;;  %v2392_v63 = vmul.f32 %v2136_v27, %v1624_v41  ;;  %v1881_v12 = vmul.f32 0.044715, %v1369_v25  ;;  %v1371_v39 = vmul.f32 %v8067_v31, %v8067_v31 }
 0x27b   :  { %10458 = vst [vmem:[#allocation76_spill] sm:$0xff] %v8088_v20  ;;  %v3146_v56 = vadd.f32 1.0, %v5167_v58  ;;  %v2805_v33 = vmul.f32 0.5, %v10459_v62  ;;  %v3317_v37 = vadd.f32 1.0, %v10460_v61  ;;  %5180 = vtanh.f32 %v2385_v54  ;;  %v10462_v20 = vld [vmem:[#allocation50_spill] sm:$0xff]  ;;  %v8113_v54 = vpop.f32.mrf.mxu1 }
 0x27c   :  { %v2394_v32 = vmul.f32 %v2138_v18, %v1626_v42  ;;  %v8101_v38 = vpop.eup %5170  ;;  %v2387_v27 = vmul.f32 %v2131_v2, %v1619_v28  ;;  %v1888_v23 = vmul.f32 0.044715, %v1376_v55  ;;  %v8105_v25 = vadd.f32 %v7651_v52, %v7854_v17  ;;  %v8124_v55 = vpop.f32.mrf.mxu0 }
 0x27d   :  { %v1890_v41 = vmul.f32 0.044715, %v1378_v10  ;;  %v3573_v11 = vmul.f32 %v3317_v37, %v2805_v33  ;;  %v2807_v58 = vmul.f32 0.5, %v10462_v20  ;;  %v3319_v18 = vadd.f32 1.0, %v7530_v1 }
 0x27e   :  { %10461 = vst [vmem:[#allocation26_spill] sm:$0xff] %v8105_v25  ;;  %5182 = vtanh.f32 %v2392_v63  ;;  %v2137_v42 = vadd.f32 1.0, %v1881_v12  ;;  %v1883_v62 = vmul.f32 0.044715, %v1371_v39  ;;  %v8111_v61 = vadd.f32 %v7671_v53, %v7782_v13 }
 0x27f   :  { %v8115_v2 = vpop.eup %5172  ;;  %v8118_v52 = vmul.f32 %v3144_v22, %v7960_v29  ;;  %5184 = vtanh.f32 %v2394_v32  ;;  %v8122_v37 = vadd.f32 %v7692_v16, %v7789_v45  ;;  %3983 = vmatprep.mubr.f32.mxu0 %v3573_v11  ;;  %v3575_v1 = vmul.f32 %v3319_v18, %v2807_v58  ;;  %v10466_v29 = vld [vmem:[#allocation68_spill] sm:$0xff]  ;;  %v8144_v58 = vpop.f32.mrf.mxu1 }
 0x280   :  { %10463 = vst [vmem:[#allocation67_spill] sm:$0xff] %v8115_v2  ;;  %v1625_v28 = vmul.f32 0.7978846, %v8043_v48  ;;  %v2144_v53 = vadd.f32 1.0, %v1888_v23  ;;  %v1377_v10 = vmul.f32 %v8105_v25, %v8105_v25  ;;  %v8131_v20 = vadd.f32 %v7665_v46, %v7871_v3  ;;  %3984 = vmatmul.mubr.f32.gmra.mxu0 %v10466_v29  ;;  %v10468_v23 = vld [vmem:[#allocation18_spill] sm:$0xff]  ;;  %v10475_v2 = vld [vmem:[#allocation35_spill] sm:$0xff] }
 0x281   :  { %10464 = vst [vmem:[#allocation33_spill] sm:$0xff] %v8118_v52  ;;  %v5175_v22 = vpop.eup %5174  ;;  %v8135_v16 = vmul.f32 %v3146_v56, %v7993_v24  ;;  %5186 = vtanh.f32 %v2387_v27  ;;  %v8138_v11 = vmul.f32 0.5, %v8005_v30  ;;  %v2146_v63 = vadd.f32 1.0, %v1890_v41  ;;  %4208 = vmatprep.mubr.f32.mxu1 %v3575_v1  ;;  %v8153_v41 = vpop.f32.mrf.mxu0 }
 0x282   :  { %10465 = vst [vmem:[#allocation50_spill] sm:$0xff] %v8131_v20  ;;  %v5177_v12 = vpop.eup %5176  ;;  %v2393_v39 = vmul.f32 %v2137_v42, %v1625_v28  ;;  %v2139_v32 = vadd.f32 1.0, %v1883_v62  ;;  %v1632_v33 = vmul.f32 0.7978846, %v8053_v6  ;;  %v1384_v46 = vmul.f32 %v8111_v61, %v8111_v61  ;;  %4209 = vmatmul.mubr.f32.gmra.mxu1 %v10468_v23  ;;  %10469 = vst [vmem:[#allocation18_spill] sm:$0xff] %v8153_v41 }
 0x283   :  { %10467 = vst [vmem:[#allocation68_spill] sm:$0xff] %v8135_v16  ;;  %v1627_v24 = vmul.f32 0.7978846, %v8067_v31  ;;  %v8148_v56 = vmul.f32 0.5, %v8053_v6  ;;  %v1634_v30 = vmul.f32 0.7978846, %v8060_v60  ;;  %v1386_v27 = vmul.f32 %v8122_v37, %v8122_v37 }
 0x284   :  { %v8155_v18 = vpop.eup %5178  ;;  %v3152_v42 = vadd.f32 1.0, %v5175_v22  ;;  %v2400_v62 = vmul.f32 %v2144_v53, %v1632_v33  ;;  %v1889_v1 = vmul.f32 0.044715, %v1377_v10  ;;  %v1379_v28 = vmul.f32 %v8131_v20, %v8131_v20  ;;  %v10471_v31 = vld [vmem:[#allocation55_spill] sm:$0xff]  ;;  %v10474_v22 = vld [vmem:[#allocation84_spill] sm:$0xff] }
 0x285   :  { %10470 = vst [vmem:[#allocation93_spill] sm:$0xff] %v8155_v18  ;;  %v3154_v29 = vadd.f32 1.0, %v5177_v12  ;;  %v2402_v23 = vmul.f32 %v2146_v63, %v1634_v30  ;;  %v2813_v6 = vmul.f32 0.5, %v10471_v31  ;;  %v3325_v48 = vadd.f32 1.0, %v7564_v26  ;;  %v8165_v18 = vpop.f32.mrf.mxu1  ;;  %v8169_v63 = vpop.f32.mrf.mxu0 }
 0x286   :  { %5188 = vtanh.f32 %v2393_v39  ;;  %v2395_v16 = vmul.f32 %v2139_v32, %v1627_v24  ;;  %v1896_v52 = vmul.f32 0.044715, %v1384_v46  ;;  %v8163_v41 = vadd.f32 %v7697_v34, %v7854_v17  ;;  %10473 = vst [vmem:[#allocation94_spill] sm:$0xff] %v8165_v18  ;;  %10476 = vst [vmem:[#allocation84_spill] sm:$0xff] %v8169_v63  ;;  %v10477_v39 = vld [vmem:[#allocation66_spill] sm:$0xff] }
 0x287   :  { %v1898_v53 = vmul.f32 0.044715, %v1386_v27  ;;  %v3581_v10 = vmul.f32 %v3325_v48, %v2813_v6  ;;  %v2815_v33 = vmul.f32 0.5, %v10474_v22  ;;  %v3327_v12 = vadd.f32 1.0, %v10475_v2  ;;  %v10479_v48 = vld [vmem:[#allocation54_spill] sm:$0xff]  ;;  %v10482_v6 = vld [vmem:[#allocation71_spill] sm:$0xff] }
 0x288   :  { %10472 = vst [vmem:[#allocation55_spill] sm:$0xff] %v8163_v41  ;;  %5190 = vtanh.f32 %v2400_v62  ;;  %v2145_v31 = vadd.f32 1.0, %v1889_v1  ;;  %v1891_v26 = vmul.f32 0.044715, %v1379_v28  ;;  %v8173_v32 = vadd.f32 %v10477_v39, %v7782_v13  ;;  %v8175_v46 = vpop.eup %5180  ;;  %v10480_v1 = vld [vmem:[#allocation44_spill] sm:$0xff] }
 0x289   :  { %10478 = vst [vmem:[#allocation35_spill] sm:$0xff] %v8175_v46  ;;  %v8178_v34 = vmul.f32 0.5, %v8060_v60  ;;  %5192 = vtanh.f32 %v2402_v23  ;;  %v8182_v24 = vadd.f32 %v10479_v48, %v7789_v45  ;;  %3988 = vmatprep.mubr.f32.mxu0 %v3581_v10  ;;  %v3583_v2 = vmul.f32 %v3327_v12, %v2815_v33  ;;  %v8192_v60 = vpop.f32.mrf.mxu1  ;;  %v8200_v33 = vpop.f32.mrf.mxu0 }
 0x28a   :  { %v1633_v30 = vmul.f32 0.7978846, %v8105_v25  ;;  %v2152_v27 = vadd.f32 1.0, %v1896_v52  ;;  %v1385_v62 = vmul.f32 %v8163_v41, %v8163_v41  ;;  %v8189_v28 = vadd.f32 %v10480_v1, %v7871_v3  ;;  %3989 = vmatmul.mubr.f32.gmra.mxu0 %v10482_v6  ;;  %10483 = vst [vmem:[#allocation54_spill] sm:$0xff] %v8192_v60  ;;  %10486 = vst [vmem:[#allocation95_spill] sm:$0xff] %v8200_v33  ;;  %v10487_v25 = vld [vmem:[#allocation37_spill] sm:$0xff] }
 0x28b   :  { %v5183_v23 = vpop.eup %5182  ;;  %v8195_v22 = vmul.f32 %v3152_v42, %v8028_v0  ;;  %v8198_v10 = vmul.f32 %v3154_v29, %v8056_v5  ;;  %5194 = vtanh.f32 %v2395_v16  ;;  %v2154_v52 = vadd.f32 1.0, %v1898_v53  ;;  %4213 = vmatprep.mubr.f32.mxu1 %v3583_v2  ;;  %v8221_v46 = vpop.f32.mrf.mxu0 }
 0x28c   :  { %10481 = vst [vmem:[#allocation66_spill] sm:$0xff] %v8189_v28  ;;  %v5185_v12 = vpop.eup %5184  ;;  %v2401_v39 = vmul.f32 %v2145_v31, %v1633_v30  ;;  %v2147_v48 = vadd.f32 1.0, %v1891_v26  ;;  %v1640_v1 = vmul.f32 0.7978846, %v8111_v61  ;;  %v1392_v6 = vmul.f32 %v8173_v32, %v8173_v32  ;;  %4214 = vmatmul.mubr.f32.gmra.mxu1 %v10487_v25  ;;  %v8217_v30 = vpop.f32.mrf.mxu1 }
 0x28d   :  { %10484 = vst [vmem:[#allocation44_spill] sm:$0xff] %v8195_v22  ;;  %10485 = vst [vmem:[#allocation71_spill] sm:$0xff] %v8198_v10  ;;  %v1635_v0 = vmul.f32 0.7978846, %v8131_v20  ;;  %v8208_v5 = vmul.f32 0.5, %v8111_v61  ;;  %v1394_v42 = vmul.f32 %v8182_v24, %v8182_v24  ;;  %v3160_v53 = vadd.f32 1.0, %v5183_v23 }
 0x28e   :  { %v1642_v16 = vmul.f32 0.7978846, %v8122_v37  ;;  %v8213_v29 = vpop.eup %5186  ;;  %v2408_v31 = vmul.f32 %v2152_v27, %v1640_v1  ;;  %v1897_v26 = vmul.f32 0.044715, %v1385_v62  ;;  %v1387_v2 = vmul.f32 %v8189_v28, %v8189_v28  ;;  %10489 = vst [vmem:[#allocation96_spill] sm:$0xff] %v8217_v30  ;;  %v10490_v10 = vld [vmem:[#allocation58_spill] sm:$0xff] }
 0x28f   :  { %10488 = vst [vmem:[#allocation37_spill] sm:$0xff] %v8213_v29  ;;  %v3162_v25 = vadd.f32 1.0, %v5185_v12  ;;  %v2821_v61 = vmul.f32 0.5, %v10490_v10  ;;  %v10491_v22 = vld [vmem:[#allocation16_spill] sm:$0xff]  ;;  %5196 = vtanh.f32 %v2401_v39  ;;  %v2403_v18 = vmul.f32 %v2147_v48, %v1635_v0  ;;  %v10492_v23 = vld [vmem:[#allocation86_spill] sm:$0xff]  ;;  %v10494_v29 = vld [vmem:[#allocation61_spill] sm:$0xff]  ;;  %v8233_v39 = vpop.f32.mrf.mxu1 }
 0x290   :  { %v2410_v20 = vmul.f32 %v2154_v52, %v1642_v16  ;;  %v3333_v33 = vadd.f32 1.0, %v10491_v22  ;;  %v1904_v60 = vmul.f32 0.044715, %v1392_v6  ;;  %v8225_v27 = vadd.f32 %v10492_v23, %v7854_v17  ;;  %v10495_v30 = vld [vmem:[#allocation40_spill] sm:$0xff] }
 0x291   :  { %v1906_v62 = vmul.f32 0.044715, %v1394_v42  ;;  %v2823_v63 = vmul.f32 0.5, %v10494_v29  ;;  %v3335_v12 = vadd.f32 1.0, %v10495_v30  ;;  %5198 = vtanh.f32 %v2408_v31  ;;  %v10496_v22 = vld [vmem:[#allocation32_spill] sm:$0xff]  ;;  %v8244_v42 = vpop.f32.mrf.mxu0 }
 0x292   :  { %10493 = vst [vmem:[#allocation58_spill] sm:$0xff] %v8225_v27  ;;  %v3589_v1 = vmul.f32 %v3333_v33, %v2821_v61  ;;  %v2153_v52 = vadd.f32 1.0, %v1897_v26  ;;  %v1899_v10 = vmul.f32 0.044715, %v1387_v2  ;;  %v8231_v16 = vadd.f32 %v10496_v22, %v7782_v13  ;;  %10498 = vst [vmem:[#allocation86_spill] sm:$0xff] %v8244_v42  ;;  %v10499_v2 = vld [vmem:[#allocation52_spill] sm:$0xff] }
 0x293   :  { %v8235_v48 = vpop.eup %5188  ;;  %v8238_v6 = vmul.f32 0.5, %v8122_v37  ;;  %5200 = vtanh.f32 %v2410_v20  ;;  %v8242_v33 = vadd.f32 %v7799_v57, %v7789_v45  ;;  %v3591_v0 = vmul.f32 %v3335_v12, %v2823_v63  ;;  %v10501_v37 = vld [vmem:[#allocation21_spill] sm:$0xff] }
 0x294   :  { %10497 = vst [vmem:[#allocation16_spill] sm:$0xff] %v8235_v48  ;;  %3993 = vmatprep.mubr.f32.mxu0 %v3589_v1  ;;  %v1641_v29 = vmul.f32 0.7978846, %v8163_v41  ;;  %v2160_v31 = vadd.f32 1.0, %v1904_v60  ;;  %v1393_v26 = vmul.f32 %v8225_v27, %v8225_v27  ;;  %v8251_v30 = vadd.f32 %v10499_v2, %v7871_v3  ;;  %v10504_v2 = vld [vmem:[#allocation80_spill] sm:$0xff]  ;;  %v10508_v41 = vld [vmem:[#allocation27_spill] sm:$0xff] }
 0x295   :  { %3994 = vmatmul.mubr.f32.gmra.mxu0 %v10501_v37  ;;  %v5191_v20 = vpop.eup %5190  ;;  %v8255_v57 = vmul.f32 %v3160_v53, %v8091_v51  ;;  %v8258_v63 = vmul.f32 %v3162_v25, %v8138_v11  ;;  %5202 = vtanh.f32 %v2403_v18  ;;  %v2162_v61 = vadd.f32 1.0, %v1906_v62  ;;  %4218 = vmatprep.mubr.f32.mxu1 %v3591_v0  ;;  %v8264_v37 = vpop.f32.mrf.mxu1  ;;  %v10512_v48 = vld [vmem:[#allocation48_spill] sm:$0xff] }
 0x296   :  { %10500 = vst [vmem:[#allocation61_spill] sm:$0xff] %v8251_v30  ;;  %v5193_v60 = vpop.eup %5192  ;;  %v2409_v23 = vmul.f32 %v2153_v52, %v1641_v29  ;;  %v2155_v1 = vadd.f32 1.0, %v1899_v10  ;;  %v1648_v12 = vmul.f32 0.7978846, %v8173_v32  ;;  %v1400_v22 = vmul.f32 %v8231_v16, %v8231_v16  ;;  %4219 = vmatmul.mubr.f32.gmra.mxu1 %v10504_v2  ;;  %10505 = vst [vmem:[#allocation52_spill] sm:$0xff] %v8264_v37  ;;  %v8273_v25 = vpop.f32.mrf.mxu0 }
 0x297   :  { %10502 = vst [vmem:[#allocation40_spill] sm:$0xff] %v8255_v57  ;;  %10503 = vst [vmem:[#allocation32_spill] sm:$0xff] %v8258_v63  ;;  %v1643_v51 = vmul.f32 0.7978846, %v8189_v28  ;;  %v8268_v11 = vmul.f32 0.5, %v8173_v32  ;;  %v1402_v53 = vmul.f32 %v8242_v33, %v8242_v33  ;;  %v3168_v52 = vadd.f32 1.0, %v5191_v20 }
 0x298   :  { %v1650_v18 = vmul.f32 0.7978846, %v8182_v24  ;;  %10506 = vst [vmem:[#allocation21_spill] sm:$0xff] %v8273_v25  ;;  %v8275_v62 = vpop.eup %5194  ;;  %v2416_v10 = vmul.f32 %v2160_v31, %v1648_v12  ;;  %v1905_v0 = vmul.f32 0.044715, %v1393_v26  ;;  %v1395_v29 = vmul.f32 %v8251_v30, %v8251_v30  ;;  %v10509_v63 = vld [vmem:[#allocation30_spill] sm:$0xff] }
 0x299   :  { %10507 = vst [vmem:[#allocation80_spill] sm:$0xff] %v8275_v62  ;;  %v3170_v2 = vadd.f32 1.0, %v5193_v60  ;;  %v2829_v32 = vmul.f32 0.5, %v10508_v41  ;;  %v3341_v57 = vadd.f32 1.0, %v10509_v63  ;;  %5204 = vtanh.f32 %v2409_v23  ;;  %v8285_v62 = vpop.f32.mrf.mxu1  ;;  %v10511_v20 = vld [vmem:[#allocation29_spill] sm:$0xff] }
 0x29a   :  { %v2418_v28 = vmul.f32 %v2162_v61, %v1650_v18  ;;  %v2411_v37 = vmul.f32 %v2155_v1, %v1643_v51  ;;  %v1912_v42 = vmul.f32 0.044715, %v1400_v22  ;;  %v8283_v25 = vadd.f32 %v7807_v44, %v7854_v17  ;;  %v8289_v61 = vpop.f32.mrf.mxu0 }
 0x29b   :  { %v1914_v31 = vmul.f32 0.044715, %v1402_v53  ;;  %v3597_v26 = vmul.f32 %v3341_v57, %v2829_v32  ;;  %v2831_v12 = vmul.f32 0.5, %v10511_v20  ;;  %v3343_v60 = vadd.f32 1.0, %v10512_v48  ;;  %10513 = vst [vmem:[#allocation30_spill] sm:$0xff] %v8289_v61  ;;  %v10515_v57 = vld [vmem:[#allocation62_spill] sm:$0xff] }
 0x29c   :  { %10510 = vst [vmem:[#allocation27_spill] sm:$0xff] %v8283_v25  ;;  %5206 = vtanh.f32 %v2416_v10  ;;  %v2161_v41 = vadd.f32 1.0, %v1905_v0  ;;  %v1907_v63 = vmul.f32 0.044715, %v1395_v29  ;;  %v8293_v23 = vadd.f32 %v7833_v50, %v7782_v13  ;;  %v8295_v1 = vpop.eup %5196  ;;  %v10516_v50 = vld [vmem:[#allocation60_spill] sm:$0xff]  ;;  %v10518_v0 = vld [vmem:[#allocation78_spill] sm:$0xff] }
 0x29d   :  { %10514 = vst [vmem:[#allocation29_spill] sm:$0xff] %v8295_v1  ;;  %v8298_v44 = vmul.f32 0.5, %v8182_v24  ;;  %5208 = vtanh.f32 %v2418_v28  ;;  %v8302_v22 = vadd.f32 %v10515_v57, %v7789_v45  ;;  %3998 = vmatprep.mubr.f32.mxu0 %v3597_v26  ;;  %v3599_v48 = vmul.f32 %v3343_v60, %v2831_v12  ;;  %v8312_v24 = vpop.f32.mrf.mxu1  ;;  %v8320_v26 = vpop.f32.mrf.mxu0 }
 0x29e   :  { %v1649_v51 = vmul.f32 0.7978846, %v8225_v27  ;;  %v2168_v18 = vadd.f32 1.0, %v1912_v42  ;;  %v1401_v53 = vmul.f32 %v8283_v25, %v8283_v25  ;;  %v8309_v10 = vadd.f32 %v10516_v50, %v7871_v3  ;;  %3999 = vmatmul.mubr.f32.gmra.mxu0 %v10518_v0  ;;  %10519 = vst [vmem:[#allocation62_spill] sm:$0xff] %v8312_v24  ;;  %v5199_v28 = vpop.eup %5198  ;;  %10522 = vst [vmem:[#allocation97_spill] sm:$0xff] %v8320_v26  ;;  %v10523_v0 = vld [vmem:[#allocation17_spill] sm:$0xff] }
 0x29f   :  { %v8315_v29 = vmul.f32 %v3168_v52, %v8148_v56  ;;  %v8318_v32 = vmul.f32 %v3170_v2, %v8178_v34  ;;  %5210 = vtanh.f32 %v2411_v37  ;;  %v2170_v42 = vadd.f32 1.0, %v1914_v31  ;;  %4223 = vmatprep.mubr.f32.mxu1 %v3599_v48  ;;  %v10526_v27 = vld [vmem:[#allocation72_spill] sm:$0xff]  ;;  %v8341_v24 = vpop.f32.mrf.mxu0 }
 0x2a0   :  { %10517 = vst [vmem:[#allocation48_spill] sm:$0xff] %v8309_v10  ;;  %v5201_v20 = vpop.eup %5200  ;;  %v2417_v12 = vmul.f32 %v2161_v41, %v1649_v51  ;;  %v2163_v60 = vadd.f32 1.0, %v1907_v63  ;;  %v1656_v57 = vmul.f32 0.7978846, %v8231_v16  ;;  %v1408_v50 = vmul.f32 %v8293_v23, %v8293_v23  ;;  %4224 = vmatmul.mubr.f32.gmra.mxu1 %v10523_v0  ;;  %v8337_v51 = vpop.f32.mrf.mxu1  ;;  %10528 = vst [vmem:[#allocation72_spill] sm:$0xff] %v8341_v24 }
 0x2a1   :  { %10520 = vst [vmem:[#allocation60_spill] sm:$0xff] %v8315_v29  ;;  %10521 = vst [vmem:[#allocation78_spill] sm:$0xff] %v8318_v32  ;;  %v1651_v56 = vmul.f32 0.7978846, %v8251_v30  ;;  %v8328_v34 = vmul.f32 0.5, %v8231_v16  ;;  %v1410_v52 = vmul.f32 %v8302_v22, %v8302_v22  ;;  %v3176_v31 = vadd.f32 1.0, %v5199_v28 }
 0x2a2   :  { %v1658_v37 = vmul.f32 0.7978846, %v8242_v33  ;;  %v8333_v2 = vpop.eup %5202  ;;  %v2424_v41 = vmul.f32 %v2168_v18, %v1656_v57  ;;  %v1913_v63 = vmul.f32 0.044715, %v1401_v53  ;;  %v1403_v48 = vmul.f32 %v8309_v10, %v8309_v10  ;;  %10525 = vst [vmem:[#allocation98_spill] sm:$0xff] %v8337_v51  ;;  %v10527_v32 = vld [vmem:[#allocation20_spill] sm:$0xff] }
 0x2a3   :  { %10524 = vst [vmem:[#allocation17_spill] sm:$0xff] %v8333_v2  ;;  %v3178_v0 = vadd.f32 1.0, %v5201_v20  ;;  %v2837_v16 = vmul.f32 0.5, %v10526_v27  ;;  %v3349_v29 = vadd.f32 1.0, %v10527_v32  ;;  %5212 = vtanh.f32 %v2417_v12  ;;  %v10529_v28 = vld [vmem:[#allocation23_spill] sm:$0xff]  ;;  %v10531_v2 = vld [vmem:[#allocation36_spill] sm:$0xff]  ;;  %v8353_v12 = vpop.f32.mrf.mxu1 }
 0x2a4   :  { %v2426_v30 = vmul.f32 %v2170_v42, %v1658_v37  ;;  %v2419_v61 = vmul.f32 %v2163_v60, %v1651_v56  ;;  %v1920_v26 = vmul.f32 0.044715, %v1408_v50  ;;  %v8345_v18 = vadd.f32 %v10529_v28, %v7854_v17  ;;  %v10532_v51 = vld [vmem:[#allocation87_spill] sm:$0xff]  ;;  %10533 = vst [vmem:[#allocation23_spill] sm:$0xff] %v8353_v12  ;;  %v8364_v37 = vpop.f32.mrf.mxu0 }
 0x2a5   :  { %v1922_v53 = vmul.f32 0.044715, %v1410_v52  ;;  %v3605_v57 = vmul.f32 %v3349_v29, %v2837_v16  ;;  %v2839_v1 = vmul.f32 0.5, %v10531_v2  ;;  %v3351_v20 = vadd.f32 1.0, %v10532_v51  ;;  %v10538_v28 = vld [vmem:[#allocation19_spill] sm:$0xff] }
 0x2a6   :  { %10530 = vst [vmem:[#allocation20_spill] sm:$0xff] %v8345_v18  ;;  %5214 = vtanh.f32 %v2424_v41  ;;  %v2169_v42 = vadd.f32 1.0, %v1913_v63  ;;  %v1915_v27 = vmul.f32 0.044715, %v1403_v48  ;;  %v8351_v32 = vadd.f32 %v7878_v43, %v7782_v13  ;;  %v8355_v60 = vpop.eup %5204 }
 0x2a7   :  { %v8358_v50 = vmul.f32 0.5, %v8242_v33  ;;  %5216 = vtanh.f32 %v2426_v30  ;;  %v8362_v29 = vadd.f32 %v7894_v15, %v7789_v45  ;;  %4003 = vmatprep.mubr.f32.mxu0 %v3605_v57  ;;  %v3607_v56 = vmul.f32 %v3351_v20, %v2839_v1  ;;  %v10535_v33 = vld [vmem:[#allocation46_spill] sm:$0xff]  ;;  %v8384_v57 = vpop.f32.mrf.mxu1 }
 0x2a8   :  { %v1657_v52 = vmul.f32 0.7978846, %v8283_v25  ;;  %v2176_v43 = vadd.f32 1.0, %v1920_v26  ;;  %v1409_v2 = vmul.f32 %v8345_v18, %v8345_v18  ;;  %v8371_v41 = vadd.f32 %v7868_v49, %v7871_v3  ;;  %4004 = vmatmul.mubr.f32.gmra.mxu0 %v10535_v33 }
 0x2a9   :  { %v5207_v30 = vpop.eup %5206  ;;  %v8375_v15 = vmul.f32 %v3176_v31, %v8208_v5  ;;  %v8378_v1 = vmul.f32 %v3178_v0, %v8238_v6  ;;  %5218 = vtanh.f32 %v2419_v61  ;;  %v2178_v63 = vadd.f32 1.0, %v1922_v53  ;;  %4228 = vmatprep.mubr.f32.mxu1 %v3607_v56  ;;  %v8393_v0 = vpop.f32.mrf.mxu0 }
 0x2aa   :  { %10534 = vst [vmem:[#allocation36_spill] sm:$0xff] %v8371_v41  ;;  %v5209_v26 = vpop.eup %5208  ;;  %v2425_v48 = vmul.f32 %v2169_v42, %v1657_v52  ;;  %v2171_v51 = vadd.f32 1.0, %v1915_v27  ;;  %v1664_v16 = vmul.f32 0.7978846, %v8293_v23  ;;  %v1416_v49 = vmul.f32 %v8351_v32, %v8351_v32  ;;  %4229 = vmatmul.mubr.f32.gmra.mxu1 %v10538_v28  ;;  %10539 = vst [vmem:[#allocation19_spill] sm:$0xff] %v8393_v0  ;;  %v10541_v28 = vld [vmem:[#allocation34_spill] sm:$0xff]  ;;  %v8405_v24 = vpop.f32.mrf.mxu1 }
 0x2ab   :  { %10536 = vst [vmem:[#allocation87_spill] sm:$0xff] %v8375_v15  ;;  %10537 = vst [vmem:[#allocation46_spill] sm:$0xff] %v8378_v1  ;;  %v1659_v5 = vmul.f32 0.7978846, %v8309_v10  ;;  %v8388_v6 = vmul.f32 0.5, %v8293_v23  ;;  %v1418_v31 = vmul.f32 %v8362_v29, %v8362_v29  ;;  %v3184_v20 = vadd.f32 1.0, %v5207_v30 }
 0x2ac   :  { %v1666_v61 = vmul.f32 0.7978846, %v8302_v22  ;;  %v8395_v53 = vpop.eup %5210  ;;  %v2432_v42 = vmul.f32 %v2176_v43, %v1664_v16  ;;  %v1921_v27 = vmul.f32 0.044715, %v1409_v2  ;;  %v1411_v56 = vmul.f32 %v8371_v41, %v8371_v41  ;;  %v10542_v10 = vld [vmem:[#allocation41_spill] sm:$0xff] }
 0x2ad   :  { %10540 = vst [vmem:[#allocation99_spill] sm:$0xff] %v8395_v53  ;;  %v3186_v52 = vadd.f32 1.0, %v5209_v26  ;;  %v2845_v23 = vmul.f32 0.5, %v10541_v28  ;;  %v3357_v25 = vadd.f32 1.0, %v10542_v10  ;;  %5220 = vtanh.f32 %v2425_v48  ;;  %v10543_v15 = vld [vmem:[#allocation65_spill] sm:$0xff]  ;;  %10545 = vst [vmem:[#allocation41_spill] sm:$0xff] %v8405_v24 }
 0x2ae   :  { %v2434_v33 = vmul.f32 %v2178_v63, %v1666_v61  ;;  %v2427_v1 = vmul.f32 %v2171_v51, %v1659_v5  ;;  %v1928_v12 = vmul.f32 0.044715, %v1416_v49  ;;  %v8403_v0 = vadd.f32 %v10543_v15, %v7854_v17  ;;  %v10546_v30 = vld [vmem:[#allocation77_spill] sm:$0xff]  ;;  %v8409_v63 = vpop.f32.mrf.mxu0  ;;  %v10560_v24 = vld [vmem:[#allocation51_spill] sm:$0xff] }
 0x2af   :  { %v1930_v43 = vmul.f32 0.044715, %v1418_v31  ;;  %v3613_v2 = vmul.f32 %v3357_v25, %v2845_v23  ;;  %v2847_v16 = vmul.f32 0.5, %v10546_v30  ;;  %v10547_v53 = vld [vmem:[#allocation57_spill] sm:$0xff]  ;;  %5222 = vtanh.f32 %v2432_v42  ;;  %v10549_v42 = vld [vmem:[#allocation15_spill] sm:$0xff] }
 0x2b0   :  { %10544 = vst [vmem:[#allocation34_spill] sm:$0xff] %v8403_v0  ;;  %v3359_v26 = vadd.f32 1.0, %v10547_v53  ;;  %v2177_v61 = vadd.f32 1.0, %v1921_v27  ;;  %v1923_v10 = vmul.f32 0.044715, %v1411_v56  ;;  %v8413_v48 = vadd.f32 %v7927_v9, %v7782_v13  ;;  %v8415_v51 = vpop.eup %5212 }
 0x2b1   :  { %v8418_v15 = vmul.f32 0.5, %v8302_v22  ;;  %5224 = vtanh.f32 %v2434_v33  ;;  %v8422_v25 = vadd.f32 %v7951_v19, %v7789_v45  ;;  %4008 = vmatprep.mubr.f32.mxu0 %v3613_v2  ;;  %v1665_v5 = vmul.f32 0.7978846, %v8345_v18  ;;  %v8432_v22 = vpop.f32.mrf.mxu1  ;;  %v8440_v33 = vpop.f32.mrf.mxu0 }
 0x2b2   :  { %v3615_v49 = vmul.f32 %v3359_v26, %v2847_v16  ;;  %v2184_v31 = vadd.f32 1.0, %v1928_v12  ;;  %v1417_v53 = vmul.f32 %v8403_v0, %v8403_v0  ;;  %v8429_v9 = vadd.f32 %v7923_v7, %v7871_v3  ;;  %4009 = vmatmul.mubr.f32.gmra.mxu0 %v10549_v42  ;;  %10550 = vst [vmem:[#allocation77_spill] sm:$0xff] %v8432_v22  ;;  %v10554_v16 = vld [vmem:[#allocation22_spill] sm:$0xff] }
 0x2b3   :  { %v5215_v27 = vpop.eup %5214  ;;  %v8435_v19 = vmul.f32 %v3184_v20, %v8268_v11  ;;  %v8438_v56 = vmul.f32 %v3186_v52, %v8298_v44  ;;  %5226 = vtanh.f32 %v2427_v1  ;;  %v2186_v12 = vadd.f32 1.0, %v1930_v43  ;;  %10553 = vst [vmem:[#allocation100_spill] sm:$0xff] %v8440_v33  ;;  %v8461_v33 = vpop.f32.mrf.mxu0 }
 0x2b4   :  { %10548 = vst [vmem:[#allocation65_spill] sm:$0xff] %v8429_v9  ;;  %4233 = vmatprep.mubr.f32.mxu1 %v3615_v49  ;;  %v5217_v28 = vpop.eup %5216  ;;  %v2433_v23 = vmul.f32 %v2177_v61, %v1665_v5  ;;  %v2179_v7 = vadd.f32 1.0, %v1923_v10  ;;  %v1672_v2 = vmul.f32 0.7978846, %v8351_v32  ;;  %v1424_v30 = vmul.f32 %v8413_v48, %v8413_v48  ;;  %v8457_v49 = vpop.f32.mrf.mxu1 }
 0x2b5   :  { %10551 = vst [vmem:[#allocation57_spill] sm:$0xff] %v8435_v19  ;;  %10552 = vst [vmem:[#allocation15_spill] sm:$0xff] %v8438_v56  ;;  %4234 = vmatmul.mubr.f32.gmra.mxu1 %v10554_v16  ;;  %v1667_v11 = vmul.f32 0.7978846, %v8371_v41  ;;  %v8448_v44 = vmul.f32 0.5, %v8351_v32  ;;  %v1426_v20 = vmul.f32 %v8422_v25, %v8422_v25  ;;  %v3192_v43 = vadd.f32 1.0, %v5215_v27 }
 0x2b6   :  { %v1674_v1 = vmul.f32 0.7978846, %v8362_v29  ;;  %v8453_v52 = vpop.eup %5218  ;;  %v2440_v26 = vmul.f32 %v2184_v31, %v1672_v2  ;;  %v1929_v61 = vmul.f32 0.044715, %v1417_v53  ;;  %v1419_v10 = vmul.f32 %v8429_v9, %v8429_v9  ;;  %10555 = vst [vmem:[#allocation22_spill] sm:$0xff] %v8457_v49  ;;  %v10556_v16 = vld [vmem:[#allocation43_spill] sm:$0xff] }
 0x2b7   :  { %v3194_v5 = vadd.f32 1.0, %v5217_v28  ;;  %v2853_v32 = vmul.f32 0.5, %v10556_v16  ;;  %v10557_v41 = vld [vmem:[#allocation42_spill] sm:$0xff]  ;;  %5228 = vtanh.f32 %v2433_v23  ;;  %v2435_v56 = vmul.f32 %v2179_v7, %v1667_v11  ;;  %v8473_v23 = vpop.f32.mrf.mxu1  ;;  %v8484_v11 = vpop.f32.mrf.mxu0 }
 0x2b8   :  { %v2442_v42 = vmul.f32 %v2186_v12, %v1674_v1  ;;  %v3365_v18 = vadd.f32 1.0, %v10557_v41  ;;  %v1936_v19 = vmul.f32 0.044715, %v1424_v30  ;;  %v10558_v27 = vld [vmem:[#allocation82_spill] sm:$0xff]  ;;  %v1938_v53 = vmul.f32 0.044715, %v1426_v20 }
 0x2b9   :  { %v8465_v31 = vadd.f32 %v10558_v27, %v7854_v17  ;;  %v2855_v22 = vmul.f32 0.5, %v10560_v24  ;;  %v10561_v49 = vld [vmem:[#allocation90_spill] sm:$0xff]  ;;  %5230 = vtanh.f32 %v2440_v26  ;;  %v2185_v12 = vadd.f32 1.0, %v1929_v61  ;;  %10562 = vst [vmem:[#allocation42_spill] sm:$0xff] %v8473_v23  ;;  %10563 = vst [vmem:[#allocation82_spill] sm:$0xff] %v8484_v11  ;;  %v10564_v61 = vld [vmem:[#allocation69_spill] sm:$0xff] }
 0x2ba   :  { %v3621_v2 = vmul.f32 %v3365_v18, %v2853_v32  ;;  %v3367_v28 = vadd.f32 1.0, %v10561_v49  ;;  %v1931_v1 = vmul.f32 0.044715, %v1419_v10  ;;  %v8471_v41 = vadd.f32 %v7984_v21, %v7782_v13  ;;  %v8475_v7 = vpop.eup %5220  ;;  %v10577_v23 = vld [vmem:[#allocation91_spill] sm:$0xff] }
 0x2bb   :  { %10559 = vst [vmem:[#allocation43_spill] sm:$0xff] %v8465_v31  ;;  %v8478_v30 = vmul.f32 0.5, %v8362_v29  ;;  %5232 = vtanh.f32 %v2442_v42  ;;  %v8482_v24 = vadd.f32 %v7999_v36, %v7789_v45  ;;  %v1673_v20 = vmul.f32 0.7978846, %v8403_v0  ;;  %v10566_v29 = vld [vmem:[#allocation64_spill] sm:$0xff]  ;;  %v10573_v0 = vld [vmem:[#allocation89_spill] sm:$0xff] }
 0x2bc   :  { %4013 = vmatprep.mubr.f32.mxu0 %v3621_v2  ;;  %v3623_v18 = vmul.f32 %v3367_v28, %v2855_v22  ;;  %v2192_v21 = vadd.f32 1.0, %v1936_v19  ;;  %v1425_v26 = vmul.f32 %v8465_v31, %v8465_v31  ;;  %v8491_v10 = vadd.f32 %v10564_v61, %v7871_v3  ;;  %v5223_v49 = vpop.eup %5222  ;;  %v10569_v28 = vld [vmem:[#allocation28_spill] sm:$0xff]  ;;  %v8504_v61 = vpop.f32.mrf.mxu1 }
 0x2bd   :  { %4014 = vmatmul.mubr.f32.gmra.mxu0 %v10566_v29  ;;  %v8495_v36 = vmul.f32 %v3192_v43, %v8328_v34  ;;  %v8498_v22 = vmul.f32 %v3194_v5, %v8358_v50  ;;  %5234 = vtanh.f32 %v2435_v56  ;;  %v2194_v42 = vadd.f32 1.0, %v1938_v53  ;;  %10570 = vst [vmem:[#allocation64_spill] sm:$0xff] %v8504_v61  ;;  %v8513_v5 = vpop.f32.mrf.mxu0 }
 0x2be   :  { %10565 = vst [vmem:[#allocation51_spill] sm:$0xff] %v8491_v10  ;;  %4238 = vmatprep.mubr.f32.mxu1 %v3623_v18  ;;  %v5225_v19 = vpop.eup %5224  ;;  %v2441_v16 = vmul.f32 %v2185_v12, %v1673_v20  ;;  %v2187_v32 = vadd.f32 1.0, %v1931_v1  ;;  %v1680_v27 = vmul.f32 0.7978846, %v8413_v48  ;;  %v1432_v2 = vmul.f32 %v8471_v41, %v8471_v41  ;;  %10571 = vst [vmem:[#allocation28_spill] sm:$0xff] %v8513_v5 }
 0x2bf   :  { %10567 = vst [vmem:[#allocation90_spill] sm:$0xff] %v8495_v36  ;;  %10568 = vst [vmem:[#allocation69_spill] sm:$0xff] %v8498_v22  ;;  %4239 = vmatmul.mubr.f32.gmra.mxu1 %v10569_v28  ;;  %v1675_v34 = vmul.f32 0.7978846, %v8429_v9  ;;  %v8508_v50 = vmul.f32 0.5, %v8413_v48  ;;  %v1434_v43 = vmul.f32 %v8482_v24, %v8482_v24  ;;  %v3200_v12 = vadd.f32 1.0, %v5223_v49  ;;  %v8525_v36 = vpop.f32.mrf.mxu1 }
 0x2c0   :  { %v1682_v56 = vmul.f32 0.7978846, %v8422_v25  ;;  %v8515_v53 = vpop.eup %5226  ;;  %v2448_v1 = vmul.f32 %v2192_v21, %v1680_v27  ;;  %v1937_v18 = vmul.f32 0.044715, %v1425_v26  ;;  %v1427_v20 = vmul.f32 %v8491_v10, %v8491_v10  ;;  %v10572_v9 = vld [vmem:[#allocation56_spill] sm:$0xff]  ;;  %10575 = vst [vmem:[#allocation89_spill] sm:$0xff] %v8525_v36 }
 0x2c1   :  { %v3202_v29 = vadd.f32 1.0, %v5225_v19  ;;  %v2861_v48 = vmul.f32 0.5, %v10572_v9  ;;  %v3373_v61 = vadd.f32 1.0, %v10573_v0  ;;  %5236 = vtanh.f32 %v2441_v16  ;;  %v10576_v49 = vld [vmem:[#allocation53_spill] sm:$0xff] }
 0x2c2   :  { %v2450_v28 = vmul.f32 %v2194_v42, %v1682_v56  ;;  %v2443_v11 = vmul.f32 %v2187_v32, %v1675_v34  ;;  %v1944_v22 = vmul.f32 0.044715, %v1432_v2  ;;  %v8523_v5 = vadd.f32 %v8007_v8, %v7854_v17  ;;  %v8529_v42 = vpop.f32.mrf.mxu0  ;;  %v10579_v16 = vld [vmem:[#allocation85_spill] sm:$0xff] }
 0x2c3   :  { %v1946_v21 = vmul.f32 0.044715, %v1434_v43  ;;  %v3629_v26 = vmul.f32 %v3373_v61, %v2861_v48  ;;  %v2863_v27 = vmul.f32 0.5, %v10576_v49  ;;  %v3375_v19 = vadd.f32 1.0, %v10577_v23  ;;  %10578 = vst [vmem:[#allocation53_spill] sm:$0xff] %v8529_v42 }
 0x2c4   :  { %10574 = vst [vmem:[#allocation56_spill] sm:$0xff] %v8523_v5  ;;  %5238 = vtanh.f32 %v2448_v1  ;;  %v2193_v9 = vadd.f32 1.0, %v1937_v18  ;;  %v1939_v0 = vmul.f32 0.044715, %v1427_v20  ;;  %v8533_v32 = vadd.f32 %v10579_v16, %v7782_v13  ;;  %v8535_v2 = vpop.eup %5228  ;;  %v10580_v1 = vld [vmem:[#allocation83_spill] sm:$0xff]  ;;  %v10582_v20 = vld [vmem:[#allocation70_spill] sm:$0xff] }
 0x2c5   :  { %v8538_v8 = vmul.f32 0.5, %v8422_v25  ;;  %5240 = vtanh.f32 %v2450_v28  ;;  %v8542_v61 = vadd.f32 %v8045_v59, %v7789_v45  ;;  %4018 = vmatprep.mubr.f32.mxu0 %v3629_v26  ;;  %v3631_v23 = vmul.f32 %v3375_v19, %v2863_v27  ;;  %v8552_v25 = vpop.f32.mrf.mxu1  ;;  %v8560_v26 = vpop.f32.mrf.mxu0 }
 0x2c6   :  { %v1681_v34 = vmul.f32 0.7978846, %v8465_v31  ;;  %v2200_v56 = vadd.f32 1.0, %v1944_v22  ;;  %v1433_v43 = vmul.f32 %v8523_v5, %v8523_v5  ;;  %v8549_v18 = vadd.f32 %v10580_v1, %v7871_v3  ;;  %4019 = vmatmul.mubr.f32.gmra.mxu0 %v10582_v20  ;;  %10583 = vst [vmem:[#allocation85_spill] sm:$0xff] %v8552_v25  ;;  %v5231_v28 = vpop.eup %5230  ;;  %10586 = vst [vmem:[#allocation101_spill] sm:$0xff] %v8560_v26  ;;  %v10587_v20 = vld [vmem:[#allocation88_spill] sm:$0xff] }
 0x2c7   :  { %v8555_v59 = vmul.f32 %v3200_v12, %v8388_v6  ;;  %v8558_v48 = vmul.f32 %v3202_v29, %v8418_v15  ;;  %5242 = vtanh.f32 %v2443_v11  ;;  %v2202_v22 = vadd.f32 1.0, %v1946_v21  ;;  %4243 = vmatprep.mubr.f32.mxu1 %v3631_v23  ;;  %v10589_v31 = vld [vmem:[#allocation74_spill] sm:$0xff]  ;;  %v10590_v25 = vld [vmem:[#allocation73_spill] sm:$0xff]  ;;  %v8581_v26 = vpop.f32.mrf.mxu0 }
 0x2c8   :  { %10581 = vst [vmem:[#allocation91_spill] sm:$0xff] %v8549_v18  ;;  %v5233_v49 = vpop.eup %5232  ;;  %v2449_v27 = vmul.f32 %v2193_v9, %v1681_v34  ;;  %v2195_v19 = vadd.f32 1.0, %v1939_v0  ;;  %v1688_v16 = vmul.f32 0.7978846, %v8471_v41  ;;  %v1440_v1 = vmul.f32 %v8533_v32, %v8533_v32  ;;  %4244 = vmatmul.mubr.f32.gmra.mxu1 %v10587_v20  ;;  %v8577_v34 = vpop.f32.mrf.mxu1  ;;  %10591 = vst [vmem:[#allocation74_spill] sm:$0xff] %v8581_v26 }
 0x2c9   :  { %10584 = vst [vmem:[#allocation83_spill] sm:$0xff] %v8555_v59  ;;  %10585 = vst [vmem:[#allocation70_spill] sm:$0xff] %v8558_v48  ;;  %v1683_v6 = vmul.f32 0.7978846, %v8491_v10  ;;  %v8568_v15 = vmul.f32 0.5, %v8471_v41  ;;  %v1442_v12 = vmul.f32 %v8542_v61, %v8542_v61  ;;  %v3208_v21 = vadd.f32 1.0, %v5231_v28 }
 0x2ca   :  { %v1690_v11 = vmul.f32 0.7978846, %v8482_v24  ;;  %v8573_v29 = vpop.eup %5234  ;;  %v2456_v9 = vmul.f32 %v2200_v56, %v1688_v16  ;;  %v1945_v0 = vmul.f32 0.044715, %v1433_v43  ;;  %v1435_v23 = vmul.f32 %v8549_v18, %v8549_v18  ;;  %10588 = vst [vmem:[#allocation88_spill] sm:$0xff] %v8577_v34  ;;  %v10593_v16 = vld [vmem:[#allocation59_spill] sm:$0xff] }
 0x2cb   :  { %v3210_v20 = vadd.f32 1.0, %v5233_v49  ;;  %v2869_v41 = vmul.f32 0.5, %v10589_v31  ;;  %v3381_v42 = vadd.f32 1.0, %v10590_v25  ;;  %5244 = vtanh.f32 %v2449_v27  ;;  %v10594_v34 = vld [vmem:[#allocation92_spill] sm:$0xff]  ;;  %v8593_v27 = vpop.f32.mrf.mxu1 }
 0x2cc   :  { %v2458_v10 = vmul.f32 %v2202_v22, %v1690_v11  ;;  %v2451_v48 = vmul.f32 %v2195_v19, %v1683_v6  ;;  %v1952_v59 = vmul.f32 0.044715, %v1440_v1  ;;  %v8585_v56 = vadd.f32 %v8049_v35, %v7854_v17  ;;  %10595 = vst [vmem:[#allocation59_spill] sm:$0xff] %v8593_v27  ;;  %v8604_v6 = vpop.f32.mrf.mxu0 }
 0x2cd   :  { %v1954_v43 = vmul.f32 0.044715, %v1442_v12  ;;  %v3637_v28 = vmul.f32 %v3381_v42, %v2869_v41  ;;  %v2871_v36 = vmul.f32 0.5, %v10593_v16  ;;  %v3383_v49 = vadd.f32 1.0, %v10594_v34  ;;  %v8624_v16 = vpop.f32.mrf.mxu1 }
 0x2ce   :  { %10592 = vst [vmem:[#allocation73_spill] sm:$0xff] %v8585_v56  ;;  %5246 = vtanh.f32 %v2456_v9  ;;  %v2201_v22 = vadd.f32 1.0, %v1945_v0  ;;  %v1947_v31 = vmul.f32 0.044715, %v1435_v23  ;;  %v8591_v25 = vadd.f32 %v8078_v47, %v7782_v13  ;;  %v8595_v19 = vpop.eup %5236 }
 0x2cf   :  { %v8598_v35 = vmul.f32 0.5, %v8482_v24  ;;  %5248 = vtanh.f32 %v2458_v10  ;;  %v8602_v42 = vadd.f32 %v8095_v4, %v7789_v45  ;;  %4023 = vmatprep.mubr.f32.mxu0 %v3637_v28  ;;  %v3639_v1 = vmul.f32 %v3383_v49, %v2871_v36  ;;  %v10597_v24 = vld [vmem:[#allocation47_spill] sm:$0xff] }
 0x2d0   :  { %v1689_v11 = vmul.f32 0.7978846, %v8523_v5  ;;  %v2208_v47 = vadd.f32 1.0, %v1952_v59  ;;  %v1441_v12 = vmul.f32 %v8585_v56, %v8585_v56  ;;  %v8611_v9 = vadd.f32 %v8070_v14, %v7871_v3  ;;  %4024 = vmatmul.mubr.f32.gmra.mxu0 %v10597_v24  ;;  %v10598_v28 = vld [vmem:[#allocation75_spill] sm:$0xff]  ;;  %10599 = vst [vmem:[#allocation47_spill] sm:$0xff] %v8624_v16  ;;  %v8645_v16 = vpop.f32.mrf.mxu1 }
 0x2d1   :  { %v5239_v10 = vpop.eup %5238  ;;  %v8615_v4 = vmul.f32 %v3208_v21, %v8448_v44  ;;  %v8618_v36 = vmul.f32 %v3210_v20, %v8478_v30  ;;  %5250 = vtanh.f32 %v2451_v48  ;;  %v2210_v0 = vadd.f32 1.0, %v1954_v43  ;;  %4248 = vmatprep.mubr.f32.mxu1 %v3639_v1  ;;  %v8633_v20 = vpop.f32.mrf.mxu0 }
 0x2d2   :  { %10596 = vst [vmem:[#allocation92_spill] sm:$0xff] %v8611_v9  ;;  %v5241_v59 = vpop.eup %5240  ;;  %v2457_v23 = vmul.f32 %v2201_v22, %v1689_v11  ;;  %v2203_v34 = vadd.f32 1.0, %v1947_v31  ;;  %v1696_v41 = vmul.f32 0.7978846, %v8533_v32  ;;  %v1448_v14 = vmul.f32 %v8591_v25, %v8591_v25  ;;  %4249 = vmatmul.mubr.f32.gmra.mxu1 %v10598_v28  ;;  %10600 = vst [vmem:[#allocation75_spill] sm:$0xff] %v8633_v20  ;;  %v10601_v28 = vld [vmem:[#allocation81_spill] sm:$0xff] }
 0x2d3   :  { %v1691_v44 = vmul.f32 0.7978846, %v8549_v18  ;;  %v8628_v30 = vmul.f32 0.5, %v8533_v32  ;;  %v1698_v48 = vmul.f32 0.7978846, %v8542_v61  ;;  %v1450_v21 = vmul.f32 %v8602_v42, %v8602_v42  ;;  %v10602_v18 = vld [vmem:[#allocation76_spill] sm:$0xff] }
 0x2d4   :  { %v8635_v43 = vpop.eup %5242  ;;  %v3216_v49 = vadd.f32 1.0, %v5239_v10  ;;  %v2464_v22 = vmul.f32 %v2208_v47, %v1696_v41  ;;  %v1953_v31 = vmul.f32 0.044715, %v1441_v12  ;;  %v1443_v1 = vmul.f32 %v8611_v9, %v8611_v9  ;;  %10603 = vst [vmem:[#allocation81_spill] sm:$0xff] %v8645_v16  ;;  %v10604_v10 = vld [vmem:[#allocation45_spill] sm:$0xff] }
 0x2d5   :  { %v3218_v11 = vadd.f32 1.0, %v5241_v59  ;;  %v2466_v24 = vmul.f32 %v2210_v0, %v1698_v48  ;;  %v2625_v32 = vmul.f32 0.5, %v10601_v28  ;;  %v3137_v5 = vadd.f32 1.0, %v10602_v18  ;;  %v8649_v0 = vpop.f32.mrf.mxu0 }
 0x2d6   :  { %5252 = vtanh.f32 %v2457_v23  ;;  %v2459_v27 = vmul.f32 %v2203_v34, %v1691_v44  ;;  %v1960_v26 = vmul.f32 0.044715, %v1448_v14  ;;  %v8643_v20 = vadd.f32 %v8124_v55, %v7782_v13  ;;  %10605 = vst [vmem:[#allocation76_spill] sm:$0xff] %v8649_v0 }
 0x2d7   :  { %v1962_v47 = vmul.f32 0.044715, %v1450_v21  ;;  %v3393_v12 = vmul.f32 %v3137_v5, %v2625_v32  ;;  %v2627_v41 = vmul.f32 0.5, %v10604_v10  ;;  %v3139_v59 = vadd.f32 1.0, %v8101_v38 }
 0x2d8   :  { %5254 = vtanh.f32 %v2464_v22  ;;  %v2209_v48 = vadd.f32 1.0, %v1953_v31  ;;  %v1955_v18 = vmul.f32 0.044715, %v1443_v1  ;;  %v8653_v23 = vadd.f32 %v8099_v40, %v7854_v17  ;;  %v8655_v34 = vpop.eup %5244  ;;  %v10608_v22 = vld [vmem:[#allocation63_spill] sm:$0xff] }
 0x2d9   :  { %v8658_v55 = vmul.f32 0.5, %v8542_v61  ;;  %5256 = vtanh.f32 %v2466_v24  ;;  %v8662_v5 = vadd.f32 %v8144_v58, %v7789_v45  ;;  %4318 = vmatprep.mubr.f32.mxu0 %v3393_v12  ;;  %v3395_v38 = vmul.f32 %v3139_v59, %v2627_v41  ;;  %v8672_v61 = vpop.f32.mrf.mxu1  ;;  %v8680_v24 = vpop.f32.mrf.mxu0  ;;  %v10612_v41 = vld [vmem:[#allocation25_spill] sm:$0xff] }
 0x2da   :  { %10606 = vst [vmem:[#allocation45_spill] sm:$0xff] %v8653_v23  ;;  %v1697_v14 = vmul.f32 0.7978846, %v8585_v56  ;;  %v2216_v44 = vadd.f32 1.0, %v1960_v26  ;;  %v8667_v21 = vadd.f32 %v8113_v54, %v7871_v3  ;;  %v1456_v40 = vmul.f32 %v8643_v20, %v8643_v20  ;;  %4319 = vmatmul.mubr.f32.vlgmr.msra.gmra.mxu0 %v10608_v22  ;;  %10609 = vst [vmem:[#allocation63_spill] sm:$0xff] %v8672_v61 }
 0x2db   :  { %v5247_v31 = vpop.eup %5246  ;;  %v8675_v58 = vmul.f32 %v3216_v49, %v8508_v50  ;;  %v8678_v1 = vmul.f32 %v3218_v11, %v8538_v8  ;;  %5258 = vtanh.f32 %v2459_v27  ;;  %v2218_v26 = vadd.f32 1.0, %v1962_v47  ;;  %4543 = vmatprep.mubr.f32.mxu1 %v3395_v38  ;;  %10611 = vst [vmem:[#allocation104_spill] sm:$0xff] %v8680_v24  ;;  %v8697_v38 = vpop.f32.mrf.mxu1 }
 0x2dc   :  { %10607 = vst [vmem:[#allocation102_spill] sm:$0xff] %v8667_v21  ;;  %v5249_v54 = vpop.eup %5248  ;;  %v2465_v28 = vmul.f32 %v2209_v48, %v1697_v14  ;;  %v2211_v32 = vadd.f32 1.0, %v1955_v18  ;;  %v1704_v12 = vmul.f32 0.7978846, %v8591_v25  ;;  %v1449_v10 = vmul.f32 %v8653_v23, %v8653_v23  ;;  %4544 = vmatmul.mubr.f32.vlgmr.msra.gmra.mxu1 %v10612_v41  ;;  %10613 = vst [vmem:[#allocation25_spill] sm:$0xff] %v8697_v38  ;;  %v10614_v41 = vld [vmem:[#allocation49_spill] sm:$0xff]  ;;  %v8701_v24 = vpop.f32.mrf.mxu0 }
 0x2dd   :  { %10610 = vst [vmem:[#allocation103_spill] sm:$0xff] %v8678_v1  ;;  %v1699_v50 = vmul.f32 0.7978846, %v8611_v9  ;;  %v8688_v8 = vmul.f32 0.5, %v8591_v25  ;;  %v1706_v27 = vmul.f32 0.7978846, %v8602_v42  ;;  %v1458_v49 = vmul.f32 %v8662_v5, %v8662_v5 }
 0x2de   :  { %v8693_v11 = vpop.eup %5250  ;;  %v3224_v47 = vadd.f32 1.0, %v5247_v31  ;;  %v2472_v59 = vmul.f32 %v2216_v44, %v1704_v12  ;;  %v1451_v48 = vmul.f32 %v8667_v21, %v8667_v21  ;;  %v1968_v18 = vmul.f32 0.044715, %v1456_v40  ;;  %v10615_v9 = vld [vmem:[#allocation67_spill] sm:$0xff]  ;;  %10616 = vst [vmem:[#allocation49_spill] sm:$0xff] %v8701_v24  ;;  %v10617_v31 = vld [vmem:[#allocation84_spill] sm:$0xff] }
 0x2df   :  { %v3226_v14 = vadd.f32 1.0, %v5249_v54  ;;  %v2474_v22 = vmul.f32 %v2218_v26, %v1706_v27  ;;  %v2633_v25 = vmul.f32 0.5, %v10614_v41  ;;  %v3145_v56 = vadd.f32 1.0, %v10615_v9  ;;  %v10618_v40 = vld [vmem:[#allocation31_spill] sm:$0xff]  ;;  %v10619_v38 = vld [vmem:[#allocation93_spill] sm:$0xff]  ;;  %v10620_v9 = vld [vmem:[#allocation54_spill] sm:$0xff] }
 0x2e0   :  { %5260 = vtanh.f32 %v2465_v28  ;;  %v2467_v61 = vmul.f32 %v2211_v32, %v1699_v50  ;;  %v1961_v16 = vmul.f32 0.044715, %v1449_v10  ;;  %v8705_v44 = vadd.f32 %v10617_v31, %v7782_v13  ;;  %v8713_v28 = vpop.f32.mrf.mxu1  ;;  %v10628_v31 = vld [vmem:[#allocation33_spill] sm:$0xff] }
 0x2e1   :  { %v1970_v12 = vmul.f32 0.044715, %v1458_v49  ;;  %v3401_v0 = vmul.f32 %v3145_v56, %v2633_v25  ;;  %v2635_v1 = vmul.f32 0.5, %v10618_v40  ;;  %v3147_v54 = vadd.f32 1.0, %v10619_v38  ;;  %10621 = vst [vmem:[#allocation67_spill] sm:$0xff] %v8713_v28  ;;  %v10623_v56 = vld [vmem:[#allocation18_spill] sm:$0xff] }
 0x2e2   :  { %5262 = vtanh.f32 %v2472_v59  ;;  %v1963_v26 = vmul.f32 0.044715, %v1451_v48  ;;  %v2224_v27 = vadd.f32 1.0, %v1968_v18  ;;  %v8711_v41 = vadd.f32 %v10620_v9, %v7789_v45  ;;  %v8724_v59 = vpop.f32.mrf.mxu0  ;;  %v10626_v38 = vld [vmem:[#allocation94_spill] sm:$0xff] }
 0x2e3   :  { %v8715_v32 = vpop.eup %5252  ;;  %v8718_v10 = vmul.f32 0.5, %v8602_v42  ;;  %5264 = vtanh.f32 %v2474_v22  ;;  %v8722_v50 = vadd.f32 %v10623_v56, %v7854_v17  ;;  %4323 = vmatprep.mubr.f32.mxu0 %v3401_v0  ;;  %v3403_v49 = vmul.f32 %v3147_v54, %v2635_v1  ;;  %10625 = vst [vmem:[#allocation93_spill] sm:$0xff] %v8724_v59  ;;  %v10631_v59 = vld [vmem:[#allocation68_spill] sm:$0xff] }
 0x2e4   :  { %10622 = vst [vmem:[#allocation84_spill] sm:$0xff] %v8715_v32  ;;  %v2217_v48 = vadd.f32 1.0, %v1961_v16  ;;  %v1712_v18 = vmul.f32 0.7978846, %v8643_v20  ;;  %v8729_v25 = vadd.f32 %v10626_v38, %v7871_v3  ;;  %v1464_v42 = vmul.f32 %v8705_v44, %v8705_v44  ;;  %4324 = vmatmul.mubr.f32.gmra.mxu0 %v10628_v31  ;;  %v8744_v31 = vpop.f32.mrf.mxu1 }
 0x2e5   :  { %10624 = vst [vmem:[#allocation31_spill] sm:$0xff] %v8722_v50  ;;  %v5255_v22 = vpop.eup %5254  ;;  %v8735_v40 = vmul.f32 %v3224_v47, %v8568_v15  ;;  %v8738_v0 = vmul.f32 %v3226_v14, %v8598_v35  ;;  %5266 = vtanh.f32 %v2467_v61  ;;  %v2226_v16 = vadd.f32 1.0, %v1970_v12  ;;  %4548 = vmatprep.mubr.f32.mxu1 %v3403_v49  ;;  %10632 = vst [vmem:[#allocation33_spill] sm:$0xff] %v8744_v31  ;;  %v8753_v14 = vpop.f32.mrf.mxu0 }
 0x2e6   :  { %10627 = vst [vmem:[#allocation54_spill] sm:$0xff] %v8729_v25  ;;  %v5257_v1 = vpop.eup %5256  ;;  %v1705_v54 = vmul.f32 0.7978846, %v8653_v23  ;;  %v2219_v9 = vadd.f32 1.0, %v1963_v26  ;;  %v2480_v56 = vmul.f32 %v2224_v27, %v1712_v18  ;;  %v1466_v38 = vmul.f32 %v8711_v41, %v8711_v41  ;;  %4549 = vmatmul.mubr.f32.gmra.mxu1 %v10631_v59  ;;  %10633 = vst [vmem:[#allocation68_spill] sm:$0xff] %v8753_v14  ;;  %v10636_v23 = vld [vmem:[#allocation35_spill] sm:$0xff] }
 0x2e7   :  { %10629 = vst [vmem:[#allocation18_spill] sm:$0xff] %v8735_v40  ;;  %10630 = vst [vmem:[#allocation94_spill] sm:$0xff] %v8738_v0  ;;  %v1707_v15 = vmul.f32 0.7978846, %v8667_v21  ;;  %v8748_v35 = vmul.f32 0.5, %v8643_v20  ;;  %v1457_v47 = vmul.f32 %v8722_v50, %v8722_v50  ;;  %v3232_v26 = vadd.f32 1.0, %v5255_v22 }
 0x2e8   :  { %v1714_v61 = vmul.f32 0.7978846, %v8662_v5  ;;  %v8755_v12 = vpop.eup %5258  ;;  %v2473_v27 = vmul.f32 %v2217_v48, %v1705_v54  ;;  %v1459_v49 = vmul.f32 %v8729_v25, %v8729_v25  ;;  %v1976_v59 = vmul.f32 0.044715, %v1464_v42  ;;  %v10635_v21 = vld [vmem:[#allocation38_spill] sm:$0xff]  ;;  %v10637_v40 = vld [vmem:[#allocation95_spill] sm:$0xff] }
 0x2e9   :  { %10634 = vst [vmem:[#allocation105_spill] sm:$0xff] %v8755_v12  ;;  %v3234_v18 = vadd.f32 1.0, %v5257_v1  ;;  %v2641_v20 = vmul.f32 0.5, %v10635_v21  ;;  %v3153_v28 = vadd.f32 1.0, %v10636_v23  ;;  %v2475_v24 = vmul.f32 %v2219_v9, %v1707_v15  ;;  %v8765_v12 = vpop.f32.mrf.mxu1  ;;  %v10640_v54 = vld [vmem:[#allocation39_spill] sm:$0xff]  ;;  %v10641_v42 = vld [vmem:[#allocation37_spill] sm:$0xff] }
 0x2ea   :  { %v2482_v31 = vmul.f32 %v2226_v16, %v1714_v61  ;;  %5268 = vtanh.f32 %v2480_v56  ;;  %v1978_v0 = vmul.f32 0.044715, %v1466_v38  ;;  %v8763_v14 = vadd.f32 %v10637_v40, %v7854_v17  ;;  %10639 = vst [vmem:[#allocation35_spill] sm:$0xff] %v8765_v12  ;;  %v8769_v16 = vpop.f32.mrf.mxu0 }
 0x2eb   :  { %v1969_v48 = vmul.f32 0.044715, %v1457_v47  ;;  %v3409_v22 = vmul.f32 %v3153_v28, %v2641_v20  ;;  %v2643_v32 = vmul.f32 0.5, %v10640_v54  ;;  %v3155_v1 = vadd.f32 1.0, %v10641_v42  ;;  %10642 = vst [vmem:[#allocation95_spill] sm:$0xff] %v8769_v16 }
 0x2ec   :  { %10638 = vst [vmem:[#allocation38_spill] sm:$0xff] %v8763_v14  ;;  %5270 = vtanh.f32 %v2473_v27  ;;  %v1971_v21 = vmul.f32 0.044715, %v1459_v49  ;;  %v2232_v23 = vadd.f32 1.0, %v1976_v59  ;;  %v8773_v9 = vadd.f32 %v8221_v46, %v7782_v13  ;;  %v10643_v46 = vld [vmem:[#allocation96_spill] sm:$0xff]  ;;  %v8800_v59 = vpop.f32.mrf.mxu0 }
 0x2ed   :  { %v8775_v56 = vpop.eup %5260  ;;  %v8778_v40 = vmul.f32 0.5, %v8662_v5  ;;  %5272 = vtanh.f32 %v2482_v31  ;;  %v8782_v28 = vadd.f32 %v8233_v39, %v7789_v45  ;;  %4328 = vmatprep.mubr.f32.mxu0 %v3409_v22  ;;  %v3411_v38 = vmul.f32 %v3155_v1, %v2643_v32  ;;  %v10645_v49 = vld [vmem:[#allocation44_spill] sm:$0xff]  ;;  %v8792_v5 = vpop.f32.mrf.mxu1  ;;  %10649 = vst [vmem:[#allocation106_spill] sm:$0xff] %v8800_v59  ;;  %v10653_v59 = vld [vmem:[#allocation79_spill] sm:$0xff] }
 0x2ee   :  { %v1720_v15 = vmul.f32 0.7978846, %v8705_v44  ;;  %v2234_v61 = vadd.f32 1.0, %v1978_v0  ;;  %v1465_v47 = vmul.f32 %v8763_v14, %v8763_v14  ;;  %v8789_v27 = vadd.f32 %v10643_v46, %v7871_v3  ;;  %4329 = vmatmul.mubr.f32.gmra.mxu0 %v10645_v49  ;;  %10646 = vst [vmem:[#allocation37_spill] sm:$0xff] %v8792_v5  ;;  %v10650_v46 = vld [vmem:[#allocation71_spill] sm:$0xff] }
 0x2ef   :  { %v5263_v31 = vpop.eup %5262  ;;  %v8795_v39 = vmul.f32 %v3232_v26, %v8628_v30  ;;  %v8798_v32 = vmul.f32 %v3234_v18, %v8658_v55  ;;  %5274 = vtanh.f32 %v2475_v24  ;;  %v2225_v0 = vadd.f32 1.0, %v1969_v48  ;;  %4553 = vmatprep.mubr.f32.mxu1 %v3411_v38 }
 0x2f0   :  { %10644 = vst [vmem:[#allocation39_spill] sm:$0xff] %v8789_v27  ;;  %v5265_v20 = vpop.eup %5264  ;;  %v2227_v22 = vadd.f32 1.0, %v1971_v21  ;;  %v2488_v54 = vmul.f32 %v2232_v23, %v1720_v15  ;;  %v1722_v42 = vmul.f32 0.7978846, %v8711_v41  ;;  %v1472_v1 = vmul.f32 %v8773_v9, %v8773_v9  ;;  %4554 = vmatmul.mubr.f32.gmra.mxu1 %v10650_v46  ;;  %v8820_v15 = vpop.f32.mrf.mxu1 }
 0x2f1   :  { %10647 = vst [vmem:[#allocation96_spill] sm:$0xff] %v8795_v39  ;;  %10648 = vst [vmem:[#allocation44_spill] sm:$0xff] %v8798_v32  ;;  %v1713_v30 = vmul.f32 0.7978846, %v8722_v50  ;;  %v1715_v55 = vmul.f32 0.7978846, %v8729_v25  ;;  %v1474_v26 = vmul.f32 %v8782_v28, %v8782_v28  ;;  %v1467_v38 = vmul.f32 %v8789_v27, %v8789_v27  ;;  %v8824_v50 = vpop.f32.mrf.mxu0 }
 0x2f2   :  { %v8809_v24 = vmul.f32 0.5, %v8705_v44  ;;  %v8813_v18 = vpop.eup %5266  ;;  %v2490_v48 = vmul.f32 %v2234_v61, %v1722_v42  ;;  %v8816_v21 = vmul.f32 0.5, %v8711_v41  ;;  %v1977_v23 = vmul.f32 0.044715, %v1465_v47  ;;  %10652 = vst [vmem:[#allocation107_spill] sm:$0xff] %v8820_v15  ;;  %v10654_v25 = vld [vmem:[#allocation16_spill] sm:$0xff] }
 0x2f3   :  { %10651 = vst [vmem:[#allocation71_spill] sm:$0xff] %v8813_v18  ;;  %v3240_v49 = vadd.f32 1.0, %v5263_v31  ;;  %v2481_v46 = vmul.f32 %v2225_v0, %v1713_v30  ;;  %v2649_v44 = vmul.f32 0.5, %v10653_v59  ;;  %v3161_v5 = vadd.f32 1.0, %v10654_v25  ;;  %10655 = vst [vmem:[#allocation79_spill] sm:$0xff] %v8824_v50  ;;  %v10656_v47 = vld [vmem:[#allocation24_spill] sm:$0xff]  ;;  %v8832_v25 = vpop.f32.mrf.mxu1 }
 0x2f4   :  { %v3242_v16 = vadd.f32 1.0, %v5265_v20  ;;  %v2483_v12 = vmul.f32 %v2227_v22, %v1715_v55  ;;  %5276 = vtanh.f32 %v2488_v54  ;;  %v1984_v61 = vmul.f32 0.044715, %v1472_v1  ;;  %v10657_v39 = vld [vmem:[#allocation80_spill] sm:$0xff]  ;;  %v10658_v0 = vld [vmem:[#allocation21_spill] sm:$0xff]  ;;  %10659 = vst [vmem:[#allocation16_spill] sm:$0xff] %v8832_v25  ;;  %v8841_v22 = vpop.f32.mrf.mxu0 }
 0x2f5   :  { %v1986_v41 = vmul.f32 0.044715, %v1474_v26  ;;  %v3417_v42 = vmul.f32 %v3161_v5, %v2649_v44  ;;  %v2651_v32 = vmul.f32 0.5, %v10656_v47  ;;  %v3163_v18 = vadd.f32 1.0, %v10657_v39  ;;  %10661 = vst [vmem:[#allocation80_spill] sm:$0xff] %v8841_v22  ;;  %v10662_v55 = vld [vmem:[#allocation86_spill] sm:$0xff] }
 0x2f6   :  { %5278 = vtanh.f32 %v2490_v48  ;;  %v2233_v15 = vadd.f32 1.0, %v1977_v23  ;;  %v1979_v31 = vmul.f32 0.044715, %v1467_v38  ;;  %v8830_v59 = vadd.f32 %v10658_v0, %v7782_v13  ;;  %v10664_v48 = vld [vmem:[#allocation52_spill] sm:$0xff]  ;;  %v8862_v0 = vpop.f32.mrf.mxu1  ;;  %v10675_v25 = vld [vmem:[#allocation50_spill] sm:$0xff] }
 0x2f7   :  { %v5269_v30 = vpop.eup %5268  ;;  %v8835_v20 = vmul.f32 %v3240_v49, %v8688_v8  ;;  %5280 = vtanh.f32 %v2481_v46  ;;  %v8839_v5 = vadd.f32 %v8285_v62, %v7789_v45  ;;  %4333 = vmatprep.mubr.f32.mxu0 %v3417_v42  ;;  %v3419_v39 = vmul.f32 %v3163_v18, %v2651_v32  ;;  %v10666_v23 = vld [vmem:[#allocation40_spill] sm:$0xff] }
 0x2f8   :  { %v1721_v54 = vmul.f32 0.7978846, %v8763_v14  ;;  %v2240_v1 = vadd.f32 1.0, %v1984_v61  ;;  %v8846_v26 = vadd.f32 %v10662_v55, %v7854_v17  ;;  %v8850_v8 = vadd.f32 %v10664_v48, %v7871_v3  ;;  %4334 = vmatmul.mubr.f32.gmra.mxu0 %v10666_v23  ;;  %v10668_v47 = vld [vmem:[#allocation32_spill] sm:$0xff]  ;;  %10669 = vst [vmem:[#allocation40_spill] sm:$0xff] %v8862_v0  ;;  %v10671_v23 = vld [vmem:[#allocation26_spill] sm:$0xff] }
 0x2f9   :  { %10660 = vst [vmem:[#allocation24_spill] sm:$0xff] %v8835_v20  ;;  %v8853_v38 = vpop.eup %5270  ;;  %v8856_v62 = vmul.f32 %v3242_v16, %v8718_v10  ;;  %5282 = vtanh.f32 %v2483_v12  ;;  %v1728_v32 = vmul.f32 0.7978846, %v8773_v9  ;;  %v2242_v18 = vadd.f32 1.0, %v1986_v41  ;;  %4558 = vmatprep.mubr.f32.mxu1 %v3419_v39  ;;  %v8871_v41 = vpop.f32.mrf.mxu0  ;;  %v10672_v0 = vld [vmem:[#allocation29_spill] sm:$0xff] }
 0x2fa   :  { %10663 = vst [vmem:[#allocation21_spill] sm:$0xff] %v8846_v26  ;;  %10665 = vst [vmem:[#allocation86_spill] sm:$0xff] %v8850_v8  ;;  %v5273_v49 = vpop.eup %5272  ;;  %v3248_v46 = vadd.f32 1.0, %v5269_v30  ;;  %v2489_v44 = vmul.f32 %v2233_v15, %v1721_v54  ;;  %v2235_v61 = vadd.f32 1.0, %v1979_v31  ;;  %v1480_v42 = vmul.f32 %v8830_v59, %v8830_v59  ;;  %4559 = vmatmul.mubr.f32.gmra.mxu1 %v10668_v47 }
 0x2fb   :  { %10667 = vst [vmem:[#allocation52_spill] sm:$0xff] %v8856_v62  ;;  %v1723_v55 = vmul.f32 0.7978846, %v8789_v27  ;;  %v8866_v10 = vmul.f32 0.5, %v8773_v9  ;;  %v1730_v12 = vmul.f32 0.7978846, %v8782_v28  ;;  %v1482_v16 = vmul.f32 %v8839_v5, %v8839_v5 }
 0x2fc   :  { %10670 = vst [vmem:[#allocation32_spill] sm:$0xff] %v8871_v41  ;;  %v8873_v15 = vpop.eup %5274  ;;  %v2496_v31 = vmul.f32 %v2240_v1, %v1728_v32  ;;  %v8876_v30 = vmul.f32 0.5, %v8782_v28  ;;  %v1473_v39 = vmul.f32 %v8846_v26, %v8846_v26  ;;  %v1475_v9 = vmul.f32 %v8850_v8, %v8850_v8  ;;  %v8887_v28 = vpop.f32.mrf.mxu1  ;;  %v10676_v62 = vld [vmem:[#allocation17_spill] sm:$0xff] }
 0x2fd   :  { %v3250_v54 = vadd.f32 1.0, %v5273_v49  ;;  %v2498_v48 = vmul.f32 %v2242_v18, %v1730_v12  ;;  %v2657_v47 = vmul.f32 0.5, %v10671_v23  ;;  %v3169_v27 = vadd.f32 1.0, %v10672_v0  ;;  %10674 = vst [vmem:[#allocation29_spill] sm:$0xff] %v8887_v28  ;;  %v8891_v49 = vpop.f32.mrf.mxu0  ;;  %v10678_v0 = vld [vmem:[#allocation97_spill] sm:$0xff] }
 0x2fe   :  { %v8885_v41 = vmul.f32 %v3248_v46, %v8748_v35  ;;  %5284 = vtanh.f32 %v2489_v44  ;;  %v2491_v1 = vmul.f32 %v2235_v61, %v1723_v55  ;;  %v1992_v32 = vmul.f32 0.044715, %v1480_v42  ;;  %10677 = vst [vmem:[#allocation50_spill] sm:$0xff] %v8891_v49  ;;  %v10681_v55 = vld [vmem:[#allocation30_spill] sm:$0xff] }
 0x2ff   :  { %v1994_v22 = vmul.f32 0.044715, %v1482_v16  ;;  %v3425_v14 = vmul.f32 %v3169_v27, %v2657_v47  ;;  %v2659_v50 = vmul.f32 0.5, %v10675_v25  ;;  %v3171_v20 = vadd.f32 1.0, %v10676_v62  ;;  %v10680_v27 = vld [vmem:[#allocation98_spill] sm:$0xff] }
 0x300   :  { %10673 = vst [vmem:[#allocation26_spill] sm:$0xff] %v8885_v41  ;;  %5286 = vtanh.f32 %v2496_v31  ;;  %v1985_v18 = vmul.f32 0.044715, %v1473_v39  ;;  %v1987_v12 = vmul.f32 0.044715, %v1475_v9  ;;  %v8895_v35 = vadd.f32 %v10678_v0, %v7782_v13  ;;  %v10683_v31 = vld [vmem:[#allocation62_spill] sm:$0xff]  ;;  %v8914_v9 = vpop.f32.mrf.mxu1 }
 0x301   :  { %v5277_v46 = vpop.eup %5276  ;;  %v8898_v44 = vmul.f32 %v3250_v54, %v8778_v40  ;;  %5288 = vtanh.f32 %v2498_v48  ;;  %v8902_v61 = vadd.f32 %v10680_v27, %v7789_v45  ;;  %4338 = vmatprep.mubr.f32.mxu0 %v3425_v14  ;;  %v3427_v25 = vmul.f32 %v3171_v20, %v2659_v50  ;;  %v10685_v40 = vld [vmem:[#allocation60_spill] sm:$0xff]  ;;  %10686 = vst [vmem:[#allocation30_spill] sm:$0xff] %v8914_v9  ;;  %v8918_v48 = vpop.f32.mrf.mxu0  ;;  %v10691_v9 = vld [vmem:[#allocation55_spill] sm:$0xff] }
 0x302   :  { %v1729_v62 = vmul.f32 0.7978846, %v8846_v26  ;;  %v2248_v42 = vadd.f32 1.0, %v1992_v32  ;;  %v8907_v16 = vadd.f32 %v10681_v55, %v7854_v17  ;;  %v8911_v39 = vadd.f32 %v10683_v31, %v7871_v3  ;;  %4339 = vmatmul.mubr.f32.gmra.mxu0 %v10685_v40  ;;  %10687 = vst [vmem:[#allocation62_spill] sm:$0xff] %v8918_v48  ;;  %v10688_v55 = vld [vmem:[#allocation78_spill] sm:$0xff]  ;;  %v10694_v41 = vld [vmem:[#allocation99_spill] sm:$0xff] }
 0x303   :  { %10679 = vst [vmem:[#allocation17_spill] sm:$0xff] %v8898_v44  ;;  %v5279_v54 = vpop.eup %5278  ;;  %5290 = vtanh.f32 %v2491_v1  ;;  %v1731_v14 = vmul.f32 0.7978846, %v8850_v8  ;;  %v1736_v50 = vmul.f32 0.7978846, %v8830_v59  ;;  %v2250_v20 = vadd.f32 1.0, %v1994_v22  ;;  %4563 = vmatprep.mubr.f32.mxu1 %v3427_v25  ;;  %v8948_v8 = vpop.f32.mrf.mxu0 }
 0x304   :  { %10682 = vst [vmem:[#allocation97_spill] sm:$0xff] %v8907_v16  ;;  %10684 = vst [vmem:[#allocation98_spill] sm:$0xff] %v8911_v39  ;;  %v8920_v23 = vpop.eup %5280  ;;  %v2241_v47 = vadd.f32 1.0, %v1985_v18  ;;  %v2243_v32 = vadd.f32 1.0, %v1987_v12  ;;  %v8923_v0 = vmul.f32 0.5, %v8830_v59  ;;  %v1488_v27 = vmul.f32 %v8895_v35, %v8895_v35  ;;  %4564 = vmatmul.mubr.f32.gmra.mxu1 %v10688_v55  ;;  %v8940_v55 = vpop.f32.mrf.mxu1 }
 0x305   :  { %v3256_v1 = vadd.f32 1.0, %v5277_v46  ;;  %v1738_v31 = vmul.f32 0.7978846, %v8839_v5  ;;  %v8930_v22 = vmul.f32 0.5, %v8839_v5  ;;  %v1490_v25 = vmul.f32 %v8902_v61, %v8902_v61  ;;  %10690 = vst [vmem:[#allocation78_spill] sm:$0xff] %v8940_v55  ;;  %10692 = vst [vmem:[#allocation55_spill] sm:$0xff] %v8948_v8 }
 0x306   :  { %v8934_v40 = vpop.eup %5282  ;;  %v3258_v18 = vadd.f32 1.0, %v5279_v54  ;;  %v2504_v12 = vmul.f32 %v2248_v42, %v1736_v50  ;;  %v1481_v59 = vmul.f32 %v8907_v16, %v8907_v16  ;;  %v1483_v48 = vmul.f32 %v8911_v39, %v8911_v39  ;;  %v8959_v8 = vpop.f32.mrf.mxu1 }
 0x307   :  { %10689 = vst [vmem:[#allocation60_spill] sm:$0xff] %v8934_v40  ;;  %v2506_v46 = vmul.f32 %v2250_v20, %v1738_v31  ;;  %v8944_v5 = vadd.f32 %v8364_v37, %v7782_v13  ;;  %v2665_v49 = vmul.f32 0.5, %v10691_v9  ;;  %v3177_v28 = vadd.f32 1.0, %v8355_v60  ;;  %v10693_v20 = vld [vmem:[#allocation66_spill] sm:$0xff] }
 0x308   :  { %v2497_v42 = vmul.f32 %v2241_v47, %v1729_v62  ;;  %v2499_v54 = vmul.f32 %v2243_v32, %v1731_v14  ;;  %v2000_v50 = vmul.f32 0.044715, %v1488_v27  ;;  %v8952_v26 = vadd.f32 %v8384_v57, %v7789_v45  ;;  %10695 = vst [vmem:[#allocation66_spill] sm:$0xff] %v8959_v8  ;;  %v10699_v32 = vld [vmem:[#allocation87_spill] sm:$0xff] }
 0x309   :  { %v2002_v44 = vmul.f32 0.044715, %v1490_v25  ;;  %v3433_v55 = vmul.f32 %v3177_v28, %v2665_v49  ;;  %v2667_v31 = vmul.f32 0.5, %v10693_v20  ;;  %v3179_v37 = vadd.f32 1.0, %v10694_v41  ;;  %v8968_v41 = vpop.f32.mrf.mxu0  ;;  %v10697_v49 = vld [vmem:[#allocation72_spill] sm:$0xff] }
 0x30a   :  { %v8957_v40 = vmul.f32 %v3256_v1, %v8809_v24  ;;  %5292 = vtanh.f32 %v2504_v12  ;;  %v1993_v60 = vmul.f32 0.044715, %v1481_v59  ;;  %v1995_v9 = vmul.f32 0.044715, %v1483_v48  ;;  %10696 = vst [vmem:[#allocation99_spill] sm:$0xff] %v8968_v41 }
 0x30b   :  { %v8961_v62 = vpop.eup %5284  ;;  %v8964_v14 = vmul.f32 %v3258_v18, %v8816_v21  ;;  %5294 = vtanh.f32 %v2506_v46  ;;  %v1496_v57 = vmul.f32 %v8944_v5, %v8944_v5  ;;  %4343 = vmatprep.mubr.f32.mxu0 %v3433_v55  ;;  %v3435_v28 = vmul.f32 %v3179_v37, %v2667_v31  ;;  %v8977_v21 = vpop.f32.mrf.mxu1  ;;  %v10704_v31 = vld [vmem:[#allocation46_spill] sm:$0xff] }
 0x30c   :  { %5296 = vtanh.f32 %v2497_v42  ;;  %v2256_v24 = vadd.f32 1.0, %v2000_v50  ;;  %v8972_v48 = vadd.f32 %v10697_v49, %v7854_v17  ;;  %v1498_v47 = vmul.f32 %v8952_v26, %v8952_v26  ;;  %4344 = vmatmul.mubr.f32.gmra.mxu0 %v10699_v32  ;;  %10700 = vst [vmem:[#allocation87_spill] sm:$0xff] %v8977_v21  ;;  %v8981_v12 = vpop.f32.mrf.mxu0  ;;  %v10702_v50 = vld [vmem:[#allocation23_spill] sm:$0xff] }
 0x30d   :  { %v5287_v27 = vpop.eup %5286  ;;  %5298 = vtanh.f32 %v2499_v54  ;;  %v1737_v1 = vmul.f32 0.7978846, %v8907_v16  ;;  %v1739_v25 = vmul.f32 0.7978846, %v8911_v39  ;;  %v2258_v18 = vadd.f32 1.0, %v2002_v44  ;;  %4568 = vmatprep.mubr.f32.mxu1 %v3435_v28  ;;  %10701 = vst [vmem:[#allocation108_spill] sm:$0xff] %v8981_v12  ;;  %v8989_v54 = vpop.f32.mrf.mxu1 }
 0x30e   :  { %10698 = vst [vmem:[#allocation72_spill] sm:$0xff] %v8972_v48  ;;  %v5289_v59 = vpop.eup %5288  ;;  %v2249_v55 = vadd.f32 1.0, %v1993_v60  ;;  %v2251_v46 = vadd.f32 1.0, %v1995_v9  ;;  %v1744_v42 = vmul.f32 0.7978846, %v8895_v35  ;;  %v8986_v20 = vadd.f32 %v10702_v50, %v7871_v3  ;;  %4569 = vmatmul.mubr.f32.gmra.mxu1 %v10704_v31  ;;  %10705 = vst [vmem:[#allocation46_spill] sm:$0xff] %v8989_v54  ;;  %v3872_v9 = vpop.f32.mrf.mxu0 }
 0x30f   :  { %v8992_v37 = vmul.f32 0.5, %v8895_v35  ;;  %v1746_v44 = vmul.f32 0.7978846, %v8902_v61  ;;  %v8996_v28 = vmul.f32 0.5, %v8902_v61  ;;  %v2008_v60 = vmul.f32 0.044715, %v1496_v57  ;;  %v4097_v8 = vpop.f32.mrf.mxu1 }
 0x310   :  { %10703 = vst [vmem:[#allocation23_spill] sm:$0xff] %v8986_v20  ;;  %v8998_v49 = vpop.eup %5290  ;;  %v3264_v32 = vadd.f32 1.0, %v5287_v27  ;;  %v2512_v12 = vmul.f32 %v2256_v24, %v1744_v42  ;;  %v1489_v50 = vmul.f32 %v8972_v48, %v8972_v48  ;;  %v2010_v31 = vmul.f32 0.044715, %v1498_v47  ;;  %v10706_v35 = vld [vmem:[#allocation58_spill] sm:$0xff]  ;;  %v9004_v16 = vpop.f32.mrf.mxu0 }
 0x311   :  { %v3266_v54 = vadd.f32 1.0, %v5289_v59  ;;  %v2514_v21 = vmul.f32 %v2258_v18, %v1746_v44  ;;  %v2673_v41 = vmul.f32 0.5, %v10706_v35  ;;  %v3185_v39 = vadd.f32 1.0, %v8415_v51  ;;  %10707 = vst [vmem:[#allocation58_spill] sm:$0xff] %v9004_v16  ;;  %v9012_v27 = vpop.f32.mrf.mxu1  ;;  %v10709_v18 = vld [vmem:[#allocation61_spill] sm:$0xff]  ;;  %v10711_v35 = vld [vmem:[#allocation19_spill] sm:$0xff] }
 0x312   :  { %v2505_v61 = vmul.f32 %v2249_v55, %v1737_v1  ;;  %v2507_v57 = vmul.f32 %v2251_v46, %v1739_v25  ;;  %v1491_v9 = vmul.f32 %v8986_v20, %v8986_v20  ;;  %v9010_v24 = vadd.f32 %v8409_v63, %v7782_v13  ;;  %10708 = vst [vmem:[#allocation109_spill] sm:$0xff] %v9012_v27  ;;  %v3877_v51 = vpop.f32.mrf.mxu0  ;;  %v10710_v25 = vld [vmem:[#allocation77_spill] sm:$0xff] }
 0x313   :  { %v2264_v8 = vadd.f32 1.0, %v2008_v60  ;;  %v3441_v47 = vmul.f32 %v3185_v39, %v2673_v41  ;;  %v2675_v59 = vmul.f32 0.5, %v10709_v18  ;;  %v3187_v42 = vadd.f32 1.0, %v8453_v52  ;;  %v4102_v46 = vpop.f32.mrf.mxu1  ;;  %v10716_v18 = vld [vmem:[#allocation57_spill] sm:$0xff] }
 0x314   :  { %5300 = vtanh.f32 %v2512_v12  ;;  %v2001_v44 = vmul.f32 0.044715, %v1489_v50  ;;  %v2266_v1 = vadd.f32 1.0, %v2010_v31  ;;  %v9018_v55 = vadd.f32 %v10710_v25, %v7789_v45  ;;  %v9025_v41 = vpop.f32.mrf.mxu0  ;;  %v10714_v50 = vld [vmem:[#allocation41_spill] sm:$0xff] }
 0x315   :  { %5302 = vtanh.f32 %v2514_v21  ;;  %v1752_v63 = vmul.f32 0.7978846, %v8944_v5  ;;  %v9023_v60 = vadd.f32 %v10711_v35, %v7854_v17  ;;  %4348 = vmatprep.mubr.f32.mxu0 %v3441_v47  ;;  %v3443_v39 = vmul.f32 %v3187_v42, %v2675_v59  ;;  %10713 = vst [vmem:[#allocation77_spill] sm:$0xff] %v9025_v41  ;;  %v9035_v51 = vpop.f32.mrf.mxu1  ;;  %v10719_v41 = vld [vmem:[#allocation15_spill] sm:$0xff] }
 0x316   :  { %v2003_v52 = vmul.f32 0.044715, %v1491_v9  ;;  %v1754_v12 = vmul.f32 0.7978846, %v8952_v26  ;;  %v9030_v31 = vadd.f32 %v10714_v50, %v7871_v3  ;;  %v1504_v21 = vmul.f32 %v9010_v24, %v9010_v24  ;;  %4349 = vmatmul.mubr.f32.gmra.mxu0 %v10716_v18  ;;  %10717 = vst [vmem:[#allocation41_spill] sm:$0xff] %v9035_v51  ;;  %v3882_v42 = vpop.f32.mrf.mxu0 }
 0x317   :  { %10712 = vst [vmem:[#allocation61_spill] sm:$0xff] %v9023_v60  ;;  %v5293_v25 = vpop.eup %5292  ;;  %v9038_v47 = vmul.f32 %v3264_v32, %v8866_v10  ;;  %v9041_v59 = vmul.f32 %v3266_v54, %v8876_v30  ;;  %5304 = vtanh.f32 %v2505_v61  ;;  %v2520_v9 = vmul.f32 %v2264_v8, %v1752_v63  ;;  %4573 = vmatprep.mubr.f32.mxu1 %v3443_v39  ;;  %v4107_v51 = vpop.f32.mrf.mxu1 }
 0x318   :  { %10715 = vst [vmem:[#allocation19_spill] sm:$0xff] %v9030_v31  ;;  %v5295_v46 = vpop.eup %5294  ;;  %5306 = vtanh.f32 %v2507_v57  ;;  %v2257_v35 = vadd.f32 1.0, %v2001_v44  ;;  %v2522_v50 = vmul.f32 %v2266_v1, %v1754_v12  ;;  %v1506_v18 = vmul.f32 %v9018_v55, %v9018_v55  ;;  %4574 = vmatmul.mubr.f32.gmra.mxu1 %v10719_v41  ;;  %v9055_v61 = vpop.f32.mrf.mxu0  ;;  %v10722_v12 = vld [vmem:[#allocation27_spill] sm:$0xff] }
 0x319   :  { %10718 = vst [vmem:[#allocation57_spill] sm:$0xff] %v9041_v59  ;;  %v9046_v27 = vpop.eup %5296  ;;  %v1745_v10 = vmul.f32 0.7978846, %v8972_v48  ;;  %v1747_v30 = vmul.f32 0.7978846, %v8986_v20  ;;  %v9051_v54 = vmul.f32 0.5, %v8944_v5  ;;  %v1497_v32 = vmul.f32 %v9023_v60, %v9023_v60  ;;  %v9061_v39 = vpop.f32.mrf.mxu1 }
 0x31a   :  { %10720 = vst [vmem:[#allocation15_spill] sm:$0xff] %v9055_v61  ;;  %v9057_v57 = vpop.eup %5298  ;;  %v3272_v8 = vadd.f32 1.0, %v5293_v25  ;;  %v2259_v44 = vadd.f32 1.0, %v2003_v52  ;;  %v1499_v1 = vmul.f32 %v9030_v31, %v9030_v31  ;;  %v2016_v63 = vmul.f32 0.044715, %v1504_v21  ;;  %10721 = vst [vmem:[#allocation110_spill] sm:$0xff] %v9061_v39  ;;  %v3887_v42 = vpop.f32.mrf.mxu0 }
 0x31b   :  { %v3274_v41 = vadd.f32 1.0, %v5295_v46  ;;  %5308 = vtanh.f32 %v2520_v9  ;;  %v2681_v5 = vmul.f32 0.5, %v10722_v12  ;;  %v3193_v51 = vadd.f32 1.0, %v8475_v7  ;;  %v4112_v52 = vpop.f32.mrf.mxu1  ;;  %v10723_v21 = vld [vmem:[#allocation48_spill] sm:$0xff] }
 0x31c   :  { %v2513_v16 = vmul.f32 %v2257_v35, %v1745_v10  ;;  %5310 = vtanh.f32 %v2522_v50  ;;  %v2018_v61 = vmul.f32 0.044715, %v1506_v18  ;;  %v9067_v25 = vadd.f32 %v8461_v33, %v7782_v13  ;;  %v9071_v9 = vpop.f32.mrf.mxu0  ;;  %v10725_v7 = vld [vmem:[#allocation100_spill] sm:$0xff]  ;;  %v10727_v50 = vld [vmem:[#allocation42_spill] sm:$0xff] }
 0x31d   :  { %v2009_v20 = vmul.f32 0.044715, %v1497_v32  ;;  %v3449_v48 = vmul.f32 %v3193_v51, %v2681_v5  ;;  %v2683_v59 = vmul.f32 0.5, %v10723_v21  ;;  %v3195_v46 = vadd.f32 1.0, %v8515_v53  ;;  %10724 = vst [vmem:[#allocation27_spill] sm:$0xff] %v9071_v9  ;;  %v9081_v33 = vpop.f32.mrf.mxu1  ;;  %v10729_v53 = vld [vmem:[#allocation22_spill] sm:$0xff] }
 0x31e   :  { %v2011_v12 = vmul.f32 0.044715, %v1499_v1  ;;  %v2272_v39 = vadd.f32 1.0, %v2016_v63  ;;  %v9075_v35 = vadd.f32 %v10725_v7, %v7854_v17  ;;  %v9079_v18 = vadd.f32 %v10727_v50, %v7789_v45  ;;  %10728 = vst [vmem:[#allocation100_spill] sm:$0xff] %v9081_v33  ;;  %v3892_v63 = vpop.f32.mrf.mxu0  ;;  %v10737_v33 = vld [vmem:[#allocation20_spill] sm:$0xff] }
 0x31f   :  { %v2515_v10 = vmul.f32 %v2259_v44, %v1747_v30  ;;  %v9084_v32 = vmul.f32 0.5, %v8952_v26  ;;  %v9088_v5 = vadd.f32 %v10729_v53, %v7871_v3  ;;  %4353 = vmatprep.mubr.f32.mxu0 %v3449_v48  ;;  %v3451_v1 = vmul.f32 %v3195_v46, %v2683_v59  ;;  %v10732_v30 = vld [vmem:[#allocation90_spill] sm:$0xff]  ;;  %v4117_v26 = vpop.f32.mrf.mxu1  ;;  %v10735_v63 = vld [vmem:[#allocation69_spill] sm:$0xff] }
 0x320   :  { %10726 = vst [vmem:[#allocation48_spill] sm:$0xff] %v9075_v35  ;;  %v9091_v51 = vmul.f32 %v3272_v8, %v8923_v0  ;;  %v1760_v42 = vmul.f32 0.7978846, %v9010_v24  ;;  %v2274_v52 = vadd.f32 1.0, %v2018_v61  ;;  %v1512_v21 = vmul.f32 %v9067_v25, %v9067_v25  ;;  %4354 = vmatmul.mubr.f32.gmra.mxu0 %v10732_v30  ;;  %v9101_v0 = vpop.f32.mrf.mxu0 }
 0x321   :  { %10730 = vst [vmem:[#allocation42_spill] sm:$0xff] %v9088_v5  ;;  %v5301_v44 = vpop.eup %5300  ;;  %v9098_v7 = vmul.f32 %v3274_v41, %v8930_v22  ;;  %5312 = vtanh.f32 %v2513_v16  ;;  %v2265_v48 = vadd.f32 1.0, %v2009_v20  ;;  %v1762_v59 = vmul.f32 0.7978846, %v9018_v55  ;;  %4578 = vmatprep.mubr.f32.mxu1 %v3451_v1  ;;  %10734 = vst [vmem:[#allocation111_spill] sm:$0xff] %v9101_v0  ;;  %v9108_v22 = vpop.f32.mrf.mxu1 }
 0x322   :  { %10731 = vst [vmem:[#allocation22_spill] sm:$0xff] %v9091_v51  ;;  %v5303_v8 = vpop.eup %5302  ;;  %v2267_v46 = vadd.f32 1.0, %v2011_v12  ;;  %v2528_v61 = vmul.f32 %v2272_v39, %v1760_v42  ;;  %v1505_v50 = vmul.f32 %v9075_v35, %v9075_v35  ;;  %v1514_v53 = vmul.f32 %v9079_v18, %v9079_v18  ;;  %4579 = vmatmul.mubr.f32.gmra.mxu1 %v10735_v63  ;;  %v3897_v12 = vpop.f32.mrf.mxu0 }
 0x323   :  { %10733 = vst [vmem:[#allocation90_spill] sm:$0xff] %v9098_v7  ;;  %10736 = vst [vmem:[#allocation69_spill] sm:$0xff] %v9108_v22  ;;  %5314 = vtanh.f32 %v2515_v10  ;;  %v1753_v16 = vmul.f32 0.7978846, %v9023_v60  ;;  %v1755_v20 = vmul.f32 0.7978846, %v9030_v31  ;;  %v1507_v41 = vmul.f32 %v9088_v5, %v9088_v5  ;;  %v4122_v63 = vpop.f32.mrf.mxu1 }
 0x324   :  { %v9114_v39 = vpop.eup %5304  ;;  %v3280_v1 = vadd.f32 1.0, %v5301_v44  ;;  %v9117_v42 = vmul.f32 0.5, %v9010_v24  ;;  %v2530_v30 = vmul.f32 %v2274_v52, %v1762_v59  ;;  %v2024_v26 = vmul.f32 0.044715, %v1512_v21  ;;  %v9123_v60 = vpop.f32.mrf.mxu0  ;;  %v10740_v21 = vld [vmem:[#allocation36_spill] sm:$0xff] }
 0x325   :  { %v9119_v0 = vpop.eup %5306  ;;  %v3282_v10 = vadd.f32 1.0, %v5303_v8  ;;  %v2521_v22 = vmul.f32 %v2265_v48, %v1753_v16  ;;  %v2689_v9 = vmul.f32 0.5, %v10737_v33  ;;  %v3201_v31 = vadd.f32 1.0, %v8535_v2  ;;  %10738 = vst [vmem:[#allocation20_spill] sm:$0xff] %v9123_v60  ;;  %v9125_v51 = vpop.f32.mrf.mxu1 }
 0x326   :  { %v2523_v12 = vmul.f32 %v2267_v46, %v1755_v20  ;;  %5316 = vtanh.f32 %v2528_v61  ;;  %v2017_v7 = vmul.f32 0.044715, %v1505_v50  ;;  %v2026_v44 = vmul.f32 0.044715, %v1514_v53  ;;  %10739 = vst [vmem:[#allocation112_spill] sm:$0xff] %v9125_v51  ;;  %v3902_v8 = vpop.f32.mrf.mxu0  ;;  %v10741_v46 = vld [vmem:[#allocation28_spill] sm:$0xff] }
 0x327   :  { %v2019_v24 = vmul.f32 0.044715, %v1507_v41  ;;  %v3457_v52 = vmul.f32 %v3201_v31, %v2689_v9  ;;  %v2691_v59 = vmul.f32 0.5, %v10740_v21  ;;  %v3203_v63 = vadd.f32 1.0, %v8573_v29  ;;  %v4127_v50 = vpop.f32.mrf.mxu1  ;;  %v10743_v29 = vld [vmem:[#allocation82_spill] sm:$0xff] }
 0x328   :  { %v5309_v48 = vpop.eup %5308  ;;  %v9130_v33 = vmul.f32 0.5, %v9018_v55  ;;  %5318 = vtanh.f32 %v2530_v30  ;;  %v2280_v2 = vadd.f32 1.0, %v2024_v26  ;;  %v9134_v61 = vadd.f32 %v10741_v46, %v7782_v13  ;;  %v9146_v20 = vpop.f32.mrf.mxu0  ;;  %v10746_v26 = vld [vmem:[#allocation89_spill] sm:$0xff]  ;;  %v10751_v50 = vld [vmem:[#allocation70_spill] sm:$0xff] }
 0x329   :  { %v5311_v53 = vpop.eup %5310  ;;  %v9137_v16 = vmul.f32 %v3280_v1, %v8992_v37  ;;  %v9140_v31 = vmul.f32 %v3282_v10, %v8996_v28  ;;  %v9144_v9 = vadd.f32 %v10743_v29, %v7854_v17  ;;  %4358 = vmatprep.mubr.f32.mxu0 %v3457_v52  ;;  %v3459_v55 = vmul.f32 %v3203_v63, %v2691_v59  ;;  %v10747_v37 = vld [vmem:[#allocation83_spill] sm:$0xff]  ;;  %v9154_v28 = vpop.f32.mrf.mxu1 }
 0x32a   :  { %10745 = vst [vmem:[#allocation82_spill] sm:$0xff] %v9146_v20  ;;  %5320 = vtanh.f32 %v2521_v22  ;;  %v1768_v41 = vmul.f32 0.7978846, %v9067_v25  ;;  %v2282_v30 = vadd.f32 1.0, %v2026_v44  ;;  %v9151_v21 = vadd.f32 %v10746_v26, %v7789_v45  ;;  %4359 = vmatmul.mubr.f32.gmra.mxu0 %v10747_v37  ;;  %10748 = vst [vmem:[#allocation89_spill] sm:$0xff] %v9154_v28  ;;  %v3907_v59 = vpop.f32.mrf.mxu0  ;;  %v10749_v44 = vld [vmem:[#allocation64_spill] sm:$0xff] }
 0x32b   :  { %10742 = vst [vmem:[#allocation36_spill] sm:$0xff] %v9140_v31  ;;  %10744 = vst [vmem:[#allocation28_spill] sm:$0xff] %v9144_v9  ;;  %5322 = vtanh.f32 %v2523_v12  ;;  %v1761_v1 = vmul.f32 0.7978846, %v9075_v35  ;;  %v2273_v10 = vadd.f32 1.0, %v2017_v7  ;;  %v2275_v52 = vadd.f32 1.0, %v2019_v24  ;;  %4583 = vmatprep.mubr.f32.mxu1 %v3459_v55  ;;  %v4132_v29 = vpop.f32.mrf.mxu1 }
 0x32c   :  { %v2536_v63 = vmul.f32 %v2280_v2, %v1768_v41  ;;  %v1770_v22 = vmul.f32 0.7978846, %v9079_v18  ;;  %v9160_v8 = vadd.f32 %v10749_v44, %v7871_v3  ;;  %v1520_v46 = vmul.f32 %v9134_v61, %v9134_v61  ;;  %4584 = vmatmul.mubr.f32.gmra.mxu1 %v10751_v50  ;;  %v9174_v55 = vpop.f32.mrf.mxu0  ;;  %v10754_v28 = vld [vmem:[#allocation34_spill] sm:$0xff] }
 0x32d   :  { %v1763_v12 = vmul.f32 0.7978846, %v9088_v5  ;;  %v9167_v7 = vmul.f32 0.5, %v9067_v25  ;;  %v9170_v24 = vmul.f32 0.5, %v9079_v18  ;;  %v1513_v2 = vmul.f32 %v9144_v9, %v9144_v9  ;;  %10752 = vst [vmem:[#allocation64_spill] sm:$0xff] %v9174_v55  ;;  %v9180_v50 = vpop.f32.mrf.mxu1 }
 0x32e   :  { %10750 = vst [vmem:[#allocation83_spill] sm:$0xff] %v9160_v8  ;;  %v9176_v41 = vpop.eup %5312  ;;  %v3288_v26 = vadd.f32 1.0, %v5309_v48  ;;  %v3290_v37 = vadd.f32 1.0, %v5311_v53  ;;  %v2538_v59 = vmul.f32 %v2282_v30, %v1770_v22  ;;  %v1522_v44 = vmul.f32 %v9151_v21, %v9151_v21  ;;  %10753 = vst [vmem:[#allocation70_spill] sm:$0xff] %v9180_v50  ;;  %v3912_v51 = vpop.f32.mrf.mxu0  ;;  %v10755_v30 = vld [vmem:[#allocation101_spill] sm:$0xff] }
 0x32f   :  { %v2529_v25 = vmul.f32 %v2273_v10, %v1761_v1  ;;  %v2531_v29 = vmul.f32 %v2275_v52, %v1763_v12  ;;  %v2697_v18 = vmul.f32 0.5, %v10754_v28  ;;  %v3209_v20 = vadd.f32 1.0, %v8595_v19  ;;  %v4137_v55 = vpop.f32.mrf.mxu1  ;;  %v10756_v10 = vld [vmem:[#allocation65_spill] sm:$0xff] }
 0x330   :  { %v9184_v60 = vpop.eup %5314  ;;  %5324 = vtanh.f32 %v2536_v63  ;;  %v1515_v48 = vmul.f32 %v9160_v8, %v9160_v8  ;;  %v2032_v53 = vmul.f32 0.044715, %v1520_v46  ;;  %v9190_v22 = vadd.f32 %v10755_v30, %v7782_v13  ;;  %v9194_v19 = vpop.f32.mrf.mxu0  ;;  %v10758_v63 = vld [vmem:[#allocation53_spill] sm:$0xff]  ;;  %v10760_v46 = vld [vmem:[#allocation88_spill] sm:$0xff] }
 0x331   :  { %v2025_v50 = vmul.f32 0.044715, %v1513_v2  ;;  %v3465_v1 = vmul.f32 %v3209_v20, %v2697_v18  ;;  %v2699_v52 = vmul.f32 0.5, %v10756_v10  ;;  %v3211_v28 = vadd.f32 1.0, %v8635_v43  ;;  %10757 = vst [vmem:[#allocation34_spill] sm:$0xff] %v9194_v19  ;;  %v9204_v30 = vpop.f32.mrf.mxu1  ;;  %v10764_v55 = vld [vmem:[#allocation85_spill] sm:$0xff] }
 0x332   :  { %5326 = vtanh.f32 %v2538_v59  ;;  %v2034_v51 = vmul.f32 0.044715, %v1522_v44  ;;  %v9198_v12 = vadd.f32 %v10758_v63, %v7854_v17  ;;  %v9202_v5 = vadd.f32 %v10760_v46, %v7789_v45  ;;  %10761 = vst [vmem:[#allocation65_spill] sm:$0xff] %v9204_v30  ;;  %v3917_v18 = vpop.f32.mrf.mxu0 }
 0x333   :  { %v5317_v2 = vpop.eup %5316  ;;  %v9207_v20 = vmul.f32 %v3288_v26, %v9051_v54  ;;  %v9210_v43 = vmul.f32 %v3290_v37, %v9084_v32  ;;  %v9214_v59 = vadd.f32 %v10764_v55, %v7871_v3  ;;  %4363 = vmatprep.mubr.f32.mxu0 %v3465_v1  ;;  %v3467_v44 = vmul.f32 %v3211_v28, %v2699_v52  ;;  %v4142_v54 = vpop.f32.mrf.mxu1 }
 0x334   :  { %10759 = vst [vmem:[#allocation101_spill] sm:$0xff] %v9198_v12  ;;  %5328 = vtanh.f32 %v2529_v25  ;;  %v2027_v10 = vmul.f32 0.044715, %v1515_v48  ;;  %v2288_v63 = vadd.f32 1.0, %v2032_v53  ;;  %v1528_v46 = vmul.f32 %v9190_v22, %v9190_v22  ;;  %4364 = vmatmul.mubr.f32.gmra.mxu0 %v8615_v4  ;;  %v9221_v1 = vpop.f32.mrf.mxu0 }
 0x335   :  { %10762 = vst [vmem:[#allocation53_spill] sm:$0xff] %v9207_v20  ;;  %10763 = vst [vmem:[#allocation88_spill] sm:$0xff] %v9210_v43  ;;  %v5319_v26 = vpop.eup %5318  ;;  %5330 = vtanh.f32 %v2531_v29  ;;  %v1769_v32 = vmul.f32 0.7978846, %v9144_v9  ;;  %v2281_v37 = vadd.f32 1.0, %v2025_v50  ;;  %4588 = vmatprep.mubr.f32.mxu1 %v3467_v44  ;;  %v2290_v48 = vadd.f32 1.0, %v2034_v51  ;;  %v9229_v29 = vpop.f32.mrf.mxu1 }
 0x336   :  { %10765 = vst [vmem:[#allocation85_spill] sm:$0xff] %v9214_v59  ;;  %v1771_v55 = vmul.f32 0.7978846, %v9160_v8  ;;  %10766 = vst [vmem:[#allocation113_spill] sm:$0xff] %v9221_v1  ;;  %v1776_v25 = vmul.f32 0.7978846, %v9134_v61  ;;  %v1521_v53 = vmul.f32 %v9198_v12, %v9198_v12  ;;  %v1530_v4 = vmul.f32 %v9202_v5, %v9202_v5  ;;  %4589 = vmatmul.mubr.f32.gmra.mxu1 %v8618_v36  ;;  %v3922_v18 = vpop.f32.mrf.mxu0 }
 0x337   :  { %10767 = vst [vmem:[#allocation114_spill] sm:$0xff] %v9229_v29  ;;  %v9231_v52 = vpop.eup %5320  ;;  %v3296_v50 = vadd.f32 1.0, %v5317_v2  ;;  %v9234_v28 = vmul.f32 0.5, %v9134_v61  ;;  %v1778_v44 = vmul.f32 0.7978846, %v9151_v21  ;;  %v1523_v51 = vmul.f32 %v9214_v59, %v9214_v59  ;;  %v4147_v8 = vpop.f32.mrf.mxu1  ;;  %v10768_v61 = vld [vmem:[#allocation43_spill] sm:$0xff] }
 0x338   :  { %v9239_v54 = vpop.eup %5322  ;;  %v3298_v1 = vadd.f32 1.0, %v5319_v26  ;;  %v2283_v30 = vadd.f32 1.0, %v2027_v10  ;;  %v2544_v19 = vmul.f32 %v2288_v63, %v1776_v25  ;;  %v2040_v36 = vmul.f32 0.044715, %v1528_v46  ;;  %v9247_v20 = vpop.f32.mrf.mxu0  ;;  %v10770_v26 = vld [vmem:[#allocation47_spill] sm:$0xff] }
 0x339   :  { %v2537_v29 = vmul.f32 %v2281_v37, %v1769_v32  ;;  %v9243_v2 = vadd.f32 %v8604_v6, %v7782_v13  ;;  %v2705_v9 = vmul.f32 0.5, %v10768_v61  ;;  %v3217_v43 = vadd.f32 1.0, %v8655_v34  ;;  %10769 = vst [vmem:[#allocation43_spill] sm:$0xff] %v9247_v20  ;;  %v9253_v63 = vpop.f32.mrf.mxu1  ;;  %v10772_v32 = vld [vmem:[#allocation51_spill] sm:$0xff] }
 0x33a   :  { %v2546_v35 = vmul.f32 %v2290_v48, %v1778_v44  ;;  %v2033_v18 = vmul.f32 0.044715, %v1521_v53  ;;  %v2042_v31 = vmul.f32 0.044715, %v1530_v4  ;;  %v9251_v10 = vadd.f32 %v10770_v26, %v7789_v45  ;;  %10771 = vst [vmem:[#allocation47_spill] sm:$0xff] %v9253_v63  ;;  %v3927_v25 = vpop.f32.mrf.mxu0 }
 0x33b   :  { %v2035_v8 = vmul.f32 0.044715, %v1523_v51  ;;  %v3473_v46 = vmul.f32 %v3217_v43, %v2705_v9  ;;  %v2707_v6 = vmul.f32 0.5, %v10772_v32  ;;  %v3219_v37 = vadd.f32 1.0, %v8693_v11  ;;  %v4152_v4 = vpop.f32.mrf.mxu1  ;;  %v10779_v32 = vld [vmem:[#allocation59_spill] sm:$0xff] }
 0x33c   :  { %v9258_v34 = vmul.f32 %v3296_v50, %v9117_v42  ;;  %5332 = vtanh.f32 %v2544_v19  ;;  %v9261_v48 = vmul.f32 0.5, %v9151_v21  ;;  %v2296_v53 = vadd.f32 1.0, %v2040_v36  ;;  %v9268_v43 = vpop.f32.mrf.mxu0 }
 0x33d   :  { %v5325_v44 = vpop.eup %5324  ;;  %v9264_v61 = vmul.f32 %v3298_v1, %v9130_v33  ;;  %v2539_v51 = vmul.f32 %v2283_v30, %v1771_v55  ;;  %v1536_v9 = vmul.f32 %v9243_v2, %v9243_v2  ;;  %4368 = vmatprep.mubr.f32.mxu0 %v3473_v46  ;;  %v3475_v11 = vmul.f32 %v3219_v37, %v2707_v6  ;;  %v9274_v50 = vpop.f32.mrf.mxu1  ;;  %v10781_v6 = vld [vmem:[#allocation103_spill] sm:$0xff] }
 0x33e   :  { %10773 = vst [vmem:[#allocation51_spill] sm:$0xff] %v9258_v34  ;;  %10775 = vst [vmem:[#allocation116_spill] sm:$0xff] %v9268_v43  ;;  %5334 = vtanh.f32 %v2546_v35  ;;  %v1784_v42 = vmul.f32 0.7978846, %v9190_v22  ;;  %v2298_v19 = vadd.f32 1.0, %v2042_v31  ;;  %v1538_v21 = vmul.f32 %v9251_v10, %v9251_v10  ;;  %4369 = vmatmul.mubr.f32.gmra.mxu0 %v8675_v58  ;;  %v3932_v36 = vpop.f32.mrf.mxu0  ;;  %v10777_v31 = vld [vmem:[#allocation74_spill] sm:$0xff] }
 0x33f   :  { %10774 = vst [vmem:[#allocation115_spill] sm:$0xff] %v9264_v61  ;;  %10776 = vst [vmem:[#allocation117_spill] sm:$0xff] %v9274_v50  ;;  %v5327_v33 = vpop.eup %5326  ;;  %5336 = vtanh.f32 %v2537_v29  ;;  %v1777_v30 = vmul.f32 0.7978846, %v9198_v12  ;;  %v2289_v55 = vadd.f32 1.0, %v2033_v18  ;;  %v2291_v1 = vadd.f32 1.0, %v2035_v8  ;;  %4593 = vmatprep.mubr.f32.mxu1 %v3475_v11  ;;  %v4157_v29 = vpop.f32.mrf.mxu1 }
 0x340   :  { %v2552_v26 = vmul.f32 %v2296_v53, %v1784_v42  ;;  %v1786_v35 = vmul.f32 0.7978846, %v9202_v5  ;;  %v9280_v46 = vadd.f32 %v10777_v31, %v7854_v17  ;;  %v9284_v58 = vadd.f32 %v10779_v32, %v7871_v3  ;;  %4594 = vmatmul.mubr.f32.gmra.mxu1 %v10781_v6  ;;  %v9293_v53 = vpop.f32.mrf.mxu0  ;;  %v10784_v50 = vld [vmem:[#allocation56_spill] sm:$0xff] }
 0x341   :  { %v9287_v37 = vpop.eup %5328  ;;  %5338 = vtanh.f32 %v2539_v51  ;;  %v1779_v18 = vmul.f32 0.7978846, %v9214_v59  ;;  %v9291_v8 = vmul.f32 0.5, %v9190_v22  ;;  %v2048_v25 = vmul.f32 0.044715, %v1536_v9  ;;  %10782 = vst [vmem:[#allocation103_spill] sm:$0xff] %v9293_v53  ;;  %v9297_v32 = vpop.f32.mrf.mxu1 }
 0x342   :  { %10778 = vst [vmem:[#allocation74_spill] sm:$0xff] %v9280_v46  ;;  %10780 = vst [vmem:[#allocation59_spill] sm:$0xff] %v9284_v58  ;;  %v9295_v4 = vpop.eup %5330  ;;  %v3304_v11 = vadd.f32 1.0, %v5325_v44  ;;  %v3306_v42 = vadd.f32 1.0, %v5327_v33  ;;  %v2554_v36 = vmul.f32 %v2298_v19, %v1786_v35  ;;  %v2050_v31 = vmul.f32 0.044715, %v1538_v21  ;;  %v3937_v20 = vpop.f32.mrf.mxu0 }
 0x343   :  { %10783 = vst [vmem:[#allocation118_spill] sm:$0xff] %v9297_v32  ;;  %v2545_v6 = vmul.f32 %v2289_v55, %v1777_v30  ;;  %v2547_v29 = vmul.f32 %v2291_v1, %v1779_v18  ;;  %v2713_v51 = vmul.f32 0.5, %v10784_v50  ;;  %v10785_v43 = vld [vmem:[#allocation84_spill] sm:$0xff]  ;;  %5340 = vtanh.f32 %v2552_v26  ;;  %v4162_v21 = vpop.f32.mrf.mxu1  ;;  %v10787_v55 = vld [vmem:[#allocation91_spill] sm:$0xff]  ;;  %v10788_v50 = vld [vmem:[#allocation105_spill] sm:$0xff] }
 0x344   :  { %v3225_v63 = vadd.f32 1.0, %v10785_v43  ;;  %v1529_v22 = vmul.f32 %v9280_v46, %v9280_v46  ;;  %v1531_v9 = vmul.f32 %v9284_v58, %v9284_v58  ;;  %v10786_v44 = vld [vmem:[#allocation76_spill] sm:$0xff]  ;;  %v2304_v33 = vadd.f32 1.0, %v2048_v25  ;;  %v9311_v43 = vpop.f32.mrf.mxu0  ;;  %v10790_v26 = vld [vmem:[#allocation75_spill] sm:$0xff]  ;;  %v10792_v32 = vld [vmem:[#allocation81_spill] sm:$0xff] }
 0x345   :  { %v9307_v19 = vadd.f32 %v10786_v44, %v7782_v13  ;;  %v2715_v1 = vmul.f32 0.5, %v10787_v55  ;;  %v3227_v35 = vadd.f32 1.0, %v10788_v50  ;;  %10789 = vst [vmem:[#allocation56_spill] sm:$0xff] %v9311_v43  ;;  %5342 = vtanh.f32 %v2554_v36  ;;  %v9321_v44 = vpop.f32.mrf.mxu1  ;;  %v10807_v12 = vld [vmem:[#allocation92_spill] sm:$0xff] }
 0x346   :  { %v3481_v30 = vmul.f32 %v3225_v63, %v2713_v51  ;;  %v2306_v20 = vadd.f32 1.0, %v2050_v31  ;;  %v9315_v18 = vadd.f32 %v10790_v26, %v7854_v17  ;;  %v9319_v53 = vadd.f32 %v10792_v32, %v7871_v3  ;;  %10794 = vst [vmem:[#allocation91_spill] sm:$0xff] %v9321_v44  ;;  %v10795_v51 = vld [vmem:[#allocation63_spill] sm:$0xff]  ;;  %v3942_v31 = vpop.f32.mrf.mxu0 }
 0x347   :  { %v9324_v63 = vmul.f32 0.5, %v9202_v5  ;;  %v1792_v25 = vmul.f32 0.7978846, %v9243_v2  ;;  %v9329_v21 = vadd.f32 %v10795_v51, %v7789_v45  ;;  %v3483_v36 = vmul.f32 %v3227_v35, %v2715_v1  ;;  %v10797_v5 = vld [vmem:[#allocation18_spill] sm:$0xff]  ;;  %v4167_v44 = vpop.f32.mrf.mxu1 }
 0x348   :  { %10791 = vst [vmem:[#allocation84_spill] sm:$0xff] %v9315_v18  ;;  %10793 = vst [vmem:[#allocation76_spill] sm:$0xff] %v9319_v53  ;;  %4373 = vmatprep.mubr.f32.mxu0 %v3481_v30  ;;  %v9332_v55 = vmul.f32 %v3304_v11, %v9167_v7  ;;  %v2041_v50 = vmul.f32 0.044715, %v1529_v22  ;;  %v1794_v32 = vmul.f32 0.7978846, %v9251_v10  ;;  %v1544_v26 = vmul.f32 %v9307_v19, %v9307_v19  ;;  %v9341_v35 = vpop.f32.mrf.mxu0 }
 0x349   :  { %4374 = vmatmul.mubr.f32.gmra.mxu0 %v10797_v5  ;;  %v5333_v43 = vpop.eup %5332  ;;  %v9339_v59 = vmul.f32 %v3306_v42, %v9170_v24  ;;  %5344 = vtanh.f32 %v2545_v6  ;;  %v2043_v30 = vmul.f32 0.044715, %v1531_v9  ;;  %v2560_v1 = vmul.f32 %v2304_v33, %v1792_v25  ;;  %4598 = vmatprep.mubr.f32.mxu1 %v3483_v36  ;;  %10799 = vst [vmem:[#allocation81_spill] sm:$0xff] %v9341_v35  ;;  %v10800_v51 = vld [vmem:[#allocation94_spill] sm:$0xff]  ;;  %v9348_v44 = vpop.f32.mrf.mxu1  ;;  %v10804_v35 = vld [vmem:[#allocation73_spill] sm:$0xff] }
 0x34a   :  { %10796 = vst [vmem:[#allocation105_spill] sm:$0xff] %v9332_v55  ;;  %5346 = vtanh.f32 %v2547_v29  ;;  %v2562_v7 = vmul.f32 %v2306_v20, %v1794_v32  ;;  %v1537_v11 = vmul.f32 %v9315_v18, %v9315_v18  ;;  %v1539_v22 = vmul.f32 %v9319_v53, %v9319_v53  ;;  %4599 = vmatmul.mubr.f32.gmra.mxu1 %v10800_v51  ;;  %v3947_v33 = vpop.f32.mrf.mxu0  ;;  %v10802_v32 = vld [vmem:[#allocation104_spill] sm:$0xff] }
 0x34b   :  { %10798 = vst [vmem:[#allocation75_spill] sm:$0xff] %v9339_v59  ;;  %10801 = vst [vmem:[#allocation63_spill] sm:$0xff] %v9348_v44  ;;  %v5335_v24 = vpop.eup %5334  ;;  %v1785_v42 = vmul.f32 0.7978846, %v9280_v46  ;;  %v1787_v6 = vmul.f32 0.7978846, %v9284_v58  ;;  %v1546_v29 = vmul.f32 %v9329_v21, %v9329_v21  ;;  %v9361_v5 = vadd.f32 %v10802_v32, %v7854_v17  ;;  %v4172_v51 = vpop.f32.mrf.mxu1 }
 0x34c   :  { %v9353_v9 = vmul.f32 0.5, %v9243_v2  ;;  %v9357_v20 = vpop.eup %5336  ;;  %v3312_v25 = vadd.f32 1.0, %v5333_v43  ;;  %v2297_v36 = vadd.f32 1.0, %v2041_v50  ;;  %v2056_v31 = vmul.f32 0.044715, %v1544_v26  ;;  %v9365_v46 = vpop.f32.mrf.mxu0 }
 0x34d   :  { %10803 = vst [vmem:[#allocation18_spill] sm:$0xff] %v9361_v5  ;;  %v2299_v44 = vadd.f32 1.0, %v2043_v30  ;;  %5348 = vtanh.f32 %v2560_v1  ;;  %v2721_v58 = vmul.f32 0.5, %v10804_v35  ;;  %v3233_v2 = vadd.f32 1.0, %v8775_v56  ;;  %10805 = vst [vmem:[#allocation94_spill] sm:$0xff] %v9365_v46  ;;  %v9369_v26 = vpop.f32.mrf.mxu1  ;;  %v10808_v30 = vld [vmem:[#allocation71_spill] sm:$0xff] }
 0x34e   :  { %v9367_v59 = vpop.eup %5338  ;;  %v3314_v33 = vadd.f32 1.0, %v5335_v24  ;;  %5350 = vtanh.f32 %v2562_v7  ;;  %v2049_v43 = vmul.f32 0.044715, %v1537_v11  ;;  %v2051_v50 = vmul.f32 0.044715, %v1539_v22  ;;  %10806 = vst [vmem:[#allocation104_spill] sm:$0xff] %v9369_v26  ;;  %v3952_v61 = vpop.f32.mrf.mxu0 }
 0x34f   :  { %v2058_v55 = vmul.f32 0.044715, %v1546_v29  ;;  %v3489_v32 = vmul.f32 %v3233_v2, %v2721_v58  ;;  %v2723_v51 = vmul.f32 0.5, %v10807_v12  ;;  %v3235_v1 = vadd.f32 1.0, %v10808_v30  ;;  %v10809_v46 = vld [vmem:[#allocation25_spill] sm:$0xff]  ;;  %v4177_v22 = vpop.f32.mrf.mxu1  ;;  %v10812_v61 = vld [vmem:[#allocation67_spill] sm:$0xff] }
 0x350   :  { %v2312_v35 = vadd.f32 1.0, %v2056_v31  ;;  %v1545_v56 = vmul.f32 %v9361_v5, %v9361_v5  ;;  %v9377_v34 = vadd.f32 %v10809_v46, %v7871_v3  ;;  %v10811_v7 = vld [vmem:[#allocation49_spill] sm:$0xff]  ;;  %v5341_v24 = vpop.eup %5340  ;;  %v2553_v58 = vmul.f32 %v2297_v36, %v1785_v42  ;;  %v9390_v2 = vpop.f32.mrf.mxu0  ;;  %v10815_v26 = vld [vmem:[#allocation96_spill] sm:$0xff] }
 0x351   :  { %v9381_v11 = vadd.f32 %v10811_v7, %v7782_v13  ;;  %v9384_v12 = vmul.f32 0.5, %v9251_v10  ;;  %v9388_v29 = vadd.f32 %v10812_v61, %v7789_v45  ;;  %4378 = vmatprep.mubr.f32.mxu0 %v3489_v32  ;;  %v3491_v31 = vmul.f32 %v3235_v1, %v2723_v51  ;;  %10813 = vst [vmem:[#allocation92_spill] sm:$0xff] %v9390_v2  ;;  %v9397_v42 = vpop.f32.mrf.mxu1 }
 0x352   :  { %10810 = vst [vmem:[#allocation73_spill] sm:$0xff] %v9377_v34  ;;  %v9393_v46 = vmul.f32 %v3312_v25, %v9234_v28  ;;  %v2555_v30 = vmul.f32 %v2299_v44, %v1787_v6  ;;  %v2305_v7 = vadd.f32 1.0, %v2049_v43  ;;  %v1800_v22 = vmul.f32 0.7978846, %v9307_v19  ;;  %4379 = vmatmul.mubr.f32.gmra.mxu0 %v10815_v26  ;;  %10816 = vst [vmem:[#allocation25_spill] sm:$0xff] %v9397_v42  ;;  %v5343_v10 = vpop.eup %5342  ;;  %v3957_v61 = vpop.f32.mrf.mxu0  ;;  %v10818_v43 = vld [vmem:[#allocation44_spill] sm:$0xff] }
 0x353   :  { %v9400_v36 = vmul.f32 %v3314_v33, %v9261_v48  ;;  %v1793_v32 = vmul.f32 0.7978846, %v9315_v18  ;;  %v2307_v51 = vadd.f32 1.0, %v2051_v50  ;;  %v2314_v1 = vadd.f32 1.0, %v2058_v55  ;;  %4603 = vmatprep.mubr.f32.mxu1 %v3491_v31  ;;  %v4182_v26 = vpop.f32.mrf.mxu1  ;;  %v10822_v42 = vld [vmem:[#allocation45_spill] sm:$0xff] }
 0x354   :  { %10814 = vst [vmem:[#allocation71_spill] sm:$0xff] %v9393_v46  ;;  %v2568_v28 = vmul.f32 %v2312_v35, %v1800_v22  ;;  %v2057_v25 = vmul.f32 0.044715, %v1545_v56  ;;  %v1547_v44 = vmul.f32 %v9377_v34, %v9377_v34  ;;  %v1552_v6 = vmul.f32 %v9381_v11, %v9381_v11  ;;  %4604 = vmatmul.mubr.f32.gmra.mxu1 %v10818_v43  ;;  %v9412_v50 = vpop.f32.mrf.mxu0 }
 0x355   :  { %10817 = vst [vmem:[#allocation49_spill] sm:$0xff] %v9400_v36  ;;  %5352 = vtanh.f32 %v2553_v58  ;;  %v1795_v48 = vmul.f32 0.7978846, %v9319_v53  ;;  %v1802_v33 = vmul.f32 0.7978846, %v9329_v21  ;;  %v1554_v55 = vmul.f32 %v9388_v29, %v9388_v29  ;;  %10819 = vst [vmem:[#allocation67_spill] sm:$0xff] %v9412_v50  ;;  %v9416_v61 = vpop.f32.mrf.mxu1 }
 0x356   :  { %v9414_v35 = vpop.eup %5344  ;;  %v3320_v56 = vadd.f32 1.0, %v5341_v24  ;;  %v3322_v31 = vadd.f32 1.0, %v5343_v10  ;;  %5354 = vtanh.f32 %v2555_v30  ;;  %v2561_v22 = vmul.f32 %v2305_v7, %v1793_v32  ;;  %10821 = vst [vmem:[#allocation44_spill] sm:$0xff] %v9416_v61  ;;  %v3962_v18 = vpop.f32.mrf.mxu0  ;;  %v10823_v30 = vld [vmem:[#allocation102_spill] sm:$0xff] }
 0x357   :  { %10820 = vst [vmem:[#allocation96_spill] sm:$0xff] %v9414_v35  ;;  %v9418_v43 = vpop.eup %5346  ;;  %v2563_v58 = vmul.f32 %v2307_v51, %v1795_v48  ;;  %v2570_v26 = vmul.f32 %v2314_v1, %v1802_v33  ;;  %v2729_v2 = vmul.f32 0.5, %v10822_v42  ;;  %v3241_v53 = vadd.f32 1.0, %v8853_v38  ;;  %v4187_v35 = vpop.f32.mrf.mxu1  ;;  %v10825_v18 = vld [vmem:[#allocation93_spill] sm:$0xff]  ;;  %v10830_v48 = vld [vmem:[#allocation24_spill] sm:$0xff] }
 0x358   :  { %5356 = vtanh.f32 %v2568_v28  ;;  %v2313_v36 = vadd.f32 1.0, %v2057_v25  ;;  %v2059_v50 = vmul.f32 0.044715, %v1547_v44  ;;  %v2064_v46 = vmul.f32 0.044715, %v1552_v6  ;;  %v9424_v61 = vpop.f32.mrf.mxu0 }
 0x359   :  { %v2066_v24 = vmul.f32 0.044715, %v1554_v55  ;;  %v3497_v10 = vmul.f32 %v3241_v53, %v2729_v2  ;;  %v2731_v7 = vmul.f32 0.5, %v10823_v30  ;;  %v3243_v32 = vadd.f32 1.0, %v8873_v15  ;;  %10824 = vst [vmem:[#allocation45_spill] sm:$0xff] %v9424_v61  ;;  %v9436_v28 = vpop.f32.mrf.mxu1 }
 0x35a   :  { %v5349_v51 = vpop.eup %5348  ;;  %5358 = vtanh.f32 %v2561_v22  ;;  %v9427_v42 = vmul.f32 0.5, %v9307_v19  ;;  %v9430_v38 = vmul.f32 0.5, %v9329_v21  ;;  %v9434_v1 = vadd.f32 %v10825_v18, %v7854_v17  ;;  %10827 = vst [vmem:[#allocation93_spill] sm:$0xff] %v9436_v28  ;;  %v3967_v19 = vpop.f32.mrf.mxu0 }
 0x35b   :  { %v5351_v53 = vpop.eup %5350  ;;  %v9439_v2 = vmul.f32 %v3320_v56, %v9291_v8  ;;  %5360 = vtanh.f32 %v2563_v58  ;;  %v1801_v15 = vmul.f32 0.7978846, %v9361_v5  ;;  %4383 = vmatprep.mubr.f32.mxu0 %v3497_v10  ;;  %v3499_v25 = vmul.f32 %v3243_v32, %v2731_v7  ;;  %v4192_v33 = vpop.f32.mrf.mxu1  ;;  %v10839_v7 = vld [vmem:[#allocation35_spill] sm:$0xff] }
 0x35c   :  { %10826 = vst [vmem:[#allocation102_spill] sm:$0xff] %v9434_v1  ;;  %v9443_v44 = vmul.f32 %v3322_v31, %v9324_v63  ;;  %5362 = vtanh.f32 %v2570_v26  ;;  %v2315_v21 = vadd.f32 1.0, %v2059_v50  ;;  %v2320_v6 = vadd.f32 1.0, %v2064_v46  ;;  %4384 = vmatmul.mubr.f32.gmra.mxu0 %v10830_v48  ;;  %v9448_v22 = vpop.f32.mrf.mxu0  ;;  %v10833_v46 = vld [vmem:[#allocation33_spill] sm:$0xff]  ;;  %v10836_v26 = vld [vmem:[#allocation52_spill] sm:$0xff]  ;;  %v10841_v48 = vld [vmem:[#allocation95_spill] sm:$0xff] }
 0x35d   :  { %10828 = vst [vmem:[#allocation119_spill] sm:$0xff] %v9439_v2  ;;  %v2569_v55 = vmul.f32 %v2313_v36, %v1801_v15  ;;  %v1803_v35 = vmul.f32 0.7978846, %v9377_v34  ;;  %v1808_v8 = vmul.f32 0.7978846, %v9381_v11  ;;  %v2322_v56 = vadd.f32 1.0, %v2066_v24  ;;  %4608 = vmatprep.mubr.f32.mxu1 %v3499_v25  ;;  %v9464_v24 = vpop.f32.mrf.mxu1 }
 0x35e   :  { %10829 = vst [vmem:[#allocation120_spill] sm:$0xff] %v9443_v44  ;;  %10831 = vst [vmem:[#allocation24_spill] sm:$0xff] %v9448_v22  ;;  %v9451_v58 = vmul.f32 0.5, %v9381_v11  ;;  %v1553_v63 = vmul.f32 %v9434_v1, %v9434_v1  ;;  %v9457_v50 = vadd.f32 %v10833_v46, %v7871_v3  ;;  %v10835_v36 = vld [vmem:[#allocation68_spill] sm:$0xff]  ;;  %4609 = vmatmul.mubr.f32.gmra.mxu1 %v10836_v26  ;;  %v3328_v10 = vadd.f32 1.0, %v5349_v51  ;;  %v3972_v18 = vpop.f32.mrf.mxu0 }
 0x35f   :  { %v9461_v31 = vadd.f32 %v10835_v36, %v7782_v13  ;;  %10837 = vst [vmem:[#allocation68_spill] sm:$0xff] %v9464_v24  ;;  %v1810_v30 = vmul.f32 0.7978846, %v9388_v29  ;;  %v9468_v11 = vmul.f32 0.5, %v9388_v29  ;;  %v9472_v32 = vadd.f32 %v10839_v7, %v7789_v45  ;;  %v4197_v46 = vpop.f32.mrf.mxu1  ;;  %v10842_v36 = vld [vmem:[#allocation31_spill] sm:$0xff]  ;;  %v10848_v18 = vld [vmem:[#allocation60_spill] sm:$0xff] }
 0x360   :  { %10832 = vst [vmem:[#allocation121_spill] sm:$0xff] %v9451_v58  ;;  %10834 = vst [vmem:[#allocation33_spill] sm:$0xff] %v9457_v50  ;;  %v3330_v15 = vadd.f32 1.0, %v5351_v53  ;;  %v2571_v25 = vmul.f32 %v2315_v21, %v1803_v35  ;;  %v2576_v19 = vmul.f32 %v2320_v6, %v1808_v8  ;;  %v9476_v33 = vadd.f32 %v10841_v48, %v7854_v17  ;;  %v10844_v6 = vld [vmem:[#allocation37_spill] sm:$0xff] }
 0x361   :  { %10838 = vst [vmem:[#allocation52_spill] sm:$0xff] %v9468_v11  ;;  %10840 = vst [vmem:[#allocation35_spill] sm:$0xff] %v9472_v32  ;;  %5364 = vtanh.f32 %v2569_v55  ;;  %v2578_v51 = vmul.f32 %v2322_v56, %v1810_v30  ;;  %v2737_v26 = vmul.f32 0.5, %v10842_v36  ;;  %v3249_v29 = vadd.f32 1.0, %v8920_v23  ;;  %v9480_v11 = vpop.f32.mrf.mxu0  ;;  %v9492_v55 = vpop.f32.mrf.mxu1  ;;  %v10847_v30 = vld [vmem:[#allocation54_spill] sm:$0xff] }
 0x362   :  { %10843 = vst [vmem:[#allocation95_spill] sm:$0xff] %v9480_v11  ;;  %v9482_v58 = vpop.eup %5352  ;;  %v2065_v7 = vmul.f32 0.044715, %v1553_v63  ;;  %v1555_v53 = vmul.f32 %v9457_v50, %v9457_v50  ;;  %v1560_v21 = vmul.f32 %v9461_v31, %v9461_v31  ;;  %v9490_v35 = vadd.f32 %v10844_v6, %v7871_v3  ;;  %10846 = vst [vmem:[#allocation37_spill] sm:$0xff] %v9492_v55  ;;  %v10850_v55 = vld [vmem:[#allocation106_spill] sm:$0xff] }
 0x363   :  { %v9494_v8 = vpop.eup %5354  ;;  %v1562_v23 = vmul.f32 %v9472_v32, %v9472_v32  ;;  %v3505_v56 = vmul.f32 %v3249_v29, %v2737_v26  ;;  %v2739_v63 = vmul.f32 0.5, %v10847_v30  ;;  %v3251_v48 = vadd.f32 1.0, %v10848_v18  ;;  %v3977_v46 = vpop.f32.mrf.mxu0  ;;  %v10853_v29 = vld [vmem:[#allocation107_spill] sm:$0xff] }
 0x364   :  { %10845 = vst [vmem:[#allocation31_spill] sm:$0xff] %v9490_v35  ;;  %v9501_v36 = vmul.f32 %v3328_v10, %v9353_v9  ;;  %5366 = vtanh.f32 %v2571_v25  ;;  %v1561_v6 = vmul.f32 %v9476_v33, %v9476_v33  ;;  %v9507_v11 = vadd.f32 %v10850_v55, %v7782_v13  ;;  %v4202_v24 = vpop.f32.mrf.mxu1  ;;  %v10856_v55 = vld [vmem:[#allocation26_spill] sm:$0xff] }
 0x365   :  { %v5357_v22 = vpop.eup %5356  ;;  %v9510_v26 = vmul.f32 %v3330_v15, %v9384_v12  ;;  %5368 = vtanh.f32 %v2576_v19  ;;  %v9514_v30 = vadd.f32 %v10853_v29, %v7789_v45  ;;  %4388 = vmatprep.mubr.f32.mxu0 %v3505_v56  ;;  %v3507_v9 = vmul.f32 %v3251_v48, %v2739_v63  ;;  %v9516_v10 = vpop.f32.mrf.mxu0 }
 0x366   :  { %10849 = vst [vmem:[#allocation54_spill] sm:$0xff] %v9501_v36  ;;  %10851 = vst [vmem:[#allocation60_spill] sm:$0xff] %v9507_v11  ;;  %v1809_v25 = vmul.f32 0.7978846, %v9434_v1  ;;  %v2067_v18 = vmul.f32 0.044715, %v1555_v53  ;;  %v1563_v24 = vmul.f32 %v9490_v35, %v9490_v35  ;;  %4389 = vmatmul.mubr.f32.gmra.mxu0 %v10856_v55  ;;  %v9522_v12 = vpop.f32.mrf.mxu1  ;;  %5370 = vtanh.f32 %v2578_v51 }
 0x367   :  { %10852 = vst [vmem:[#allocation106_spill] sm:$0xff] %v9510_v26  ;;  %10854 = vst [vmem:[#allocation107_spill] sm:$0xff] %v9514_v30  ;;  %v2072_v46 = vmul.f32 0.044715, %v1560_v21  ;;  %v9524_v15 = vpop.eup %5358  ;;  %v2321_v19 = vadd.f32 1.0, %v2065_v7  ;;  %4613 = vmatprep.mubr.f32.mxu1 %v3507_v9  ;;  %v3982_v48 = vpop.f32.mrf.mxu0  ;;  %v1568_v1 = vmul.f32 %v9507_v11, %v9507_v11  ;;  %v10859_v55 = vld [vmem:[#allocation79_spill] sm:$0xff] }
 0x368   :  { %10855 = vst [vmem:[#allocation122_spill] sm:$0xff] %v9516_v10  ;;  %10857 = vst [vmem:[#allocation26_spill] sm:$0xff] %v9522_v12  ;;  %v1811_v56 = vmul.f32 0.7978846, %v9457_v50  ;;  %v2074_v63 = vmul.f32 0.044715, %v1562_v23  ;;  %v9527_v29 = vpop.eup %5360  ;;  %v9534_v26 = vadd.f32 %v10859_v55, %v7854_v17  ;;  %v4207_v51 = vpop.f32.mrf.mxu1 }
 0x369   :  { %10858 = vst [vmem:[#allocation123_spill] sm:$0xff] %v9527_v29  ;;  %v1816_v53 = vmul.f32 0.7978846, %v9461_v31  ;;  %v2073_v21 = vmul.f32 0.044715, %v1561_v6  ;;  %v10861_v36 = vld [vmem:[#allocation17_spill] sm:$0xff]  ;;  %v5363_v7 = vpop.eup %5362  ;;  %v1570_v6 = vmul.f32 %v9514_v30, %v9514_v30  ;;  %v9543_v48 = vpop.f32.mrf.mxu0 }
 0x36a   :  { %10860 = vst [vmem:[#allocation79_spill] sm:$0xff] %v9534_v26  ;;  %4614 = vmatmul.mubr.f32.gmra.mxu1 %v10861_v36  ;;  %v3336_v50 = vadd.f32 1.0, %v5357_v22  ;;  %v9538_v23 = vmul.f32 0.5, %v9461_v31  ;;  %v1818_v9 = vmul.f32 0.7978846, %v9472_v32  ;;  %10863 = vst [vmem:[#allocation124_spill] sm:$0xff] %v9543_v48  ;;  %v9549_v36 = vpop.f32.mrf.mxu1  ;;  %v2577_v22 = vmul.f32 %v2321_v19, %v1809_v25 }
 0x36b   :  { %v2323_v12 = vadd.f32 1.0, %v2067_v18  ;;  %v2328_v10 = vadd.f32 1.0, %v2072_v46  ;;  %v2075_v28 = vmul.f32 0.044715, %v1563_v24  ;;  %v10864_v55 = vld [vmem:[#allocation16_spill] sm:$0xff]  ;;  %10866 = vst [vmem:[#allocation125_spill] sm:$0xff] %v9549_v36  ;;  %v3987_v44 = vpop.f32.mrf.mxu0  ;;  %v1569_v18 = vmul.f32 %v9534_v26, %v9534_v26 }
 0x36c   :  { %10862 = vst [vmem:[#allocation17_spill] sm:$0xff] %v9538_v23  ;;  %v9547_v61 = vadd.f32 %v10864_v55, %v7871_v3  ;;  %v2330_v51 = vadd.f32 1.0, %v2074_v63  ;;  %v10867_v31 = vld [vmem:[#allocation38_spill] sm:$0xff]  ;;  %v3257_v32 = vadd.f32 1.0, %v8961_v62  ;;  %v2329_v34 = vadd.f32 1.0, %v2073_v21  ;;  %v10868_v46 = vld [vmem:[#allocation80_spill] sm:$0xff]  ;;  %v4212_v55 = vpop.f32.mrf.mxu1 }
 0x36d   :  { %v2745_v23 = vmul.f32 0.5, %v10867_v31  ;;  %v2080_v2 = vmul.f32 0.044715, %v1568_v1  ;;  %v9557_v24 = vadd.f32 %v10868_v46, %v7782_v13  ;;  %v2082_v48 = vmul.f32 0.044715, %v1570_v6  ;;  %v10870_v36 = vld [vmem:[#allocation39_spill] sm:$0xff]  ;;  %v9561_v63 = vpop.f32.mrf.mxu0 }
 0x36e   :  { %10865 = vst [vmem:[#allocation16_spill] sm:$0xff] %v9547_v61  ;;  %v2747_v25 = vmul.f32 0.5, %v10870_v36  ;;  %v3259_v19 = vadd.f32 1.0, %v8998_v49  ;;  %v9563_v62 = vpop.eup %5364  ;;  %v2579_v44 = vmul.f32 %v2323_v12, %v1811_v56  ;;  %v2584_v1 = vmul.f32 %v2328_v10, %v1816_v53  ;;  %v9567_v29 = vpop.f32.mrf.mxu1 }
 0x36f   :  { %10869 = vst [vmem:[#allocation38_spill] sm:$0xff] %v9557_v24  ;;  %v3513_v5 = vmul.f32 %v3257_v32, %v2745_v23  ;;  %v2331_v21 = vadd.f32 1.0, %v2075_v28  ;;  %v1571_v31 = vmul.f32 %v9547_v61, %v9547_v61  ;;  %v2586_v46 = vmul.f32 %v2330_v51, %v1818_v9  ;;  %v10871_v32 = vld [vmem:[#allocation40_spill] sm:$0xff]  ;;  %v3992_v36 = vpop.f32.mrf.mxu0 }
 0x370   :  { %v1817_v6 = vmul.f32 0.7978846, %v9476_v33  ;;  %v9572_v23 = vadd.f32 %v10871_v32, %v7789_v45  ;;  %v3515_v49 = vmul.f32 %v3259_v19, %v2747_v25  ;;  %v1819_v55 = vmul.f32 0.7978846, %v9490_v35  ;;  %v4217_v56 = vpop.f32.mrf.mxu1 }
 0x371   :  { %4393 = vmatprep.mubr.f32.mxu0 %v3513_v5  ;;  %v2336_v12 = vadd.f32 1.0, %v2080_v2  ;;  %v2081_v10 = vmul.f32 0.044715, %v1569_v18  ;;  %v1576_v28 = vmul.f32 %v9557_v24, %v9557_v24  ;;  %v9578_v53 = vpop.eup %5366  ;;  %v3338_v9 = vadd.f32 1.0, %v5363_v7  ;;  %v9580_v5 = vpop.f32.mrf.mxu0 }
 0x372   :  { %10872 = vst [vmem:[#allocation80_spill] sm:$0xff] %v9572_v23  ;;  %4394 = vmatmul.mubr.f32.gmra.mxu0 %v8957_v40  ;;  %5372 = vtanh.f32 %v2577_v22  ;;  %v2585_v51 = vmul.f32 %v2329_v34, %v1817_v6  ;;  %v2338_v32 = vadd.f32 1.0, %v2082_v48  ;;  %4618 = vmatprep.mubr.f32.mxu1 %v3515_v49  ;;  %v5369_v25 = vpop.eup %5368  ;;  %v2587_v19 = vmul.f32 %v2331_v21, %v1819_v55  ;;  %v9584_v36 = vpop.f32.mrf.mxu1  ;;  %v10873_v49 = vld [vmem:[#allocation21_spill] sm:$0xff] }
 0x373   :  { %5374 = vtanh.f32 %v2579_v44  ;;  %v1824_v2 = vmul.f32 0.7978846, %v9507_v11  ;;  %v2083_v18 = vmul.f32 0.044715, %v1571_v31  ;;  %4619 = vmatmul.mubr.f32.gmra.mxu1 %v8964_v14  ;;  %v9587_v40 = vmul.f32 %v3336_v50, %v9427_v42  ;;  %v3997_v48 = vpop.f32.mrf.mxu0  ;;  %v9592_v22 = vpop.eup %5370 }
 0x374   :  { %5376 = vtanh.f32 %v2584_v1  ;;  %v1826_v34 = vmul.f32 0.7978846, %v9514_v30  ;;  %v1578_v7 = vmul.f32 %v9572_v23, %v9572_v23  ;;  %v2337_v21 = vadd.f32 1.0, %v2081_v10  ;;  %v4222_v6 = vpop.f32.mrf.mxu1 }
 0x375   :  { %5378 = vtanh.f32 %v2586_v46  ;;  %v2592_v44 = vmul.f32 %v2336_v12, %v1824_v2  ;;  %v2088_v31 = vmul.f32 0.044715, %v1576_v28  ;;  %v2753_v55 = vmul.f32 0.5, %v10873_v49  ;;  %v9596_v50 = vpop.f32.mrf.mxu0  ;;  %v10874_v28 = vld [vmem:[#allocation86_spill] sm:$0xff] }
 0x376   :  { %5380 = vtanh.f32 %v2585_v51  ;;  %v2594_v14 = vmul.f32 %v2338_v32, %v1826_v34  ;;  %v3265_v42 = vadd.f32 1.0, %v9046_v27  ;;  %v9599_v1 = vmul.f32 %v3338_v9, %v9430_v38  ;;  %v9602_v46 = vpop.f32.mrf.mxu1 }
 0x377   :  { %5382 = vtanh.f32 %v2587_v19  ;;  %v1825_v56 = vmul.f32 0.7978846, %v9534_v26  ;;  %v2339_v48 = vadd.f32 1.0, %v2083_v18  ;;  %v2090_v12 = vmul.f32 0.044715, %v1578_v7  ;;  %v4002_v2 = vpop.f32.mrf.mxu0  ;;  %v10875_v19 = vld [vmem:[#allocation32_spill] sm:$0xff] }
 0x378   :  { %v3521_v10 = vmul.f32 %v3265_v42, %v2753_v55  ;;  %v2755_v51 = vmul.f32 0.5, %v10874_v28  ;;  %v3267_v32 = vadd.f32 1.0, %v9057_v57  ;;  %5384 = vtanh.f32 %v2592_v44  ;;  %v4227_v38 = vpop.f32.mrf.mxu1  ;;  %v10879_v42 = vld [vmem:[#allocation50_spill] sm:$0xff]  ;;  %v10882_v2 = vld [vmem:[#allocation57_spill] sm:$0xff] }
 0x379   :  { %v2593_v27 = vmul.f32 %v2337_v21, %v1825_v56  ;;  %v1827_v34 = vmul.f32 0.7978846, %v9547_v61  ;;  %v2344_v6 = vadd.f32 1.0, %v2088_v31  ;;  %v9607_v9 = vadd.f32 1.0, %v5369_v25  ;;  %v9613_v49 = vpop.f32.mrf.mxu0  ;;  %v10877_v21 = vld [vmem:[#allocation29_spill] sm:$0xff]  ;;  %v10894_v61 = vld [vmem:[#allocation78_spill] sm:$0xff] }
 0x37a   :  { %5386 = vtanh.f32 %v2594_v14  ;;  %v9611_v18 = vadd.f32 %v10875_v19, %v7854_v17  ;;  %4398 = vmatprep.mubr.f32.mxu0 %v3521_v10  ;;  %v3523_v7 = vmul.f32 %v3267_v32, %v2755_v51  ;;  %v1832_v57 = vmul.f32 0.7978846, %v9557_v24  ;;  %v9622_v25 = vpop.f32.mrf.mxu1  ;;  %v10881_v10 = vld [vmem:[#allocation97_spill] sm:$0xff]  ;;  %v10888_v24 = vld [vmem:[#allocation22_spill] sm:$0xff] }
 0x37b   :  { %v2595_v55 = vmul.f32 %v2339_v48, %v1827_v34  ;;  %v1834_v44 = vmul.f32 0.7978846, %v9572_v23  ;;  %v9619_v31 = vadd.f32 %v10877_v21, %v7871_v3  ;;  %4399 = vmatmul.mubr.f32.gmra.mxu0 %v9038_v47  ;;  %v2346_v14 = vadd.f32 1.0, %v2090_v12  ;;  %v4007_v51 = vpop.f32.mrf.mxu0  ;;  %v10883_v34 = vld [vmem:[#allocation98_spill] sm:$0xff] }
 0x37c   :  { %10876 = vst [vmem:[#allocation39_spill] sm:$0xff] %v9611_v18  ;;  %v9626_v56 = vadd.f32 %v10879_v42, %v7782_v13  ;;  %4623 = vmatprep.mubr.f32.mxu1 %v3523_v7  ;;  %v2761_v48 = vmul.f32 0.5, %v10881_v10  ;;  %v3273_v28 = vadd.f32 1.0, %v9114_v39  ;;  %5388 = vtanh.f32 %v2593_v27  ;;  %v4232_v19 = vpop.f32.mrf.mxu1  ;;  %v10884_v42 = vld [vmem:[#allocation72_spill] sm:$0xff] }
 0x37d   :  { %10878 = vst [vmem:[#allocation40_spill] sm:$0xff] %v9619_v31  ;;  %v2600_v32 = vmul.f32 %v2344_v6, %v1832_v57  ;;  %4624 = vmatmul.mubr.f32.gmra.mxu1 %v10882_v2  ;;  %v2763_v38 = vmul.f32 0.5, %v10883_v34  ;;  %v3275_v47 = vadd.f32 1.0, %v9119_v0  ;;  %v1577_v12 = vmul.f32 %v9611_v18, %v9611_v18  ;;  %v9637_v23 = vpop.f32.mrf.mxu0  ;;  %v10885_v6 = vld [vmem:[#allocation30_spill] sm:$0xff]  ;;  %v10887_v2 = vld [vmem:[#allocation23_spill] sm:$0xff] }
 0x37e   :  { %10880 = vst [vmem:[#allocation21_spill] sm:$0xff] %v9626_v56  ;;  %v3529_v21 = vmul.f32 %v3273_v28, %v2761_v48  ;;  %v2769_v7 = vmul.f32 0.5, %v10884_v42  ;;  %v3281_v10 = vadd.f32 1.0, %v9176_v41  ;;  %5390 = vtanh.f32 %v2595_v55  ;;  %v9647_v51 = vpop.f32.mrf.mxu1 }
 0x37f   :  { %v9639_v39 = vpop.eup %5372  ;;  %v1579_v27 = vmul.f32 %v9619_v31, %v9619_v31  ;;  %v9645_v0 = vadd.f32 %v10885_v6, %v7789_v45  ;;  %v3531_v57 = vmul.f32 %v3275_v47, %v2763_v38  ;;  %v1584_v41 = vmul.f32 %v9626_v56, %v9626_v56  ;;  %v4012_v19 = vpop.f32.mrf.mxu0 }
 0x380   :  { %v9649_v48 = vpop.eup %5374  ;;  %4403 = vmatprep.mubr.f32.mxu0 %v3529_v21  ;;  %v3537_v28 = vmul.f32 %v3281_v10, %v2769_v7  ;;  %v2771_v34 = vmul.f32 0.5, %v10887_v2  ;;  %v3283_v55 = vadd.f32 1.0, %v9184_v60  ;;  %v9658_v6 = vadd.f32 1.0, %v9592_v22  ;;  %v4237_v30 = vpop.f32.mrf.mxu1  ;;  %v10890_v10 = vld [vmem:[#allocation90_spill] sm:$0xff]  ;;  %v10891_v2 = vld [vmem:[#allocation61_spill] sm:$0xff] }
 0x381   :  { %10886 = vst [vmem:[#allocation86_spill] sm:$0xff] %v9645_v0  ;;  %v9655_v42 = vpop.eup %5376  ;;  %5392 = vtanh.f32 %v2600_v32  ;;  %v2602_v38 = vmul.f32 %v2346_v14, %v1834_v44  ;;  %v1833_v47 = vmul.f32 0.7978846, %v9611_v18  ;;  %4628 = vmatprep.mubr.f32.mxu1 %v3531_v57  ;;  %4404 = vmatmul.mubr.f32.gmra.mxu0 %v10888_v24  ;;  %v2089_v7 = vmul.f32 0.044715, %v1577_v12  ;;  %v9667_v11 = vpop.f32.mrf.mxu0  ;;  %v10892_v30 = vld [vmem:[#allocation62_spill] sm:$0xff] }
 0x382   :  { %v9662_v21 = vpop.eup %5378  ;;  %4629 = vmatmul.mubr.f32.gmra.mxu1 %v10890_v10  ;;  %4408 = vmatprep.mubr.f32.mxu0 %v3537_v28  ;;  %v3539_v60 = vmul.f32 %v3283_v55, %v2771_v34  ;;  %v2777_v19 = vmul.f32 0.5, %v10891_v2  ;;  %v3289_v22 = vadd.f32 1.0, %v9231_v52  ;;  %v1586_v14 = vmul.f32 %v9645_v0, %v9645_v0  ;;  %v10893_v32 = vld [vmem:[#allocation19_spill] sm:$0xff]  ;;  %v9679_v28 = vpop.f32.mrf.mxu1 }
 0x383   :  { %10889 = vst [vmem:[#allocation32_spill] sm:$0xff] %v9662_v21  ;;  %v9669_v44 = vpop.eup %5380  ;;  %v9675_v24 = vadd.f32 %v10892_v30, %v7854_v17  ;;  %v2779_v12 = vmul.f32 0.5, %v10893_v32  ;;  %v3291_v57 = vadd.f32 1.0, %v9239_v54  ;;  %v2091_v52 = vmul.f32 0.044715, %v1579_v27  ;;  %v4017_v18 = vpop.f32.mrf.mxu0  ;;  %v10912_v21 = vld [vmem:[#allocation96_spill] sm:$0xff] }
 0x384   :  { %v9681_v34 = vpop.eup %5382  ;;  %v2096_v55 = vmul.f32 0.044715, %v1584_v41  ;;  %4633 = vmatprep.mubr.f32.mxu1 %v3539_v60  ;;  %v3545_v10 = vmul.f32 %v3289_v22, %v2777_v19  ;;  %v3297_v2 = vadd.f32 1.0, %v9287_v37  ;;  %5394 = vtanh.f32 %v2602_v38  ;;  %v4242_v26 = vpop.f32.mrf.mxu1  ;;  %v10897_v37 = vld [vmem:[#allocation36_spill] sm:$0xff] }
 0x385   :  { %v9686_v30 = vadd.f32 %v10894_v61, %v7871_v3  ;;  %4409 = vmatmul.mubr.f32.gmra.mxu0 %v9137_v16  ;;  %v3547_v32 = vmul.f32 %v3291_v57, %v2779_v12  ;;  %v3299_v54 = vadd.f32 1.0, %v9295_v4  ;;  %v9690_v35 = vpop.eup %5384  ;;  %v2345_v27 = vadd.f32 1.0, %v2089_v7  ;;  %v10898_v18 = vld [vmem:[#allocation48_spill] sm:$0xff]  ;;  %v10900_v26 = vld [vmem:[#allocation42_spill] sm:$0xff] }
 0x386   :  { %10896 = vst [vmem:[#allocation50_spill] sm:$0xff] %v9690_v35  ;;  %v1835_v41 = vmul.f32 0.7978846, %v9619_v31  ;;  %v1840_v60 = vmul.f32 0.7978846, %v9626_v56  ;;  %4634 = vmatmul.mubr.f32.gmra.mxu1 %v10897_v37  ;;  %4413 = vmatprep.mubr.f32.mxu0 %v3545_v10  ;;  %v2785_v38 = vmul.f32 0.5, %v10898_v18  ;;  %v1585_v4 = vmul.f32 %v9675_v24, %v9675_v24  ;;  %v9702_v22 = vpop.f32.mrf.mxu0 }
 0x387   :  { %10895 = vst [vmem:[#allocation29_spill] sm:$0xff] %v9686_v30  ;;  %v9696_v61 = vpop.eup %5386  ;;  %v1842_v16 = vmul.f32 0.7978846, %v9645_v0  ;;  %v2098_v19 = vmul.f32 0.044715, %v1586_v14  ;;  %4638 = vmatprep.mubr.f32.mxu1 %v3547_v32  ;;  %v2787_v7 = vmul.f32 0.5, %v10900_v26  ;;  %v1587_v37 = vmul.f32 %v9686_v30, %v9686_v30 }
 0x388   :  { %10899 = vst [vmem:[#allocation97_spill] sm:$0xff] %v9696_v61  ;;  %v2347_v12 = vadd.f32 1.0, %v2091_v52  ;;  %v2352_v57 = vadd.f32 1.0, %v2096_v55  ;;  %v3553_v56 = vmul.f32 %v3297_v2, %v2785_v38  ;;  %v3305_v10 = vadd.f32 1.0, %v9357_v20  ;;  %v10901_v18 = vld [vmem:[#allocation55_spill] sm:$0xff]  ;;  %v10903_v14 = vld [vmem:[#allocation53_spill] sm:$0xff]  ;;  %v9713_v26 = vpop.f32.mrf.mxu1  ;;  %v4022_v61 = vpop.f32.mrf.mxu0 }
 0x389   :  { %v9709_v0 = vadd.f32 %v10901_v18, %v7782_v13  ;;  %4414 = vmatmul.mubr.f32.gmra.mxu0 %v10903_v14  ;;  %v3555_v31 = vmul.f32 %v3299_v54, %v2787_v7  ;;  %v3307_v32 = vadd.f32 1.0, %v9367_v59  ;;  %v9715_v52 = vpop.eup %5388  ;;  %v2601_v55 = vmul.f32 %v2345_v27, %v1833_v47  ;;  %v10905_v20 = vld [vmem:[#allocation99_spill] sm:$0xff]  ;;  %v10907_v13 = vld [vmem:[#allocation88_spill] sm:$0xff]  ;;  %v10909_v61 = vld [vmem:[#allocation66_spill] sm:$0xff] }
 0x38a   :  { %10904 = vst [vmem:[#allocation98_spill] sm:$0xff] %v9715_v52  ;;  %v9719_v2 = vadd.f32 %v10905_v20, %v7854_v17  ;;  %v10906_v38 = vld [vmem:[#allocation87_spill] sm:$0xff]  ;;  %4639 = vmatmul.mubr.f32.gmra.mxu1 %v10907_v13  ;;  %4418 = vmatprep.mubr.f32.mxu0 %v3553_v56  ;;  %v10908_v54 = vld [vmem:[#allocation28_spill] sm:$0xff]  ;;  %v2354_v59 = vadd.f32 1.0, %v2098_v19  ;;  %v2097_v18 = vmul.f32 0.044715, %v1585_v4  ;;  %v9729_v14 = vadd.f32 %v10909_v61, %v7789_v45  ;;  %v4247_v17 = vpop.f32.mrf.mxu1 }
 0x38b   :  { %10902 = vst [vmem:[#allocation57_spill] sm:$0xff] %v9709_v0  ;;  %v9723_v35 = vadd.f32 %v10906_v38, %v7871_v3  ;;  %v2793_v7 = vmul.f32 0.5, %v10908_v54  ;;  %4643 = vmatprep.mubr.f32.mxu1 %v3555_v31  ;;  %v10911_v47 = vld [vmem:[#allocation83_spill] sm:$0xff]  ;;  %v9732_v20 = vpop.eup %5390  ;;  %v2603_v52 = vmul.f32 %v2347_v12, %v1835_v41  ;;  %v2608_v3 = vmul.f32 %v2352_v57, %v1840_v60 }
 0x38c   :  { %10910 = vst [vmem:[#allocation72_spill] sm:$0xff] %v9729_v14  ;;  %v2795_v27 = vmul.f32 0.5, %v10911_v47  ;;  %v3313_v13 = vadd.f32 1.0, %v10912_v21  ;;  %v2099_v56 = vmul.f32 0.044715, %v1587_v37  ;;  %v1592_v19 = vmul.f32 %v9709_v0, %v9709_v0  ;;  %v10913_v4 = vld [vmem:[#allocation51_spill] sm:$0xff] }
 0x38d   :  { %v3561_v38 = vmul.f32 %v3305_v10, %v2793_v7  ;;  %4419 = vmatmul.mubr.f32.gmra.mxu0 %v10913_v4  ;;  %v3315_v45 = vadd.f32 1.0, %v9418_v43  ;;  %5396 = vtanh.f32 %v2601_v55  ;;  %v1593_v61 = vmul.f32 %v9719_v2, %v9719_v2  ;;  %v10914_v60 = vld [vmem:[#allocation115_spill] sm:$0xff]  ;;  %v10915_v21 = vld [vmem:[#allocation101_spill] sm:$0xff] }
 0x38e   :  { %v3563_v54 = vmul.f32 %v3307_v32, %v2795_v27  ;;  %v9739_v31 = vpop.eup %5392  ;;  %v1595_v41 = vmul.f32 %v9723_v35, %v9723_v35  ;;  %4644 = vmatmul.mubr.f32.gmra.mxu1 %v10914_v60  ;;  %v2801_v12 = vmul.f32 0.5, %v10915_v21  ;;  %v9747_v57 = vmul.f32 %v2354_v59, %v1842_v16  ;;  %v10916_v37 = vld [vmem:[#allocation85_spill] sm:$0xff] }
 0x38f   :  { %4423 = vmatprep.mubr.f32.mxu0 %v3561_v38  ;;  %v2353_v10 = vadd.f32 1.0, %v2097_v18  ;;  %v1594_v43 = vmul.f32 %v9729_v14, %v9729_v14  ;;  %v2803_v32 = vmul.f32 0.5, %v10916_v37  ;;  %5398 = vtanh.f32 %v2603_v52  ;;  %v10917_v38 = vld [vmem:[#allocation105_spill] sm:$0xff]  ;;  %v10918_v52 = vld [vmem:[#allocation75_spill] sm:$0xff] }
 0x390   :  { %4648 = vmatprep.mubr.f32.mxu1 %v3563_v54  ;;  %v1841_v55 = vmul.f32 0.7978846, %v9675_v24  ;;  %v3569_v7 = vmul.f32 %v3313_v13, %v2801_v12  ;;  %v3321_v47 = vadd.f32 1.0, %v9482_v58  ;;  %v2355_v27 = vadd.f32 1.0, %v2099_v56  ;;  %v9756_v59 = vpop.f32.mrf.mxu0  ;;  %v10919_v13 = vld [vmem:[#allocation74_spill] sm:$0xff] }
 0x391   :  { %v2104_v17 = vmul.f32 0.044715, %v1592_v19  ;;  %4424 = vmatmul.mubr.f32.gmra.mxu0 %v10917_v38  ;;  %v3571_v4 = vmul.f32 %v3315_v45, %v2803_v32  ;;  %v3323_v16 = vadd.f32 1.0, %v9494_v8  ;;  %v9758_v18 = vpop.eup %5394  ;;  %5400 = vtanh.f32 %v2608_v3  ;;  %v10920_v45 = vld [vmem:[#allocation59_spill] sm:$0xff] }
 0x392   :  { %v2105_v54 = vmul.f32 0.044715, %v1593_v61  ;;  %v2107_v60 = vmul.f32 0.044715, %v1595_v41  ;;  %4649 = vmatmul.mubr.f32.gmra.mxu1 %v10918_v52  ;;  %4428 = vmatprep.mubr.f32.mxu0 %v3569_v7  ;;  %v2809_v21 = vmul.f32 0.5, %v10919_v13  ;;  %v2609_v58 = vmul.f32 %v2353_v10, %v1841_v55  ;;  %v4250_v8 = vpop.f32.mrf.mxu1  ;;  %v4027_v37 = vpop.f32.mrf.mxu0  ;;  %v10921_v10 = vld [vmem:[#allocation71_spill] sm:$0xff] }
 0x393   :  { %v1843_v56 = vmul.f32 0.7978846, %v9686_v30  ;;  %v2106_v19 = vmul.f32 0.044715, %v1594_v43  ;;  %4653 = vmatprep.mubr.f32.mxu1 %v3571_v4  ;;  %v2811_v12 = vmul.f32 0.5, %v10920_v45  ;;  %v3329_v41 = vadd.f32 1.0, %v9524_v15 }
 0x394   :  { %v9765_v32 = vmul.f32 0.7978846, %v9709_v0  ;;  %v9768_v3 = vmul.f32 0.7978846, %v9729_v14  ;;  %v3577_v61 = vmul.f32 %v3321_v47, %v2809_v21  ;;  %v2360_v38 = vadd.f32 1.0, %v2104_v17  ;;  %v10922_v43 = vld [vmem:[#allocation123_spill] sm:$0xff]  ;;  %v4252_v52 = vpop.f32.mrf.mxu1 }
 0x395   :  { %v2611_v7 = vmul.f32 %v2355_v27, %v1843_v56  ;;  %4429 = vmatmul.mubr.f32.gmra.mxu0 %v10921_v10  ;;  %v3579_v55 = vmul.f32 %v3323_v16, %v2811_v12  ;;  %v3331_v4 = vadd.f32 1.0, %v10922_v43  ;;  %v2361_v13 = vadd.f32 1.0, %v2105_v54  ;;  %v10923_v37 = vld [vmem:[#allocation49_spill] sm:$0xff]  ;;  %v10924_v0 = vld [vmem:[#allocation84_spill] sm:$0xff]  ;;  %v10929_v10 = vld [vmem:[#allocation119_spill] sm:$0xff] }
 0x396   :  { %v2363_v45 = vadd.f32 1.0, %v2107_v60  ;;  %4654 = vmatmul.mubr.f32.gmra.mxu1 %v10923_v37  ;;  %4433 = vmatprep.mubr.f32.mxu0 %v3577_v61  ;;  %v2817_v30 = vmul.f32 0.5, %v10924_v0  ;;  %v3337_v14 = vadd.f32 1.0, %v9563_v62  ;;  %5402 = vtanh.f32 %v2609_v58  ;;  %v10925_v15 = vld [vmem:[#allocation76_spill] sm:$0xff]  ;;  %v10926_v60 = vld [vmem:[#allocation18_spill] sm:$0xff]  ;;  %v10930_v58 = vld [vmem:[#allocation73_spill] sm:$0xff] }
 0x397   :  { %v2362_v47 = vadd.f32 1.0, %v2106_v19  ;;  %4658 = vmatprep.mubr.f32.mxu1 %v3579_v55  ;;  %v2819_v27 = vmul.f32 0.5, %v10925_v15  ;;  %v3339_v17 = vadd.f32 1.0, %v9578_v53  ;;  %v1849_v16 = vmul.f32 0.7978846, %v9719_v2  ;;  %v10927_v12 = vld [vmem:[#allocation108_spill] sm:$0xff] }
 0x398   :  { %v1851_v21 = vmul.f32 0.7978846, %v9723_v35  ;;  %v3585_v54 = vmul.f32 %v3329_v41, %v2817_v30  ;;  %v2825_v56 = vmul.f32 0.5, %v10926_v60  ;;  %5404 = vtanh.f32 %v2611_v7  ;;  %v10928_v61 = vld [vmem:[#allocation46_spill] sm:$0xff]  ;;  %v10931_v52 = vld [vmem:[#allocation120_spill] sm:$0xff]  ;;  %v10932_v15 = vld [vmem:[#allocation45_spill] sm:$0xff] }
 0x399   :  { %v4096_v0 = vadd.f32 %v10928_v61, %v10927_v12  ;;  %4434 = vmatmul.mubr.f32.gmra.mxu0 %v10929_v10  ;;  %v3587_v62 = vmul.f32 %v3331_v4, %v2819_v27  ;;  %v2827_v19 = vmul.f32 0.5, %v10930_v58  ;;  %v2617_v55 = vmul.f32 %v2361_v13, %v1849_v16  ;;  %v10933_v60 = vld [vmem:[#allocation93_spill] sm:$0xff]  ;;  %v10934_v4 = vld [vmem:[#allocation24_spill] sm:$0xff]  ;;  %v10936_v16 = vld [vmem:[#allocation95_spill] sm:$0xff] }
 0x39a   :  { %v2619_v43 = vmul.f32 %v2363_v45, %v1851_v21  ;;  %4659 = vmatmul.mubr.f32.gmra.mxu1 %v10931_v52  ;;  %4438 = vmatprep.mubr.f32.mxu0 %v3585_v54  ;;  %v3593_v53 = vmul.f32 %v3337_v14, %v2825_v56  ;;  %v3345_v37 = vadd.f32 1.0, %v9639_v39  ;;  %v9787_v30 = vpop.eup %5396  ;;  %v3347_v7 = vadd.f32 1.0, %v9649_v48  ;;  %v10935_v27 = vld [vmem:[#allocation68_spill] sm:$0xff]  ;;  %v4320_v45 = vpop.f32.mrf.mxu0  ;;  %v10937_v21 = vld [vmem:[#allocation37_spill] sm:$0xff]  ;;  %v10938_v39 = vld [vmem:[#allocation122_spill] sm:$0xff] }
 0x39b   :  { %4663 = vmatprep.mubr.f32.mxu1 %v3587_v62  ;;  %v3595_v41 = vmul.f32 %v3339_v17, %v2827_v19  ;;  %v9792_v12 = vadd.f32 %v10933_v60, %v10932_v15  ;;  %v9796_v13 = vadd.f32 %v10935_v27, %v10934_v4  ;;  %v9800_v14 = vadd.f32 %v10937_v21, %v10936_v16  ;;  %v10939_v54 = vld [vmem:[#allocation26_spill] sm:$0xff]  ;;  %v10940_v17 = vld [vmem:[#allocation124_spill] sm:$0xff]  ;;  %v10941_v61 = vld [vmem:[#allocation125_spill] sm:$0xff] }
 0x39c   :  { %v9804_v56 = vadd.f32 %v10939_v54, %v10938_v39  ;;  %v9808_v48 = vadd.f32 %v10941_v61, %v10940_v17  ;;  %v9812_v10 = vadd.f32 %v9567_v29, %v9561_v63  ;;  %v9814_v62 = vpop.eup %5398  ;;  %v10942_v58 = vld [vmem:[#allocation54_spill] sm:$0xff]  ;;  %v9819_v19 = vadd.f32 %v9584_v36, %v9580_v5  ;;  %v4545_v63 = vpop.f32.mrf.mxu1 }
 0x39d   :  { %4439 = vmatmul.mubr.f32.gmra.mxu0 %v10942_v58  ;;  %v9823_v52 = vadd.f32 %v9602_v46, %v9596_v50  ;;  %v9827_v15 = vadd.f32 %v9622_v25, %v9613_v49  ;;  %v9831_v29 = vadd.f32 %v9647_v51, %v9637_v23  ;;  %v4322_v60 = vpop.f32.mrf.mxu0  ;;  %v10943_v4 = vld [vmem:[#allocation106_spill] sm:$0xff]  ;;  %v9837_v36 = vadd.f32 %v9679_v28, %v9667_v11  ;;  %v10945_v25 = vld [vmem:[#allocation33_spill] sm:$0xff]  ;;  %v10954_v58 = vld [vmem:[#allocation79_spill] sm:$0xff] }
 0x39e   :  { %4664 = vmatmul.mubr.f32.gmra.mxu1 %v10943_v4  ;;  %4443 = vmatprep.mubr.f32.mxu0 %v3593_v53  ;;  %v10944_v27 = vld [vmem:[#allocation102_spill] sm:$0xff]  ;;  %v9841_v50 = vadd.f32 %v9713_v26, %v9702_v22  ;;  %v9844_v46 = vadd.f32 %v4250_v8, %v9756_v59  ;;  %v9846_v23 = vpop.eup %5400  ;;  %5406 = vtanh.f32 %v9747_v57  ;;  %v2616_v49 = vmul.f32 %v2360_v38, %v9765_v32  ;;  %v4547_v16 = vpop.f32.mrf.mxu1  ;;  %v10946_v8 = vld [vmem:[#allocation121_spill] sm:$0xff]  ;;  %v10947_v38 = vld [vmem:[#allocation52_spill] sm:$0xff] }
 0x39f   :  { %v2833_v5 = vmul.f32 0.5, %v10944_v27  ;;  %4668 = vmatprep.mubr.f32.mxu1 %v3595_v41  ;;  %v2835_v51 = vmul.f32 0.5, %v10945_v25  ;;  %v4321_v53 = vadd.f32 %v4320_v45, %v4096_v0  ;;  %v2618_v11 = vmul.f32 %v2362_v47, %v9768_v3  ;;  %v10955_v4 = vld [vmem:[#allocation17_spill] sm:$0xff] }
 0x3a0   :  { %5408 = vtanh.f32 %v2617_v55  ;;  %v3353_v22 = vadd.f32 1.0, %v9669_v44  ;;  %v3355_v59 = vadd.f32 1.0, %v9681_v34  ;;  %v3600_v32 = vmul.f32 %v9607_v9, %v10946_v8  ;;  %v10948_v34 = vld [vmem:[#allocation32_spill] sm:$0xff]  ;;  %v10949_v9 = vld [vmem:[#allocation31_spill] sm:$0xff] }
 0x3a1   :  { %v3601_v28 = vmul.f32 %v3345_v37, %v2833_v5  ;;  %5410 = vtanh.f32 %v2619_v43  ;;  %4444 = vmatmul.mubr.f32.gmra.mxu0 %v9587_v40  ;;  %v3603_v26 = vmul.f32 %v3347_v7, %v2835_v51  ;;  %v4546_v57 = vadd.f32 %v4545_v63, %v4321_v53  ;;  %v9865_v40 = vld [vmem:[%s9987_s4] ss:$0 sm:$0xff]  ;;  %v10957_v51 = vld [vmem:[#allocation16_spill] sm:$0xff]  ;;  %s5535_s4 = smov [#allocation10]  }
 0x3a2   :  { %v3602_v0 = vmul.f32 %v9658_v6, %v10947_v38  ;;  %v3352_v41 = vadd.f32 1.0, %v9655_v42  ;;  %4669 = vmatmul.mubr.f32.gmra.mxu1 %v9599_v1  ;;  %v2841_v44 = vmul.f32 0.5, %v9476_v33  ;;  %v3354_v3 = vadd.f32 1.0, %v10948_v34  ;;  %v10950_v6 = vld [vmem:[#allocation58_spill] sm:$0xff]  ;;  %v10951_v42 = vld [vmem:[#allocation109_spill] sm:$0xff]  ;;  %v10953_v33 = vld [vmem:[#allocation35_spill] sm:$0xff] }
 0x3a3   :  { %4448 = vmatprep.mubr.f32.mxu0 %v3601_v28  ;;  %5412 = vtanh.f32 %v2616_v49  ;;  %4673 = vmatprep.mubr.f32.mxu1 %v3603_v26  ;;  %v2843_v47 = vmul.f32 0.5, %v10949_v9  ;;  %v5403_v55 = vpop.eup %5402  ;;  %v4101_v43 = vadd.f32 %v10951_v42, %v10950_v6  ;;  %v10952_v37 = vld [vmem:[#allocation98_spill] sm:$0xff]  ;;  %v2842_v45 = vmul.f32 0.5, %v10953_v33  ;;  %v10961_v34 = vld [vmem:[#allocation39_spill] sm:$0xff]  ;;  %s4879_s15 = sshll.u32 %s5535_s4, 4  ;;  %s4880_s15 = int_to_ptr.vmem [resolvable:$true] %s4879_s15 }
 0x3a4   :  { %5414 = vtanh.f32 %v2618_v11  ;;  %v3609_v1 = vmul.f32 %v3353_v22, %v2841_v44  ;;  %v3361_v7 = vadd.f32 1.0, %v10952_v37  ;;  %v3363_v39 = vadd.f32 1.0, %v9732_v20  ;;  %v4325_v17 = vpop.f32.mrf.mxu0  ;;  %v10956_v49 = vld [vmem:[#allocation50_spill] sm:$0xff]  ;;  %v10958_v11 = vld [vmem:[#allocation97_spill] sm:$0xff]  ;;  %s5498_s16 = scalar_lea.vmem %s4880_s15, 4096  ;;  %p5503_p7 = scmp.lt.s32.totalorder %s4880_s15, %s4880_s15 }
 0x3a5   :  { %4449 = vmatmul.mubr.f32.gmra.mxu0 %v3600_v32  ;;  %v3611_v21 = vmul.f32 %v3355_v59, %v2843_v47  ;;  %v4810_v54 = vadd.f32 %v9865_v40, %v4546_v57  ;;  %v5405_v61 = vpop.eup %5404  ;;  %v2849_v63 = vmul.f32 0.5, %v10954_v58  ;;  %v4326_v60 = vadd.f32 %v4325_v17, %v4101_v43  ;;  %v10959_v57 = vld [vmem:[#allocation60_spill] sm:$0xff]  ;;  %p5499_p6 = scmp.ne.s32.totalorder %s4880_s15, %s5498_s16  ;;  %p5504_p8 = scmp.lt.s32.totalorder %s5498_s16, %s5498_s16 }
 0x3a6   :  { %4674 = vmatmul.mubr.f32.gmra.mxu1 %v3602_v0  ;;  %4453 = vmatprep.mubr.f32.mxu0 %v3609_v1  ;;  %v3608_v27 = vmul.f32 %v3352_v41, %v10955_v4  ;;  %v3610_v5 = vmul.f32 %v3354_v3, %v2842_v45  ;;  %v3360_v25 = vadd.f32 1.0, %v10956_v49  ;;  %v2851_v53 = vmul.f32 0.5, %v10957_v51  ;;  %v4550_v16 = vpop.f32.mrf.mxu1  ;;  %v4327_v20 = vpop.f32.mrf.mxu0  ;;  %v10960_v41 = vld [vmem:[#allocation107_spill] sm:$0xff]  ;;  %v10963_v45 = vld [vmem:[#allocation38_spill] sm:$0xff]  ;;  %v10967_v49 = vld [vmem:[#allocation29_spill] sm:$0xff] }
 0x3a7   :  { %4678 = vmatprep.mubr.f32.mxu1 %v3611_v21  ;;  %4842 = vst [vmem:[#allocation10] sm:$0xff] %v4810_v54  ;;  %v3362_v28 = vadd.f32 1.0, %v10958_v11  ;;  %v3617_v22 = vmul.f32 %v3361_v7, %v2849_v63  ;;  %v3369_v26 = vadd.f32 1.0, %v9787_v30  ;;  %v4551_v59 = vadd.f32 %v4550_v16, %v4326_v60  ;;  %v10962_v30 = vld [vmem:[#allocation40_spill] sm:$0xff]  ;;  %v10965_v63 = vld [vmem:[#allocation77_spill] sm:$0xff]  ;;  %p5505_p9 = por %p5504_p8, %p5503_p7 }
 0x3a8   :  { %v2848_v8 = vmul.f32 0.5, %v10959_v57  ;;  %v3619_v32 = vmul.f32 %v3363_v39, %v2851_v53  ;;  %v3371_v38 = vadd.f32 1.0, %v9814_v62  ;;  %v4552_v0 = vpop.f32.mrf.mxu1  ;;  %v2850_v44 = vmul.f32 0.5, %v10960_v41  ;;  %v10964_v39 = vld [vmem:[#allocation80_spill] sm:$0xff] }
 0x3a9   :  { %4454 = vmatmul.mubr.f32.gmra.mxu0 %v3608_v27  ;;  %v2857_v3 = vmul.f32 0.5, %v10961_v34  ;;  %v3368_v47 = vadd.f32 1.0, %v9739_v31  ;;  %v3370_v6 = vadd.f32 1.0, %v9758_v18  ;;  %v2859_v42 = vmul.f32 0.5, %v10962_v30  ;;  %v10966_v18 = vld [vmem:[#allocation41_spill] sm:$0xff]  ;;  %p5506_p10 = pnand %p5505_p9, %p5499_p6 }
 0x3aa   :  { %4679 = vmatmul.mubr.f32.gmra.mxu1 %v3610_v5  ;;  %4458 = vmatprep.mubr.f32.mxu0 %v3617_v22  ;;  %v3616_v9 = vmul.f32 %v3360_v25, %v2848_v8  ;;  %v3618_v1 = vmul.f32 %v3362_v28, %v2850_v44  ;;  %v3377_v7 = vadd.f32 1.0, %v5403_v55  ;;  %v4811_v62 = vadd.f32 %v9865_v40, %v4551_v59  ;;  %v10968_v22 = vld [vmem:[#allocation21_spill] sm:$0xff] }
 0x3ab   :  { %4683 = vmatprep.mubr.f32.mxu1 %v3619_v32  ;;  %v5407_v43 = vpop.eup %5406  ;;  %v3625_v37 = vmul.f32 %v3369_v26, %v2857_v3  ;;  %v2856_v21 = vmul.f32 0.5, %v10963_v45  ;;  %v2858_v54 = vmul.f32 0.5, %v10964_v39  ;;  %v3627_v17 = vmul.f32 %v3371_v38, %v2859_v42  ;;  %v10969_v32 = vld [vmem:[#allocation86_spill] sm:$0xff]  ;;  %v10970_v30 = vld [vmem:[#allocation57_spill] sm:$0xff] }
 0x3ac   :  { %v3379_v58 = vadd.f32 1.0, %v5405_v61  ;;  %v4106_v60 = vadd.f32 %v10966_v18, %v10965_v63  ;;  %v2865_v4 = vmul.f32 0.5, %v9675_v24  ;;  %4843 = vst [vmem:[#allocation10 + $0x8] sm:$0xff] %v4811_v62  ;;  %v3376_v5 = vadd.f32 1.0, %v9846_v23  ;;  %v10973_v45 = vld [vmem:[#allocation110_spill] sm:$0xff]  ;;  %v10974_v18 = vld [vmem:[#allocation27_spill] sm:$0xff] }
 0x3ad   :  { %v5409_v33 = vpop.eup %5408  ;;  %4459 = vmatmul.mubr.f32.gmra.mxu0 %v3616_v9  ;;  %v3624_v55 = vmul.f32 %v3368_v47, %v2856_v21  ;;  %v3626_v27 = vmul.f32 %v3370_v6, %v2858_v54  ;;  %v2867_v25 = vmul.f32 0.5, %v10967_v49  ;;  %v3378_v16 = vadd.f32 1.0, %v5407_v43 }
 0x3ae   :  { %v5411_v31 = vpop.eup %5410  ;;  %4684 = vmatmul.mubr.f32.gmra.mxu1 %v3618_v1  ;;  %4463 = vmatprep.mubr.f32.mxu0 %v3625_v37  ;;  %v4330_v51 = vpop.f32.mrf.mxu0  ;;  %v3633_v61 = vmul.f32 %v3377_v7, %v2865_v4  ;;  %v3385_v20 = vadd.f32 1.0, %v5409_v33  ;;  %v2864_v26 = vmul.f32 0.5, %v10968_v22  ;;  %v2866_v38 = vmul.f32 0.5, %v10969_v32  ;;  %v10971_v1 = vld [vmem:[#allocation72_spill] sm:$0xff]  ;;  %v10972_v33 = vld [vmem:[#allocation15_spill] sm:$0xff] }
 0x3af   :  { %4688 = vmatprep.mubr.f32.mxu1 %v3627_v17  ;;  %v4331_v11 = vadd.f32 %v4330_v51, %v4106_v60  ;;  %v3635_v59 = vmul.f32 %v3379_v58, %v2867_v25  ;;  %v3387_v24 = vadd.f32 1.0, %v5411_v31  ;;  %v2873_v23 = vmul.f32 0.5, %v9719_v2  ;;  %v10975_v60 = vld [vmem:[#allocation100_spill] sm:$0xff] }
 0x3b0   :  { %v5413_v53 = vpop.eup %5412  ;;  %v4555_v57 = vpop.f32.mrf.mxu1  ;;  %v3632_v41 = vmul.f32 %v3376_v5, %v2864_v26  ;;  %v2875_v34 = vmul.f32 0.5, %v9723_v35  ;;  %v3634_v9 = vmul.f32 %v3378_v16, %v2866_v38  ;;  %v2872_v42 = vmul.f32 0.5, %v10970_v30  ;;  %v10976_v16 = vld [vmem:[#allocation111_spill] sm:$0xff]  ;;  %v10979_v32 = vld [vmem:[#allocation112_spill] sm:$0xff] }
 0x3b1   :  { %v5415_v28 = vpop.eup %5414  ;;  %4464 = vmatmul.mubr.f32.gmra.mxu0 %v3624_v55  ;;  %v4332_v8 = vpop.f32.mrf.mxu0  ;;  %v4556_v0 = vadd.f32 %v4555_v57, %v4331_v11  ;;  %v3384_v44 = vadd.f32 1.0, %v5413_v53  ;;  %v3641_v6 = vmul.f32 %v3385_v20, %v2873_v23  ;;  %v2874_v37 = vmul.f32 0.5, %v10971_v1 }
 0x3b2   :  { %4689 = vmatmul.mubr.f32.gmra.mxu1 %v3626_v27  ;;  %4468 = vmatprep.mubr.f32.mxu0 %v3633_v61  ;;  %v4557_v3 = vpop.f32.mrf.mxu1  ;;  %v3386_v47 = vadd.f32 1.0, %v5415_v28  ;;  %v3643_v43 = vmul.f32 %v3387_v24, %v2875_v34  ;;  %v4111_v35 = vadd.f32 %v10973_v45, %v10972_v33  ;;  %v4116_v4 = vadd.f32 %v10975_v60, %v10974_v18  ;;  %v10977_v61 = vld [vmem:[#allocation69_spill] sm:$0xff]  ;;  %v10978_v8 = vld [vmem:[#allocation20_spill] sm:$0xff]  ;;  %v10983_v45 = vld [vmem:[#allocation70_spill] sm:$0xff] }
 0x3b3   :  { %4693 = vmatprep.mubr.f32.mxu1 %v3635_v59  ;;  %v4812_v2 = vadd.f32 %v9865_v40, %v4556_v0  ;;  %v3640_v7 = vmul.f32 %v3384_v44, %v2872_v42  ;;  %v4121_v20 = vadd.f32 %v10977_v61, %v10976_v16  ;;  %v4126_v38 = vadd.f32 %v10979_v32, %v10978_v8  ;;  %v10982_v33 = vld [vmem:[#allocation64_spill] sm:$0xff]  ;;  %v10984_v18 = vld [vmem:[#allocation34_spill] sm:$0xff]  ;;  %v10985_v60 = vld [vmem:[#allocation65_spill] sm:$0xff] }
 0x3b4   :  { %v3642_v62 = vmul.f32 %v3386_v47, %v2874_v37  ;;  %v10980_v47 = vld [vmem:[#allocation82_spill] sm:$0xff]  ;;  %v10986_v16 = vld [vmem:[#allocation113_spill] sm:$0xff]  ;;  %v10988_v8 = vld [vmem:[#allocation43_spill] sm:$0xff] }
 0x3b5   :  { %4469 = vmatmul.mubr.f32.gmra.mxu0 %v3632_v41  ;;  %4844 = vst [vmem:[#allocation10 + $0x10] sm:$0xff] %v4812_v2  ;;  %v10987_v61 = vld [vmem:[#allocation114_spill] sm:$0xff]  ;;  %v10989_v32 = vld [vmem:[#allocation47_spill] sm:$0xff] }
 0x3b6   :  { %4694 = vmatmul.mubr.f32.gmra.mxu1 %v3634_v9  ;;  %4473 = vmatprep.mubr.f32.mxu0 %v3641_v6  ;;  %v10981_v6 = vld [vmem:[#allocation89_spill] sm:$0xff] }
 0x3b7   :  { %4698 = vmatprep.mubr.f32.mxu1 %v3643_v43  ;;  %v4131_v30 = vadd.f32 %v10981_v6, %v10980_v47  ;;  %v10990_v47 = vld [vmem:[#allocation116_spill] sm:$0xff]  ;;  %v10991_v6 = vld [vmem:[#allocation117_spill] sm:$0xff] }
 0x3b8   :  { %v4335_v21 = vpop.f32.mrf.mxu0 }
 0x3b9   :  { %4474 = vmatmul.mubr.f32.gmra.mxu0 %v3640_v7  ;;  %v4336_v39 = vadd.f32 %v4335_v21, %v4111_v35  ;;  %v4136_v35 = vadd.f32 %v10983_v45, %v10982_v33  ;;  %v10992_v33 = vld [vmem:[#allocation103_spill] sm:$0xff]  ;;  %v10993_v45 = vld [vmem:[#allocation118_spill] sm:$0xff] }
 0x3ba   :  { %4699 = vmatmul.mubr.f32.gmra.mxu1 %v3642_v62  ;;  %v4560_v54 = vpop.f32.mrf.mxu1  ;;  %v4337_v17 = vpop.f32.mrf.mxu0 }
 0x3bb   :  { %v4561_v58 = vadd.f32 %v4560_v54, %v4336_v39 }
 0x3bc   :  { %v4562_v31 = vpop.f32.mrf.mxu1 }
 0x3bd   :  { %v4813_v63 = vadd.f32 %v9865_v40, %v4561_v58 }
 0x3bf   :  { %4845 = vst [vmem:[#allocation10 + $0x18] sm:$0xff] %v4813_v63 }
 0x3c2   :  { %v4340_v55 = vpop.f32.mrf.mxu0 }
 0x3c3   :  { %v4341_v27 = vadd.f32 %v4340_v55, %v4116_v4  ;;  %v4141_v4 = vadd.f32 %v10985_v60, %v10984_v18  ;;  %v10994_v18 = vld [vmem:[#allocation56_spill] sm:$0xff]  ;;  %v10995_v60 = vld [vmem:[#allocation91_spill] sm:$0xff] }
 0x3c4   :  { %v4565_v5 = vpop.f32.mrf.mxu1  ;;  %v4342_v49 = vpop.f32.mrf.mxu0 }
 0x3c5   :  { %v4566_v25 = vadd.f32 %v4565_v5, %v4341_v27 }
 0x3c6   :  { %v4567_v51 = vpop.f32.mrf.mxu1 }
 0x3c7   :  { %v4814_v53 = vadd.f32 %v9865_v40, %v4566_v25 }
 0x3c9   :  { %4846 = vst [vmem:[#allocation10 + $0x20] sm:$0xff] %v4814_v53 }
 0x3cc   :  { %v4345_v11 = vpop.f32.mrf.mxu0 }
 0x3cd   :  { %v4346_v28 = vadd.f32 %v4345_v11, %v4121_v20  ;;  %v4146_v20 = vadd.f32 %v10987_v61, %v10986_v16  ;;  %v10996_v16 = vld [vmem:[#allocation81_spill] sm:$0xff]  ;;  %v10997_v61 = vld [vmem:[#allocation63_spill] sm:$0xff] }
 0x3ce   :  { %v4570_v22 = vpop.f32.mrf.mxu1  ;;  %v4347_v26 = vpop.f32.mrf.mxu0 }
 0x3cf   :  { %v4571_v59 = vadd.f32 %v4570_v22, %v4346_v28 }
 0x3d0   :  { %v4572_v24 = vpop.f32.mrf.mxu1 }
 0x3d1   :  { %v4815_v57 = vadd.f32 %v9865_v40, %v4571_v59 }
 0x3d3   :  { %4847 = vst [vmem:[#allocation10 + $0x28] sm:$0xff] %v4815_v57 }
 0x3d6   :  { %v4350_v23 = vpop.f32.mrf.mxu0 }
 0x3d7   :  { %v4351_v0 = vadd.f32 %v4350_v23, %v4126_v38  ;;  %v4151_v38 = vadd.f32 %v10989_v32, %v10988_v8  ;;  %v10998_v8 = vld [vmem:[#allocation94_spill] sm:$0xff]  ;;  %v10999_v32 = vld [vmem:[#allocation104_spill] sm:$0xff] }
 0x3d8   :  { %v4575_v41 = vpop.f32.mrf.mxu1  ;;  %v4352_v44 = vpop.f32.mrf.mxu0 }
 0x3d9   :  { %v4576_v34 = vadd.f32 %v4575_v41, %v4351_v0 }
 0x3da   :  { %v4577_v3 = vpop.f32.mrf.mxu1 }
 0x3db   :  { %v4816_v9 = vadd.f32 %v9865_v40, %v4576_v34 }
 0x3dd   :  { %4848 = vst [vmem:[#allocation10 + $0x30] sm:$0xff] %v4816_v9 }
 0x3e0   :  { %v4355_v42 = vpop.f32.mrf.mxu0 }
 0x3e1   :  { %v4356_v43 = vadd.f32 %v4355_v42, %v4131_v30  ;;  %v4156_v30 = vadd.f32 %v10991_v6, %v10990_v47  ;;  %v11001_v47 = vld [vmem:[#allocation25_spill] sm:$0xff] }
 0x3e2   :  { %v4580_v1 = vpop.f32.mrf.mxu1  ;;  %v4357_v37 = vpop.f32.mrf.mxu0 }
 0x3e3   :  { %v4581_v2 = vadd.f32 %v4580_v1, %v4356_v43 }
 0x3e4   :  { %v4582_v7 = vpop.f32.mrf.mxu1 }
 0x3e5   :  { %v4817_v62 = vadd.f32 %v9865_v40, %v4581_v2 }
 0x3e7   :  { %4849 = vst [vmem:[#allocation10 + $0x38] sm:$0xff] %v4817_v62 }
 0x3ea   :  { %v4360_v21 = vpop.f32.mrf.mxu0 }
 0x3eb   :  { %v4361_v39 = vadd.f32 %v4360_v21, %v4136_v35  ;;  %v4161_v35 = vadd.f32 %v10993_v45, %v10992_v33 }
 0x3ec   :  { %v4585_v54 = vpop.f32.mrf.mxu1  ;;  %v4362_v17 = vpop.f32.mrf.mxu0 }
 0x3ed   :  { %v4586_v58 = vadd.f32 %v4585_v54, %v4361_v39 }
 0x3ee   :  { %v4587_v31 = vpop.f32.mrf.mxu1 }
 0x3ef   :  { %v4818_v63 = vadd.f32 %v9865_v40, %v4586_v58 }
 0x3f1   :  { %4850 = vst [vmem:[#allocation10 + $0x40] sm:$0xff] %v4818_v63 }
 0x3f4   :  { %v4365_v55 = vpop.f32.mrf.mxu0 }
 0x3f5   :  { %v4366_v27 = vadd.f32 %v4365_v55, %v4141_v4  ;;  %v4166_v4 = vadd.f32 %v10995_v60, %v10994_v18 }
 0x3f6   :  { %v4590_v5 = vpop.f32.mrf.mxu1  ;;  %v4367_v49 = vpop.f32.mrf.mxu0 }
 0x3f7   :  { %v4591_v25 = vadd.f32 %v4590_v5, %v4366_v27 }
 0x3f8   :  { %v4592_v51 = vpop.f32.mrf.mxu1 }
 0x3f9   :  { %v4819_v53 = vadd.f32 %v9865_v40, %v4591_v25 }
 0x3fb   :  { %4851 = vst [vmem:[#allocation10 + $0x48] sm:$0xff] %v4819_v53 }
 0x3fe   :  { %v4370_v11 = vpop.f32.mrf.mxu0 }
 0x3ff   :  { %v4371_v28 = vadd.f32 %v4370_v11, %v4146_v20  ;;  %v4171_v20 = vadd.f32 %v10997_v61, %v10996_v16 }
 0x400   :  { %v4595_v22 = vpop.f32.mrf.mxu1  ;;  %v4372_v26 = vpop.f32.mrf.mxu0 }
 0x401   :  { %v4596_v59 = vadd.f32 %v4595_v22, %v4371_v28 }
 0x402   :  { %v4597_v24 = vpop.f32.mrf.mxu1 }
 0x403   :  { %v4820_v57 = vadd.f32 %v9865_v40, %v4596_v59 }
 0x405   :  { %4852 = vst [vmem:[#allocation10 + $0x50] sm:$0xff] %v4820_v57 }
 0x409   :  { %v4375_v23 = vpop.f32.mrf.mxu0 }
 0x40a   :  { %v4376_v0 = vadd.f32 %v4375_v23, %v4151_v38  ;;  %v4600_v41 = vpop.f32.mrf.mxu1  ;;  %v4176_v38 = vadd.f32 %v10999_v32, %v10998_v8 }
 0x40b   :  { %v4377_v44 = vpop.f32.mrf.mxu0 }
 0x40c   :  { %v4601_v34 = vadd.f32 %v4600_v41, %v4376_v0  ;;  %v4602_v3 = vpop.f32.mrf.mxu1 }
 0x40e   :  { %v4821_v9 = vadd.f32 %v9865_v40, %v4601_v34 }
 0x410   :  { %4853 = vst [vmem:[#allocation10 + $0x58] sm:$0xff] %v4821_v9  ;;  %v11000_v9 = vld [vmem:[#allocation92_spill] sm:$0xff] }
 0x411   :  { %v4181_v6 = vadd.f32 %v11001_v47, %v11000_v9 }
 0x412   :  { %v4380_v42 = vpop.f32.mrf.mxu0 }
 0x413   :  { %v4381_v43 = vadd.f32 %v4380_v42, %v4156_v30 }
 0x414   :  { %v4605_v1 = vpop.f32.mrf.mxu1  ;;  %v4382_v37 = vpop.f32.mrf.mxu0 }
 0x415   :  { %v4606_v2 = vadd.f32 %v4605_v1, %v4381_v43 }
 0x416   :  { %v4607_v7 = vpop.f32.mrf.mxu1 }
 0x417   :  { %v4822_v62 = vadd.f32 %v9865_v40, %v4606_v2  ;;  %v11002_v2 = vld [vmem:[#allocation67_spill] sm:$0xff]  ;;  %v11003_v7 = vld [vmem:[#allocation44_spill] sm:$0xff] }
 0x419   :  { %4854 = vst [vmem:[#allocation10 + $0x60] sm:$0xff] %v4822_v62  ;;  %v4186_v62 = vadd.f32 %v11003_v7, %v11002_v2 }
 0x41c   :  { %v4385_v21 = vpop.f32.mrf.mxu0 }
 0x41d   :  { %v4386_v39 = vadd.f32 %v4385_v21, %v4161_v35 }
 0x41e   :  { %v4610_v54 = vpop.f32.mrf.mxu1  ;;  %v4387_v17 = vpop.f32.mrf.mxu0 }
 0x41f   :  { %v4611_v58 = vadd.f32 %v4610_v54, %v4386_v39 }
 0x420   :  { %v4612_v31 = vpop.f32.mrf.mxu1 }
 0x421   :  { %v4823_v63 = vadd.f32 %v9865_v40, %v4611_v58 }
 0x423   :  { %4855 = vst [vmem:[#allocation10 + $0x68] sm:$0xff] %v4823_v63 }
 0x426   :  { %v4390_v55 = vpop.f32.mrf.mxu0 }
 0x427   :  { %v4391_v27 = vadd.f32 %v4390_v55, %v4166_v4 }
 0x428   :  { %v4392_v49 = vpop.f32.mrf.mxu0 }
 0x42a   :  { %v4615_v5 = vpop.f32.mrf.mxu1 }
 0x42b   :  { %v4616_v25 = vadd.f32 %v4615_v5, %v4391_v27 }
 0x42c   :  { %v4617_v51 = vpop.f32.mrf.mxu1 }
 0x42d   :  { %v4824_v53 = vadd.f32 %v9865_v40, %v4616_v25 }
 0x42f   :  { %4856 = vst [vmem:[#allocation10 + $0x70] sm:$0xff] %v4824_v53 }
 0x432   :  { %v4395_v11 = vpop.f32.mrf.mxu0 }
 0x433   :  { %v4396_v28 = vadd.f32 %v4395_v11, %v4171_v20  ;;  %v4620_v22 = vpop.f32.mrf.mxu1 }
 0x434   :  { %v4397_v26 = vpop.f32.mrf.mxu0 }
 0x435   :  { %v4621_v59 = vadd.f32 %v4620_v22, %v4396_v28  ;;  %v4622_v24 = vpop.f32.mrf.mxu1 }
 0x437   :  { %v4825_v57 = vadd.f32 %v9865_v40, %v4621_v59 }
 0x439   :  { %4857 = vst [vmem:[#allocation10 + $0x78] sm:$0xff] %v4825_v57 }
 0x43b   :  { %v4400_v23 = vpop.f32.mrf.mxu0 }
 0x43c   :  { %v4401_v0 = vadd.f32 %v4400_v23, %v4176_v38 }
 0x43d   :  { %v4625_v41 = vpop.f32.mrf.mxu1  ;;  %v4402_v44 = vpop.f32.mrf.mxu0 }
 0x43e   :  { %v4626_v34 = vadd.f32 %v4625_v41, %v4401_v0 }
 0x43f   :  { %v4627_v3 = vpop.f32.mrf.mxu1 }
 0x440   :  { %v4826_v42 = vadd.f32 %v9865_v40, %v4626_v34 }
 0x441   :  { %v4405_v30 = vpop.f32.mrf.mxu0 }
 0x442   :  { %v4406_v43 = vadd.f32 %v4405_v30, %v4181_v6  ;;  %v4630_v1 = vpop.f32.mrf.mxu1  ;;  %4858 = vst [vmem:[#allocation10 + $0x80] sm:$0xff] %v4826_v42 }
 0x443   :  { %v4407_v37 = vpop.f32.mrf.mxu0 }
 0x444   :  { %v4631_v33 = vadd.f32 %v4630_v1, %v4406_v43  ;;  %v4632_v45 = vpop.f32.mrf.mxu1 }
 0x445   :  { %v4410_v35 = vpop.f32.mrf.mxu0 }
 0x446   :  { %v4411_v21 = vadd.f32 %v4410_v35, %v4186_v62  ;;  %v4635_v39 = vpop.f32.mrf.mxu1  ;;  %v4827_v17 = vadd.f32 %v9865_v40, %v4631_v33 }
 0x447   :  { %v4412_v54 = vpop.f32.mrf.mxu0 }
 0x448   :  { %v4636_v58 = vadd.f32 %v4635_v39, %v4411_v21  ;;  %v4637_v31 = vpop.f32.mrf.mxu1  ;;  %4859 = vst [vmem:[#allocation10 + $0x88] sm:$0xff] %v4827_v17 }
 0x449   :  { %v4415_v63 = vpop.f32.mrf.mxu0 }
 0x44a   :  { %v4416_v18 = vadd.f32 %v4415_v63, %v9792_v12  ;;  %v4640_v60 = vpop.f32.mrf.mxu1  ;;  %v4828_v55 = vadd.f32 %v9865_v40, %v4636_v58 }
 0x44b   :  { %v4417_v4 = vpop.f32.mrf.mxu0 }
 0x44c   :  { %v4641_v27 = vadd.f32 %v4640_v60, %v4416_v18  ;;  %v4642_v5 = vpop.f32.mrf.mxu1  ;;  %4860 = vst [vmem:[#allocation10 + $0x90] sm:$0xff] %v4828_v55 }
 0x44d   :  { %v4420_v49 = vpop.f32.mrf.mxu0 }
 0x44e   :  { %v4421_v25 = vadd.f32 %v4420_v49, %v9796_v13  ;;  %v4645_v51 = vpop.f32.mrf.mxu1  ;;  %v4829_v16 = vadd.f32 %v9865_v40, %v4641_v27 }
 0x44f   :  { %v4422_v53 = vpop.f32.mrf.mxu0 }
 0x450   :  { %v4646_v61 = vadd.f32 %v4645_v51, %v4421_v25  ;;  %v4647_v20 = vpop.f32.mrf.mxu1  ;;  %4861 = vst [vmem:[#allocation10 + $0x98] sm:$0xff] %v4829_v16 }
 0x451   :  { %v4425_v11 = vpop.f32.mrf.mxu0 }
 0x452   :  { %v4426_v12 = vadd.f32 %v4425_v11, %v9800_v14  ;;  %v4650_v28 = vpop.f32.mrf.mxu1  ;;  %v4830_v26 = vadd.f32 %v9865_v40, %v4646_v61 }
 0x453   :  { %v4427_v22 = vpop.f32.mrf.mxu0 }
 0x454   :  { %v4651_v59 = vadd.f32 %v4650_v28, %v4426_v12  ;;  %v4652_v24 = vpop.f32.mrf.mxu1  ;;  %4862 = vst [vmem:[#allocation10 + $0xa0] sm:$0xff] %v4830_v26 }
 0x455   :  { %v4430_v57 = vpop.f32.mrf.mxu0 }
 0x456   :  { %v4431_v13 = vadd.f32 %v4430_v57, %v9804_v56  ;;  %v4655_v8 = vpop.f32.mrf.mxu1  ;;  %v4831_v38 = vadd.f32 %v9865_v40, %v4651_v59 }
 0x457   :  { %v4432_v32 = vpop.f32.mrf.mxu0 }
 0x458   :  { %v4656_v23 = vadd.f32 %v4655_v8, %v4431_v13  ;;  %v4657_v0 = vpop.f32.mrf.mxu1  ;;  %4863 = vst [vmem:[#allocation10 + $0xa8] sm:$0xff] %v4831_v38 }
 0x459   :  { %v4435_v41 = vpop.f32.mrf.mxu0 }
 0x45a   :  { %v4436_v14 = vadd.f32 %v4435_v41, %v9808_v48  ;;  %v4660_v44 = vpop.f32.mrf.mxu1  ;;  %v4832_v3 = vadd.f32 %v9865_v40, %v4656_v23 }
 0x45b   :  { %v4437_v34 = vpop.f32.mrf.mxu0 }
 0x45c   :  { %v4661_v9 = vadd.f32 %v4660_v44, %v4436_v14  ;;  %v4662_v47 = vpop.f32.mrf.mxu1  ;;  %4864 = vst [vmem:[#allocation10 + $0xb0] sm:$0xff] %v4832_v3 }
 0x45d   :  { %v4440_v6 = vpop.f32.mrf.mxu0 }
 0x45e   :  { %v4441_v56 = vadd.f32 %v4440_v6, %v9812_v10  ;;  %v4665_v30 = vpop.f32.mrf.mxu1  ;;  %v4833_v43 = vadd.f32 %v9865_v40, %v4661_v9 }
 0x45f   :  { %v4442_v42 = vpop.f32.mrf.mxu0 }
 0x460   :  { %v4666_v1 = vadd.f32 %v4665_v30, %v4441_v56  ;;  %v4667_v37 = vpop.f32.mrf.mxu1  ;;  %4865 = vst [vmem:[#allocation10 + $0xb8] sm:$0xff] %v4833_v43 }
 0x461   :  { %v4445_v2 = vpop.f32.mrf.mxu0 }
 0x462   :  { %v4446_v48 = vadd.f32 %v4445_v2, %v9819_v19  ;;  %v4670_v7 = vpop.f32.mrf.mxu1  ;;  %v4834_v33 = vadd.f32 %v9865_v40, %v4666_v1 }
 0x463   :  { %v4447_v62 = vpop.f32.mrf.mxu0 }
 0x464   :  { %v4671_v45 = vadd.f32 %v4670_v7, %v4446_v48  ;;  %v4672_v35 = vpop.f32.mrf.mxu1  ;;  %4866 = vst [vmem:[#allocation10 + $0xc0] sm:$0xff] %v4834_v33 }
 0x465   :  { %v4450_v21 = vpop.f32.mrf.mxu0 }
 0x466   :  { %v4451_v10 = vadd.f32 %v4450_v21, %v9823_v52  ;;  %v4675_v39 = vpop.f32.mrf.mxu1  ;;  %v4835_v17 = vadd.f32 %v9865_v40, %v4671_v45 }
 0x467   :  { %v4452_v54 = vpop.f32.mrf.mxu0 }
 0x468   :  { %v4676_v58 = vadd.f32 %v4675_v39, %v4451_v10  ;;  %v4677_v31 = vpop.f32.mrf.mxu1  ;;  %4867 = vst [vmem:[#allocation10 + $0xc8] sm:$0xff] %v4835_v17 }
 0x469   :  { %v4455_v63 = vpop.f32.mrf.mxu0 }
 0x46a   :  { %v4456_v19 = vadd.f32 %v4455_v63, %v9827_v15  ;;  %v4680_v18 = vpop.f32.mrf.mxu1  ;;  %v4836_v4 = vadd.f32 %v9865_v40, %v4676_v58 }
 0x46b   :  { %v4457_v60 = vpop.f32.mrf.mxu0 }
 0x46c   :  { %v4681_v55 = vadd.f32 %v4680_v18, %v4456_v19  ;;  %v4682_v27 = vpop.f32.mrf.mxu1  ;;  %4868 = vst [vmem:[#allocation10 + $0xd0] sm:$0xff] %v4836_v4 }
 0x46d   :  { %v4460_v5 = vpop.f32.mrf.mxu0 }
 0x46e   :  { %v4461_v52 = vadd.f32 %v4460_v5, %v9831_v29  ;;  %v4685_v49 = vpop.f32.mrf.mxu1  ;;  %v4837_v51 = vadd.f32 %v9865_v40, %v4681_v55 }
 0x46f   :  { %v4462_v25 = vpop.f32.mrf.mxu0 }
 0x470   :  { %v4686_v53 = vadd.f32 %v4685_v49, %v4461_v52  ;;  %v4687_v16 = vpop.f32.mrf.mxu1  ;;  %4869 = vst [vmem:[#allocation10 + $0xd8] sm:$0xff] %v4837_v51 }
 0x471   :  { %v4465_v61 = vpop.f32.mrf.mxu0 }
 0x472   :  { %v4466_v15 = vadd.f32 %v4465_v61, %v9837_v36  ;;  %v4690_v20 = vpop.f32.mrf.mxu1  ;;  %v4838_v12 = vadd.f32 %v9865_v40, %v4686_v53 }
 0x473   :  { %v4467_v11 = vpop.f32.mrf.mxu0 }
 0x474   :  { %v4691_v28 = vadd.f32 %v4690_v20, %v4466_v15  ;;  %v4692_v22 = vpop.f32.mrf.mxu1  ;;  %4870 = vst [vmem:[#allocation10 + $0xe0] sm:$0xff] %v4838_v12 }
 0x475   :  { %v4470_v26 = vpop.f32.mrf.mxu0 }
 0x476   :  { %v4471_v29 = vadd.f32 %v4470_v26, %v9841_v50  ;;  %v4695_v59 = vpop.f32.mrf.mxu1  ;;  %v4839_v57 = vadd.f32 %v9865_v40, %v4691_v28 }
 0x477   :  { %v4472_v24 = vpop.f32.mrf.mxu0 }
 0x478   :  { %v4696_v13 = vadd.f32 %v4695_v59, %v4471_v29  ;;  %v4697_v8 = vpop.f32.mrf.mxu1  ;;  %4871 = vst [vmem:[#allocation10 + $0xe8] sm:$0xff] %v4839_v57 }
 0x479   :  { %v4475_v32 = vpop.f32.mrf.mxu0 }
 0x47a   :  { %v4476_v36 = vadd.f32 %v4475_v32, %v9844_v46  ;;  %v4700_v38 = vpop.f32.mrf.mxu1  ;;  %v4840_v0 = vadd.f32 %v9865_v40, %v4696_v13 }
 0x47b   :  { %v4477_v23 = vpop.f32.mrf.mxu0 }
 0x47c   :  { %v4701_v41 = vadd.f32 %v4700_v38, %v4476_v36  ;;  %v4702_v14 = vpop.f32.mrf.mxu1  ;;  %4872 = vst [vmem:[#allocation10 + $0xf0] sm:$0xff] %v4840_v0 }
 0x47e   :  { %v4841_v50 = vadd.f32 %v9865_v40, %v4701_v41 }
 0x480   :  { %4873 = vst [vmem:[#allocation10 + $0xf8] sm:$0xff] %v4841_v50 }
 0x481   :  { %5509 = shalt.err (!%p5506_p10)
}
 0x482   :  { %4885 = dma.vmem_to_hbm [thread:$0]  %s4880_s15, 4096, %s9988_s5, [#allocation4], %s5530_s28, %s5530_s28, %s5531_s29  }
 0x483   :  { %5524 = dma.done.wait [#allocation4], 4096  }
 0x484   :  { %5525 = vsyncadd [#allocation4], 4294963200 }
 0x485   :  { %4889 = vsyncpa [#allocation3], 1 }
 0x486   :  { %4890 = vsyncpa [#allocation6], 1 }
 0x487   :  { %4891 = vsyncpa [#allocation9], 1 }
 0x488   :  { %4892 = vsyncpa [#allocation4], 1 }

</bundles_post_ra>
